<compile_context>
chip_gen: v7x
topology: tpu7x:2x2x1
jax: 0.10.0
libtpu: 0.0.40
codegen_flags: <defaults>
</compile_context>

<pallas_src>
import functools

import jax
import jax.numpy as jnp
from jax.experimental import pallas as pl
from jax.experimental.pallas import tpu as pltpu

# ---------------- neuron parameters (from Network.__init__) ----------------
P_SCALE = 1 << 12
THRESHOLD = int(1.25 * 64) / 64            # w_scale quantization (exact: 1.25)
CURRENT_DECAY = int(0.25 * P_SCALE) / P_SCALE
VOLTAGE_DECAY = int(0.03 * P_SCALE) / P_SCALE

BATCH_TILE = 16                             # T*B = 128 rows per MXU matmul
MAX_DELAY = 2                               # per-neuron axonal delays in [0, 2]
K_DELAY = MAX_DELAY + 1

C_IN = 34 * 34 * 2                          # 2312 (NMNIST DVS input)
C_HID = 512
C_OUT = 10


def _round_up(x, m):
    return ((x + m - 1) // m) * m


C_IN_P = _round_up(C_IN, 128)               # 2432
C_OUT_P = _round_up(C_OUT, 128)             # 128


# ----------------------------- Pallas kernel -------------------------------
def _snn_fused_kernel(x_ref, w1_ref, w2_ref, w3_ref, dm1_ref, dm2_ref,
                      out_ref, cnt_ref,
                      z_ref, z3_ref, raw_ref, a1_ref, a2_ref, *,
                      T, B, k1, k2, current_decay, voltage_decay, threshold):
    """One batch tile (B elements, T steps) through all three CUBA blocks.

    x_ref   : (T*B, C_IN_P)   bf16 input spikes, row = t*B + b
    w*_ref  : bf16 weights (weight_norm folded)
    dm*_ref : (8, 512) f32 one-hot delay masks, row k = (delay == k)
    out_ref : (T*B, C_OUT_P)  bf16 block-3 delayed spikes
    cnt_ref : (8, 128) f32, rows 0..2 hold this tile's spike totals per block
    z_ref   : (T*B, 512) f32  synaptic-current scratch (reused by blocks 1 & 2)
    z3_ref  : (T*B, 128) f32  block-3 synaptic-current scratch
    raw_ref : (T*B, 512) bf16 undelayed 0/1 spikes (reused by blocks 1 & 2)
    a1_ref  : (T*B, 512) bf16 delayed block-1 spikes (block-2 matmul input)
    a2_ref  : (T*B, 512) bf16 delayed block-2 spikes (block-3 matmul input)
    """
    one_m_cd = jnp.float32(1.0 - current_decay)
    one_m_vd = jnp.float32(1.0 - voltage_decay)
    thr = jnp.float32(threshold)

    def tile_sum(x):                                    # (B, c) -> (1, 1)
        return jnp.sum(x, axis=1, keepdims=True).sum(axis=0, keepdims=True)

    def lif_to_raw(z_src_ref):
        """CUBA LIF over T steps; stores 0/1 spikes (bf16) into raw_ref."""
        c = z_src_ref.shape[-1]
        cur = jnp.zeros((B, c), jnp.float32)
        vol = jnp.zeros((B, c), jnp.float32)
        for t in range(T):
            zt = z_src_ref[pl.ds(t * B, B), :]
            cur = cur * one_m_cd + zt
            vol = vol * one_m_vd + cur
            s = (vol >= thr).astype(jnp.float32)
            vol = vol * (1.0 - s)                       # hard reset
            raw_ref[pl.ds(t * B, B), :] = s.astype(raw_ref.dtype)

    def delay_scatter(dm_ref, n_delays, dst_ref):
        """dst[t] = sum_k raw[t-1-k] * mask_k (fixed delay_shift=1 + per-neuron
        delay).  Masks are one-hot over k per channel -> each destination
        element receives at most one 0/1 contribution, so bf16 stores stay
        exact.  Masks are kept (1, c) (no (B, c) broadcast materialized)."""
        c = dst_ref.shape[-1]
        masks = [dm_ref[pl.ds(k, 1), :] for k in range(n_delays)]   # (1, c) f32
        total = jnp.zeros((1, 1), jnp.float32)
        for t in range(T):
            acc = jnp.zeros((B, c), jnp.float32)
            for k in range(n_delays):
                src = t - 1 - k
                if src >= 0:
                    acc = acc + (raw_ref[pl.ds(src * B, B), :]
                                 .astype(jnp.float32) * masks[k])
            dst_ref[pl.ds(t * B, B), :] = acc.astype(dst_ref.dtype)
            total = total + tile_sum(acc)
        return total

    # ---------------- block 1: 2312(->2432) -> 512, delayed ----------------
    z_ref[...] = jnp.dot(x_ref[...], w1_ref[...],
                         preferred_element_type=jnp.float32)
    lif_to_raw(z_ref)
    cnt1 = delay_scatter(dm1_ref, k1, a1_ref)

    # ---------------- block 2: 512 -> 512, delayed --------------------------
    z_ref[...] = jnp.dot(a1_ref[...], w2_ref[...],
                         preferred_element_type=jnp.float32)
    lif_to_raw(z_ref)
    cnt2 = delay_scatter(dm2_ref, k2, a2_ref)

    # ---------------- block 3: 512 -> 10(->128), delay_shift=1 only ---------
    z3_ref[...] = jnp.dot(a2_ref[...], w3_ref[...],
                          preferred_element_type=jnp.float32)
    c3 = out_ref.shape[-1]
    out_ref[pl.ds(0, B), :] = jnp.zeros((B, c3), out_ref.dtype)
    cur = jnp.zeros((B, c3), jnp.float32)
    vol = jnp.zeros((B, c3), jnp.float32)
    cnt3 = jnp.zeros((1, 1), jnp.float32)
    for t in range(T):
        zt = z3_ref[pl.ds(t * B, B), :]
        cur = cur * one_m_cd + zt
        vol = vol * one_m_vd + cur
        s = (vol >= thr).astype(jnp.float32)
        vol = vol * (1.0 - s)                           # hard reset
        if t + 1 < T:                                   # spikes past window drop
            out_ref[pl.ds((t + 1) * B, B), :] = s.astype(out_ref.dtype)
            cnt3 = cnt3 + tile_sum(s)

    # Per-tile spike totals for the three blocks -> rows 0..2 of an (8,128) tile.
    rows = jax.lax.broadcasted_iota(jnp.int32, (8, 128), 0)
    cnt_ref[...] = (jnp.where(rows == 0, cnt1, 0.0)
                    + jnp.where(rows == 1, cnt2, 0.0)
                    + jnp.where(rows == 2, cnt3, 0.0)).astype(cnt_ref.dtype)


def snn_forward_fused(x2d, w1, w2, w3, dm1, dm2, *, T, B, k1, k2):
    """All three CUBA Dense blocks in one pallas_call.

    x2d : (n_tiles*T*B, C_IN_P) bf16 spikes (batch-tiled, t-major, b-minor).
    Returns (spikes2d (rows, C_OUT_P) bf16, counts (n_tiles*8, 128) f32).
    """
    rows, c_in_p = x2d.shape
    n_tiles = rows // (T * B)
    c_hid = w1.shape[1]
    c_out_p = w3.shape[1]

    kernel = functools.partial(
        _snn_fused_kernel, T=T, B=B, k1=k1, k2=k2,
        current_decay=CURRENT_DECAY, voltage_decay=VOLTAGE_DECAY,
        threshold=THRESHOLD)

    return pl.pallas_call(
        kernel,
        out_shape=(jax.ShapeDtypeStruct((rows, c_out_p), jnp.bfloat16),
                   jax.ShapeDtypeStruct((n_tiles * 8, 128), jnp.float32)),
        grid_spec=pltpu.PrefetchScalarGridSpec(
            num_scalar_prefetch=0,
            grid=(n_tiles,),
            in_specs=[
                pl.BlockSpec((T * B, c_in_p), lambda n: (n, 0)),
                pl.BlockSpec((c_in_p, c_hid), lambda n: (0, 0)),
                pl.BlockSpec((c_hid, c_hid), lambda n: (0, 0)),
                pl.BlockSpec((c_hid, c_out_p), lambda n: (0, 0)),
                pl.BlockSpec(dm1.shape, lambda n: (0, 0)),
                pl.BlockSpec(dm2.shape, lambda n: (0, 0)),
            ],
            out_specs=[
                pl.BlockSpec((T * B, c_out_p), lambda n: (n, 0)),
                pl.BlockSpec((8, 128), lambda n: (n, 0)),
            ],
            scratch_shapes=[
                pltpu.VMEM((T * B, c_hid), jnp.float32),    # z (blocks 1 & 2)
                pltpu.VMEM((T * B, c_out_p), jnp.float32),  # z3
                pltpu.VMEM((T * B, c_hid), jnp.bfloat16),   # raw spikes
                pltpu.VMEM((T * B, c_hid), jnp.bfloat16),   # delayed block-1 act
                pltpu.VMEM((T * B, c_hid), jnp.bfloat16),   # delayed block-2 act
            ]),
        compiler_params=pltpu.CompilerParams(
            dimension_semantics=("parallel",),              # no cross-tile state
            vmem_limit_bytes=48 << 20),
    )(x2d, w1, w2, w3, dm1, dm2)


# ------------------------------- params ------------------------------------
def init_params(key):
    """Returns (weights, delay_masks, layer_cout).

    weights     : [w1, w2, w3] padded bf16, weight_norm folded (identity at init).
    delay_masks : [(8, 512) f32] one-hot masks for blocks 1 and 2.
    layer_cout  : (512, 512, 10) real output channels (static).
    """
    specs = [(C_IN, C_HID, True), (C_HID, C_HID, True), (C_HID, C_OUT, False)]
    weights, delay_masks, layer_cout = [], [], []
    for i, (cin, cout, has_delay) in enumerate(specs):
        kw, kd = jax.random.split(jax.random.fold_in(key, i))
        v = jax.random.normal(kw, (cin, cout), jnp.float32) / jnp.sqrt(
            jnp.float32(cin))
        # torch weight_norm(dim=0) with g initialized to ||v|| is the identity
        # (g * v / ||v|| == v) -> folded into the stored weight.
        cin_p = _round_up(cin, 128)
        cout_p = _round_up(cout, 128)
        w = jnp.pad(v, ((0, cin_p - cin), (0, cout_p - cout))).astype(
            jnp.bfloat16)
        weights.append(w)
        if has_delay:
            # TODO(synk): lava-dl learns these axonal delays; random ints here.
            d = jax.random.randint(kd, (1, cout), 0, K_DELAY)
            dm = (d == jnp.arange(K_DELAY)[:, None]).astype(jnp.float32)
            dm = jnp.pad(dm, ((0, 8 - K_DELAY), (0, cout_p - cout)))  # (8, 512)
            delay_masks.append(dm)
        layer_cout.append(cout)
    return weights, delay_masks, tuple(layer_cout)


# ------------------------------- forward ------------------------------------
def network_forward(spike_nct, weights, delay_masks, *, layer_cout,
                    batch_tile=BATCH_TILE):
    """spike_nct: (N, C=34*34*2, T) float {0,1} — PyTorch/lava layout."""
    N, C, T = spike_nct.shape
    B = batch_tile
    N_pad = _round_up(N, B)
    n_tiles = N_pad // B
    c_in_p = weights[0].shape[0]

    # (N, C, T) -> batch-tiled, lane-dense (n_tiles*T*B, C_in_pad) bf16 layout.
    x = jnp.transpose(spike_nct, (0, 2, 1))                       # (N, T, C)
    x = jnp.pad(x, ((0, N_pad - N), (0, 0), (0, c_in_p - C)))
    x = x.reshape(n_tiles, B, T, c_in_p).transpose(0, 2, 1, 3)
    x = x.reshape(n_tiles * T * B, c_in_p).astype(jnp.bfloat16)

    y2d, cnt2d = snn_forward_fused(x, weights[0], weights[1], weights[2],
                                   delay_masks[0], delay_masks[1],
                                   T=T, B=B, k1=K_DELAY, k2=K_DELAY)

    # Spike counts: padded batch rows / channels never spike, so the padded
    # in-kernel sums equal the real sums; divide by the real element counts.
    sums = jnp.sum(cnt2d.reshape(n_tiles, 8, 128)[:, :3, 0], axis=0)   # (3,)
    denom = jnp.array([N * T * c for c in layer_cout], jnp.float32)
    count = (sums / denom).reshape(1, -1).astype(jnp.float32)

    # Final spikes back to PyTorch layout (N, 10, T), dropping padding.
    c_out_p = y2d.shape[-1]
    y = y2d.reshape(n_tiles, T, B, c_out_p).transpose(0, 2, 1, 3)
    y = y.reshape(N_pad, T, c_out_p)[:N, :, :layer_cout[-1]]
    spike_out = jnp.transpose(y, (0, 2, 1)).astype(jnp.float32)
    return spike_out, count


# ----------------------------------- main -----------------------------------
if __name__ == "__main__":
    key = jax.random.PRNGKey(0)
    k_in, k_par = jax.random.split(key)

    N, T = 2, 8
    spike_in = (jax.random.uniform(k_in, (N, C_IN, T)) < 0.3).astype(jnp.float32)
    weights, delay_masks, layer_cout = init_params(k_par)

    forward = jax.jit(functools.partial(network_forward, layer_cout=layer_cout))
    spike_out, count = forward(spike_in, weights, delay_masks)
    jax.block_until_ready((spike_out, count))

    assert spike_out.shape == (N, 10, T)
    assert count.shape == (1, 3)
    print("KERNEL_OK")
</pallas_src>

<mosaic_0001>
module attributes {stable_mosaic.version = 11 : i64} {
  func.func @_snn_fused_kernel(%arg0: i32, %arg1: memref<128x2432xbf16, #tpu.memory_space<vmem>>, %arg2: memref<2432x512xbf16, #tpu.memory_space<vmem>>, %arg3: memref<512x512xbf16, #tpu.memory_space<vmem>>, %arg4: memref<512x128xbf16, #tpu.memory_space<vmem>>, %arg5: memref<8x512xf32, #tpu.memory_space<vmem>>, %arg6: memref<8x512xf32, #tpu.memory_space<vmem>>, %arg7: memref<128x128xbf16, #tpu.memory_space<vmem>>, %arg8: memref<8x128xf32, #tpu.memory_space<vmem>>, %arg9: memref<128x512xf32, #tpu.memory_space<vmem>>, %arg10: memref<128x128xf32, #tpu.memory_space<vmem>>, %arg11: memref<128x512xbf16, #tpu.memory_space<vmem>>, %arg12: memref<128x512xbf16, #tpu.memory_space<vmem>>, %arg13: memref<128x512xbf16, #tpu.memory_space<vmem>>) attributes {dimension_semantics = [#tpu.dimension_semantics<parallel>], iteration_bounds = array<i64: 1>, scalar_prefetch = 0 : i64, scratch_operands = 5 : i64, tpu.core_type = #tpu.core_type<tc>, window_params = [{transform_indices = @transform_0, window_bounds = array<i64: 128, 2432>}, {pipeline_mode = #tpu.pipeline_mode<synchronous>, transform_indices = @transform_1, window_bounds = array<i64: 2432, 512>}, {pipeline_mode = #tpu.pipeline_mode<synchronous>, transform_indices = @transform_2, window_bounds = array<i64: 512, 512>}, {pipeline_mode = #tpu.pipeline_mode<synchronous>, transform_indices = @transform_3, window_bounds = array<i64: 512, 128>}, {pipeline_mode = #tpu.pipeline_mode<synchronous>, transform_indices = @transform_4, window_bounds = array<i64: 8, 512>}, {pipeline_mode = #tpu.pipeline_mode<synchronous>, transform_indices = @transform_5, window_bounds = array<i64: 8, 512>}, {transform_indices = @transform_6, window_bounds = array<i64: 128, 128>}, {transform_indices = @transform_7, window_bounds = array<i64: 8, 128>}]} {
    %c0 = arith.constant 0 : index
    %c0_0 = arith.constant 0 : index
    %0 = vector.load %arg1[%c0, %c0_0] : memref<128x2432xbf16, #tpu.memory_space<vmem>>, vector<128x2432xbf16>
    %c0_1 = arith.constant 0 : index
    %c0_2 = arith.constant 0 : index
    %1 = vector.load %arg2[%c0_1, %c0_2] : memref<2432x512xbf16, #tpu.memory_space<vmem>>, vector<2432x512xbf16>
    %cst = arith.constant dense<0.000000e+00> : vector<128x512xf32>
    %2 = tpu.matmul %0, %1, %cst {dimension_numbers = #tpu.dot_dimension_numbers<[1], [0], [0], [1], [0, 0, 1, 1], [], []>} : vector<128x2432xbf16>, vector<2432x512xbf16>, vector<128x512xf32> -> vector<128x512xf32>
    %c0_3 = arith.constant 0 : index
    %c0_4 = arith.constant 0 : index
    %3 = vector.load %arg9[%c0_3, %c0_4] : memref<128x512xf32, #tpu.memory_space<vmem>>, vector<128x512xf32>
    tpu.vector_store %arg9[%c0_3, %c0_4], %2 {strides = array<i32>} : memref<128x512xf32, #tpu.memory_space<vmem>>, vector<128x512xf32>,
    %cst_5 = arith.constant 0.000000e+00 : f32
    %4 = vector.broadcast %cst_5 : f32 to vector<16x512xf32>
    %cst_6 = arith.constant 0.000000e+00 : f32
    %5 = vector.broadcast %cst_6 : f32 to vector<16x512xf32>
    %c0_7 = arith.constant 0 : index
    %c0_8 = arith.constant 0 : index
    %6 = vector.load %arg9[%c0_7, %c0_8] : memref<128x512xf32, #tpu.memory_space<vmem>>, vector<16x512xf32>
    %cst_9 = arith.constant 7.500000e-01 : f32
    %7 = vector.broadcast %cst_9 : f32 to vector<16x512xf32>
    %8 = arith.mulf %4, %7 : vector<16x512xf32>
    %9 = arith.addf %8, %6 : vector<16x512xf32>
    %cst_10 = arith.constant 0.970214843 : f32
    %10 = vector.broadcast %cst_10 : f32 to vector<16x512xf32>
    %11 = arith.mulf %5, %10 : vector<16x512xf32>
    %12 = arith.addf %11, %9 : vector<16x512xf32>
    %cst_11 = arith.constant 1.250000e+00 : f32
    %13 = vector.broadcast %cst_11 : f32 to vector<16x512xf32>
    %14 = arith.cmpf oge, %12, %13 : vector<16x512xf32>
    %15 = arith.extui %14 : vector<16x512xi1> to vector<16x512xi32>
    %16 = arith.sitofp %15 : vector<16x512xi32> to vector<16x512xf32>
    %cst_12 = arith.constant 1.000000e+00 : f32
    %17 = vector.broadcast %cst_12 : f32 to vector<16x512xf32>
    %18 = arith.subf %17, %16 : vector<16x512xf32>
    %19 = arith.mulf %12, %18 : vector<16x512xf32>
    %20 = arith.truncf %16 : vector<16x512xf32> to vector<16x512xbf16>
    %c0_13 = arith.constant 0 : index
    %c0_14 = arith.constant 0 : index
    %21 = vector.load %arg11[%c0_13, %c0_14] : memref<128x512xbf16, #tpu.memory_space<vmem>>, vector<16x512xbf16>
    tpu.vector_store %arg11[%c0_13, %c0_14], %20 {strides = array<i32>} : memref<128x512xbf16, #tpu.memory_space<vmem>>, vector<16x512xbf16>,
    %c16 = arith.constant 16 : index
    %c0_15 = arith.constant 0 : index
    %22 = vector.load %arg9[%c16, %c0_15] : memref<128x512xf32, #tpu.memory_space<vmem>>, vector<16x512xf32>
    %cst_16 = arith.constant 7.500000e-01 : f32
    %23 = vector.broadcast %cst_16 : f32 to vector<16x512xf32>
    %24 = arith.mulf %9, %23 : vector<16x512xf32>
    %25 = arith.addf %24, %22 : vector<16x512xf32>
    %cst_17 = arith.constant 0.970214843 : f32
    %26 = vector.broadcast %cst_17 : f32 to vector<16x512xf32>
    %27 = arith.mulf %19, %26 : vector<16x512xf32>
    %28 = arith.addf %27, %25 : vector<16x512xf32>
    %cst_18 = arith.constant 1.250000e+00 : f32
    %29 = vector.broadcast %cst_18 : f32 to vector<16x512xf32>
    %30 = arith.cmpf oge, %28, %29 : vector<16x512xf32>
    %31 = arith.extui %30 : vector<16x512xi1> to vector<16x512xi32>
    %32 = arith.sitofp %31 : vector<16x512xi32> to vector<16x512xf32>
    %cst_19 = arith.constant 1.000000e+00 : f32
    %33 = vector.broadcast %cst_19 : f32 to vector<16x512xf32>
    %34 = arith.subf %33, %32 : vector<16x512xf32>
    %35 = arith.mulf %28, %34 : vector<16x512xf32>
    %36 = arith.truncf %32 : vector<16x512xf32> to vector<16x512xbf16>
    %c16_20 = arith.constant 16 : index
    %c0_21 = arith.constant 0 : index
    %37 = vector.load %arg11[%c16_20, %c0_21] : memref<128x512xbf16, #tpu.memory_space<vmem>>, vector<16x512xbf16>
    tpu.vector_store %arg11[%c16_20, %c0_21], %36 {strides = array<i32>} : memref<128x512xbf16, #tpu.memory_space<vmem>>, vector<16x512xbf16>,
    %c32 = arith.constant 32 : index
    %c0_22 = arith.constant 0 : index
    %38 = vector.load %arg9[%c32, %c0_22] : memref<128x512xf32, #tpu.memory_space<vmem>>, vector<16x512xf32>
    %cst_23 = arith.constant 7.500000e-01 : f32
    %39 = vector.broadcast %cst_23 : f32 to vector<16x512xf32>
    %40 = arith.mulf %25, %39 : vector<16x512xf32>
    %41 = arith.addf %40, %38 : vector<16x512xf32>
    %cst_24 = arith.constant 0.970214843 : f32
    %42 = vector.broadcast %cst_24 : f32 to vector<16x512xf32>
    %43 = arith.mulf %35, %42 : vector<16x512xf32>
    %44 = arith.addf %43, %41 : vector<16x512xf32>
    %cst_25 = arith.constant 1.250000e+00 : f32
    %45 = vector.broadcast %cst_25 : f32 to vector<16x512xf32>
    %46 = arith.cmpf oge, %44, %45 : vector<16x512xf32>
    %47 = arith.extui %46 : vector<16x512xi1> to vector<16x512xi32>
    %48 = arith.sitofp %47 : vector<16x512xi32> to vector<16x512xf32>
    %cst_26 = arith.constant 1.000000e+00 : f32
    %49 = vector.broadcast %cst_26 : f32 to vector<16x512xf32>
    %50 = arith.subf %49, %48 : vector<16x512xf32>
    %51 = arith.mulf %44, %50 : vector<16x512xf32>
    %52 = arith.truncf %48 : vector<16x512xf32> to vector<16x512xbf16>
    %c32_27 = arith.constant 32 : index
    %c0_28 = arith.constant 0 : index
    %53 = vector.load %arg11[%c32_27, %c0_28] : memref<128x512xbf16, #tpu.memory_space<vmem>>, vector<16x512xbf16>
    tpu.vector_store %arg11[%c32_27, %c0_28], %52 {strides = array<i32>} : memref<128x512xbf16, #tpu.memory_space<vmem>>, vector<16x512xbf16>,
    %c48 = arith.constant 48 : index
    %c0_29 = arith.constant 0 : index
    %54 = vector.load %arg9[%c48, %c0_29] : memref<128x512xf32, #tpu.memory_space<vmem>>, vector<16x512xf32>
    %cst_30 = arith.constant 7.500000e-01 : f32
    %55 = vector.broadcast %cst_30 : f32 to vector<16x512xf32>
    %56 = arith.mulf %41, %55 : vector<16x512xf32>
    %57 = arith.addf %56, %54 : vector<16x512xf32>
    %cst_31 = arith.constant 0.970214843 : f32
    %58 = vector.broadcast %cst_31 : f32 to vector<16x512xf32>
    %59 = arith.mulf %51, %58 : vector<16x512xf32>
    %60 = arith.addf %59, %57 : vector<16x512xf32>
    %cst_32 = arith.constant 1.250000e+00 : f32
    %61 = vector.broadcast %cst_32 : f32 to vector<16x512xf32>
    %62 = arith.cmpf oge, %60, %61 : vector<16x512xf32>
    %63 = arith.extui %62 : vector<16x512xi1> to vector<16x512xi32>
    %64 = arith.sitofp %63 : vector<16x512xi32> to vector<16x512xf32>
    %cst_33 = arith.constant 1.000000e+00 : f32
    %65 = vector.broadcast %cst_33 : f32 to vector<16x512xf32>
    %66 = arith.subf %65, %64 : vector<16x512xf32>
    %67 = arith.mulf %60, %66 : vector<16x512xf32>
    %68 = arith.truncf %64 : vector<16x512xf32> to vector<16x512xbf16>
    %c48_34 = arith.constant 48 : index
    %c0_35 = arith.constant 0 : index
    %69 = vector.load %arg11[%c48_34, %c0_35] : memref<128x512xbf16, #tpu.memory_space<vmem>>, vector<16x512xbf16>
    tpu.vector_store %arg11[%c48_34, %c0_35], %68 {strides = array<i32>} : memref<128x512xbf16, #tpu.memory_space<vmem>>, vector<16x512xbf16>,
    %c64 = arith.constant 64 : index
    %c0_36 = arith.constant 0 : index
    %70 = vector.load %arg9[%c64, %c0_36] : memref<128x512xf32, #tpu.memory_space<vmem>>, vector<16x512xf32>
    %cst_37 = arith.constant 7.500000e-01 : f32
    %71 = vector.broadcast %cst_37 : f32 to vector<16x512xf32>
    %72 = arith.mulf %57, %71 : vector<16x512xf32>
    %73 = arith.addf %72, %70 : vector<16x512xf32>
    %cst_38 = arith.constant 0.970214843 : f32
    %74 = vector.broadcast %cst_38 : f32 to vector<16x512xf32>
    %75 = arith.mulf %67, %74 : vector<16x512xf32>
    %76 = arith.addf %75, %73 : vector<16x512xf32>
    %cst_39 = arith.constant 1.250000e+00 : f32
    %77 = vector.broadcast %cst_39 : f32 to vector<16x512xf32>
    %78 = arith.cmpf oge, %76, %77 : vector<16x512xf32>
    %79 = arith.extui %78 : vector<16x512xi1> to vector<16x512xi32>
    %80 = arith.sitofp %79 : vector<16x512xi32> to vector<16x512xf32>
    %cst_40 = arith.constant 1.000000e+00 : f32
    %81 = vector.broadcast %cst_40 : f32 to vector<16x512xf32>
    %82 = arith.subf %81, %80 : vector<16x512xf32>
    %83 = arith.mulf %76, %82 : vector<16x512xf32>
    %84 = arith.truncf %80 : vector<16x512xf32> to vector<16x512xbf16>
    %c64_41 = arith.constant 64 : index
    %c0_42 = arith.constant 0 : index
    %85 = vector.load %arg11[%c64_41, %c0_42] : memref<128x512xbf16, #tpu.memory_space<vmem>>, vector<16x512xbf16>
    tpu.vector_store %arg11[%c64_41, %c0_42], %84 {strides = array<i32>} : memref<128x512xbf16, #tpu.memory_space<vmem>>, vector<16x512xbf16>,
    %c80 = arith.constant 80 : index
    %c0_43 = arith.constant 0 : index
    %86 = vector.load %arg9[%c80, %c0_43] : memref<128x512xf32, #tpu.memory_space<vmem>>, vector<16x512xf32>
    %cst_44 = arith.constant 7.500000e-01 : f32
    %87 = vector.broadcast %cst_44 : f32 to vector<16x512xf32>
    %88 = arith.mulf %73, %87 : vector<16x512xf32>
    %89 = arith.addf %88, %86 : vector<16x512xf32>
    %cst_45 = arith.constant 0.970214843 : f32
    %90 = vector.broadcast %cst_45 : f32 to vector<16x512xf32>
    %91 = arith.mulf %83, %90 : vector<16x512xf32>
    %92 = arith.addf %91, %89 : vector<16x512xf32>
    %cst_46 = arith.constant 1.250000e+00 : f32
    %93 = vector.broadcast %cst_46 : f32 to vector<16x512xf32>
    %94 = arith.cmpf oge, %92, %93 : vector<16x512xf32>
    %95 = arith.extui %94 : vector<16x512xi1> to vector<16x512xi32>
    %96 = arith.sitofp %95 : vector<16x512xi32> to vector<16x512xf32>
    %cst_47 = arith.constant 1.000000e+00 : f32
    %97 = vector.broadcast %cst_47 : f32 to vector<16x512xf32>
    %98 = arith.subf %97, %96 : vector<16x512xf32>
    %99 = arith.mulf %92, %98 : vector<16x512xf32>
    %100 = arith.truncf %96 : vector<16x512xf32> to vector<16x512xbf16>
    %c80_48 = arith.constant 80 : index
    %c0_49 = arith.constant 0 : index
    %101 = vector.load %arg11[%c80_48, %c0_49] : memref<128x512xbf16, #tpu.memory_space<vmem>>, vector<16x512xbf16>
    tpu.vector_store %arg11[%c80_48, %c0_49], %100 {strides = array<i32>} : memref<128x512xbf16, #tpu.memory_space<vmem>>, vector<16x512xbf16>,
    %c96 = arith.constant 96 : index
    %c0_50 = arith.constant 0 : index
    %102 = vector.load %arg9[%c96, %c0_50] : memref<128x512xf32, #tpu.memory_space<vmem>>, vector<16x512xf32>
    %cst_51 = arith.constant 7.500000e-01 : f32
    %103 = vector.broadcast %cst_51 : f32 to vector<16x512xf32>
    %104 = arith.mulf %89, %103 : vector<16x512xf32>
    %105 = arith.addf %104, %102 : vector<16x512xf32>
    %cst_52 = arith.constant 0.970214843 : f32
    %106 = vector.broadcast %cst_52 : f32 to vector<16x512xf32>
    %107 = arith.mulf %99, %106 : vector<16x512xf32>
    %108 = arith.addf %107, %105 : vector<16x512xf32>
    %cst_53 = arith.constant 1.250000e+00 : f32
    %109 = vector.broadcast %cst_53 : f32 to vector<16x512xf32>
    %110 = arith.cmpf oge, %108, %109 : vector<16x512xf32>
    %111 = arith.extui %110 : vector<16x512xi1> to vector<16x512xi32>
    %112 = arith.sitofp %111 : vector<16x512xi32> to vector<16x512xf32>
    %cst_54 = arith.constant 1.000000e+00 : f32
    %113 = vector.broadcast %cst_54 : f32 to vector<16x512xf32>
    %114 = arith.subf %113, %112 : vector<16x512xf32>
    %115 = arith.mulf %108, %114 : vector<16x512xf32>
    %116 = arith.truncf %112 : vector<16x512xf32> to vector<16x512xbf16>
    %c96_55 = arith.constant 96 : index
    %c0_56 = arith.constant 0 : index
    %117 = vector.load %arg11[%c96_55, %c0_56] : memref<128x512xbf16, #tpu.memory_space<vmem>>, vector<16x512xbf16>
    tpu.vector_store %arg11[%c96_55, %c0_56], %116 {strides = array<i32>} : memref<128x512xbf16, #tpu.memory_space<vmem>>, vector<16x512xbf16>,
    %c112 = arith.constant 112 : index
    %c0_57 = arith.constant 0 : index
    %118 = vector.load %arg9[%c112, %c0_57] : memref<128x512xf32, #tpu.memory_space<vmem>>, vector<16x512xf32>
    %cst_58 = arith.constant 7.500000e-01 : f32
    %119 = vector.broadcast %cst_58 : f32 to vector<16x512xf32>
    %120 = arith.mulf %105, %119 : vector<16x512xf32>
    %121 = arith.addf %120, %118 : vector<16x512xf32>
    %cst_59 = arith.constant 0.970214843 : f32
    %122 = vector.broadcast %cst_59 : f32 to vector<16x512xf32>
    %123 = arith.mulf %115, %122 : vector<16x512xf32>
    %124 = arith.addf %123, %121 : vector<16x512xf32>
    %cst_60 = arith.constant 1.250000e+00 : f32
    %125 = vector.broadcast %cst_60 : f32 to vector<16x512xf32>
    %126 = arith.cmpf oge, %124, %125 : vector<16x512xf32>
    %127 = arith.extui %126 : vector<16x512xi1> to vector<16x512xi32>
    %128 = arith.sitofp %127 : vector<16x512xi32> to vector<16x512xf32>
    %129 = arith.truncf %128 : vector<16x512xf32> to vector<16x512xbf16>
    %c112_61 = arith.constant 112 : index
    %c0_62 = arith.constant 0 : index
    %130 = vector.load %arg11[%c112_61, %c0_62] : memref<128x512xbf16, #tpu.memory_space<vmem>>, vector<16x512xbf16>
    tpu.vector_store %arg11[%c112_61, %c0_62], %129 {strides = array<i32>} : memref<128x512xbf16, #tpu.memory_space<vmem>>, vector<16x512xbf16>,
    %c0_63 = arith.constant 0 : index
    %c0_64 = arith.constant 0 : index
    %131 = vector.load %arg5[%c0_63, %c0_64] : memref<8x512xf32, #tpu.memory_space<vmem>>, vector<1x512xf32>
    %c1 = arith.constant 1 : index
    %c0_65 = arith.constant 0 : index
    %132 = vector.load %arg5[%c1, %c0_65] : memref<8x512xf32, #tpu.memory_space<vmem>>, vector<1x512xf32>
    %c2 = arith.constant 2 : index
    %c0_66 = arith.constant 0 : index
    %133 = vector.load %arg5[%c2, %c0_66] : memref<8x512xf32, #tpu.memory_space<vmem>>, vector<1x512xf32>
    %cst_67 = arith.constant 0.000000e+00 : f32
    %134 = vector.broadcast %cst_67 : f32 to vector<1x1xf32>
    %cst_68 = arith.constant 0.000000e+00 : f32
    %135 = vector.broadcast %cst_68 : f32 to vector<16x512xf32>
    %136 = arith.truncf %135 : vector<16x512xf32> to vector<16x512xbf16>
    %c0_69 = arith.constant 0 : index
    %c0_70 = arith.constant 0 : index
    %137 = vector.load %arg12[%c0_69, %c0_70] : memref<128x512xbf16, #tpu.memory_space<vmem>>, vector<16x512xbf16>
    tpu.vector_store %arg12[%c0_69, %c0_70], %136 {strides = array<i32>} : memref<128x512xbf16, #tpu.memory_space<vmem>>, vector<16x512xbf16>,
    %cst_71 = arith.constant dense<0.000000e+00> : vector<16xf32>
    %138 = vector.multi_reduction <add>, %135, %cst_71 [1] : vector<16x512xf32> to vector<16xf32>
    %139 = vector.shape_cast %138 : vector<16xf32> to vector<16x1xf32>
    %cst_72 = arith.constant dense<0.000000e+00> : vector<1xf32>
    %140 = vector.multi_reduction <add>, %139, %cst_72 [0] : vector<16x1xf32> to vector<1xf32>
    %141 = vector.shape_cast %140 : vector<1xf32> to vector<1x1xf32>
    %142 = arith.addf %134, %141 : vector<1x1xf32>
    %cst_73 = arith.constant 0.000000e+00 : f32
    %143 = vector.broadcast %cst_73 : f32 to vector<16x512xf32>
    %c0_74 = arith.constant 0 : index
    %c0_75 = arith.constant 0 : index
    %144 = vector.load %arg11[%c0_74, %c0_75] : memref<128x512xbf16, #tpu.memory_space<vmem>>, vector<16x512xbf16>
    %145 = arith.extf %144 : vector<16x512xbf16> to vector<16x512xf32>
    %146 = vector.broadcast %131 : vector<1x512xf32> to vector<16x512xf32>
    %147 = arith.mulf %145, %146 : vector<16x512xf32>
    %148 = arith.addf %143, %147 : vector<16x512xf32>
    %149 = arith.truncf %148 : vector<16x512xf32> to vector<16x512xbf16>
    %c16_76 = arith.constant 16 : index
    %c0_77 = arith.constant 0 : index
    %150 = vector.load %arg12[%c16_76, %c0_77] : memref<128x512xbf16, #tpu.memory_space<vmem>>, vector<16x512xbf16>
    tpu.vector_store %arg12[%c16_76, %c0_77], %149 {strides = array<i32>} : memref<128x512xbf16, #tpu.memory_space<vmem>>, vector<16x512xbf16>,
    %cst_78 = arith.constant dense<0.000000e+00> : vector<16xf32>
    %151 = vector.multi_reduction <add>, %148, %cst_78 [1] : vector<16x512xf32> to vector<16xf32>
    %152 = vector.shape_cast %151 : vector<16xf32> to vector<16x1xf32>
    %cst_79 = arith.constant dense<0.000000e+00> : vector<1xf32>
    %153 = vector.multi_reduction <add>, %152, %cst_79 [0] : vector<16x1xf32> to vector<1xf32>
    %154 = vector.shape_cast %153 : vector<1xf32> to vector<1x1xf32>
    %155 = arith.addf %142, %154 : vector<1x1xf32>
    %cst_80 = arith.constant 0.000000e+00 : f32
    %156 = vector.broadcast %cst_80 : f32 to vector<16x512xf32>
    %c16_81 = arith.constant 16 : index
    %c0_82 = arith.constant 0 : index
    %157 = vector.load %arg11[%c16_81, %c0_82] : memref<128x512xbf16, #tpu.memory_space<vmem>>, vector<16x512xbf16>
    %158 = arith.extf %157 : vector<16x512xbf16> to vector<16x512xf32>
    %159 = vector.broadcast %131 : vector<1x512xf32> to vector<16x512xf32>
    %160 = arith.mulf %158, %159 : vector<16x512xf32>
    %161 = arith.addf %156, %160 : vector<16x512xf32>
    %c0_83 = arith.constant 0 : index
    %c0_84 = arith.constant 0 : index
    %162 = vector.load %arg11[%c0_83, %c0_84] : memref<128x512xbf16, #tpu.memory_space<vmem>>, vector<16x512xbf16>
    %163 = arith.extf %162 : vector<16x512xbf16> to vector<16x512xf32>
    %164 = vector.broadcast %132 : vector<1x512xf32> to vector<16x512xf32>
    %165 = arith.mulf %163, %164 : vector<16x512xf32>
    %166 = arith.addf %161, %165 : vector<16x512xf32>
    %167 = arith.truncf %166 : vector<16x512xf32> to vector<16x512xbf16>
    %c32_85 = arith.constant 32 : index
    %c0_86 = arith.constant 0 : index
    %168 = vector.load %arg12[%c32_85, %c0_86] : memref<128x512xbf16, #tpu.memory_space<vmem>>, vector<16x512xbf16>
    tpu.vector_store %arg12[%c32_85, %c0_86], %167 {strides = array<i32>} : memref<128x512xbf16, #tpu.memory_space<vmem>>, vector<16x512xbf16>,
    %cst_87 = arith.constant dense<0.000000e+00> : vector<16xf32>
    %169 = vector.multi_reduction <add>, %166, %cst_87 [1] : vector<16x512xf32> to vector<16xf32>
    %170 = vector.shape_cast %169 : vector<16xf32> to vector<16x1xf32>
    %cst_88 = arith.constant dense<0.000000e+00> : vector<1xf32>
    %171 = vector.multi_reduction <add>, %170, %cst_88 [0] : vector<16x1xf32> to vector<1xf32>
    %172 = vector.shape_cast %171 : vector<1xf32> to vector<1x1xf32>
    %173 = arith.addf %155, %172 : vector<1x1xf32>
    %cst_89 = arith.constant 0.000000e+00 : f32
    %174 = vector.broadcast %cst_89 : f32 to vector<16x512xf32>
    %c32_90 = arith.constant 32 : index
    %c0_91 = arith.constant 0 : index
    %175 = vector.load %arg11[%c32_90, %c0_91] : memref<128x512xbf16, #tpu.memory_space<vmem>>, vector<16x512xbf16>
    %176 = arith.extf %175 : vector<16x512xbf16> to vector<16x512xf32>
    %177 = vector.broadcast %131 : vector<1x512xf32> to vector<16x512xf32>
    %178 = arith.mulf %176, %177 : vector<16x512xf32>
    %179 = arith.addf %174, %178 : vector<16x512xf32>
    %c16_92 = arith.constant 16 : index
    %c0_93 = arith.constant 0 : index
    %180 = vector.load %arg11[%c16_92, %c0_93] : memref<128x512xbf16, #tpu.memory_space<vmem>>, vector<16x512xbf16>
    %181 = arith.extf %180 : vector<16x512xbf16> to vector<16x512xf32>
    %182 = vector.broadcast %132 : vector<1x512xf32> to vector<16x512xf32>
    %183 = arith.mulf %181, %182 : vector<16x512xf32>
    %184 = arith.addf %179, %183 : vector<16x512xf32>
    %c0_94 = arith.constant 0 : index
    %c0_95 = arith.constant 0 : index
    %185 = vector.load %arg11[%c0_94, %c0_95] : memref<128x512xbf16, #tpu.memory_space<vmem>>, vector<16x512xbf16>
    %186 = arith.extf %185 : vector<16x512xbf16> to vector<16x512xf32>
    %187 = vector.broadcast %133 : vector<1x512xf32> to vector<16x512xf32>
    %188 = arith.mulf %186, %187 : vector<16x512xf32>
    %189 = arith.addf %184, %188 : vector<16x512xf32>
    %190 = arith.truncf %189 : vector<16x512xf32> to vector<16x512xbf16>
    %c48_96 = arith.constant 48 : index
    %c0_97 = arith.constant 0 : index
    %191 = vector.load %arg12[%c48_96, %c0_97] : memref<128x512xbf16, #tpu.memory_space<vmem>>, vector<16x512xbf16>
    tpu.vector_store %arg12[%c48_96, %c0_97], %190 {strides = array<i32>} : memref<128x512xbf16, #tpu.memory_space<vmem>>, vector<16x512xbf16>,
    %cst_98 = arith.constant dense<0.000000e+00> : vector<16xf32>
    %192 = vector.multi_reduction <add>, %189, %cst_98 [1] : vector<16x512xf32> to vector<16xf32>
    %193 = vector.shape_cast %192 : vector<16xf32> to vector<16x1xf32>
    %cst_99 = arith.constant dense<0.000000e+00> : vector<1xf32>
    %194 = vector.multi_reduction <add>, %193, %cst_99 [0] : vector<16x1xf32> to vector<1xf32>
    %195 = vector.shape_cast %194 : vector<1xf32> to vector<1x1xf32>
    %196 = arith.addf %173, %195 : vector<1x1xf32>
    %cst_100 = arith.constant 0.000000e+00 : f32
    %197 = vector.broadcast %cst_100 : f32 to vector<16x512xf32>
    %c48_101 = arith.constant 48 : index
    %c0_102 = arith.constant 0 : index
    %198 = vector.load %arg11[%c48_101, %c0_102] : memref<128x512xbf16, #tpu.memory_space<vmem>>, vector<16x512xbf16>
    %199 = arith.extf %198 : vector<16x512xbf16> to vector<16x512xf32>
    %200 = vector.broadcast %131 : vector<1x512xf32> to vector<16x512xf32>
    %201 = arith.mulf %199, %200 : vector<16x512xf32>
    %202 = arith.addf %197, %201 : vector<16x512xf32>
    %c32_103 = arith.constant 32 : index
    %c0_104 = arith.constant 0 : index
    %203 = vector.load %arg11[%c32_103, %c0_104] : memref<128x512xbf16, #tpu.memory_space<vmem>>, vector<16x512xbf16>
    %204 = arith.extf %203 : vector<16x512xbf16> to vector<16x512xf32>
    %205 = vector.broadcast %132 : vector<1x512xf32> to vector<16x512xf32>
    %206 = arith.mulf %204, %205 : vector<16x512xf32>
    %207 = arith.addf %202, %206 : vector<16x512xf32>
    %c16_105 = arith.constant 16 : index
    %c0_106 = arith.constant 0 : index
    %208 = vector.load %arg11[%c16_105, %c0_106] : memref<128x512xbf16, #tpu.memory_space<vmem>>, vector<16x512xbf16>
    %209 = arith.extf %208 : vector<16x512xbf16> to vector<16x512xf32>
    %210 = vector.broadcast %133 : vector<1x512xf32> to vector<16x512xf32>
    %211 = arith.mulf %209, %210 : vector<16x512xf32>
    %212 = arith.addf %207, %211 : vector<16x512xf32>
    %213 = arith.truncf %212 : vector<16x512xf32> to vector<16x512xbf16>
    %c64_107 = arith.constant 64 : index
    %c0_108 = arith.constant 0 : index
    %214 = vector.load %arg12[%c64_107, %c0_108] : memref<128x512xbf16, #tpu.memory_space<vmem>>, vector<16x512xbf16>
    tpu.vector_store %arg12[%c64_107, %c0_108], %213 {strides = array<i32>} : memref<128x512xbf16, #tpu.memory_space<vmem>>, vector<16x512xbf16>,
    %cst_109 = arith.constant dense<0.000000e+00> : vector<16xf32>
    %215 = vector.multi_reduction <add>, %212, %cst_109 [1] : vector<16x512xf32> to vector<16xf32>
    %216 = vector.shape_cast %215 : vector<16xf32> to vector<16x1xf32>
    %cst_110 = arith.constant dense<0.000000e+00> : vector<1xf32>
    %217 = vector.multi_reduction <add>, %216, %cst_110 [0] : vector<16x1xf32> to vector<1xf32>
    %218 = vector.shape_cast %217 : vector<1xf32> to vector<1x1xf32>
    %219 = arith.addf %196, %218 : vector<1x1xf32>
    %cst_111 = arith.constant 0.000000e+00 : f32
    %220 = vector.broadcast %cst_111 : f32 to vector<16x512xf32>
    %c64_112 = arith.constant 64 : index
    %c0_113 = arith.constant 0 : index
    %221 = vector.load %arg11[%c64_112, %c0_113] : memref<128x512xbf16, #tpu.memory_space<vmem>>, vector<16x512xbf16>
    %222 = arith.extf %221 : vector<16x512xbf16> to vector<16x512xf32>
    %223 = vector.broadcast %131 : vector<1x512xf32> to vector<16x512xf32>
    %224 = arith.mulf %222, %223 : vector<16x512xf32>
    %225 = arith.addf %220, %224 : vector<16x512xf32>
    %c48_114 = arith.constant 48 : index
    %c0_115 = arith.constant 0 : index
    %226 = vector.load %arg11[%c48_114, %c0_115] : memref<128x512xbf16, #tpu.memory_space<vmem>>, vector<16x512xbf16>
    %227 = arith.extf %226 : vector<16x512xbf16> to vector<16x512xf32>
    %228 = vector.broadcast %132 : vector<1x512xf32> to vector<16x512xf32>
    %229 = arith.mulf %227, %228 : vector<16x512xf32>
    %230 = arith.addf %225, %229 : vector<16x512xf32>
    %c32_116 = arith.constant 32 : index
    %c0_117 = arith.constant 0 : index
    %231 = vector.load %arg11[%c32_116, %c0_117] : memref<128x512xbf16, #tpu.memory_space<vmem>>, vector<16x512xbf16>
    %232 = arith.extf %231 : vector<16x512xbf16> to vector<16x512xf32>
    %233 = vector.broadcast %133 : vector<1x512xf32> to vector<16x512xf32>
    %234 = arith.mulf %232, %233 : vector<16x512xf32>
    %235 = arith.addf %230, %234 : vector<16x512xf32>
    %236 = arith.truncf %235 : vector<16x512xf32> to vector<16x512xbf16>
    %c80_118 = arith.constant 80 : index
    %c0_119 = arith.constant 0 : index
    %237 = vector.load %arg12[%c80_118, %c0_119] : memref<128x512xbf16, #tpu.memory_space<vmem>>, vector<16x512xbf16>
    tpu.vector_store %arg12[%c80_118, %c0_119], %236 {strides = array<i32>} : memref<128x512xbf16, #tpu.memory_space<vmem>>, vector<16x512xbf16>,
    %cst_120 = arith.constant dense<0.000000e+00> : vector<16xf32>
    %238 = vector.multi_reduction <add>, %235, %cst_120 [1] : vector<16x512xf32> to vector<16xf32>
    %239 = vector.shape_cast %238 : vector<16xf32> to vector<16x1xf32>
    %cst_121 = arith.constant dense<0.000000e+00> : vector<1xf32>
    %240 = vector.multi_reduction <add>, %239, %cst_121 [0] : vector<16x1xf32> to vector<1xf32>
    %241 = vector.shape_cast %240 : vector<1xf32> to vector<1x1xf32>
    %242 = arith.addf %219, %241 : vector<1x1xf32>
    %cst_122 = arith.constant 0.000000e+00 : f32
    %243 = vector.broadcast %cst_122 : f32 to vector<16x512xf32>
    %c80_123 = arith.constant 80 : index
    %c0_124 = arith.constant 0 : index
    %244 = vector.load %arg11[%c80_123, %c0_124] : memref<128x512xbf16, #tpu.memory_space<vmem>>, vector<16x512xbf16>
    %245 = arith.extf %244 : vector<16x512xbf16> to vector<16x512xf32>
    %246 = vector.broadcast %131 : vector<1x512xf32> to vector<16x512xf32>
    %247 = arith.mulf %245, %246 : vector<16x512xf32>
    %248 = arith.addf %243, %247 : vector<16x512xf32>
    %c64_125 = arith.constant 64 : index
    %c0_126 = arith.constant 0 : index
    %249 = vector.load %arg11[%c64_125, %c0_126] : memref<128x512xbf16, #tpu.memory_space<vmem>>, vector<16x512xbf16>
    %250 = arith.extf %249 : vector<16x512xbf16> to vector<16x512xf32>
    %251 = vector.broadcast %132 : vector<1x512xf32> to vector<16x512xf32>
    %252 = arith.mulf %250, %251 : vector<16x512xf32>
    %253 = arith.addf %248, %252 : vector<16x512xf32>
    %c48_127 = arith.constant 48 : index
    %c0_128 = arith.constant 0 : index
    %254 = vector.load %arg11[%c48_127, %c0_128] : memref<128x512xbf16, #tpu.memory_space<vmem>>, vector<16x512xbf16>
    %255 = arith.extf %254 : vector<16x512xbf16> to vector<16x512xf32>
    %256 = vector.broadcast %133 : vector<1x512xf32> to vector<16x512xf32>
    %257 = arith.mulf %255, %256 : vector<16x512xf32>
    %258 = arith.addf %253, %257 : vector<16x512xf32>
    %259 = arith.truncf %258 : vector<16x512xf32> to vector<16x512xbf16>
    %c96_129 = arith.constant 96 : index
    %c0_130 = arith.constant 0 : index
    %260 = vector.load %arg12[%c96_129, %c0_130] : memref<128x512xbf16, #tpu.memory_space<vmem>>, vector<16x512xbf16>
    tpu.vector_store %arg12[%c96_129, %c0_130], %259 {strides = array<i32>} : memref<128x512xbf16, #tpu.memory_space<vmem>>, vector<16x512xbf16>,
    %cst_131 = arith.constant dense<0.000000e+00> : vector<16xf32>
    %261 = vector.multi_reduction <add>, %258, %cst_131 [1] : vector<16x512xf32> to vector<16xf32>
    %262 = vector.shape_cast %261 : vector<16xf32> to vector<16x1xf32>
    %cst_132 = arith.constant dense<0.000000e+00> : vector<1xf32>
    %263 = vector.multi_reduction <add>, %262, %cst_132 [0] : vector<16x1xf32> to vector<1xf32>
    %264 = vector.shape_cast %263 : vector<1xf32> to vector<1x1xf32>
    %265 = arith.addf %242, %264 : vector<1x1xf32>
    %cst_133 = arith.constant 0.000000e+00 : f32
    %266 = vector.broadcast %cst_133 : f32 to vector<16x512xf32>
    %c96_134 = arith.constant 96 : index
    %c0_135 = arith.constant 0 : index
    %267 = vector.load %arg11[%c96_134, %c0_135] : memref<128x512xbf16, #tpu.memory_space<vmem>>, vector<16x512xbf16>
    %268 = arith.extf %267 : vector<16x512xbf16> to vector<16x512xf32>
    %269 = vector.broadcast %131 : vector<1x512xf32> to vector<16x512xf32>
    %270 = arith.mulf %268, %269 : vector<16x512xf32>
    %271 = arith.addf %266, %270 : vector<16x512xf32>
    %c80_136 = arith.constant 80 : index
    %c0_137 = arith.constant 0 : index
    %272 = vector.load %arg11[%c80_136, %c0_137] : memref<128x512xbf16, #tpu.memory_space<vmem>>, vector<16x512xbf16>
    %273 = arith.extf %272 : vector<16x512xbf16> to vector<16x512xf32>
    %274 = vector.broadcast %132 : vector<1x512xf32> to vector<16x512xf32>
    %275 = arith.mulf %273, %274 : vector<16x512xf32>
    %276 = arith.addf %271, %275 : vector<16x512xf32>
    %c64_138 = arith.constant 64 : index
    %c0_139 = arith.constant 0 : index
    %277 = vector.load %arg11[%c64_138, %c0_139] : memref<128x512xbf16, #tpu.memory_space<vmem>>, vector<16x512xbf16>
    %278 = arith.extf %277 : vector<16x512xbf16> to vector<16x512xf32>
    %279 = vector.broadcast %133 : vector<1x512xf32> to vector<16x512xf32>
    %280 = arith.mulf %278, %279 : vector<16x512xf32>
    %281 = arith.addf %276, %280 : vector<16x512xf32>
    %282 = arith.truncf %281 : vector<16x512xf32> to vector<16x512xbf16>
    %c112_140 = arith.constant 112 : index
    %c0_141 = arith.constant 0 : index
    %283 = vector.load %arg12[%c112_140, %c0_141] : memref<128x512xbf16, #tpu.memory_space<vmem>>, vector<16x512xbf16>
    tpu.vector_store %arg12[%c112_140, %c0_141], %282 {strides = array<i32>} : memref<128x512xbf16, #tpu.memory_space<vmem>>, vector<16x512xbf16>,
    %cst_142 = arith.constant dense<0.000000e+00> : vector<16xf32>
    %284 = vector.multi_reduction <add>, %281, %cst_142 [1] : vector<16x512xf32> to vector<16xf32>
    %285 = vector.shape_cast %284 : vector<16xf32> to vector<16x1xf32>
    %cst_143 = arith.constant dense<0.000000e+00> : vector<1xf32>
    %286 = vector.multi_reduction <add>, %285, %cst_143 [0] : vector<16x1xf32> to vector<1xf32>
    %287 = vector.shape_cast %286 : vector<1xf32> to vector<1x1xf32>
    %288 = arith.addf %265, %287 : vector<1x1xf32>
    %c0_144 = arith.constant 0 : index
    %c0_145 = arith.constant 0 : index
    %289 = vector.load %arg12[%c0_144, %c0_145] : memref<128x512xbf16, #tpu.memory_space<vmem>>, vector<128x512xbf16>
    %c0_146 = arith.constant 0 : index
    %c0_147 = arith.constant 0 : index
    %290 = vector.load %arg3[%c0_146, %c0_147] : memref<512x512xbf16, #tpu.memory_space<vmem>>, vector<512x512xbf16>
    %cst_148 = arith.constant dense<0.000000e+00> : vector<128x512xf32>
    %291 = tpu.matmul %289, %290, %cst_148 {dimension_numbers = #tpu.dot_dimension_numbers<[1], [0], [0], [1], [0, 0, 1, 1], [], []>} : vector<128x512xbf16>, vector<512x512xbf16>, vector<128x512xf32> -> vector<128x512xf32>
    %c0_149 = arith.constant 0 : index
    %c0_150 = arith.constant 0 : index
    %292 = vector.load %arg9[%c0_149, %c0_150] : memref<128x512xf32, #tpu.memory_space<vmem>>, vector<128x512xf32>
    tpu.vector_store %arg9[%c0_149, %c0_150], %291 {strides = array<i32>} : memref<128x512xf32, #tpu.memory_space<vmem>>, vector<128x512xf32>,
    %cst_151 = arith.constant 0.000000e+00 : f32
    %293 = vector.broadcast %cst_151 : f32 to vector<16x512xf32>
    %cst_152 = arith.constant 0.000000e+00 : f32
    %294 = vector.broadcast %cst_152 : f32 to vector<16x512xf32>
    %c0_153 = arith.constant 0 : index
    %c0_154 = arith.constant 0 : index
    %295 = vector.load %arg9[%c0_153, %c0_154] : memref<128x512xf32, #tpu.memory_space<vmem>>, vector<16x512xf32>
    %cst_155 = arith.constant 7.500000e-01 : f32
    %296 = vector.broadcast %cst_155 : f32 to vector<16x512xf32>
    %297 = arith.mulf %293, %296 : vector<16x512xf32>
    %298 = arith.addf %297, %295 : vector<16x512xf32>
    %cst_156 = arith.constant 0.970214843 : f32
    %299 = vector.broadcast %cst_156 : f32 to vector<16x512xf32>
    %300 = arith.mulf %294, %299 : vector<16x512xf32>
    %301 = arith.addf %300, %298 : vector<16x512xf32>
    %cst_157 = arith.constant 1.250000e+00 : f32
    %302 = vector.broadcast %cst_157 : f32 to vector<16x512xf32>
    %303 = arith.cmpf oge, %301, %302 : vector<16x512xf32>
    %304 = arith.extui %303 : vector<16x512xi1> to vector<16x512xi32>
    %305 = arith.sitofp %304 : vector<16x512xi32> to vector<16x512xf32>
    %cst_158 = arith.constant 1.000000e+00 : f32
    %306 = vector.broadcast %cst_158 : f32 to vector<16x512xf32>
    %307 = arith.subf %306, %305 : vector<16x512xf32>
    %308 = arith.mulf %301, %307 : vector<16x512xf32>
    %309 = arith.truncf %305 : vector<16x512xf32> to vector<16x512xbf16>
    %c0_159 = arith.constant 0 : index
    %c0_160 = arith.constant 0 : index
    %310 = vector.load %arg11[%c0_159, %c0_160] : memref<128x512xbf16, #tpu.memory_space<vmem>>, vector<16x512xbf16>
    tpu.vector_store %arg11[%c0_159, %c0_160], %309 {strides = array<i32>} : memref<128x512xbf16, #tpu.memory_space<vmem>>, vector<16x512xbf16>,
    %c16_161 = arith.constant 16 : index
    %c0_162 = arith.constant 0 : index
    %311 = vector.load %arg9[%c16_161, %c0_162] : memref<128x512xf32, #tpu.memory_space<vmem>>, vector<16x512xf32>
    %cst_163 = arith.constant 7.500000e-01 : f32
    %312 = vector.broadcast %cst_163 : f32 to vector<16x512xf32>
    %313 = arith.mulf %298, %312 : vector<16x512xf32>
    %314 = arith.addf %313, %311 : vector<16x512xf32>
    %cst_164 = arith.constant 0.970214843 : f32
    %315 = vector.broadcast %cst_164 : f32 to vector<16x512xf32>
    %316 = arith.mulf %308, %315 : vector<16x512xf32>
    %317 = arith.addf %316, %314 : vector<16x512xf32>
    %cst_165 = arith.constant 1.250000e+00 : f32
    %318 = vector.broadcast %cst_165 : f32 to vector<16x512xf32>
    %319 = arith.cmpf oge, %317, %318 : vector<16x512xf32>
    %320 = arith.extui %319 : vector<16x512xi1> to vector<16x512xi32>
    %321 = arith.sitofp %320 : vector<16x512xi32> to vector<16x512xf32>
    %cst_166 = arith.constant 1.000000e+00 : f32
    %322 = vector.broadcast %cst_166 : f32 to vector<16x512xf32>
    %323 = arith.subf %322, %321 : vector<16x512xf32>
    %324 = arith.mulf %317, %323 : vector<16x512xf32>
    %325 = arith.truncf %321 : vector<16x512xf32> to vector<16x512xbf16>
    %c16_167 = arith.constant 16 : index
    %c0_168 = arith.constant 0 : index
    %326 = vector.load %arg11[%c16_167, %c0_168] : memref<128x512xbf16, #tpu.memory_space<vmem>>, vector<16x512xbf16>
    tpu.vector_store %arg11[%c16_167, %c0_168], %325 {strides = array<i32>} : memref<128x512xbf16, #tpu.memory_space<vmem>>, vector<16x512xbf16>,
    %c32_169 = arith.constant 32 : index
    %c0_170 = arith.constant 0 : index
    %327 = vector.load %arg9[%c32_169, %c0_170] : memref<128x512xf32, #tpu.memory_space<vmem>>, vector<16x512xf32>
    %cst_171 = arith.constant 7.500000e-01 : f32
    %328 = vector.broadcast %cst_171 : f32 to vector<16x512xf32>
    %329 = arith.mulf %314, %328 : vector<16x512xf32>
    %330 = arith.addf %329, %327 : vector<16x512xf32>
    %cst_172 = arith.constant 0.970214843 : f32
    %331 = vector.broadcast %cst_172 : f32 to vector<16x512xf32>
    %332 = arith.mulf %324, %331 : vector<16x512xf32>
    %333 = arith.addf %332, %330 : vector<16x512xf32>
    %cst_173 = arith.constant 1.250000e+00 : f32
    %334 = vector.broadcast %cst_173 : f32 to vector<16x512xf32>
    %335 = arith.cmpf oge, %333, %334 : vector<16x512xf32>
    %336 = arith.extui %335 : vector<16x512xi1> to vector<16x512xi32>
    %337 = arith.sitofp %336 : vector<16x512xi32> to vector<16x512xf32>
    %cst_174 = arith.constant 1.000000e+00 : f32
    %338 = vector.broadcast %cst_174 : f32 to vector<16x512xf32>
    %339 = arith.subf %338, %337 : vector<16x512xf32>
    %340 = arith.mulf %333, %339 : vector<16x512xf32>
    %341 = arith.truncf %337 : vector<16x512xf32> to vector<16x512xbf16>
    %c32_175 = arith.constant 32 : index
    %c0_176 = arith.constant 0 : index
    %342 = vector.load %arg11[%c32_175, %c0_176] : memref<128x512xbf16, #tpu.memory_space<vmem>>, vector<16x512xbf16>
    tpu.vector_store %arg11[%c32_175, %c0_176], %341 {strides = array<i32>} : memref<128x512xbf16, #tpu.memory_space<vmem>>, vector<16x512xbf16>,
    %c48_177 = arith.constant 48 : index
    %c0_178 = arith.constant 0 : index
    %343 = vector.load %arg9[%c48_177, %c0_178] : memref<128x512xf32, #tpu.memory_space<vmem>>, vector<16x512xf32>
    %cst_179 = arith.constant 7.500000e-01 : f32
    %344 = vector.broadcast %cst_179 : f32 to vector<16x512xf32>
    %345 = arith.mulf %330, %344 : vector<16x512xf32>
    %346 = arith.addf %345, %343 : vector<16x512xf32>
    %cst_180 = arith.constant 0.970214843 : f32
    %347 = vector.broadcast %cst_180 : f32 to vector<16x512xf32>
    %348 = arith.mulf %340, %347 : vector<16x512xf32>
    %349 = arith.addf %348, %346 : vector<16x512xf32>
    %cst_181 = arith.constant 1.250000e+00 : f32
    %350 = vector.broadcast %cst_181 : f32 to vector<16x512xf32>
    %351 = arith.cmpf oge, %349, %350 : vector<16x512xf32>
    %352 = arith.extui %351 : vector<16x512xi1> to vector<16x512xi32>
    %353 = arith.sitofp %352 : vector<16x512xi32> to vector<16x512xf32>
    %cst_182 = arith.constant 1.000000e+00 : f32
    %354 = vector.broadcast %cst_182 : f32 to vector<16x512xf32>
    %355 = arith.subf %354, %353 : vector<16x512xf32>
    %356 = arith.mulf %349, %355 : vector<16x512xf32>
    %357 = arith.truncf %353 : vector<16x512xf32> to vector<16x512xbf16>
    %c48_183 = arith.constant 48 : index
    %c0_184 = arith.constant 0 : index
    %358 = vector.load %arg11[%c48_183, %c0_184] : memref<128x512xbf16, #tpu.memory_space<vmem>>, vector<16x512xbf16>
    tpu.vector_store %arg11[%c48_183, %c0_184], %357 {strides = array<i32>} : memref<128x512xbf16, #tpu.memory_space<vmem>>, vector<16x512xbf16>,
    %c64_185 = arith.constant 64 : index
    %c0_186 = arith.constant 0 : index
    %359 = vector.load %arg9[%c64_185, %c0_186] : memref<128x512xf32, #tpu.memory_space<vmem>>, vector<16x512xf32>
    %cst_187 = arith.constant 7.500000e-01 : f32
    %360 = vector.broadcast %cst_187 : f32 to vector<16x512xf32>
    %361 = arith.mulf %346, %360 : vector<16x512xf32>
    %362 = arith.addf %361, %359 : vector<16x512xf32>
    %cst_188 = arith.constant 0.970214843 : f32
    %363 = vector.broadcast %cst_188 : f32 to vector<16x512xf32>
    %364 = arith.mulf %356, %363 : vector<16x512xf32>
    %365 = arith.addf %364, %362 : vector<16x512xf32>
    %cst_189 = arith.constant 1.250000e+00 : f32
    %366 = vector.broadcast %cst_189 : f32 to vector<16x512xf32>
    %367 = arith.cmpf oge, %365, %366 : vector<16x512xf32>
    %368 = arith.extui %367 : vector<16x512xi1> to vector<16x512xi32>
    %369 = arith.sitofp %368 : vector<16x512xi32> to vector<16x512xf32>
    %cst_190 = arith.constant 1.000000e+00 : f32
    %370 = vector.broadcast %cst_190 : f32 to vector<16x512xf32>
    %371 = arith.subf %370, %369 : vector<16x512xf32>
    %372 = arith.mulf %365, %371 : vector<16x512xf32>
    %373 = arith.truncf %369 : vector<16x512xf32> to vector<16x512xbf16>
    %c64_191 = arith.constant 64 : index
    %c0_192 = arith.constant 0 : index
    %374 = vector.load %arg11[%c64_191, %c0_192] : memref<128x512xbf16, #tpu.memory_space<vmem>>, vector<16x512xbf16>
    tpu.vector_store %arg11[%c64_191, %c0_192], %373 {strides = array<i32>} : memref<128x512xbf16, #tpu.memory_space<vmem>>, vector<16x512xbf16>,
    %c80_193 = arith.constant 80 : index
    %c0_194 = arith.constant 0 : index
    %375 = vector.load %arg9[%c80_193, %c0_194] : memref<128x512xf32, #tpu.memory_space<vmem>>, vector<16x512xf32>
    %cst_195 = arith.constant 7.500000e-01 : f32
    %376 = vector.broadcast %cst_195 : f32 to vector<16x512xf32>
    %377 = arith.mulf %362, %376 : vector<16x512xf32>
    %378 = arith.addf %377, %375 : vector<16x512xf32>
    %cst_196 = arith.constant 0.970214843 : f32
    %379 = vector.broadcast %cst_196 : f32 to vector<16x512xf32>
    %380 = arith.mulf %372, %379 : vector<16x512xf32>
    %381 = arith.addf %380, %378 : vector<16x512xf32>
    %cst_197 = arith.constant 1.250000e+00 : f32
    %382 = vector.broadcast %cst_197 : f32 to vector<16x512xf32>
    %383 = arith.cmpf oge, %381, %382 : vector<16x512xf32>
    %384 = arith.extui %383 : vector<16x512xi1> to vector<16x512xi32>
    %385 = arith.sitofp %384 : vector<16x512xi32> to vector<16x512xf32>
    %cst_198 = arith.constant 1.000000e+00 : f32
    %386 = vector.broadcast %cst_198 : f32 to vector<16x512xf32>
    %387 = arith.subf %386, %385 : vector<16x512xf32>
    %388 = arith.mulf %381, %387 : vector<16x512xf32>
    %389 = arith.truncf %385 : vector<16x512xf32> to vector<16x512xbf16>
    %c80_199 = arith.constant 80 : index
    %c0_200 = arith.constant 0 : index
    %390 = vector.load %arg11[%c80_199, %c0_200] : memref<128x512xbf16, #tpu.memory_space<vmem>>, vector<16x512xbf16>
    tpu.vector_store %arg11[%c80_199, %c0_200], %389 {strides = array<i32>} : memref<128x512xbf16, #tpu.memory_space<vmem>>, vector<16x512xbf16>,
    %c96_201 = arith.constant 96 : index
    %c0_202 = arith.constant 0 : index
    %391 = vector.load %arg9[%c96_201, %c0_202] : memref<128x512xf32, #tpu.memory_space<vmem>>, vector<16x512xf32>
    %cst_203 = arith.constant 7.500000e-01 : f32
    %392 = vector.broadcast %cst_203 : f32 to vector<16x512xf32>
    %393 = arith.mulf %378, %392 : vector<16x512xf32>
    %394 = arith.addf %393, %391 : vector<16x512xf32>
    %cst_204 = arith.constant 0.970214843 : f32
    %395 = vector.broadcast %cst_204 : f32 to vector<16x512xf32>
    %396 = arith.mulf %388, %395 : vector<16x512xf32>
    %397 = arith.addf %396, %394 : vector<16x512xf32>
    %cst_205 = arith.constant 1.250000e+00 : f32
    %398 = vector.broadcast %cst_205 : f32 to vector<16x512xf32>
    %399 = arith.cmpf oge, %397, %398 : vector<16x512xf32>
    %400 = arith.extui %399 : vector<16x512xi1> to vector<16x512xi32>
    %401 = arith.sitofp %400 : vector<16x512xi32> to vector<16x512xf32>
    %cst_206 = arith.constant 1.000000e+00 : f32
    %402 = vector.broadcast %cst_206 : f32 to vector<16x512xf32>
    %403 = arith.subf %402, %401 : vector<16x512xf32>
    %404 = arith.mulf %397, %403 : vector<16x512xf32>
    %405 = arith.truncf %401 : vector<16x512xf32> to vector<16x512xbf16>
    %c96_207 = arith.constant 96 : index
    %c0_208 = arith.constant 0 : index
    %406 = vector.load %arg11[%c96_207, %c0_208] : memref<128x512xbf16, #tpu.memory_space<vmem>>, vector<16x512xbf16>
    tpu.vector_store %arg11[%c96_207, %c0_208], %405 {strides = array<i32>} : memref<128x512xbf16, #tpu.memory_space<vmem>>, vector<16x512xbf16>,
    %c112_209 = arith.constant 112 : index
    %c0_210 = arith.constant 0 : index
    %407 = vector.load %arg9[%c112_209, %c0_210] : memref<128x512xf32, #tpu.memory_space<vmem>>, vector<16x512xf32>
    %cst_211 = arith.constant 7.500000e-01 : f32
    %408 = vector.broadcast %cst_211 : f32 to vector<16x512xf32>
    %409 = arith.mulf %394, %408 : vector<16x512xf32>
    %410 = arith.addf %409, %407 : vector<16x512xf32>
    %cst_212 = arith.constant 0.970214843 : f32
    %411 = vector.broadcast %cst_212 : f32 to vector<16x512xf32>
    %412 = arith.mulf %404, %411 : vector<16x512xf32>
    %413 = arith.addf %412, %410 : vector<16x512xf32>
    %cst_213 = arith.constant 1.250000e+00 : f32
    %414 = vector.broadcast %cst_213 : f32 to vector<16x512xf32>
    %415 = arith.cmpf oge, %413, %414 : vector<16x512xf32>
    %416 = arith.extui %415 : vector<16x512xi1> to vector<16x512xi32>
    %417 = arith.sitofp %416 : vector<16x512xi32> to vector<16x512xf32>
    %418 = arith.truncf %417 : vector<16x512xf32> to vector<16x512xbf16>
    %c112_214 = arith.constant 112 : index
    %c0_215 = arith.constant 0 : index
    %419 = vector.load %arg11[%c112_214, %c0_215] : memref<128x512xbf16, #tpu.memory_space<vmem>>, vector<16x512xbf16>
    tpu.vector_store %arg11[%c112_214, %c0_215], %418 {strides = array<i32>} : memref<128x512xbf16, #tpu.memory_space<vmem>>, vector<16x512xbf16>,
    %c0_216 = arith.constant 0 : index
    %c0_217 = arith.constant 0 : index
    %420 = vector.load %arg6[%c0_216, %c0_217] : memref<8x512xf32, #tpu.memory_space<vmem>>, vector<1x512xf32>
    %c1_218 = arith.constant 1 : index
    %c0_219 = arith.constant 0 : index
    %421 = vector.load %arg6[%c1_218, %c0_219] : memref<8x512xf32, #tpu.memory_space<vmem>>, vector<1x512xf32>
    %c2_220 = arith.constant 2 : index
    %c0_221 = arith.constant 0 : index
    %422 = vector.load %arg6[%c2_220, %c0_221] : memref<8x512xf32, #tpu.memory_space<vmem>>, vector<1x512xf32>
    %cst_222 = arith.constant 0.000000e+00 : f32
    %423 = vector.broadcast %cst_222 : f32 to vector<1x1xf32>
    %cst_223 = arith.constant 0.000000e+00 : f32
    %424 = vector.broadcast %cst_223 : f32 to vector<16x512xf32>
    %425 = arith.truncf %424 : vector<16x512xf32> to vector<16x512xbf16>
    %c0_224 = arith.constant 0 : index
    %c0_225 = arith.constant 0 : index
    %426 = vector.load %arg13[%c0_224, %c0_225] : memref<128x512xbf16, #tpu.memory_space<vmem>>, vector<16x512xbf16>
    tpu.vector_store %arg13[%c0_224, %c0_225], %425 {strides = array<i32>} : memref<128x512xbf16, #tpu.memory_space<vmem>>, vector<16x512xbf16>,
    %cst_226 = arith.constant dense<0.000000e+00> : vector<16xf32>
    %427 = vector.multi_reduction <add>, %424, %cst_226 [1] : vector<16x512xf32> to vector<16xf32>
    %428 = vector.shape_cast %427 : vector<16xf32> to vector<16x1xf32>
    %cst_227 = arith.constant dense<0.000000e+00> : vector<1xf32>
    %429 = vector.multi_reduction <add>, %428, %cst_227 [0] : vector<16x1xf32> to vector<1xf32>
    %430 = vector.shape_cast %429 : vector<1xf32> to vector<1x1xf32>
    %431 = arith.addf %423, %430 : vector<1x1xf32>
    %cst_228 = arith.constant 0.000000e+00 : f32
    %432 = vector.broadcast %cst_228 : f32 to vector<16x512xf32>
    %c0_229 = arith.constant 0 : index
    %c0_230 = arith.constant 0 : index
    %433 = vector.load %arg11[%c0_229, %c0_230] : memref<128x512xbf16, #tpu.memory_space<vmem>>, vector<16x512xbf16>
    %434 = arith.extf %433 : vector<16x512xbf16> to vector<16x512xf32>
    %435 = vector.broadcast %420 : vector<1x512xf32> to vector<16x512xf32>
    %436 = arith.mulf %434, %435 : vector<16x512xf32>
    %437 = arith.addf %432, %436 : vector<16x512xf32>
    %438 = arith.truncf %437 : vector<16x512xf32> to vector<16x512xbf16>
    %c16_231 = arith.constant 16 : index
    %c0_232 = arith.constant 0 : index
    %439 = vector.load %arg13[%c16_231, %c0_232] : memref<128x512xbf16, #tpu.memory_space<vmem>>, vector<16x512xbf16>
    tpu.vector_store %arg13[%c16_231, %c0_232], %438 {strides = array<i32>} : memref<128x512xbf16, #tpu.memory_space<vmem>>, vector<16x512xbf16>,
    %cst_233 = arith.constant dense<0.000000e+00> : vector<16xf32>
    %440 = vector.multi_reduction <add>, %437, %cst_233 [1] : vector<16x512xf32> to vector<16xf32>
    %441 = vector.shape_cast %440 : vector<16xf32> to vector<16x1xf32>
    %cst_234 = arith.constant dense<0.000000e+00> : vector<1xf32>
    %442 = vector.multi_reduction <add>, %441, %cst_234 [0] : vector<16x1xf32> to vector<1xf32>
    %443 = vector.shape_cast %442 : vector<1xf32> to vector<1x1xf32>
    %444 = arith.addf %431, %443 : vector<1x1xf32>
    %cst_235 = arith.constant 0.000000e+00 : f32
    %445 = vector.broadcast %cst_235 : f32 to vector<16x512xf32>
    %c16_236 = arith.constant 16 : index
    %c0_237 = arith.constant 0 : index
    %446 = vector.load %arg11[%c16_236, %c0_237] : memref<128x512xbf16, #tpu.memory_space<vmem>>, vector<16x512xbf16>
    %447 = arith.extf %446 : vector<16x512xbf16> to vector<16x512xf32>
    %448 = vector.broadcast %420 : vector<1x512xf32> to vector<16x512xf32>
    %449 = arith.mulf %447, %448 : vector<16x512xf32>
    %450 = arith.addf %445, %449 : vector<16x512xf32>
    %c0_238 = arith.constant 0 : index
    %c0_239 = arith.constant 0 : index
    %451 = vector.load %arg11[%c0_238, %c0_239] : memref<128x512xbf16, #tpu.memory_space<vmem>>, vector<16x512xbf16>
    %452 = arith.extf %451 : vector<16x512xbf16> to vector<16x512xf32>
    %453 = vector.broadcast %421 : vector<1x512xf32> to vector<16x512xf32>
    %454 = arith.mulf %452, %453 : vector<16x512xf32>
    %455 = arith.addf %450, %454 : vector<16x512xf32>
    %456 = arith.truncf %455 : vector<16x512xf32> to vector<16x512xbf16>
    %c32_240 = arith.constant 32 : index
    %c0_241 = arith.constant 0 : index
    %457 = vector.load %arg13[%c32_240, %c0_241] : memref<128x512xbf16, #tpu.memory_space<vmem>>, vector<16x512xbf16>
    tpu.vector_store %arg13[%c32_240, %c0_241], %456 {strides = array<i32>} : memref<128x512xbf16, #tpu.memory_space<vmem>>, vector<16x512xbf16>,
    %cst_242 = arith.constant dense<0.000000e+00> : vector<16xf32>
    %458 = vector.multi_reduction <add>, %455, %cst_242 [1] : vector<16x512xf32> to vector<16xf32>
    %459 = vector.shape_cast %458 : vector<16xf32> to vector<16x1xf32>
    %cst_243 = arith.constant dense<0.000000e+00> : vector<1xf32>
    %460 = vector.multi_reduction <add>, %459, %cst_243 [0] : vector<16x1xf32> to vector<1xf32>
    %461 = vector.shape_cast %460 : vector<1xf32> to vector<1x1xf32>
    %462 = arith.addf %444, %461 : vector<1x1xf32>
    %cst_244 = arith.constant 0.000000e+00 : f32
    %463 = vector.broadcast %cst_244 : f32 to vector<16x512xf32>
    %c32_245 = arith.constant 32 : index
    %c0_246 = arith.constant 0 : index
    %464 = vector.load %arg11[%c32_245, %c0_246] : memref<128x512xbf16, #tpu.memory_space<vmem>>, vector<16x512xbf16>
    %465 = arith.extf %464 : vector<16x512xbf16> to vector<16x512xf32>
    %466 = vector.broadcast %420 : vector<1x512xf32> to vector<16x512xf32>
    %467 = arith.mulf %465, %466 : vector<16x512xf32>
    %468 = arith.addf %463, %467 : vector<16x512xf32>
    %c16_247 = arith.constant 16 : index
    %c0_248 = arith.constant 0 : index
    %469 = vector.load %arg11[%c16_247, %c0_248] : memref<128x512xbf16, #tpu.memory_space<vmem>>, vector<16x512xbf16>
    %470 = arith.extf %469 : vector<16x512xbf16> to vector<16x512xf32>
    %471 = vector.broadcast %421 : vector<1x512xf32> to vector<16x512xf32>
    %472 = arith.mulf %470, %471 : vector<16x512xf32>
    %473 = arith.addf %468, %472 : vector<16x512xf32>
    %c0_249 = arith.constant 0 : index
    %c0_250 = arith.constant 0 : index
    %474 = vector.load %arg11[%c0_249, %c0_250] : memref<128x512xbf16, #tpu.memory_space<vmem>>, vector<16x512xbf16>
    %475 = arith.extf %474 : vector<16x512xbf16> to vector<16x512xf32>
    %476 = vector.broadcast %422 : vector<1x512xf32> to vector<16x512xf32>
    %477 = arith.mulf %475, %476 : vector<16x512xf32>
    %478 = arith.addf %473, %477 : vector<16x512xf32>
    %479 = arith.truncf %478 : vector<16x512xf32> to vector<16x512xbf16>
    %c48_251 = arith.constant 48 : index
    %c0_252 = arith.constant 0 : index
    %480 = vector.load %arg13[%c48_251, %c0_252] : memref<128x512xbf16, #tpu.memory_space<vmem>>, vector<16x512xbf16>
    tpu.vector_store %arg13[%c48_251, %c0_252], %479 {strides = array<i32>} : memref<128x512xbf16, #tpu.memory_space<vmem>>, vector<16x512xbf16>,
    %cst_253 = arith.constant dense<0.000000e+00> : vector<16xf32>
    %481 = vector.multi_reduction <add>, %478, %cst_253 [1] : vector<16x512xf32> to vector<16xf32>
    %482 = vector.shape_cast %481 : vector<16xf32> to vector<16x1xf32>
    %cst_254 = arith.constant dense<0.000000e+00> : vector<1xf32>
    %483 = vector.multi_reduction <add>, %482, %cst_254 [0] : vector<16x1xf32> to vector<1xf32>
    %484 = vector.shape_cast %483 : vector<1xf32> to vector<1x1xf32>
    %485 = arith.addf %462, %484 : vector<1x1xf32>
    %cst_255 = arith.constant 0.000000e+00 : f32
    %486 = vector.broadcast %cst_255 : f32 to vector<16x512xf32>
    %c48_256 = arith.constant 48 : index
    %c0_257 = arith.constant 0 : index
    %487 = vector.load %arg11[%c48_256, %c0_257] : memref<128x512xbf16, #tpu.memory_space<vmem>>, vector<16x512xbf16>
    %488 = arith.extf %487 : vector<16x512xbf16> to vector<16x512xf32>
    %489 = vector.broadcast %420 : vector<1x512xf32> to vector<16x512xf32>
    %490 = arith.mulf %488, %489 : vector<16x512xf32>
    %491 = arith.addf %486, %490 : vector<16x512xf32>
    %c32_258 = arith.constant 32 : index
    %c0_259 = arith.constant 0 : index
    %492 = vector.load %arg11[%c32_258, %c0_259] : memref<128x512xbf16, #tpu.memory_space<vmem>>, vector<16x512xbf16>
    %493 = arith.extf %492 : vector<16x512xbf16> to vector<16x512xf32>
    %494 = vector.broadcast %421 : vector<1x512xf32> to vector<16x512xf32>
    %495 = arith.mulf %493, %494 : vector<16x512xf32>
    %496 = arith.addf %491, %495 : vector<16x512xf32>
    %c16_260 = arith.constant 16 : index
    %c0_261 = arith.constant 0 : index
    %497 = vector.load %arg11[%c16_260, %c0_261] : memref<128x512xbf16, #tpu.memory_space<vmem>>, vector<16x512xbf16>
    %498 = arith.extf %497 : vector<16x512xbf16> to vector<16x512xf32>
    %499 = vector.broadcast %422 : vector<1x512xf32> to vector<16x512xf32>
    %500 = arith.mulf %498, %499 : vector<16x512xf32>
    %501 = arith.addf %496, %500 : vector<16x512xf32>
    %502 = arith.truncf %501 : vector<16x512xf32> to vector<16x512xbf16>
    %c64_262 = arith.constant 64 : index
    %c0_263 = arith.constant 0 : index
    %503 = vector.load %arg13[%c64_262, %c0_263] : memref<128x512xbf16, #tpu.memory_space<vmem>>, vector<16x512xbf16>
    tpu.vector_store %arg13[%c64_262, %c0_263], %502 {strides = array<i32>} : memref<128x512xbf16, #tpu.memory_space<vmem>>, vector<16x512xbf16>,
    %cst_264 = arith.constant dense<0.000000e+00> : vector<16xf32>
    %504 = vector.multi_reduction <add>, %501, %cst_264 [1] : vector<16x512xf32> to vector<16xf32>
    %505 = vector.shape_cast %504 : vector<16xf32> to vector<16x1xf32>
    %cst_265 = arith.constant dense<0.000000e+00> : vector<1xf32>
    %506 = vector.multi_reduction <add>, %505, %cst_265 [0] : vector<16x1xf32> to vector<1xf32>
    %507 = vector.shape_cast %506 : vector<1xf32> to vector<1x1xf32>
    %508 = arith.addf %485, %507 : vector<1x1xf32>
    %cst_266 = arith.constant 0.000000e+00 : f32
    %509 = vector.broadcast %cst_266 : f32 to vector<16x512xf32>
    %c64_267 = arith.constant 64 : index
    %c0_268 = arith.constant 0 : index
    %510 = vector.load %arg11[%c64_267, %c0_268] : memref<128x512xbf16, #tpu.memory_space<vmem>>, vector<16x512xbf16>
    %511 = arith.extf %510 : vector<16x512xbf16> to vector<16x512xf32>
    %512 = vector.broadcast %420 : vector<1x512xf32> to vector<16x512xf32>
    %513 = arith.mulf %511, %512 : vector<16x512xf32>
    %514 = arith.addf %509, %513 : vector<16x512xf32>
    %c48_269 = arith.constant 48 : index
    %c0_270 = arith.constant 0 : index
    %515 = vector.load %arg11[%c48_269, %c0_270] : memref<128x512xbf16, #tpu.memory_space<vmem>>, vector<16x512xbf16>
    %516 = arith.extf %515 : vector<16x512xbf16> to vector<16x512xf32>
    %517 = vector.broadcast %421 : vector<1x512xf32> to vector<16x512xf32>
    %518 = arith.mulf %516, %517 : vector<16x512xf32>
    %519 = arith.addf %514, %518 : vector<16x512xf32>
    %c32_271 = arith.constant 32 : index
    %c0_272 = arith.constant 0 : index
    %520 = vector.load %arg11[%c32_271, %c0_272] : memref<128x512xbf16, #tpu.memory_space<vmem>>, vector<16x512xbf16>
    %521 = arith.extf %520 : vector<16x512xbf16> to vector<16x512xf32>
    %522 = vector.broadcast %422 : vector<1x512xf32> to vector<16x512xf32>
    %523 = arith.mulf %521, %522 : vector<16x512xf32>
    %524 = arith.addf %519, %523 : vector<16x512xf32>
    %525 = arith.truncf %524 : vector<16x512xf32> to vector<16x512xbf16>
    %c80_273 = arith.constant 80 : index
    %c0_274 = arith.constant 0 : index
    %526 = vector.load %arg13[%c80_273, %c0_274] : memref<128x512xbf16, #tpu.memory_space<vmem>>, vector<16x512xbf16>
    tpu.vector_store %arg13[%c80_273, %c0_274], %525 {strides = array<i32>} : memref<128x512xbf16, #tpu.memory_space<vmem>>, vector<16x512xbf16>,
    %cst_275 = arith.constant dense<0.000000e+00> : vector<16xf32>
    %527 = vector.multi_reduction <add>, %524, %cst_275 [1] : vector<16x512xf32> to vector<16xf32>
    %528 = vector.shape_cast %527 : vector<16xf32> to vector<16x1xf32>
    %cst_276 = arith.constant dense<0.000000e+00> : vector<1xf32>
    %529 = vector.multi_reduction <add>, %528, %cst_276 [0] : vector<16x1xf32> to vector<1xf32>
    %530 = vector.shape_cast %529 : vector<1xf32> to vector<1x1xf32>
    %531 = arith.addf %508, %530 : vector<1x1xf32>
    %cst_277 = arith.constant 0.000000e+00 : f32
    %532 = vector.broadcast %cst_277 : f32 to vector<16x512xf32>
    %c80_278 = arith.constant 80 : index
    %c0_279 = arith.constant 0 : index
    %533 = vector.load %arg11[%c80_278, %c0_279] : memref<128x512xbf16, #tpu.memory_space<vmem>>, vector<16x512xbf16>
    %534 = arith.extf %533 : vector<16x512xbf16> to vector<16x512xf32>
    %535 = vector.broadcast %420 : vector<1x512xf32> to vector<16x512xf32>
    %536 = arith.mulf %534, %535 : vector<16x512xf32>
    %537 = arith.addf %532, %536 : vector<16x512xf32>
    %c64_280 = arith.constant 64 : index
    %c0_281 = arith.constant 0 : index
    %538 = vector.load %arg11[%c64_280, %c0_281] : memref<128x512xbf16, #tpu.memory_space<vmem>>, vector<16x512xbf16>
    %539 = arith.extf %538 : vector<16x512xbf16> to vector<16x512xf32>
    %540 = vector.broadcast %421 : vector<1x512xf32> to vector<16x512xf32>
    %541 = arith.mulf %539, %540 : vector<16x512xf32>
    %542 = arith.addf %537, %541 : vector<16x512xf32>
    %c48_282 = arith.constant 48 : index
    %c0_283 = arith.constant 0 : index
    %543 = vector.load %arg11[%c48_282, %c0_283] : memref<128x512xbf16, #tpu.memory_space<vmem>>, vector<16x512xbf16>
    %544 = arith.extf %543 : vector<16x512xbf16> to vector<16x512xf32>
    %545 = vector.broadcast %422 : vector<1x512xf32> to vector<16x512xf32>
    %546 = arith.mulf %544, %545 : vector<16x512xf32>
    %547 = arith.addf %542, %546 : vector<16x512xf32>
    %548 = arith.truncf %547 : vector<16x512xf32> to vector<16x512xbf16>
    %c96_284 = arith.constant 96 : index
    %c0_285 = arith.constant 0 : index
    %549 = vector.load %arg13[%c96_284, %c0_285] : memref<128x512xbf16, #tpu.memory_space<vmem>>, vector<16x512xbf16>
    tpu.vector_store %arg13[%c96_284, %c0_285], %548 {strides = array<i32>} : memref<128x512xbf16, #tpu.memory_space<vmem>>, vector<16x512xbf16>,
    %cst_286 = arith.constant dense<0.000000e+00> : vector<16xf32>
    %550 = vector.multi_reduction <add>, %547, %cst_286 [1] : vector<16x512xf32> to vector<16xf32>
    %551 = vector.shape_cast %550 : vector<16xf32> to vector<16x1xf32>
    %cst_287 = arith.constant dense<0.000000e+00> : vector<1xf32>
    %552 = vector.multi_reduction <add>, %551, %cst_287 [0] : vector<16x1xf32> to vector<1xf32>
    %553 = vector.shape_cast %552 : vector<1xf32> to vector<1x1xf32>
    %554 = arith.addf %531, %553 : vector<1x1xf32>
    %cst_288 = arith.constant 0.000000e+00 : f32
    %555 = vector.broadcast %cst_288 : f32 to vector<16x512xf32>
    %c96_289 = arith.constant 96 : index
    %c0_290 = arith.constant 0 : index
    %556 = vector.load %arg11[%c96_289, %c0_290] : memref<128x512xbf16, #tpu.memory_space<vmem>>, vector<16x512xbf16>
    %557 = arith.extf %556 : vector<16x512xbf16> to vector<16x512xf32>
    %558 = vector.broadcast %420 : vector<1x512xf32> to vector<16x512xf32>
    %559 = arith.mulf %557, %558 : vector<16x512xf32>
    %560 = arith.addf %555, %559 : vector<16x512xf32>
    %c80_291 = arith.constant 80 : index
    %c0_292 = arith.constant 0 : index
    %561 = vector.load %arg11[%c80_291, %c0_292] : memref<128x512xbf16, #tpu.memory_space<vmem>>, vector<16x512xbf16>
    %562 = arith.extf %561 : vector<16x512xbf16> to vector<16x512xf32>
    %563 = vector.broadcast %421 : vector<1x512xf32> to vector<16x512xf32>
    %564 = arith.mulf %562, %563 : vector<16x512xf32>
    %565 = arith.addf %560, %564 : vector<16x512xf32>
    %c64_293 = arith.constant 64 : index
    %c0_294 = arith.constant 0 : index
    %566 = vector.load %arg11[%c64_293, %c0_294] : memref<128x512xbf16, #tpu.memory_space<vmem>>, vector<16x512xbf16>
    %567 = arith.extf %566 : vector<16x512xbf16> to vector<16x512xf32>
    %568 = vector.broadcast %422 : vector<1x512xf32> to vector<16x512xf32>
    %569 = arith.mulf %567, %568 : vector<16x512xf32>
    %570 = arith.addf %565, %569 : vector<16x512xf32>
    %571 = arith.truncf %570 : vector<16x512xf32> to vector<16x512xbf16>
    %c112_295 = arith.constant 112 : index
    %c0_296 = arith.constant 0 : index
    %572 = vector.load %arg13[%c112_295, %c0_296] : memref<128x512xbf16, #tpu.memory_space<vmem>>, vector<16x512xbf16>
    tpu.vector_store %arg13[%c112_295, %c0_296], %571 {strides = array<i32>} : memref<128x512xbf16, #tpu.memory_space<vmem>>, vector<16x512xbf16>,
    %cst_297 = arith.constant dense<0.000000e+00> : vector<16xf32>
    %573 = vector.multi_reduction <add>, %570, %cst_297 [1] : vector<16x512xf32> to vector<16xf32>
    %574 = vector.shape_cast %573 : vector<16xf32> to vector<16x1xf32>
    %cst_298 = arith.constant dense<0.000000e+00> : vector<1xf32>
    %575 = vector.multi_reduction <add>, %574, %cst_298 [0] : vector<16x1xf32> to vector<1xf32>
    %576 = vector.shape_cast %575 : vector<1xf32> to vector<1x1xf32>
    %577 = arith.addf %554, %576 : vector<1x1xf32>
    %c0_299 = arith.constant 0 : index
    %c0_300 = arith.constant 0 : index
    %578 = vector.load %arg13[%c0_299, %c0_300] : memref<128x512xbf16, #tpu.memory_space<vmem>>, vector<128x512xbf16>
    %c0_301 = arith.constant 0 : index
    %c0_302 = arith.constant 0 : index
    %579 = vector.load %arg4[%c0_301, %c0_302] : memref<512x128xbf16, #tpu.memory_space<vmem>>, vector<512x128xbf16>
    %cst_303 = arith.constant dense<0.000000e+00> : vector<128x128xf32>
    %580 = tpu.matmul %578, %579, %cst_303 {dimension_numbers = #tpu.dot_dimension_numbers<[1], [0], [0], [1], [0, 0, 1, 1], [], []>} : vector<128x512xbf16>, vector<512x128xbf16>, vector<128x128xf32> -> vector<128x128xf32>
    %c0_304 = arith.constant 0 : index
    %c0_305 = arith.constant 0 : index
    %581 = vector.load %arg10[%c0_304, %c0_305] : memref<128x128xf32, #tpu.memory_space<vmem>>, vector<128x128xf32>
    tpu.vector_store %arg10[%c0_304, %c0_305], %580 {strides = array<i32>} : memref<128x128xf32, #tpu.memory_space<vmem>>, vector<128x128xf32>,
    %cst_306 = arith.constant 0.000000e+00 : bf16
    %582 = vector.broadcast %cst_306 : bf16 to vector<16x128xbf16>
    %c0_307 = arith.constant 0 : index
    %c0_308 = arith.constant 0 : index
    %583 = vector.load %arg7[%c0_307, %c0_308] : memref<128x128xbf16, #tpu.memory_space<vmem>>, vector<16x128xbf16>
    tpu.vector_store %arg7[%c0_307, %c0_308], %582 {strides = array<i32>} : memref<128x128xbf16, #tpu.memory_space<vmem>>, vector<16x128xbf16>,
    %cst_309 = arith.constant 0.000000e+00 : f32
    %584 = vector.broadcast %cst_309 : f32 to vector<16x128xf32>
    %cst_310 = arith.constant 0.000000e+00 : f32
    %585 = vector.broadcast %cst_310 : f32 to vector<16x128xf32>
    %cst_311 = arith.constant 0.000000e+00 : f32
    %586 = vector.broadcast %cst_311 : f32 to vector<1x1xf32>
    %c0_312 = arith.constant 0 : index
    %c0_313 = arith.constant 0 : index
    %587 = vector.load %arg10[%c0_312, %c0_313] : memref<128x128xf32, #tpu.memory_space<vmem>>, vector<16x128xf32>
    %cst_314 = arith.constant 7.500000e-01 : f32
    %588 = vector.broadcast %cst_314 : f32 to vector<16x128xf32>
    %589 = arith.mulf %584, %588 : vector<16x128xf32>
    %590 = arith.addf %589, %587 : vector<16x128xf32>
    %cst_315 = arith.constant 0.970214843 : f32
    %591 = vector.broadcast %cst_315 : f32 to vector<16x128xf32>
    %592 = arith.mulf %585, %591 : vector<16x128xf32>
    %593 = arith.addf %592, %590 : vector<16x128xf32>
    %cst_316 = arith.constant 1.250000e+00 : f32
    %594 = vector.broadcast %cst_316 : f32 to vector<16x128xf32>
    %595 = arith.cmpf oge, %593, %594 : vector<16x128xf32>
    %596 = arith.extui %595 : vector<16x128xi1> to vector<16x128xi32>
    %597 = arith.sitofp %596 : vector<16x128xi32> to vector<16x128xf32>
    %cst_317 = arith.constant 1.000000e+00 : f32
    %598 = vector.broadcast %cst_317 : f32 to vector<16x128xf32>
    %599 = arith.subf %598, %597 : vector<16x128xf32>
    %600 = arith.mulf %593, %599 : vector<16x128xf32>
    %601 = arith.truncf %597 : vector<16x128xf32> to vector<16x128xbf16>
    %c16_318 = arith.constant 16 : index
    %c0_319 = arith.constant 0 : index
    %602 = vector.load %arg7[%c16_318, %c0_319] : memref<128x128xbf16, #tpu.memory_space<vmem>>, vector<16x128xbf16>
    tpu.vector_store %arg7[%c16_318, %c0_319], %601 {strides = array<i32>} : memref<128x128xbf16, #tpu.memory_space<vmem>>, vector<16x128xbf16>,
    %cst_320 = arith.constant dense<0.000000e+00> : vector<16xf32>
    %603 = vector.multi_reduction <add>, %597, %cst_320 [1] : vector<16x128xf32> to vector<16xf32>
    %604 = vector.shape_cast %603 : vector<16xf32> to vector<16x1xf32>
    %cst_321 = arith.constant dense<0.000000e+00> : vector<1xf32>
    %605 = vector.multi_reduction <add>, %604, %cst_321 [0] : vector<16x1xf32> to vector<1xf32>
    %606 = vector.shape_cast %605 : vector<1xf32> to vector<1x1xf32>
    %607 = arith.addf %586, %606 : vector<1x1xf32>
    %c16_322 = arith.constant 16 : index
    %c0_323 = arith.constant 0 : index
    %608 = vector.load %arg10[%c16_322, %c0_323] : memref<128x128xf32, #tpu.memory_space<vmem>>, vector<16x128xf32>
    %cst_324 = arith.constant 7.500000e-01 : f32
    %609 = vector.broadcast %cst_324 : f32 to vector<16x128xf32>
    %610 = arith.mulf %590, %609 : vector<16x128xf32>
    %611 = arith.addf %610, %608 : vector<16x128xf32>
    %cst_325 = arith.constant 0.970214843 : f32
    %612 = vector.broadcast %cst_325 : f32 to vector<16x128xf32>
    %613 = arith.mulf %600, %612 : vector<16x128xf32>
    %614 = arith.addf %613, %611 : vector<16x128xf32>
    %cst_326 = arith.constant 1.250000e+00 : f32
    %615 = vector.broadcast %cst_326 : f32 to vector<16x128xf32>
    %616 = arith.cmpf oge, %614, %615 : vector<16x128xf32>
    %617 = arith.extui %616 : vector<16x128xi1> to vector<16x128xi32>
    %618 = arith.sitofp %617 : vector<16x128xi32> to vector<16x128xf32>
    %cst_327 = arith.constant 1.000000e+00 : f32
    %619 = vector.broadcast %cst_327 : f32 to vector<16x128xf32>
    %620 = arith.subf %619, %618 : vector<16x128xf32>
    %621 = arith.mulf %614, %620 : vector<16x128xf32>
    %622 = arith.truncf %618 : vector<16x128xf32> to vector<16x128xbf16>
    %c32_328 = arith.constant 32 : index
    %c0_329 = arith.constant 0 : index
    %623 = vector.load %arg7[%c32_328, %c0_329] : memref<128x128xbf16, #tpu.memory_space<vmem>>, vector<16x128xbf16>
    tpu.vector_store %arg7[%c32_328, %c0_329], %622 {strides = array<i32>} : memref<128x128xbf16, #tpu.memory_space<vmem>>, vector<16x128xbf16>,
    %cst_330 = arith.constant dense<0.000000e+00> : vector<16xf32>
    %624 = vector.multi_reduction <add>, %618, %cst_330 [1] : vector<16x128xf32> to vector<16xf32>
    %625 = vector.shape_cast %624 : vector<16xf32> to vector<16x1xf32>
    %cst_331 = arith.constant dense<0.000000e+00> : vector<1xf32>
    %626 = vector.multi_reduction <add>, %625, %cst_331 [0] : vector<16x1xf32> to vector<1xf32>
    %627 = vector.shape_cast %626 : vector<1xf32> to vector<1x1xf32>
    %628 = arith.addf %607, %627 : vector<1x1xf32>
    %c32_332 = arith.constant 32 : index
    %c0_333 = arith.constant 0 : index
    %629 = vector.load %arg10[%c32_332, %c0_333] : memref<128x128xf32, #tpu.memory_space<vmem>>, vector<16x128xf32>
    %cst_334 = arith.constant 7.500000e-01 : f32
    %630 = vector.broadcast %cst_334 : f32 to vector<16x128xf32>
    %631 = arith.mulf %611, %630 : vector<16x128xf32>
    %632 = arith.addf %631, %629 : vector<16x128xf32>
    %cst_335 = arith.constant 0.970214843 : f32
    %633 = vector.broadcast %cst_335 : f32 to vector<16x128xf32>
    %634 = arith.mulf %621, %633 : vector<16x128xf32>
    %635 = arith.addf %634, %632 : vector<16x128xf32>
    %cst_336 = arith.constant 1.250000e+00 : f32
    %636 = vector.broadcast %cst_336 : f32 to vector<16x128xf32>
    %637 = arith.cmpf oge, %635, %636 : vector<16x128xf32>
    %638 = arith.extui %637 : vector<16x128xi1> to vector<16x128xi32>
    %639 = arith.sitofp %638 : vector<16x128xi32> to vector<16x128xf32>
    %cst_337 = arith.constant 1.000000e+00 : f32
    %640 = vector.broadcast %cst_337 : f32 to vector<16x128xf32>
    %641 = arith.subf %640, %639 : vector<16x128xf32>
    %642 = arith.mulf %635, %641 : vector<16x128xf32>
    %643 = arith.truncf %639 : vector<16x128xf32> to vector<16x128xbf16>
    %c48_338 = arith.constant 48 : index
    %c0_339 = arith.constant 0 : index
    %644 = vector.load %arg7[%c48_338, %c0_339] : memref<128x128xbf16, #tpu.memory_space<vmem>>, vector<16x128xbf16>
    tpu.vector_store %arg7[%c48_338, %c0_339], %643 {strides = array<i32>} : memref<128x128xbf16, #tpu.memory_space<vmem>>, vector<16x128xbf16>,
    %cst_340 = arith.constant dense<0.000000e+00> : vector<16xf32>
    %645 = vector.multi_reduction <add>, %639, %cst_340 [1] : vector<16x128xf32> to vector<16xf32>
    %646 = vector.shape_cast %645 : vector<16xf32> to vector<16x1xf32>
    %cst_341 = arith.constant dense<0.000000e+00> : vector<1xf32>
    %647 = vector.multi_reduction <add>, %646, %cst_341 [0] : vector<16x1xf32> to vector<1xf32>
    %648 = vector.shape_cast %647 : vector<1xf32> to vector<1x1xf32>
    %649 = arith.addf %628, %648 : vector<1x1xf32>
    %c48_342 = arith.constant 48 : index
    %c0_343 = arith.constant 0 : index
    %650 = vector.load %arg10[%c48_342, %c0_343] : memref<128x128xf32, #tpu.memory_space<vmem>>, vector<16x128xf32>
    %cst_344 = arith.constant 7.500000e-01 : f32
    %651 = vector.broadcast %cst_344 : f32 to vector<16x128xf32>
    %652 = arith.mulf %632, %651 : vector<16x128xf32>
    %653 = arith.addf %652, %650 : vector<16x128xf32>
    %cst_345 = arith.constant 0.970214843 : f32
    %654 = vector.broadcast %cst_345 : f32 to vector<16x128xf32>
    %655 = arith.mulf %642, %654 : vector<16x128xf32>
    %656 = arith.addf %655, %653 : vector<16x128xf32>
    %cst_346 = arith.constant 1.250000e+00 : f32
    %657 = vector.broadcast %cst_346 : f32 to vector<16x128xf32>
    %658 = arith.cmpf oge, %656, %657 : vector<16x128xf32>
    %659 = arith.extui %658 : vector<16x128xi1> to vector<16x128xi32>
    %660 = arith.sitofp %659 : vector<16x128xi32> to vector<16x128xf32>
    %cst_347 = arith.constant 1.000000e+00 : f32
    %661 = vector.broadcast %cst_347 : f32 to vector<16x128xf32>
    %662 = arith.subf %661, %660 : vector<16x128xf32>
    %663 = arith.mulf %656, %662 : vector<16x128xf32>
    %664 = arith.truncf %660 : vector<16x128xf32> to vector<16x128xbf16>
    %c64_348 = arith.constant 64 : index
    %c0_349 = arith.constant 0 : index
    %665 = vector.load %arg7[%c64_348, %c0_349] : memref<128x128xbf16, #tpu.memory_space<vmem>>, vector<16x128xbf16>
    tpu.vector_store %arg7[%c64_348, %c0_349], %664 {strides = array<i32>} : memref<128x128xbf16, #tpu.memory_space<vmem>>, vector<16x128xbf16>,
    %cst_350 = arith.constant dense<0.000000e+00> : vector<16xf32>
    %666 = vector.multi_reduction <add>, %660, %cst_350 [1] : vector<16x128xf32> to vector<16xf32>
    %667 = vector.shape_cast %666 : vector<16xf32> to vector<16x1xf32>
    %cst_351 = arith.constant dense<0.000000e+00> : vector<1xf32>
    %668 = vector.multi_reduction <add>, %667, %cst_351 [0] : vector<16x1xf32> to vector<1xf32>
    %669 = vector.shape_cast %668 : vector<1xf32> to vector<1x1xf32>
    %670 = arith.addf %649, %669 : vector<1x1xf32>
    %c64_352 = arith.constant 64 : index
    %c0_353 = arith.constant 0 : index
    %671 = vector.load %arg10[%c64_352, %c0_353] : memref<128x128xf32, #tpu.memory_space<vmem>>, vector<16x128xf32>
    %cst_354 = arith.constant 7.500000e-01 : f32
    %672 = vector.broadcast %cst_354 : f32 to vector<16x128xf32>
    %673 = arith.mulf %653, %672 : vector<16x128xf32>
    %674 = arith.addf %673, %671 : vector<16x128xf32>
    %cst_355 = arith.constant 0.970214843 : f32
    %675 = vector.broadcast %cst_355 : f32 to vector<16x128xf32>
    %676 = arith.mulf %663, %675 : vector<16x128xf32>
    %677 = arith.addf %676, %674 : vector<16x128xf32>
    %cst_356 = arith.constant 1.250000e+00 : f32
    %678 = vector.broadcast %cst_356 : f32 to vector<16x128xf32>
    %679 = arith.cmpf oge, %677, %678 : vector<16x128xf32>
    %680 = arith.extui %679 : vector<16x128xi1> to vector<16x128xi32>
    %681 = arith.sitofp %680 : vector<16x128xi32> to vector<16x128xf32>
    %cst_357 = arith.constant 1.000000e+00 : f32
    %682 = vector.broadcast %cst_357 : f32 to vector<16x128xf32>
    %683 = arith.subf %682, %681 : vector<16x128xf32>
    %684 = arith.mulf %677, %683 : vector<16x128xf32>
    %685 = arith.truncf %681 : vector<16x128xf32> to vector<16x128xbf16>
    %c80_358 = arith.constant 80 : index
    %c0_359 = arith.constant 0 : index
    %686 = vector.load %arg7[%c80_358, %c0_359] : memref<128x128xbf16, #tpu.memory_space<vmem>>, vector<16x128xbf16>
    tpu.vector_store %arg7[%c80_358, %c0_359], %685 {strides = array<i32>} : memref<128x128xbf16, #tpu.memory_space<vmem>>, vector<16x128xbf16>,
    %cst_360 = arith.constant dense<0.000000e+00> : vector<16xf32>
    %687 = vector.multi_reduction <add>, %681, %cst_360 [1] : vector<16x128xf32> to vector<16xf32>
    %688 = vector.shape_cast %687 : vector<16xf32> to vector<16x1xf32>
    %cst_361 = arith.constant dense<0.000000e+00> : vector<1xf32>
    %689 = vector.multi_reduction <add>, %688, %cst_361 [0] : vector<16x1xf32> to vector<1xf32>
    %690 = vector.shape_cast %689 : vector<1xf32> to vector<1x1xf32>
    %691 = arith.addf %670, %690 : vector<1x1xf32>
    %c80_362 = arith.constant 80 : index
    %c0_363 = arith.constant 0 : index
    %692 = vector.load %arg10[%c80_362, %c0_363] : memref<128x128xf32, #tpu.memory_space<vmem>>, vector<16x128xf32>
    %cst_364 = arith.constant 7.500000e-01 : f32
    %693 = vector.broadcast %cst_364 : f32 to vector<16x128xf32>
    %694 = arith.mulf %674, %693 : vector<16x128xf32>
    %695 = arith.addf %694, %692 : vector<16x128xf32>
    %cst_365 = arith.constant 0.970214843 : f32
    %696 = vector.broadcast %cst_365 : f32 to vector<16x128xf32>
    %697 = arith.mulf %684, %696 : vector<16x128xf32>
    %698 = arith.addf %697, %695 : vector<16x128xf32>
    %cst_366 = arith.constant 1.250000e+00 : f32
    %699 = vector.broadcast %cst_366 : f32 to vector<16x128xf32>
    %700 = arith.cmpf oge, %698, %699 : vector<16x128xf32>
    %701 = arith.extui %700 : vector<16x128xi1> to vector<16x128xi32>
    %702 = arith.sitofp %701 : vector<16x128xi32> to vector<16x128xf32>
    %cst_367 = arith.constant 1.000000e+00 : f32
    %703 = vector.broadcast %cst_367 : f32 to vector<16x128xf32>
    %704 = arith.subf %703, %702 : vector<16x128xf32>
    %705 = arith.mulf %698, %704 : vector<16x128xf32>
    %706 = arith.truncf %702 : vector<16x128xf32> to vector<16x128xbf16>
    %c96_368 = arith.constant 96 : index
    %c0_369 = arith.constant 0 : index
    %707 = vector.load %arg7[%c96_368, %c0_369] : memref<128x128xbf16, #tpu.memory_space<vmem>>, vector<16x128xbf16>
    tpu.vector_store %arg7[%c96_368, %c0_369], %706 {strides = array<i32>} : memref<128x128xbf16, #tpu.memory_space<vmem>>, vector<16x128xbf16>,
    %cst_370 = arith.constant dense<0.000000e+00> : vector<16xf32>
    %708 = vector.multi_reduction <add>, %702, %cst_370 [1] : vector<16x128xf32> to vector<16xf32>
    %709 = vector.shape_cast %708 : vector<16xf32> to vector<16x1xf32>
    %cst_371 = arith.constant dense<0.000000e+00> : vector<1xf32>
    %710 = vector.multi_reduction <add>, %709, %cst_371 [0] : vector<16x1xf32> to vector<1xf32>
    %711 = vector.shape_cast %710 : vector<1xf32> to vector<1x1xf32>
    %712 = arith.addf %691, %711 : vector<1x1xf32>
    %c96_372 = arith.constant 96 : index
    %c0_373 = arith.constant 0 : index
    %713 = vector.load %arg10[%c96_372, %c0_373] : memref<128x128xf32, #tpu.memory_space<vmem>>, vector<16x128xf32>
    %cst_374 = arith.constant 7.500000e-01 : f32
    %714 = vector.broadcast %cst_374 : f32 to vector<16x128xf32>
    %715 = arith.mulf %695, %714 : vector<16x128xf32>
    %716 = arith.addf %715, %713 : vector<16x128xf32>
    %cst_375 = arith.constant 0.970214843 : f32
    %717 = vector.broadcast %cst_375 : f32 to vector<16x128xf32>
    %718 = arith.mulf %705, %717 : vector<16x128xf32>
    %719 = arith.addf %718, %716 : vector<16x128xf32>
    %cst_376 = arith.constant 1.250000e+00 : f32
    %720 = vector.broadcast %cst_376 : f32 to vector<16x128xf32>
    %721 = arith.cmpf oge, %719, %720 : vector<16x128xf32>
    %722 = arith.extui %721 : vector<16x128xi1> to vector<16x128xi32>
    %723 = arith.sitofp %722 : vector<16x128xi32> to vector<16x128xf32>
    %724 = arith.truncf %723 : vector<16x128xf32> to vector<16x128xbf16>
    %c112_377 = arith.constant 112 : index
    %c0_378 = arith.constant 0 : index
    %725 = vector.load %arg7[%c112_377, %c0_378] : memref<128x128xbf16, #tpu.memory_space<vmem>>, vector<16x128xbf16>
    tpu.vector_store %arg7[%c112_377, %c0_378], %724 {strides = array<i32>} : memref<128x128xbf16, #tpu.memory_space<vmem>>, vector<16x128xbf16>,
    %cst_379 = arith.constant dense<0.000000e+00> : vector<16xf32>
    %726 = vector.multi_reduction <add>, %723, %cst_379 [1] : vector<16x128xf32> to vector<16xf32>
    %727 = vector.shape_cast %726 : vector<16xf32> to vector<16x1xf32>
    %cst_380 = arith.constant dense<0.000000e+00> : vector<1xf32>
    %728 = vector.multi_reduction <add>, %727, %cst_380 [0] : vector<16x1xf32> to vector<1xf32>
    %729 = vector.shape_cast %728 : vector<1xf32> to vector<1x1xf32>
    %730 = arith.addf %712, %729 : vector<1x1xf32>
    %731 = tpu.iota {dimensions = array<i32: 0>} : vector<8x128xi32>
    %c0_i32 = arith.constant 0 : i32
    %732 = vector.broadcast %c0_i32 : i32 to vector<8x128xi32>
    %733 = arith.cmpi eq, %731, %732 : vector<8x128xi32>
    %cst_381 = arith.constant 0.000000e+00 : f32
    %734 = vector.shape_cast %288 : vector<1x1xf32> to vector<1x1xf32>
    %735 = vector.broadcast %734 : vector<1x1xf32> to vector<8x128xf32>
    %736 = vector.broadcast %cst_381 : f32 to vector<8x128xf32>
    %737 = arith.select %733, %735, %736 : vector<8x128xi1>, vector<8x128xf32>
    %c1_i32 = arith.constant 1 : i32
    %738 = vector.broadcast %c1_i32 : i32 to vector<8x128xi32>
    %739 = arith.cmpi eq, %731, %738 : vector<8x128xi32>
    %cst_382 = arith.constant 0.000000e+00 : f32
    %740 = vector.shape_cast %577 : vector<1x1xf32> to vector<1x1xf32>
    %741 = vector.broadcast %740 : vector<1x1xf32> to vector<8x128xf32>
    %742 = vector.broadcast %cst_382 : f32 to vector<8x128xf32>
    %743 = arith.select %739, %741, %742 : vector<8x128xi1>, vector<8x128xf32>
    %744 = arith.addf %737, %743 : vector<8x128xf32>
    %c2_i32 = arith.constant 2 : i32
    %745 = vector.broadcast %c2_i32 : i32 to vector<8x128xi32>
    %746 = arith.cmpi eq, %731, %745 : vector<8x128xi32>
    %cst_383 = arith.constant 0.000000e+00 : f32
    %747 = vector.shape_cast %730 : vector<1x1xf32> to vector<1x1xf32>
    %748 = vector.broadcast %747 : vector<1x1xf32> to vector<8x128xf32>
    %749 = vector.broadcast %cst_383 : f32 to vector<8x128xf32>
    %750 = arith.select %746, %748, %749 : vector<8x128xi1>, vector<8x128xf32>
    %751 = arith.addf %744, %750 : vector<8x128xf32>
    %c0_384 = arith.constant 0 : index
    %c0_385 = arith.constant 0 : index
    %752 = vector.load %arg8[%c0_384, %c0_385] : memref<8x128xf32, #tpu.memory_space<vmem>>, vector<8x128xf32>
    tpu.vector_store %arg8[%c0_384, %c0_385], %751 {strides = array<i32>} : memref<8x128xf32, #tpu.memory_space<vmem>>, vector<8x128xf32>,
    return
  }
  func.func @transform_0(%arg0: i32) -> (i32, i32) {
    %c0_i32 = arith.constant 0 : i32
    %c0_i32_0 = arith.constant 0 : i32
    return %arg0, %c0_i32 : i32, i32
  }
  func.func @transform_1(%arg0: i32) -> (i32, i32) {
    %c0_i32 = arith.constant 0 : i32
    %c0_i32_0 = arith.constant 0 : i32
    %c0_i32_1 = arith.constant 0 : i32
    return %c0_i32, %c0_i32_0 : i32, i32
  }
  func.func @transform_2(%arg0: i32) -> (i32, i32) {
    %c0_i32 = arith.constant 0 : i32
    %c0_i32_0 = arith.constant 0 : i32
    %c0_i32_1 = arith.constant 0 : i32
    return %c0_i32, %c0_i32_0 : i32, i32
  }
  func.func @transform_3(%arg0: i32) -> (i32, i32) {
    %c0_i32 = arith.constant 0 : i32
    %c0_i32_0 = arith.constant 0 : i32
    %c0_i32_1 = arith.constant 0 : i32
    return %c0_i32, %c0_i32_0 : i32, i32
  }
  func.func @transform_4(%arg0: i32) -> (i32, i32) {
    %c0_i32 = arith.constant 0 : i32
    %c0_i32_0 = arith.constant 0 : i32
    %c0_i32_1 = arith.constant 0 : i32
    return %c0_i32, %c0_i32_0 : i32, i32
  }
  func.func @transform_5(%arg0: i32) -> (i32, i32) {
    %c0_i32 = arith.constant 0 : i32
    %c0_i32_0 = arith.constant 0 : i32
    %c0_i32_1 = arith.constant 0 : i32
    return %c0_i32, %c0_i32_0 : i32, i32
  }
  func.func @transform_6(%arg0: i32) -> (i32, i32) {
    %c0_i32 = arith.constant 0 : i32
    %c0_i32_0 = arith.constant 0 : i32
    return %arg0, %c0_i32 : i32, i32
  }
  func.func @transform_7(%arg0: i32) -> (i32, i32) {
    %c0_i32 = arith.constant 0 : i32
    %c0_i32_0 = arith.constant 0 : i32
    return %arg0, %c0_i32 : i32, i32
  }
}

</mosaic_0001>

<bundles_post_ra>
// kernel: network_forward.1
= control target key start
LH: loop header
LB: loop body
LE: loop exit
PB: predicated region body
PF: predicated region fallthrough
CT: control target
= control target key end

     0   :  { %13 = vsyncpa [#allocation8], 0  ;;  %s18619_s0 = inlined_call_operand.vmem [shape: bf16[128,2432], index: 0, kind: input, shape index: {}]   ;;  %s18620_s1 = inlined_call_operand.hbm [shape: bf16[2432,512], index: 1, kind: input, shape index: {}]   ;;  %s18621_s2 = inlined_call_operand.vmem [shape: bf16[512,512], index: 2, kind: input, shape index: {}]   ;;  %s18622_s3 = inlined_call_operand.hbm [shape: bf16[512,128], index: 3, kind: input, shape index: {}]   ;;  %s18623_s4 = inlined_call_operand.hbm [shape: f32[8,512], index: 4, kind: input, shape index: {}]   ;;  %s18624_s5 = inlined_call_operand.hbm [shape: f32[8,512], index: 5, kind: input, shape index: {}]   ;;  %s18625_s6 = inlined_call_operand.vmem [shape: bf16[128,128], index: 6, kind: output, shape index: {0}]   ;;  %s18626_s7 = inlined_call_operand.vmem [shape: f32[8,128], index: 7, kind: output, shape index: {1}]  }
   0x1   :  { %14 = vsyncpa [#allocation10], 0 }
   0x2   :  { %15 = vsyncpa [#allocation13], 0  ;;  %s15241_s24 = smov [#allocation9]   ;;  %s15147_s28 = scalar_lea.hbm %s18622_s3, 4096 }
   0x3   :  { %s37_s25 = sshll.u32 %s15241_s24, 4  ;;  %p15148_p0 = scmp.ne.s32.totalorder %s18622_s3, %s15147_s28  ;;  %s38_s25 = int_to_ptr.vmem [resolvable:$true] %s37_s25 }
   0x4   :  { %p15151_p1 = scmp.lt.u32.totalorder %s15147_s28, %s18622_s3 }
   0x6   :  { %p15153_p2 = pnand %p15151_p1, %p15148_p0 }
   0x8   :  { %15156 = shalt.err (!%p15153_p2)
}
   0x9   :  { %s15157_s10 = scalar_lea.vmem %s38_s25, 4096  ;;  %p15162_p4 = scmp.lt.s32.totalorder %s38_s25, %s38_s25 }
   0xa   :  { %p15158_p3 = scmp.ne.s32.totalorder %s38_s25, %s15157_s10  ;;  %p15163_p5 = scmp.lt.s32.totalorder %s15157_s10, %s15157_s10 }
   0xc   :  { %p15164_p6 = por %p15163_p5, %p15162_p4 }
   0xe   :  { %p15165_p7 = pnand %p15164_p6, %p15158_p3 }
  0x10   :  { %15168 = shalt.err (!%p15165_p7)
}
  0x11   :  { %s15242_s11 = smov 64   ;;  %s15243_s12 = smov 4  }
  0x12   :  { %43 = dma.hbm_to_vmem [thread:$0]  %s18622_s3, 4096, %s38_s25, [#allocation10], %s15242_s11, %s15242_s11, %s15243_s12  }
  0x13   :  { %s15244_s15 = smov [#allocation7]   ;;  %s15169_s19 = scalar_lea.hbm %s18620_s1, 77824 }
  0x14   :  { %s23_s16 = sshll.u32 %s15244_s15, 4  ;;  %p15170_p8 = scmp.ne.s32.totalorder %s18620_s1, %s15169_s19  ;;  %s24_s16 = int_to_ptr.vmem [resolvable:$true] %s23_s16 }
  0x15   :  { %p15173_p9 = scmp.lt.u32.totalorder %s15169_s19, %s18620_s1 }
  0x17   :  { %p15175_p10 = pnand %p15173_p9, %p15170_p8 }
  0x19   :  { %15178 = shalt.err (!%p15175_p10)
}
  0x1a   :  { %s15179_s24 = scalar_lea.vmem %s24_s16, 77824  ;;  %p15184_p12 = scmp.lt.s32.totalorder %s24_s16, %s24_s16 }
  0x1b   :  { %p15180_p11 = scmp.ne.s32.totalorder %s24_s16, %s15179_s24  ;;  %p15185_p13 = scmp.lt.s32.totalorder %s15179_s24, %s15179_s24 }
  0x1d   :  { %p15186_p0 = por %p15185_p13, %p15184_p12 }
  0x1f   :  { %p15187_p1 = pnand %p15186_p0, %p15180_p11 }
  0x21   :  { %15190 = shalt.err (!%p15187_p1)
}
  0x22   :  { %s15245_s3 = smov 256   ;;  %s15246_s25 = smov 16  }
  0x23   :  { %29 = dma.hbm_to_vmem [thread:$0]  %s18620_s1, 77824, %s24_s16, [#allocation8], %s15245_s3, %s15245_s3, %s15246_s25  }
  0x24   :  { %s15247_s28 = smov [#allocation11]   ;;  %s15248_s30 = smov [#allocation12]  }
  0x25   :  { %s50_s29 = sshll.u32 %s15247_s28, 4  ;;  %s60_s8 = sshll.u32 %s15248_s30, 4  ;;  %s51_s29 = int_to_ptr.vmem [resolvable:$true] %s50_s29  ;;  %s61_s8 = int_to_ptr.vmem [resolvable:$true] %s60_s8 }
  0x26   :  { %s15191_s11 = scalar_lea.hbm %s18623_s4, 512 }
  0x27   :  { %p15192_p2 = scmp.ne.s32.totalorder %s18623_s4, %s15191_s11  ;;  %p15195_p3 = scmp.lt.u32.totalorder %s15191_s11, %s18623_s4 }
  0x29   :  { %p15197_p4 = pnand %p15195_p3, %p15192_p2 }
  0x2b   :  { %15200 = shalt.err (!%p15197_p4)
}
  0x2c   :  { %s15201_s1 = scalar_lea.vmem %s51_s29, 512  ;;  %p15206_p6 = scmp.lt.s32.totalorder %s51_s29, %s51_s29 }
  0x2d   :  { %p15202_p5 = scmp.ne.s32.totalorder %s51_s29, %s15201_s1  ;;  %p15207_p7 = scmp.lt.s32.totalorder %s15201_s1, %s15201_s1 }
  0x2f   :  { %p15208_p8 = por %p15207_p7, %p15206_p6 }
  0x31   :  { %p15209_p9 = pnand %p15208_p8, %p15202_p5 }
  0x33   :  { %15212 = shalt.err (!%p15209_p9)
}
  0x34   :  { %53 = dma.hbm_to_vmem [thread:$0]  %s18623_s4, 512, %s51_s29, [#allocation10]  }
  0x35   :  { %s15213_s20 = scalar_lea.hbm %s18624_s5, 512 }
  0x36   :  { %p15214_p10 = scmp.ne.s32.totalorder %s18624_s5, %s15213_s20  ;;  %p15217_p11 = scmp.lt.u32.totalorder %s15213_s20, %s18624_s5 }
  0x38   :  { %p15219_p12 = pnand %p15217_p11, %p15214_p10 }
  0x3a   :  { %15222 = shalt.err (!%p15219_p12)
}
  0x3b   :  { %s15223_s3 = scalar_lea.vmem %s61_s8, 512  ;;  %p15228_p0 = scmp.lt.s32.totalorder %s61_s8, %s61_s8 }
  0x3c   :  { %p15224_p13 = scmp.ne.s32.totalorder %s61_s8, %s15223_s3  ;;  %p15229_p1 = scmp.lt.s32.totalorder %s15223_s3, %s15223_s3 }
  0x3e   :  { %p15230_p2 = por %p15229_p1, %p15228_p0 }
  0x40   :  { %p15231_p3 = pnand %p15230_p2, %p15224_p13 }
  0x42   :  { %15234 = shalt.err (!%p15231_p3)
}
  0x43   :  { %63 = dma.hbm_to_vmem [thread:$0]  %s18624_s5, 512, %s61_s8, [#allocation13]  }
  0x44   :  { %15235 = dma.done.wait [#allocation8], 77824  }
  0x45   :  { %15236 = vsyncadd [#allocation8], 4294889472 }
  0x46   :  { %15237 = dma.done.wait [#allocation10], 4608  }
  0x47   :  { %15238 = vsyncadd [#allocation10], 4294962688 }
  0x48   :  { %15239 = dma.done.wait [#allocation13], 512  }
  0x49   :  { %15240 = vsyncadd [#allocation13], 4294966784  ;;  %v13787_v0 = vld [vmem:[#allocation7 + $0x4] ss:$16 sps:$4 sm:$0xff]   ;;  %v13789_v1 = vld [vmem:[#allocation7 + $0xc] ss:$16 sps:$4 sm:$0xff]  }
  0x4a   :  { %4653 = vmatprep.subr.bf16.mxu0 %v13787_v0  ;;  %v13791_v2 = vld [vmem:[#allocation7] ss:$16 sps:$4 sm:$0xff]   ;;  %v13792_v3 = vld [vmem:[#allocation7 + $0x8] ss:$16 sps:$4 sm:$0xff]   ;;  %5783 = vmatprep.subr.bf16.mxu1 %v13789_v1  ;;  %v13793_v4 = vld [vmem:[#allocation7 + $0x24] ss:$16 sps:$4 sm:$0xff]  }
  0x4b   :  { %4654 = vmatpush1.bf16.msra.mxu0 %v13791_v2  ;;  %5784 = vmatpush1.bf16.msra.mxu1 %v13792_v3  ;;  %v13795_v5 = vld [vmem:[#allocation7 + $0x2c] ss:$16 sps:$4 sm:$0xff]   ;;  %v13797_v6 = vld [vmem:[#allocation7 + $0x20] ss:$16 sps:$4 sm:$0xff]   ;;  %v13798_v7 = vld [vmem:[#allocation7 + $0x28] ss:$16 sps:$4 sm:$0xff]  }
  0x4c   :  { %4655 = vmatprep.subr.bf16.mxu0 %v13793_v4  ;;  %5785 = vmatprep.subr.bf16.mxu1 %v13795_v5  ;;  %v13799_v8 = vld [vmem:[#allocation7 + $0x44] ss:$16 sps:$4 sm:$0xff]   ;;  %v13801_v9 = vld [vmem:[#allocation7 + $0x4c] ss:$16 sps:$4 sm:$0xff]   ;;  %v13803_v10 = vld [vmem:[#allocation7 + $0x40] ss:$16 sps:$4 sm:$0xff]  }
  0x4d   :  { %v13804_v11 = vld [vmem:[#allocation7 + $0x48] ss:$16 sps:$4 sm:$0xff]   ;;  %v13805_v12 = vld [vmem:[#allocation7 + $0x64] ss:$16 sps:$4 sm:$0xff]   ;;  %v13807_v13 = vld [vmem:[#allocation7 + $0x6c] ss:$16 sps:$4 sm:$0xff]  }
  0x4e   :  { %v13809_v14 = vld [vmem:[#allocation7 + $0x60] ss:$16 sps:$4 sm:$0xff]   ;;  %v13810_v15 = vld [vmem:[#allocation7 + $0x68] ss:$16 sps:$4 sm:$0xff]   ;;  %v13811_v16 = vld [vmem:[#allocation7 + $0x84] ss:$16 sps:$4 sm:$0xff]  }
  0x4f   :  { %4656 = vmatpush1.bf16.msra.mxu0 %v13797_v6  ;;  %5786 = vmatpush1.bf16.msra.mxu1 %v13798_v7  ;;  %v13813_v17 = vld [vmem:[#allocation7 + $0x8c] ss:$16 sps:$4 sm:$0xff]   ;;  %v13815_v18 = vld [vmem:[#allocation7 + $0x80] ss:$16 sps:$4 sm:$0xff]   ;;  %v13816_v19 = vld [vmem:[#allocation7 + $0x88] ss:$16 sps:$4 sm:$0xff]  }
  0x50   :  { %4657 = vmatprep.subr.bf16.mxu0 %v13799_v8  ;;  %5787 = vmatprep.subr.bf16.mxu1 %v13801_v9  ;;  %v13817_v20 = vld [vmem:[#allocation7 + $0xa4] ss:$16 sps:$4 sm:$0xff]   ;;  %v13819_v21 = vld [vmem:[#allocation7 + $0xac] ss:$16 sps:$4 sm:$0xff]   ;;  %v13821_v22 = vld [vmem:[#allocation7 + $0xa0] ss:$16 sps:$4 sm:$0xff]  }
  0x51   :  { %v13822_v23 = vld [vmem:[#allocation7 + $0xa8] ss:$16 sps:$4 sm:$0xff]   ;;  %v13823_v24 = vld [vmem:[#allocation7 + $0xc4] ss:$16 sps:$4 sm:$0xff]   ;;  %v13825_v25 = vld [vmem:[#allocation7 + $0xcc] ss:$16 sps:$4 sm:$0xff]  }
  0x52   :  { %v13827_v26 = vld [vmem:[#allocation7 + $0xc0] ss:$16 sps:$4 sm:$0xff]   ;;  %v13828_v27 = vld [vmem:[#allocation7 + $0xc8] ss:$16 sps:$4 sm:$0xff]   ;;  %v13829_v28 = vld [vmem:[#allocation7 + $0xe4] ss:$16 sps:$4 sm:$0xff]  }
  0x53   :  { %4658 = vmatpush1.bf16.msra.mxu0 %v13803_v10  ;;  %5788 = vmatpush1.bf16.msra.mxu1 %v13804_v11  ;;  %v13831_v29 = vld [vmem:[#allocation7 + $0xec] ss:$16 sps:$4 sm:$0xff]   ;;  %v13833_v30 = vld [vmem:[#allocation7 + $0xe0] ss:$16 sps:$4 sm:$0xff]   ;;  %v13834_v31 = vld [vmem:[#allocation7 + $0xe8] ss:$16 sps:$4 sm:$0xff]  }
  0x54   :  { %4659 = vmatprep.subr.bf16.mxu0 %v13805_v12  ;;  %5789 = vmatprep.subr.bf16.mxu1 %v13807_v13  ;;  %v13835_v32 = vld [vmem:[#allocation7 + $0x104] ss:$16 sps:$4 sm:$0xff]   ;;  %v13837_v33 = vld [vmem:[#allocation7 + $0x10c] ss:$16 sps:$4 sm:$0xff]   ;;  %v13839_v34 = vld [vmem:[#allocation7 + $0x100] ss:$16 sps:$4 sm:$0xff]  }
  0x55   :  { %v13840_v35 = vld [vmem:[#allocation7 + $0x108] ss:$16 sps:$4 sm:$0xff]   ;;  %v13841_v36 = vld [vmem:[#allocation7 + $0x124] ss:$16 sps:$4 sm:$0xff]   ;;  %v13843_v37 = vld [vmem:[#allocation7 + $0x12c] ss:$16 sps:$4 sm:$0xff]  }
  0x56   :  { %v13845_v38 = vld [vmem:[#allocation7 + $0x120] ss:$16 sps:$4 sm:$0xff]   ;;  %v13846_v39 = vld [vmem:[#allocation7 + $0x128] ss:$16 sps:$4 sm:$0xff]   ;;  %v13847_v40 = vld [vmem:[#allocation7 + $0x144] ss:$16 sps:$4 sm:$0xff]  }
  0x57   :  { %4660 = vmatpush1.bf16.msra.mxu0 %v13809_v14  ;;  %5790 = vmatpush1.bf16.msra.mxu1 %v13810_v15  ;;  %v13849_v41 = vld [vmem:[#allocation7 + $0x14c] ss:$16 sps:$4 sm:$0xff]   ;;  %v13851_v42 = vld [vmem:[#allocation7 + $0x140] ss:$16 sps:$4 sm:$0xff]   ;;  %v13852_v43 = vld [vmem:[#allocation7 + $0x148] ss:$16 sps:$4 sm:$0xff]  }
  0x58   :  { %4661 = vmatprep.subr.bf16.mxu0 %v13811_v16  ;;  %5791 = vmatprep.subr.bf16.mxu1 %v13813_v17  ;;  %v13853_v44 = vld [vmem:[#allocation7 + $0x164] ss:$16 sps:$4 sm:$0xff]   ;;  %v13855_v45 = vld [vmem:[#allocation7 + $0x16c] ss:$16 sps:$4 sm:$0xff]   ;;  %v13857_v46 = vld [vmem:[#allocation7 + $0x160] ss:$16 sps:$4 sm:$0xff]  }
  0x59   :  { %v13858_v47 = vld [vmem:[#allocation7 + $0x168] ss:$16 sps:$4 sm:$0xff]   ;;  %v13885_v48 = vld [vmem:[%s18619_s0 + $0x4] ss:$76 sps:$4 sm:$0xff]   ;;  %v13861_v50 = vld [vmem:[#allocation7 + $0x18c] ss:$16 sps:$4 sm:$0xff]  }
  0x5a   :  { %v13859_v49 = vld [vmem:[#allocation7 + $0x184] ss:$16 sps:$4 sm:$0xff]   ;;  %4685 = vmatprep.mubr.bf16.mxu0 %v13885_v48  ;;  %5815 = vmatprep.mubr.bf16.mxu1 %v13885_v48  ;;  %v13863_v51 = vld [vmem:[#allocation7 + $0x180] ss:$16 sps:$4 sm:$0xff]   ;;  %v13864_v52 = vld [vmem:[#allocation7 + $0x188] ss:$16 sps:$4 sm:$0xff]  }
  0x5b   :  { %4662 = vmatpush1.bf16.msra.mxu0 %v13815_v18  ;;  %5792 = vmatpush1.bf16.msra.mxu1 %v13816_v19  ;;  %v13865_v53 = vld [vmem:[#allocation7 + $0x1a4] ss:$16 sps:$4 sm:$0xff]   ;;  %v13867_v54 = vld [vmem:[#allocation7 + $0x1ac] ss:$16 sps:$4 sm:$0xff]   ;;  %v13869_v55 = vld [vmem:[#allocation7 + $0x1a0] ss:$16 sps:$4 sm:$0xff]  }
  0x5c   :  { %4663 = vmatprep.subr.bf16.mxu0 %v13817_v20  ;;  %5793 = vmatprep.subr.bf16.mxu1 %v13819_v21  ;;  %v13870_v56 = vld [vmem:[#allocation7 + $0x1a8] ss:$16 sps:$4 sm:$0xff]   ;;  %v13871_v57 = vld [vmem:[#allocation7 + $0x1c4] ss:$16 sps:$4 sm:$0xff]   ;;  %v13873_v58 = vld [vmem:[#allocation7 + $0x1cc] ss:$16 sps:$4 sm:$0xff]  }
  0x5d   :  { %v13875_v59 = vld [vmem:[#allocation7 + $0x1c0] ss:$16 sps:$4 sm:$0xff]   ;;  %v13876_v60 = vld [vmem:[#allocation7 + $0x1c8] ss:$16 sps:$4 sm:$0xff]   ;;  %v13877_v61 = vld [vmem:[#allocation7 + $0x1e4] ss:$16 sps:$4 sm:$0xff]  }
  0x5e   :  { %v13879_v62 = vld [vmem:[#allocation7 + $0x1ec] ss:$16 sps:$4 sm:$0xff]   ;;  %v13881_v63 = vld [vmem:[#allocation7 + $0x1e0] ss:$16 sps:$4 sm:$0xff]   ;;  %v13882_v0 = vld [vmem:[#allocation7 + $0x1e8] ss:$16 sps:$4 sm:$0xff]  }
  0x5f   :  { %4664 = vmatpush1.bf16.msra.mxu0 %v13821_v22  ;;  %5794 = vmatpush1.bf16.msra.mxu1 %v13822_v23  ;;  %v13888_v1 = vld [vmem:[#allocation7 + $0x204] ss:$16 sps:$4 sm:$0xff]   ;;  %v13891_v2 = vld [vmem:[#allocation7 + $0x20c] ss:$16 sps:$4 sm:$0xff]   ;;  %v13886_v4 = vld [vmem:[#allocation7 + $0x200] ss:$16 sps:$4 sm:$0xff]  }
  0x60   :  { %4665 = vmatprep.subr.bf16.mxu0 %v13823_v24  ;;  %5795 = vmatprep.subr.bf16.mxu1 %v13825_v25  ;;  %v13883_v3 = vld [vmem:[%s18619_s0] ss:$76 sps:$4 sm:$0xff]   ;;  %v13889_v5 = vld [vmem:[#allocation7 + $0x208] ss:$16 sps:$4 sm:$0xff]   ;;  %v13894_v6 = vld [vmem:[#allocation7 + $0x224] ss:$16 sps:$4 sm:$0xff]  }
  0x61   :  { %v13897_v7 = vld [vmem:[#allocation7 + $0x22c] ss:$16 sps:$4 sm:$0xff]   ;;  %v13892_v9 = vld [vmem:[#allocation7 + $0x220] ss:$16 sps:$4 sm:$0xff]   ;;  %v13895_v10 = vld [vmem:[#allocation7 + $0x228] ss:$16 sps:$4 sm:$0xff]  }
  0x62   :  { %v13898_v8 = vld [vmem:[%s18619_s0 + $0x9c] ss:$76 sps:$4 sm:$0xff]   ;;  %v13903_v11 = vld [vmem:[#allocation7 + $0x244] ss:$16 sps:$4 sm:$0xff]   ;;  %v13901_v14 = vld [vmem:[#allocation7 + $0x240] ss:$16 sps:$4 sm:$0xff]  }
  0x63   :  { %4666 = vmatpush1.bf16.msra.mxu0 %v13827_v26  ;;  %5796 = vmatpush1.bf16.msra.mxu1 %v13828_v27  ;;  %v13906_v12 = vld [vmem:[#allocation7 + $0x24c] ss:$16 sps:$4 sm:$0xff]   ;;  %v13900_v13 = vld [vmem:[%s18619_s0 + $0x98] ss:$76 sps:$4 sm:$0xff]   ;;  %v13913_v18 = vld [vmem:[%s18619_s0 + $0x134] ss:$76 sps:$4 sm:$0xff]  }
  0x64   :  { %4667 = vmatprep.subr.bf16.mxu0 %v13829_v28  ;;  %5797 = vmatprep.subr.bf16.mxu1 %v13831_v29  ;;  %v13904_v15 = vld [vmem:[#allocation7 + $0x248] ss:$16 sps:$4 sm:$0xff]   ;;  %v13909_v16 = vld [vmem:[#allocation7 + $0x264] ss:$16 sps:$4 sm:$0xff]   ;;  %v13912_v17 = vld [vmem:[#allocation7 + $0x26c] ss:$16 sps:$4 sm:$0xff]  }
  0x65   :  { %v13907_v19 = vld [vmem:[#allocation7 + $0x260] ss:$16 sps:$4 sm:$0xff]   ;;  %v13910_v20 = vld [vmem:[#allocation7 + $0x268] ss:$16 sps:$4 sm:$0xff]   ;;  %v13918_v21 = vld [vmem:[#allocation7 + $0x284] ss:$16 sps:$4 sm:$0xff]  }
  0x66   :  { %v13921_v22 = vld [vmem:[#allocation7 + $0x28c] ss:$16 sps:$4 sm:$0xff]   ;;  %v13916_v24 = vld [vmem:[#allocation7 + $0x280] ss:$16 sps:$4 sm:$0xff]   ;;  %v13919_v25 = vld [vmem:[#allocation7 + $0x288] ss:$16 sps:$4 sm:$0xff]  }
  0x67   :  { %4668 = vmatpush1.bf16.msra.mxu0 %v13833_v30  ;;  %5798 = vmatpush1.bf16.msra.mxu1 %v13834_v31  ;;  %v13915_v23 = vld [vmem:[%s18619_s0 + $0x130] ss:$76 sps:$4 sm:$0xff]   ;;  %v13924_v26 = vld [vmem:[#allocation7 + $0x2a4] ss:$16 sps:$4 sm:$0xff]   ;;  %v13928_v28 = vld [vmem:[%s18619_s0 + $0x1cc] ss:$76 sps:$4 sm:$0xff]  }
  0x68   :  { %4669 = vmatprep.subr.bf16.mxu0 %v13835_v32  ;;  %5799 = vmatprep.subr.bf16.mxu1 %v13837_v33  ;;  %v13927_v27 = vld [vmem:[#allocation7 + $0x2ac] ss:$16 sps:$4 sm:$0xff]   ;;  %v13922_v29 = vld [vmem:[#allocation7 + $0x2a0] ss:$16 sps:$4 sm:$0xff]   ;;  %v13925_v30 = vld [vmem:[#allocation7 + $0x2a8] ss:$16 sps:$4 sm:$0xff]  }
  0x69   :  { %v13933_v31 = vld [vmem:[#allocation7 + $0x2c4] ss:$16 sps:$4 sm:$0xff]   ;;  %v13936_v32 = vld [vmem:[#allocation7 + $0x2cc] ss:$16 sps:$4 sm:$0xff]  }
  0x6a   :  { %v13930_v33 = vld [vmem:[%s18619_s0 + $0x1c8] ss:$76 sps:$4 sm:$0xff]  }
  0x6b   :  { %4670 = vmatpush1.bf16.msra.mxu0 %v13839_v34  ;;  %5800 = vmatpush1.bf16.msra.mxu1 %v13840_v35  ;;  %v13931_v34 = vld [vmem:[#allocation7 + $0x2c0] ss:$16 sps:$4 sm:$0xff]   ;;  %v13934_v35 = vld [vmem:[#allocation7 + $0x2c8] ss:$16 sps:$4 sm:$0xff]  }
  0x6c   :  { %4671 = vmatprep.subr.bf16.mxu0 %v13841_v36  ;;  %5801 = vmatprep.subr.bf16.mxu1 %v13843_v37  ;;  %v13939_v36 = vld [vmem:[#allocation7 + $0x2e4] ss:$16 sps:$4 sm:$0xff]   ;;  %v13942_v37 = vld [vmem:[#allocation7 + $0x2ec] ss:$16 sps:$4 sm:$0xff]  }
  0x6d   :  { %v13958_v48 = vld [vmem:[%s18619_s0 + $0x2fc] ss:$76 sps:$4 sm:$0xff]  }
  0x6f   :  { %4672 = vmatpush1.bf16.msra.mxu0 %v13845_v38  ;;  %5802 = vmatpush1.bf16.msra.mxu1 %v13846_v39  ;;  %v13943_v38 = vld [vmem:[%s18619_s0 + $0x264] ss:$76 sps:$4 sm:$0xff]  }
  0x70   :  { %4673 = vmatprep.subr.bf16.mxu0 %v13847_v40  ;;  %5803 = vmatprep.subr.bf16.mxu1 %v13849_v41  ;;  %v13937_v39 = vld [vmem:[#allocation7 + $0x2e0] ss:$16 sps:$4 sm:$0xff]   ;;  %v13940_v40 = vld [vmem:[#allocation7 + $0x2e8] ss:$16 sps:$4 sm:$0xff]   ;;  %v13948_v41 = vld [vmem:[#allocation7 + $0x304] ss:$16 sps:$4 sm:$0xff]  }
  0x73   :  { %4674 = vmatpush1.bf16.msra.mxu0 %v13851_v42  ;;  %5804 = vmatpush1.bf16.msra.mxu1 %v13852_v43  ;;  %v13951_v42 = vld [vmem:[#allocation7 + $0x30c] ss:$16 sps:$4 sm:$0xff]  }
  0x74   :  { %4675 = vmatprep.subr.bf16.mxu0 %v13853_v44  ;;  %5805 = vmatprep.subr.bf16.mxu1 %v13855_v45  ;;  %v13945_v43 = vld [vmem:[%s18619_s0 + $0x260] ss:$76 sps:$4 sm:$0xff]   ;;  %v13949_v45 = vld [vmem:[#allocation7 + $0x308] ss:$16 sps:$4 sm:$0xff]  }
  0x75   :  { %v13946_v44 = vld [vmem:[#allocation7 + $0x300] ss:$16 sps:$4 sm:$0xff]  }
  0x77   :  { %4676 = vmatpush1.bf16.msra.mxu0 %v13857_v46  ;;  %5806 = vmatpush1.bf16.msra.mxu1 %v13858_v47  ;;  %v13954_v46 = vld [vmem:[#allocation7 + $0x324] ss:$16 sps:$4 sm:$0xff]   ;;  %v13957_v47 = vld [vmem:[#allocation7 + $0x32c] ss:$16 sps:$4 sm:$0xff]  }
  0x78   :  { %4677 = vmatprep.subr.bf16.mxu0 %v13859_v49  ;;  %5807 = vmatprep.subr.bf16.mxu1 %v13861_v50  ;;  %v13952_v49 = vld [vmem:[#allocation7 + $0x320] ss:$16 sps:$4 sm:$0xff]   ;;  %v13955_v50 = vld [vmem:[#allocation7 + $0x328] ss:$16 sps:$4 sm:$0xff]  }
  0x7b   :  { %4678 = vmatpush1.bf16.msra.mxu0 %v13863_v51  ;;  %5808 = vmatpush1.bf16.msra.mxu1 %v13864_v52  ;;  %v13963_v51 = vld [vmem:[#allocation7 + $0x344] ss:$16 sps:$4 sm:$0xff]   ;;  %v13966_v52 = vld [vmem:[#allocation7 + $0x34c] ss:$16 sps:$4 sm:$0xff]  }
  0x7c   :  { %4679 = vmatprep.subr.bf16.mxu0 %v13865_v53  ;;  %5809 = vmatprep.subr.bf16.mxu1 %v13867_v54  ;;  %v13960_v53 = vld [vmem:[%s18619_s0 + $0x2f8] ss:$76 sps:$4 sm:$0xff]   ;;  %v13961_v54 = vld [vmem:[#allocation7 + $0x340] ss:$16 sps:$4 sm:$0xff]  }
  0x7f   :  { %4680 = vmatpush1.bf16.msra.mxu0 %v13869_v55  ;;  %5810 = vmatpush1.bf16.msra.mxu1 %v13870_v56  ;;  %v13964_v55 = vld [vmem:[#allocation7 + $0x348] ss:$16 sps:$4 sm:$0xff]   ;;  %v13969_v56 = vld [vmem:[#allocation7 + $0x364] ss:$16 sps:$4 sm:$0xff]  }
  0x80   :  { %4681 = vmatprep.subr.bf16.mxu0 %v13871_v57  ;;  %5811 = vmatprep.subr.bf16.mxu1 %v13873_v58  ;;  %v13972_v57 = vld [vmem:[#allocation7 + $0x36c] ss:$16 sps:$4 sm:$0xff]   ;;  %v13973_v58 = vld [vmem:[%s18619_s0 + $0x394] ss:$76 sps:$4 sm:$0xff]  }
  0x83   :  { %4682 = vmatpush1.bf16.msra.mxu0 %v13875_v59  ;;  %5812 = vmatpush1.bf16.msra.mxu1 %v13876_v60  ;;  %v13967_v59 = vld [vmem:[#allocation7 + $0x360] ss:$16 sps:$4 sm:$0xff]   ;;  %v13970_v60 = vld [vmem:[#allocation7 + $0x368] ss:$16 sps:$4 sm:$0xff]  }
  0x84   :  { %4683 = vmatprep.subr.bf16.mxu0 %v13877_v61  ;;  %5813 = vmatprep.subr.bf16.mxu1 %v13879_v62  ;;  %v13978_v61 = vld [vmem:[#allocation7 + $0x384] ss:$16 sps:$4 sm:$0xff]   ;;  %v13981_v62 = vld [vmem:[#allocation7 + $0x38c] ss:$16 sps:$4 sm:$0xff]  }
  0x87   :  { %4684 = vmatpush1.bf16.msra.mxu0 %v13881_v63  ;;  %5814 = vmatpush1.bf16.msra.mxu1 %v13882_v0  ;;  %v13975_v63 = vld [vmem:[%s18619_s0 + $0x390] ss:$76 sps:$4 sm:$0xff]  }
  0x88   :  { %4766 = vmatprep.subr.bf16.mxu0 %v13888_v1  ;;  %5896 = vmatprep.subr.bf16.mxu1 %v13891_v2  ;;  %v13976_v0 = vld [vmem:[#allocation7 + $0x380] ss:$16 sps:$4 sm:$0xff]   ;;  %v13979_v1 = vld [vmem:[#allocation7 + $0x388] ss:$16 sps:$4 sm:$0xff]   ;;  %v13984_v2 = vld [vmem:[#allocation7 + $0x3a4] ss:$16 sps:$4 sm:$0xff]  }
  0x8a   :  { %4686 = vmatmul.mubr.bf16.vlgmr.msra.gmra.mrb[0].mxu0 %v13883_v3  ;;  %5816 = vmatmul.mubr.bf16.vlgmr.msra.gmra.mrb[0].mxu1 %v13883_v3  ;;  %v13987_v3 = vld [vmem:[#allocation7 + $0x3ac] ss:$16 sps:$4 sm:$0xff]  }
  0x8b   :  { %4767 = vmatpush1.bf16.msra.mxu0 %v13886_v4  ;;  %5897 = vmatpush1.bf16.msra.mxu1 %v13889_v5  ;;  %v13988_v4 = vld [vmem:[%s18619_s0 + $0x42c] ss:$76 sps:$4 sm:$0xff]   ;;  %v13982_v5 = vld [vmem:[#allocation7 + $0x3a0] ss:$16 sps:$4 sm:$0xff]  }
  0x8c   :  { %4768 = vmatprep.subr.bf16.mxu0 %v13894_v6  ;;  %5898 = vmatprep.subr.bf16.mxu1 %v13897_v7  ;;  %v13985_v6 = vld [vmem:[#allocation7 + $0x3a8] ss:$16 sps:$4 sm:$0xff]   ;;  %v13993_v7 = vld [vmem:[#allocation7 + $0x3c4] ss:$16 sps:$4 sm:$0xff]  }
  0x8d   :  { %4695 = vmatprep.mubr.bf16.mxu0 %v13898_v8  ;;  %5825 = vmatprep.mubr.bf16.mxu1 %v13898_v8  ;;  %v13996_v8 = vld [vmem:[#allocation7 + $0x3cc] ss:$16 sps:$4 sm:$0xff]  }
  0x8f   :  { %4769 = vmatpush1.bf16.msra.mxu0 %v13892_v9  ;;  %5899 = vmatpush1.bf16.msra.mxu1 %v13895_v10  ;;  %v13990_v9 = vld [vmem:[%s18619_s0 + $0x428] ss:$76 sps:$4 sm:$0xff]   ;;  %v13991_v10 = vld [vmem:[#allocation7 + $0x3c0] ss:$16 sps:$4 sm:$0xff]  }
  0x90   :  { %4770 = vmatprep.subr.bf16.mxu0 %v13903_v11  ;;  %5900 = vmatprep.subr.bf16.mxu1 %v13906_v12  ;;  %v13994_v11 = vld [vmem:[#allocation7 + $0x3c8] ss:$16 sps:$4 sm:$0xff]   ;;  %v13999_v12 = vld [vmem:[#allocation7 + $0x3e4] ss:$16 sps:$4 sm:$0xff]  }
  0x92   :  { %4696 = vmatmul.mubr.bf16.gmra.mrb[4].mxu0 %v13900_v13  ;;  %5826 = vmatmul.mubr.bf16.gmra.mrb[4].mxu1 %v13900_v13  ;;  %v14002_v13 = vld [vmem:[#allocation7 + $0x3ec] ss:$16 sps:$4 sm:$0xff]  }
  0x93   :  { %4771 = vmatpush1.bf16.msra.mxu0 %v13901_v14  ;;  %5901 = vmatpush1.bf16.msra.mxu1 %v13904_v15  ;;  %v14005_v14 = vld [vmem:[%s18619_s0 + $0xc] ss:$76 sps:$4 sm:$0xff]   ;;  %v13997_v15 = vld [vmem:[#allocation7 + $0x3e0] ss:$16 sps:$4 sm:$0xff]  }
  0x94   :  { %4772 = vmatprep.subr.bf16.mxu0 %v13909_v16  ;;  %5902 = vmatprep.subr.bf16.mxu1 %v13912_v17  ;;  %v14000_v16 = vld [vmem:[#allocation7 + $0x3e8] ss:$16 sps:$4 sm:$0xff]   ;;  %v14008_v17 = vld [vmem:[#allocation7 + $0x404] ss:$16 sps:$4 sm:$0xff]  }
  0x95   :  { %4705 = vmatprep.mubr.bf16.mxu0 %v13913_v18  ;;  %5835 = vmatprep.mubr.bf16.mxu1 %v13913_v18  ;;  %v14011_v18 = vld [vmem:[#allocation7 + $0x40c] ss:$16 sps:$4 sm:$0xff]  }
  0x97   :  { %4773 = vmatpush1.bf16.msra.mxu0 %v13907_v19  ;;  %5903 = vmatpush1.bf16.msra.mxu1 %v13910_v20  ;;  %v14003_v19 = vld [vmem:[%s18619_s0 + $0x8] ss:$76 sps:$4 sm:$0xff]   ;;  %v14006_v20 = vld [vmem:[#allocation7 + $0x400] ss:$16 sps:$4 sm:$0xff]  }
  0x98   :  { %4774 = vmatprep.subr.bf16.mxu0 %v13918_v21  ;;  %5904 = vmatprep.subr.bf16.mxu1 %v13921_v22  ;;  %v14009_v21 = vld [vmem:[#allocation7 + $0x408] ss:$16 sps:$4 sm:$0xff]   ;;  %v14014_v22 = vld [vmem:[#allocation7 + $0x424] ss:$16 sps:$4 sm:$0xff]  }
  0x9a   :  { %4706 = vmatmul.mubr.bf16.gmra.mrb[8].mxu0 %v13915_v23  ;;  %5836 = vmatmul.mubr.bf16.gmra.mrb[8].mxu1 %v13915_v23  ;;  %v14017_v23 = vld [vmem:[#allocation7 + $0x42c] ss:$16 sps:$4 sm:$0xff]  }
  0x9b   :  { %4775 = vmatpush1.bf16.msra.mxu0 %v13916_v24  ;;  %5905 = vmatpush1.bf16.msra.mxu1 %v13919_v25  ;;  %v14018_v24 = vld [vmem:[%s18619_s0 + $0xa4] ss:$76 sps:$4 sm:$0xff]  }
  0x9c   :  { %4776 = vmatprep.subr.bf16.mxu0 %v13924_v26  ;;  %5906 = vmatprep.subr.bf16.mxu1 %v13927_v27  ;;  %v14012_v25 = vld [vmem:[#allocation7 + $0x420] ss:$16 sps:$4 sm:$0xff]   ;;  %v14015_v26 = vld [vmem:[#allocation7 + $0x428] ss:$16 sps:$4 sm:$0xff]   ;;  %v14023_v27 = vld [vmem:[#allocation7 + $0x444] ss:$16 sps:$4 sm:$0xff]  }
  0x9d   :  { %4715 = vmatprep.mubr.bf16.mxu0 %v13928_v28  ;;  %5845 = vmatprep.mubr.bf16.mxu1 %v13928_v28  ;;  %v14026_v28 = vld [vmem:[#allocation7 + $0x44c] ss:$16 sps:$4 sm:$0xff]  }
  0x9f   :  { %4777 = vmatpush1.bf16.msra.mxu0 %v13922_v29  ;;  %5907 = vmatpush1.bf16.msra.mxu1 %v13925_v30  ;;  %v14020_v29 = vld [vmem:[%s18619_s0 + $0xa0] ss:$76 sps:$4 sm:$0xff]  }
  0xa0   :  { %4778 = vmatprep.subr.bf16.mxu0 %v13933_v31  ;;  %5908 = vmatprep.subr.bf16.mxu1 %v13936_v32  ;;  %v14021_v30 = vld [vmem:[#allocation7 + $0x440] ss:$16 sps:$4 sm:$0xff]   ;;  %v14024_v31 = vld [vmem:[#allocation7 + $0x448] ss:$16 sps:$4 sm:$0xff]   ;;  %v14029_v32 = vld [vmem:[#allocation7 + $0x464] ss:$16 sps:$4 sm:$0xff]  }
  0xa2   :  { %4716 = vmatmul.mubr.bf16.gmra.mrb[12].mxu0 %v13930_v33  ;;  %5846 = vmatmul.mubr.bf16.gmra.mrb[12].mxu1 %v13930_v33  ;;  %v14032_v33 = vld [vmem:[#allocation7 + $0x46c] ss:$16 sps:$4 sm:$0xff]  }
  0xa3   :  { %4779 = vmatpush1.bf16.msra.mxu0 %v13931_v34  ;;  %5909 = vmatpush1.bf16.msra.mxu1 %v13934_v35  ;;  %v14033_v34 = vld [vmem:[%s18619_s0 + $0x13c] ss:$76 sps:$4 sm:$0xff]   ;;  %v14027_v35 = vld [vmem:[#allocation7 + $0x460] ss:$16 sps:$4 sm:$0xff]  }
  0xa4   :  { %4780 = vmatprep.subr.bf16.mxu0 %v13939_v36  ;;  %5910 = vmatprep.subr.bf16.mxu1 %v13942_v37  ;;  %v14030_v36 = vld [vmem:[#allocation7 + $0x468] ss:$16 sps:$4 sm:$0xff]   ;;  %v14038_v37 = vld [vmem:[#allocation7 + $0x484] ss:$16 sps:$4 sm:$0xff]  }
  0xa5   :  { %4725 = vmatprep.mubr.bf16.mxu0 %v13943_v38  ;;  %5855 = vmatprep.mubr.bf16.mxu1 %v13943_v38  ;;  %v14041_v38 = vld [vmem:[#allocation7 + $0x48c] ss:$16 sps:$4 sm:$0xff]  }
  0xa7   :  { %4781 = vmatpush1.bf16.msra.mxu0 %v13937_v39  ;;  %5911 = vmatpush1.bf16.msra.mxu1 %v13940_v40  ;;  %v14035_v39 = vld [vmem:[%s18619_s0 + $0x138] ss:$76 sps:$4 sm:$0xff]   ;;  %v14036_v40 = vld [vmem:[#allocation7 + $0x480] ss:$16 sps:$4 sm:$0xff]  }
  0xa8   :  { %4782 = vmatprep.subr.bf16.mxu0 %v13948_v41  ;;  %5912 = vmatprep.subr.bf16.mxu1 %v13951_v42  ;;  %v14039_v41 = vld [vmem:[#allocation7 + $0x488] ss:$16 sps:$4 sm:$0xff]   ;;  %v14044_v42 = vld [vmem:[#allocation7 + $0x4a4] ss:$16 sps:$4 sm:$0xff]  }
  0xaa   :  { %4726 = vmatmul.mubr.bf16.gmra.mrb[16].mxu0 %v13945_v43  ;;  %5856 = vmatmul.mubr.bf16.gmra.mrb[16].mxu1 %v13945_v43  ;;  %v14047_v43 = vld [vmem:[#allocation7 + $0x4ac] ss:$16 sps:$4 sm:$0xff]  }
  0xab   :  { %4783 = vmatpush1.bf16.msra.mxu0 %v13946_v44  ;;  %5913 = vmatpush1.bf16.msra.mxu1 %v13949_v45  ;;  %v14048_v44 = vld [vmem:[%s18619_s0 + $0x1d4] ss:$76 sps:$4 sm:$0xff]  }
  0xac   :  { %4784 = vmatprep.subr.bf16.mxu0 %v13954_v46  ;;  %5914 = vmatprep.subr.bf16.mxu1 %v13957_v47  ;;  %v14042_v45 = vld [vmem:[#allocation7 + $0x4a0] ss:$16 sps:$4 sm:$0xff]   ;;  %v14045_v46 = vld [vmem:[#allocation7 + $0x4a8] ss:$16 sps:$4 sm:$0xff]   ;;  %v14053_v47 = vld [vmem:[#allocation7 + $0x4c4] ss:$16 sps:$4 sm:$0xff]  }
  0xad   :  { %4735 = vmatprep.mubr.bf16.mxu0 %v13958_v48  ;;  %5865 = vmatprep.mubr.bf16.mxu1 %v13958_v48  ;;  %v14056_v48 = vld [vmem:[#allocation7 + $0x4cc] ss:$16 sps:$4 sm:$0xff]  }
  0xaf   :  { %4785 = vmatpush1.bf16.msra.mxu0 %v13952_v49  ;;  %5915 = vmatpush1.bf16.msra.mxu1 %v13955_v50  ;;  %v14050_v49 = vld [vmem:[%s18619_s0 + $0x1d0] ss:$76 sps:$4 sm:$0xff]  }
  0xb0   :  { %4786 = vmatprep.subr.bf16.mxu0 %v13963_v51  ;;  %5916 = vmatprep.subr.bf16.mxu1 %v13966_v52  ;;  %v14051_v50 = vld [vmem:[#allocation7 + $0x4c0] ss:$16 sps:$4 sm:$0xff]   ;;  %v14054_v51 = vld [vmem:[#allocation7 + $0x4c8] ss:$16 sps:$4 sm:$0xff]   ;;  %v14059_v52 = vld [vmem:[#allocation7 + $0x4e4] ss:$16 sps:$4 sm:$0xff]  }
  0xb2   :  { %4736 = vmatmul.mubr.bf16.gmra.mrb[20].mxu0 %v13960_v53  ;;  %5866 = vmatmul.mubr.bf16.gmra.mrb[20].mxu1 %v13960_v53  ;;  %v14062_v53 = vld [vmem:[#allocation7 + $0x4ec] ss:$16 sps:$4 sm:$0xff]  }
  0xb3   :  { %4787 = vmatpush1.bf16.msra.mxu0 %v13961_v54  ;;  %5917 = vmatpush1.bf16.msra.mxu1 %v13964_v55  ;;  %v14063_v54 = vld [vmem:[%s18619_s0 + $0x26c] ss:$76 sps:$4 sm:$0xff]   ;;  %v14057_v55 = vld [vmem:[#allocation7 + $0x4e0] ss:$16 sps:$4 sm:$0xff]  }
  0xb4   :  { %4788 = vmatprep.subr.bf16.mxu0 %v13969_v56  ;;  %5918 = vmatprep.subr.bf16.mxu1 %v13972_v57  ;;  %v14060_v56 = vld [vmem:[#allocation7 + $0x4e8] ss:$16 sps:$4 sm:$0xff]   ;;  %v14068_v57 = vld [vmem:[#allocation7 + $0x504] ss:$16 sps:$4 sm:$0xff]  }
  0xb5   :  { %4745 = vmatprep.mubr.bf16.mxu0 %v13973_v58  ;;  %5875 = vmatprep.mubr.bf16.mxu1 %v13973_v58  ;;  %v14071_v58 = vld [vmem:[#allocation7 + $0x50c] ss:$16 sps:$4 sm:$0xff]  }
  0xb7   :  { %4789 = vmatpush1.bf16.msra.mxu0 %v13967_v59  ;;  %5919 = vmatpush1.bf16.msra.mxu1 %v13970_v60  ;;  %v14065_v59 = vld [vmem:[%s18619_s0 + $0x268] ss:$76 sps:$4 sm:$0xff]   ;;  %v14066_v60 = vld [vmem:[#allocation7 + $0x500] ss:$16 sps:$4 sm:$0xff]  }
  0xb8   :  { %4790 = vmatprep.subr.bf16.mxu0 %v13978_v61  ;;  %5920 = vmatprep.subr.bf16.mxu1 %v13981_v62  ;;  %v14069_v61 = vld [vmem:[#allocation7 + $0x508] ss:$16 sps:$4 sm:$0xff]   ;;  %v14074_v62 = vld [vmem:[#allocation7 + $0x524] ss:$16 sps:$4 sm:$0xff]  }
  0xba   :  { %4746 = vmatmul.mubr.bf16.gmra.mrb[24].mxu0 %v13975_v63  ;;  %5876 = vmatmul.mubr.bf16.gmra.mrb[24].mxu1 %v13975_v63  ;;  %v14077_v63 = vld [vmem:[#allocation7 + $0x52c] ss:$16 sps:$4 sm:$0xff]  }
  0xbb   :  { %4791 = vmatpush1.bf16.msra.mxu0 %v13976_v0  ;;  %5921 = vmatpush1.bf16.msra.mxu1 %v13979_v1  ;;  %v14078_v0 = vld [vmem:[%s18619_s0 + $0x304] ss:$76 sps:$4 sm:$0xff]  }
  0xbc   :  { %4792 = vmatprep.subr.bf16.mxu0 %v13984_v2  ;;  %5922 = vmatprep.subr.bf16.mxu1 %v13987_v3  ;;  %v14072_v1 = vld [vmem:[#allocation7 + $0x520] ss:$16 sps:$4 sm:$0xff]   ;;  %v14075_v2 = vld [vmem:[#allocation7 + $0x528] ss:$16 sps:$4 sm:$0xff]   ;;  %v14083_v3 = vld [vmem:[#allocation7 + $0x544] ss:$16 sps:$4 sm:$0xff]  }
  0xbd   :  { %4755 = vmatprep.mubr.bf16.mxu0 %v13988_v4  ;;  %5885 = vmatprep.mubr.bf16.mxu1 %v13988_v4  ;;  %v14086_v4 = vld [vmem:[#allocation7 + $0x54c] ss:$16 sps:$4 sm:$0xff]  }
  0xbf   :  { %4793 = vmatpush1.bf16.msra.mxu0 %v13982_v5  ;;  %5923 = vmatpush1.bf16.msra.mxu1 %v13985_v6  ;;  %v14080_v5 = vld [vmem:[%s18619_s0 + $0x300] ss:$76 sps:$4 sm:$0xff]  }
  0xc0   :  { %4794 = vmatprep.subr.bf16.mxu0 %v13993_v7  ;;  %5924 = vmatprep.subr.bf16.mxu1 %v13996_v8  ;;  %v14081_v6 = vld [vmem:[#allocation7 + $0x540] ss:$16 sps:$4 sm:$0xff]   ;;  %v14084_v7 = vld [vmem:[#allocation7 + $0x548] ss:$16 sps:$4 sm:$0xff]   ;;  %v14089_v8 = vld [vmem:[#allocation7 + $0x564] ss:$16 sps:$4 sm:$0xff]  }
  0xc2   :  { %4756 = vmatmul.mubr.bf16.gmra.mrb[28].mxu0 %v13990_v9  ;;  %5886 = vmatmul.mubr.bf16.gmra.mrb[28].mxu1 %v13990_v9  ;;  %v14092_v9 = vld [vmem:[#allocation7 + $0x56c] ss:$16 sps:$4 sm:$0xff]  }
  0xc3   :  { %4795 = vmatpush1.bf16.msra.mxu0 %v13991_v10  ;;  %5925 = vmatpush1.bf16.msra.mxu1 %v13994_v11  ;;  %v14093_v10 = vld [vmem:[%s18619_s0 + $0x39c] ss:$76 sps:$4 sm:$0xff]   ;;  %v14087_v11 = vld [vmem:[#allocation7 + $0x560] ss:$16 sps:$4 sm:$0xff]  }
  0xc4   :  { %4796 = vmatprep.subr.bf16.mxu0 %v13999_v12  ;;  %5926 = vmatprep.subr.bf16.mxu1 %v14002_v13  ;;  %v14090_v12 = vld [vmem:[#allocation7 + $0x568] ss:$16 sps:$4 sm:$0xff]   ;;  %v14098_v13 = vld [vmem:[#allocation7 + $0x584] ss:$16 sps:$4 sm:$0xff]  }
  0xc5   :  { %4798 = vmatprep.mubr.bf16.mxu0 %v14005_v14  ;;  %5928 = vmatprep.mubr.bf16.mxu1 %v14005_v14  ;;  %v14101_v14 = vld [vmem:[#allocation7 + $0x58c] ss:$16 sps:$4 sm:$0xff]  }
  0xc7   :  { %4797 = vmatpush1.bf16.msra.mxu0 %v13997_v15  ;;  %5927 = vmatpush1.bf16.msra.mxu1 %v14000_v16  ;;  %v14095_v15 = vld [vmem:[%s18619_s0 + $0x398] ss:$76 sps:$4 sm:$0xff]   ;;  %v14096_v16 = vld [vmem:[#allocation7 + $0x580] ss:$16 sps:$4 sm:$0xff]  }
  0xc8   :  { %4879 = vmatprep.subr.bf16.mxu0 %v14008_v17  ;;  %6009 = vmatprep.subr.bf16.mxu1 %v14011_v18  ;;  %v14099_v17 = vld [vmem:[#allocation7 + $0x588] ss:$16 sps:$4 sm:$0xff]   ;;  %v14104_v18 = vld [vmem:[#allocation7 + $0x5a4] ss:$16 sps:$4 sm:$0xff]  }
  0xca   :  { %4799 = vmatmul.mubr.bf16.vlgmr.msra.gmra.mrb[0].mxu0 %v14003_v19  ;;  %5929 = vmatmul.mubr.bf16.vlgmr.msra.gmra.mrb[0].mxu1 %v14003_v19  ;;  %v14107_v19 = vld [vmem:[#allocation7 + $0x5ac] ss:$16 sps:$4 sm:$0xff]  }
  0xcb   :  { %4880 = vmatpush1.bf16.msra.mxu0 %v14006_v20  ;;  %6010 = vmatpush1.bf16.msra.mxu1 %v14009_v21  ;;  %v14108_v20 = vld [vmem:[%s18619_s0 + $0x434] ss:$76 sps:$4 sm:$0xff]  }
  0xcc   :  { %4881 = vmatprep.subr.bf16.mxu0 %v14014_v22  ;;  %6011 = vmatprep.subr.bf16.mxu1 %v14017_v23  ;;  %v14102_v21 = vld [vmem:[#allocation7 + $0x5a0] ss:$16 sps:$4 sm:$0xff]   ;;  %v14105_v22 = vld [vmem:[#allocation7 + $0x5a8] ss:$16 sps:$4 sm:$0xff]   ;;  %v14113_v23 = vld [vmem:[#allocation7 + $0x5c4] ss:$16 sps:$4 sm:$0xff]  }
  0xcd   :  { %4808 = vmatprep.mubr.bf16.mxu0 %v14018_v24  ;;  %5938 = vmatprep.mubr.bf16.mxu1 %v14018_v24  ;;  %v14116_v24 = vld [vmem:[#allocation7 + $0x5cc] ss:$16 sps:$4 sm:$0xff]  }
  0xcf   :  { %4882 = vmatpush1.bf16.msra.mxu0 %v14012_v25  ;;  %6012 = vmatpush1.bf16.msra.mxu1 %v14015_v26  ;;  %v14110_v25 = vld [vmem:[%s18619_s0 + $0x430] ss:$76 sps:$4 sm:$0xff]  }
  0xd0   :  { %4883 = vmatprep.subr.bf16.mxu0 %v14023_v27  ;;  %6013 = vmatprep.subr.bf16.mxu1 %v14026_v28  ;;  %v14111_v26 = vld [vmem:[#allocation7 + $0x5c0] ss:$16 sps:$4 sm:$0xff]   ;;  %v14114_v27 = vld [vmem:[#allocation7 + $0x5c8] ss:$16 sps:$4 sm:$0xff]   ;;  %v14119_v28 = vld [vmem:[#allocation7 + $0x5e4] ss:$16 sps:$4 sm:$0xff]  }
  0xd2   :  { %4809 = vmatmul.mubr.bf16.gmra.mrb[4].mxu0 %v14020_v29  ;;  %5939 = vmatmul.mubr.bf16.gmra.mrb[4].mxu1 %v14020_v29  ;;  %v14122_v29 = vld [vmem:[#allocation7 + $0x5ec] ss:$16 sps:$4 sm:$0xff]  }
  0xd3   :  { %4884 = vmatpush1.bf16.msra.mxu0 %v14021_v30  ;;  %6014 = vmatpush1.bf16.msra.mxu1 %v14024_v31  ;;  %v14125_v30 = vld [vmem:[%s18619_s0 + $0x14] ss:$76 sps:$4 sm:$0xff]  }
  0xd4   :  { %4885 = vmatprep.subr.bf16.mxu0 %v14029_v32  ;;  %6015 = vmatprep.subr.bf16.mxu1 %v14032_v33  ;;  %v14117_v31 = vld [vmem:[#allocation7 + $0x5e0] ss:$16 sps:$4 sm:$0xff]   ;;  %v14120_v32 = vld [vmem:[#allocation7 + $0x5e8] ss:$16 sps:$4 sm:$0xff]   ;;  %v14128_v33 = vld [vmem:[#allocation7 + $0x604] ss:$16 sps:$4 sm:$0xff]  }
  0xd5   :  { %4818 = vmatprep.mubr.bf16.mxu0 %v14033_v34  ;;  %5948 = vmatprep.mubr.bf16.mxu1 %v14033_v34  ;;  %v14131_v34 = vld [vmem:[#allocation7 + $0x60c] ss:$16 sps:$4 sm:$0xff]  }
  0xd7   :  { %4886 = vmatpush1.bf16.msra.mxu0 %v14027_v35  ;;  %6016 = vmatpush1.bf16.msra.mxu1 %v14030_v36  ;;  %v14123_v35 = vld [vmem:[%s18619_s0 + $0x10] ss:$76 sps:$4 sm:$0xff]  }
  0xd8   :  { %4887 = vmatprep.subr.bf16.mxu0 %v14038_v37  ;;  %6017 = vmatprep.subr.bf16.mxu1 %v14041_v38  ;;  %v14126_v36 = vld [vmem:[#allocation7 + $0x600] ss:$16 sps:$4 sm:$0xff]   ;;  %v14129_v37 = vld [vmem:[#allocation7 + $0x608] ss:$16 sps:$4 sm:$0xff]   ;;  %v14134_v38 = vld [vmem:[#allocation7 + $0x624] ss:$16 sps:$4 sm:$0xff]  }
  0xda   :  { %4819 = vmatmul.mubr.bf16.gmra.mrb[8].mxu0 %v14035_v39  ;;  %5949 = vmatmul.mubr.bf16.gmra.mrb[8].mxu1 %v14035_v39  ;;  %v14137_v39 = vld [vmem:[#allocation7 + $0x62c] ss:$16 sps:$4 sm:$0xff]  }
  0xdb   :  { %4888 = vmatpush1.bf16.msra.mxu0 %v14036_v40  ;;  %6018 = vmatpush1.bf16.msra.mxu1 %v14039_v41  ;;  %v14138_v40 = vld [vmem:[%s18619_s0 + $0xac] ss:$76 sps:$4 sm:$0xff]   ;;  %v14132_v41 = vld [vmem:[#allocation7 + $0x620] ss:$16 sps:$4 sm:$0xff]  }
  0xdc   :  { %4889 = vmatprep.subr.bf16.mxu0 %v14044_v42  ;;  %6019 = vmatprep.subr.bf16.mxu1 %v14047_v43  ;;  %v14135_v42 = vld [vmem:[#allocation7 + $0x628] ss:$16 sps:$4 sm:$0xff]   ;;  %v14143_v43 = vld [vmem:[#allocation7 + $0x644] ss:$16 sps:$4 sm:$0xff]  }
  0xdd   :  { %4828 = vmatprep.mubr.bf16.mxu0 %v14048_v44  ;;  %5958 = vmatprep.mubr.bf16.mxu1 %v14048_v44  ;;  %v14146_v44 = vld [vmem:[#allocation7 + $0x64c] ss:$16 sps:$4 sm:$0xff]  }
  0xdf   :  { %4890 = vmatpush1.bf16.msra.mxu0 %v14042_v45  ;;  %6020 = vmatpush1.bf16.msra.mxu1 %v14045_v46  ;;  %v14140_v45 = vld [vmem:[%s18619_s0 + $0xa8] ss:$76 sps:$4 sm:$0xff]   ;;  %v14141_v46 = vld [vmem:[#allocation7 + $0x640] ss:$16 sps:$4 sm:$0xff]  }
  0xe0   :  { %4891 = vmatprep.subr.bf16.mxu0 %v14053_v47  ;;  %6021 = vmatprep.subr.bf16.mxu1 %v14056_v48  ;;  %v14144_v47 = vld [vmem:[#allocation7 + $0x648] ss:$16 sps:$4 sm:$0xff]   ;;  %v14149_v48 = vld [vmem:[#allocation7 + $0x664] ss:$16 sps:$4 sm:$0xff]  }
  0xe2   :  { %4829 = vmatmul.mubr.bf16.gmra.mrb[12].mxu0 %v14050_v49  ;;  %5959 = vmatmul.mubr.bf16.gmra.mrb[12].mxu1 %v14050_v49  ;;  %v14152_v49 = vld [vmem:[#allocation7 + $0x66c] ss:$16 sps:$4 sm:$0xff]  }
  0xe3   :  { %4892 = vmatpush1.bf16.msra.mxu0 %v14051_v50  ;;  %6022 = vmatpush1.bf16.msra.mxu1 %v14054_v51  ;;  %v14153_v50 = vld [vmem:[%s18619_s0 + $0x144] ss:$76 sps:$4 sm:$0xff]  }
  0xe4   :  { %4893 = vmatprep.subr.bf16.mxu0 %v14059_v52  ;;  %6023 = vmatprep.subr.bf16.mxu1 %v14062_v53  ;;  %v14147_v51 = vld [vmem:[#allocation7 + $0x660] ss:$16 sps:$4 sm:$0xff]   ;;  %v14150_v52 = vld [vmem:[#allocation7 + $0x668] ss:$16 sps:$4 sm:$0xff]   ;;  %v14158_v53 = vld [vmem:[#allocation7 + $0x684] ss:$16 sps:$4 sm:$0xff]  }
  0xe5   :  { %4838 = vmatprep.mubr.bf16.mxu0 %v14063_v54  ;;  %5968 = vmatprep.mubr.bf16.mxu1 %v14063_v54  ;;  %v14161_v54 = vld [vmem:[#allocation7 + $0x68c] ss:$16 sps:$4 sm:$0xff]  }
  0xe7   :  { %4894 = vmatpush1.bf16.msra.mxu0 %v14057_v55  ;;  %6024 = vmatpush1.bf16.msra.mxu1 %v14060_v56  ;;  %v14155_v55 = vld [vmem:[%s18619_s0 + $0x140] ss:$76 sps:$4 sm:$0xff]  }
  0xe8   :  { %4895 = vmatprep.subr.bf16.mxu0 %v14068_v57  ;;  %6025 = vmatprep.subr.bf16.mxu1 %v14071_v58  ;;  %v14156_v56 = vld [vmem:[#allocation7 + $0x680] ss:$16 sps:$4 sm:$0xff]   ;;  %v14159_v57 = vld [vmem:[#allocation7 + $0x688] ss:$16 sps:$4 sm:$0xff]   ;;  %v14164_v58 = vld [vmem:[#allocation7 + $0x6a4] ss:$16 sps:$4 sm:$0xff]  }
  0xea   :  { %4839 = vmatmul.mubr.bf16.gmra.mrb[16].mxu0 %v14065_v59  ;;  %5969 = vmatmul.mubr.bf16.gmra.mrb[16].mxu1 %v14065_v59  ;;  %v14167_v59 = vld [vmem:[#allocation7 + $0x6ac] ss:$16 sps:$4 sm:$0xff]  }
  0xeb   :  { %4896 = vmatpush1.bf16.msra.mxu0 %v14066_v60  ;;  %6026 = vmatpush1.bf16.msra.mxu1 %v14069_v61  ;;  %v14168_v60 = vld [vmem:[%s18619_s0 + $0x1dc] ss:$76 sps:$4 sm:$0xff]   ;;  %v14162_v61 = vld [vmem:[#allocation7 + $0x6a0] ss:$16 sps:$4 sm:$0xff]  }
  0xec   :  { %4897 = vmatprep.subr.bf16.mxu0 %v14074_v62  ;;  %6027 = vmatprep.subr.bf16.mxu1 %v14077_v63  ;;  %v14165_v62 = vld [vmem:[#allocation7 + $0x6a8] ss:$16 sps:$4 sm:$0xff]   ;;  %v14173_v63 = vld [vmem:[#allocation7 + $0x6c4] ss:$16 sps:$4 sm:$0xff]  }
  0xed   :  { %4848 = vmatprep.mubr.bf16.mxu0 %v14078_v0  ;;  %5978 = vmatprep.mubr.bf16.mxu1 %v14078_v0  ;;  %v14176_v0 = vld [vmem:[#allocation7 + $0x6cc] ss:$16 sps:$4 sm:$0xff]  }
  0xef   :  { %4898 = vmatpush1.bf16.msra.mxu0 %v14072_v1  ;;  %6028 = vmatpush1.bf16.msra.mxu1 %v14075_v2  ;;  %v14170_v1 = vld [vmem:[%s18619_s0 + $0x1d8] ss:$76 sps:$4 sm:$0xff]   ;;  %v14171_v2 = vld [vmem:[#allocation7 + $0x6c0] ss:$16 sps:$4 sm:$0xff]  }
  0xf0   :  { %4899 = vmatprep.subr.bf16.mxu0 %v14083_v3  ;;  %6029 = vmatprep.subr.bf16.mxu1 %v14086_v4  ;;  %v14174_v3 = vld [vmem:[#allocation7 + $0x6c8] ss:$16 sps:$4 sm:$0xff]   ;;  %v14179_v4 = vld [vmem:[#allocation7 + $0x6e4] ss:$16 sps:$4 sm:$0xff]  }
  0xf2   :  { %4849 = vmatmul.mubr.bf16.gmra.mrb[20].mxu0 %v14080_v5  ;;  %5979 = vmatmul.mubr.bf16.gmra.mrb[20].mxu1 %v14080_v5  ;;  %v14182_v5 = vld [vmem:[#allocation7 + $0x6ec] ss:$16 sps:$4 sm:$0xff]  }
  0xf3   :  { %4900 = vmatpush1.bf16.msra.mxu0 %v14081_v6  ;;  %6030 = vmatpush1.bf16.msra.mxu1 %v14084_v7  ;;  %v14183_v6 = vld [vmem:[%s18619_s0 + $0x274] ss:$76 sps:$4 sm:$0xff]  }
  0xf4   :  { %4901 = vmatprep.subr.bf16.mxu0 %v14089_v8  ;;  %6031 = vmatprep.subr.bf16.mxu1 %v14092_v9  ;;  %v14177_v7 = vld [vmem:[#allocation7 + $0x6e0] ss:$16 sps:$4 sm:$0xff]   ;;  %v14180_v8 = vld [vmem:[#allocation7 + $0x6e8] ss:$16 sps:$4 sm:$0xff]   ;;  %v14188_v9 = vld [vmem:[#allocation7 + $0x704] ss:$16 sps:$4 sm:$0xff]  }
  0xf5   :  { %4858 = vmatprep.mubr.bf16.mxu0 %v14093_v10  ;;  %5988 = vmatprep.mubr.bf16.mxu1 %v14093_v10  ;;  %v14191_v10 = vld [vmem:[#allocation7 + $0x70c] ss:$16 sps:$4 sm:$0xff]  }
  0xf7   :  { %4902 = vmatpush1.bf16.msra.mxu0 %v14087_v11  ;;  %6032 = vmatpush1.bf16.msra.mxu1 %v14090_v12  ;;  %v14185_v11 = vld [vmem:[%s18619_s0 + $0x270] ss:$76 sps:$4 sm:$0xff]  }
  0xf8   :  { %4903 = vmatprep.subr.bf16.mxu0 %v14098_v13  ;;  %6033 = vmatprep.subr.bf16.mxu1 %v14101_v14  ;;  %v14186_v12 = vld [vmem:[#allocation7 + $0x700] ss:$16 sps:$4 sm:$0xff]   ;;  %v14189_v13 = vld [vmem:[#allocation7 + $0x708] ss:$16 sps:$4 sm:$0xff]   ;;  %v14194_v14 = vld [vmem:[#allocation7 + $0x724] ss:$16 sps:$4 sm:$0xff]  }
  0xfa   :  { %4859 = vmatmul.mubr.bf16.gmra.mrb[24].mxu0 %v14095_v15  ;;  %5989 = vmatmul.mubr.bf16.gmra.mrb[24].mxu1 %v14095_v15  ;;  %v14197_v15 = vld [vmem:[#allocation7 + $0x72c] ss:$16 sps:$4 sm:$0xff]  }
  0xfb   :  { %4904 = vmatpush1.bf16.msra.mxu0 %v14096_v16  ;;  %6034 = vmatpush1.bf16.msra.mxu1 %v14099_v17  ;;  %v14198_v16 = vld [vmem:[%s18619_s0 + $0x30c] ss:$76 sps:$4 sm:$0xff]   ;;  %v14192_v17 = vld [vmem:[#allocation7 + $0x720] ss:$16 sps:$4 sm:$0xff]  }
  0xfc   :  { %4905 = vmatprep.subr.bf16.mxu0 %v14104_v18  ;;  %6035 = vmatprep.subr.bf16.mxu1 %v14107_v19  ;;  %v14195_v18 = vld [vmem:[#allocation7 + $0x728] ss:$16 sps:$4 sm:$0xff]   ;;  %v14203_v19 = vld [vmem:[#allocation7 + $0x744] ss:$16 sps:$4 sm:$0xff]  }
  0xfd   :  { %4868 = vmatprep.mubr.bf16.mxu0 %v14108_v20  ;;  %5998 = vmatprep.mubr.bf16.mxu1 %v14108_v20  ;;  %v14206_v20 = vld [vmem:[#allocation7 + $0x74c] ss:$16 sps:$4 sm:$0xff]  }
  0xff   :  { %4906 = vmatpush1.bf16.msra.mxu0 %v14102_v21  ;;  %6036 = vmatpush1.bf16.msra.mxu1 %v14105_v22  ;;  %v14200_v21 = vld [vmem:[%s18619_s0 + $0x308] ss:$76 sps:$4 sm:$0xff]   ;;  %v14201_v22 = vld [vmem:[#allocation7 + $0x740] ss:$16 sps:$4 sm:$0xff]  }
 0x100   :  { %4907 = vmatprep.subr.bf16.mxu0 %v14113_v23  ;;  %6037 = vmatprep.subr.bf16.mxu1 %v14116_v24  ;;  %v14204_v23 = vld [vmem:[#allocation7 + $0x748] ss:$16 sps:$4 sm:$0xff]   ;;  %v14209_v24 = vld [vmem:[#allocation7 + $0x764] ss:$16 sps:$4 sm:$0xff]  }
 0x102   :  { %4869 = vmatmul.mubr.bf16.gmra.mrb[32].mxu0 %v14110_v25  ;;  %5999 = vmatmul.mubr.bf16.gmra.mrb[32].mxu1 %v14110_v25  ;;  %v14212_v25 = vld [vmem:[#allocation7 + $0x76c] ss:$16 sps:$4 sm:$0xff]  }
 0x103   :  { %4908 = vmatpush1.bf16.msra.mxu0 %v14111_v26  ;;  %6038 = vmatpush1.bf16.msra.mxu1 %v14114_v27  ;;  %v14213_v26 = vld [vmem:[%s18619_s0 + $0x3a4] ss:$76 sps:$4 sm:$0xff]  }
 0x104   :  { %4909 = vmatprep.subr.bf16.mxu0 %v14119_v28  ;;  %6039 = vmatprep.subr.bf16.mxu1 %v14122_v29  ;;  %v14207_v27 = vld [vmem:[#allocation7 + $0x760] ss:$16 sps:$4 sm:$0xff]   ;;  %v14210_v28 = vld [vmem:[#allocation7 + $0x768] ss:$16 sps:$4 sm:$0xff]   ;;  %v14218_v29 = vld [vmem:[#allocation7 + $0x784] ss:$16 sps:$4 sm:$0xff]  }
 0x105   :  { %4911 = vmatprep.mubr.bf16.mxu0 %v14125_v30  ;;  %6041 = vmatprep.mubr.bf16.mxu1 %v14125_v30  ;;  %v14221_v30 = vld [vmem:[#allocation7 + $0x78c] ss:$16 sps:$4 sm:$0xff]  }
 0x107   :  { %4910 = vmatpush1.bf16.msra.mxu0 %v14117_v31  ;;  %6040 = vmatpush1.bf16.msra.mxu1 %v14120_v32  ;;  %v14215_v31 = vld [vmem:[%s18619_s0 + $0x3a0] ss:$76 sps:$4 sm:$0xff]  }
 0x108   :  { %4992 = vmatprep.subr.bf16.mxu0 %v14128_v33  ;;  %6122 = vmatprep.subr.bf16.mxu1 %v14131_v34  ;;  %v14216_v32 = vld [vmem:[#allocation7 + $0x780] ss:$16 sps:$4 sm:$0xff]   ;;  %v14219_v33 = vld [vmem:[#allocation7 + $0x788] ss:$16 sps:$4 sm:$0xff]   ;;  %v14224_v34 = vld [vmem:[#allocation7 + $0x7a4] ss:$16 sps:$4 sm:$0xff]  }
 0x10a   :  { %4912 = vmatmul.mubr.bf16.vlgmr.msra.gmra.mrb[0].mxu0 %v14123_v35  ;;  %6042 = vmatmul.mubr.bf16.vlgmr.msra.gmra.mrb[0].mxu1 %v14123_v35  ;;  %v14227_v35 = vld [vmem:[#allocation7 + $0x7ac] ss:$16 sps:$4 sm:$0xff]  }
 0x10b   :  { %4993 = vmatpush1.bf16.msra.mxu0 %v14126_v36  ;;  %6123 = vmatpush1.bf16.msra.mxu1 %v14129_v37  ;;  %v14228_v36 = vld [vmem:[%s18619_s0 + $0x43c] ss:$76 sps:$4 sm:$0xff]   ;;  %v14222_v37 = vld [vmem:[#allocation7 + $0x7a0] ss:$16 sps:$4 sm:$0xff]  }
 0x10c   :  { %4994 = vmatprep.subr.bf16.mxu0 %v14134_v38  ;;  %6124 = vmatprep.subr.bf16.mxu1 %v14137_v39  ;;  %v14225_v38 = vld [vmem:[#allocation7 + $0x7a8] ss:$16 sps:$4 sm:$0xff]   ;;  %v14233_v39 = vld [vmem:[#allocation7 + $0x7c4] ss:$16 sps:$4 sm:$0xff]  }
 0x10d   :  { %4921 = vmatprep.mubr.bf16.mxu0 %v14138_v40  ;;  %6051 = vmatprep.mubr.bf16.mxu1 %v14138_v40  ;;  %v14236_v40 = vld [vmem:[#allocation7 + $0x7cc] ss:$16 sps:$4 sm:$0xff]  }
 0x10f   :  { %4995 = vmatpush1.bf16.msra.mxu0 %v14132_v41  ;;  %6125 = vmatpush1.bf16.msra.mxu1 %v14135_v42  ;;  %v14230_v41 = vld [vmem:[%s18619_s0 + $0x438] ss:$76 sps:$4 sm:$0xff]   ;;  %v14231_v42 = vld [vmem:[#allocation7 + $0x7c0] ss:$16 sps:$4 sm:$0xff]  }
 0x110   :  { %4996 = vmatprep.subr.bf16.mxu0 %v14143_v43  ;;  %6126 = vmatprep.subr.bf16.mxu1 %v14146_v44  ;;  %v14234_v43 = vld [vmem:[#allocation7 + $0x7c8] ss:$16 sps:$4 sm:$0xff]   ;;  %v14239_v44 = vld [vmem:[#allocation7 + $0x7e4] ss:$16 sps:$4 sm:$0xff]  }
 0x112   :  { %4922 = vmatmul.mubr.bf16.gmra.mrb[4].mxu0 %v14140_v45  ;;  %6052 = vmatmul.mubr.bf16.gmra.mrb[4].mxu1 %v14140_v45  ;;  %v14242_v45 = vld [vmem:[#allocation7 + $0x7ec] ss:$16 sps:$4 sm:$0xff]  }
 0x113   :  { %4997 = vmatpush1.bf16.msra.mxu0 %v14141_v46  ;;  %6127 = vmatpush1.bf16.msra.mxu1 %v14144_v47  ;;  %v14245_v46 = vld [vmem:[%s18619_s0 + $0x1c] ss:$76 sps:$4 sm:$0xff]   ;;  %v14237_v47 = vld [vmem:[#allocation7 + $0x7e0] ss:$16 sps:$4 sm:$0xff]  }
 0x114   :  { %4998 = vmatprep.subr.bf16.mxu0 %v14149_v48  ;;  %6128 = vmatprep.subr.bf16.mxu1 %v14152_v49  ;;  %v14240_v48 = vld [vmem:[#allocation7 + $0x7e8] ss:$16 sps:$4 sm:$0xff]   ;;  %v14248_v49 = vld [vmem:[#allocation7 + $0x804] ss:$16 sps:$4 sm:$0xff]  }
 0x115   :  { %4931 = vmatprep.mubr.bf16.mxu0 %v14153_v50  ;;  %6061 = vmatprep.mubr.bf16.mxu1 %v14153_v50  ;;  %v14251_v50 = vld [vmem:[#allocation7 + $0x80c] ss:$16 sps:$4 sm:$0xff]  }
 0x117   :  { %4999 = vmatpush1.bf16.msra.mxu0 %v14147_v51  ;;  %6129 = vmatpush1.bf16.msra.mxu1 %v14150_v52  ;;  %v14243_v51 = vld [vmem:[%s18619_s0 + $0x18] ss:$76 sps:$4 sm:$0xff]   ;;  %v14246_v52 = vld [vmem:[#allocation7 + $0x800] ss:$16 sps:$4 sm:$0xff]  }
 0x118   :  { %5000 = vmatprep.subr.bf16.mxu0 %v14158_v53  ;;  %6130 = vmatprep.subr.bf16.mxu1 %v14161_v54  ;;  %v14249_v53 = vld [vmem:[#allocation7 + $0x808] ss:$16 sps:$4 sm:$0xff]   ;;  %v14254_v54 = vld [vmem:[#allocation7 + $0x824] ss:$16 sps:$4 sm:$0xff]  }
 0x11a   :  { %4932 = vmatmul.mubr.bf16.gmra.mrb[8].mxu0 %v14155_v55  ;;  %6062 = vmatmul.mubr.bf16.gmra.mrb[8].mxu1 %v14155_v55  ;;  %v14257_v55 = vld [vmem:[#allocation7 + $0x82c] ss:$16 sps:$4 sm:$0xff]  }
 0x11b   :  { %5001 = vmatpush1.bf16.msra.mxu0 %v14156_v56  ;;  %6131 = vmatpush1.bf16.msra.mxu1 %v14159_v57  ;;  %v14258_v56 = vld [vmem:[%s18619_s0 + $0xb4] ss:$76 sps:$4 sm:$0xff]  }
 0x11c   :  { %5002 = vmatprep.subr.bf16.mxu0 %v14164_v58  ;;  %6132 = vmatprep.subr.bf16.mxu1 %v14167_v59  ;;  %v14252_v57 = vld [vmem:[#allocation7 + $0x820] ss:$16 sps:$4 sm:$0xff]   ;;  %v14255_v58 = vld [vmem:[#allocation7 + $0x828] ss:$16 sps:$4 sm:$0xff]   ;;  %v14263_v59 = vld [vmem:[#allocation7 + $0x844] ss:$16 sps:$4 sm:$0xff]  }
 0x11d   :  { %4941 = vmatprep.mubr.bf16.mxu0 %v14168_v60  ;;  %6071 = vmatprep.mubr.bf16.mxu1 %v14168_v60  ;;  %v14266_v60 = vld [vmem:[#allocation7 + $0x84c] ss:$16 sps:$4 sm:$0xff]  }
 0x11f   :  { %5003 = vmatpush1.bf16.msra.mxu0 %v14162_v61  ;;  %6133 = vmatpush1.bf16.msra.mxu1 %v14165_v62  ;;  %v14260_v61 = vld [vmem:[%s18619_s0 + $0xb0] ss:$76 sps:$4 sm:$0xff]  }
 0x120   :  { %5004 = vmatprep.subr.bf16.mxu0 %v14173_v63  ;;  %6134 = vmatprep.subr.bf16.mxu1 %v14176_v0  ;;  %v14261_v62 = vld [vmem:[#allocation7 + $0x840] ss:$16 sps:$4 sm:$0xff]   ;;  %v14264_v63 = vld [vmem:[#allocation7 + $0x848] ss:$16 sps:$4 sm:$0xff]   ;;  %v14269_v0 = vld [vmem:[#allocation7 + $0x864] ss:$16 sps:$4 sm:$0xff]  }
 0x122   :  { %4942 = vmatmul.mubr.bf16.gmra.mrb[12].mxu0 %v14170_v1  ;;  %6072 = vmatmul.mubr.bf16.gmra.mrb[12].mxu1 %v14170_v1  ;;  %v14272_v1 = vld [vmem:[#allocation7 + $0x86c] ss:$16 sps:$4 sm:$0xff]  }
 0x123   :  { %5005 = vmatpush1.bf16.msra.mxu0 %v14171_v2  ;;  %6135 = vmatpush1.bf16.msra.mxu1 %v14174_v3  ;;  %v14273_v2 = vld [vmem:[%s18619_s0 + $0x14c] ss:$76 sps:$4 sm:$0xff]   ;;  %v14267_v3 = vld [vmem:[#allocation7 + $0x860] ss:$16 sps:$4 sm:$0xff]  }
 0x124   :  { %5006 = vmatprep.subr.bf16.mxu0 %v14179_v4  ;;  %6136 = vmatprep.subr.bf16.mxu1 %v14182_v5  ;;  %v14270_v4 = vld [vmem:[#allocation7 + $0x868] ss:$16 sps:$4 sm:$0xff]   ;;  %v14278_v5 = vld [vmem:[#allocation7 + $0x884] ss:$16 sps:$4 sm:$0xff]  }
 0x125   :  { %4951 = vmatprep.mubr.bf16.mxu0 %v14183_v6  ;;  %6081 = vmatprep.mubr.bf16.mxu1 %v14183_v6  ;;  %v14281_v6 = vld [vmem:[#allocation7 + $0x88c] ss:$16 sps:$4 sm:$0xff]  }
 0x127   :  { %5007 = vmatpush1.bf16.msra.mxu0 %v14177_v7  ;;  %6137 = vmatpush1.bf16.msra.mxu1 %v14180_v8  ;;  %v14275_v7 = vld [vmem:[%s18619_s0 + $0x148] ss:$76 sps:$4 sm:$0xff]   ;;  %v14276_v8 = vld [vmem:[#allocation7 + $0x880] ss:$16 sps:$4 sm:$0xff]  }
 0x128   :  { %5008 = vmatprep.subr.bf16.mxu0 %v14188_v9  ;;  %6138 = vmatprep.subr.bf16.mxu1 %v14191_v10  ;;  %v14279_v9 = vld [vmem:[#allocation7 + $0x888] ss:$16 sps:$4 sm:$0xff]   ;;  %v14284_v10 = vld [vmem:[#allocation7 + $0x8a4] ss:$16 sps:$4 sm:$0xff]  }
 0x12a   :  { %4952 = vmatmul.mubr.bf16.gmra.mrb[16].mxu0 %v14185_v11  ;;  %6082 = vmatmul.mubr.bf16.gmra.mrb[16].mxu1 %v14185_v11  ;;  %v14287_v11 = vld [vmem:[#allocation7 + $0x8ac] ss:$16 sps:$4 sm:$0xff]  }
 0x12b   :  { %5009 = vmatpush1.bf16.msra.mxu0 %v14186_v12  ;;  %6139 = vmatpush1.bf16.msra.mxu1 %v14189_v13  ;;  %v14288_v12 = vld [vmem:[%s18619_s0 + $0x1e4] ss:$76 sps:$4 sm:$0xff]  }
 0x12c   :  { %5010 = vmatprep.subr.bf16.mxu0 %v14194_v14  ;;  %6140 = vmatprep.subr.bf16.mxu1 %v14197_v15  ;;  %v14282_v13 = vld [vmem:[#allocation7 + $0x8a0] ss:$16 sps:$4 sm:$0xff]   ;;  %v14285_v14 = vld [vmem:[#allocation7 + $0x8a8] ss:$16 sps:$4 sm:$0xff]   ;;  %v14293_v15 = vld [vmem:[#allocation7 + $0x8c4] ss:$16 sps:$4 sm:$0xff]  }
 0x12d   :  { %4961 = vmatprep.mubr.bf16.mxu0 %v14198_v16  ;;  %6091 = vmatprep.mubr.bf16.mxu1 %v14198_v16  ;;  %v14296_v16 = vld [vmem:[#allocation7 + $0x8cc] ss:$16 sps:$4 sm:$0xff]  }
 0x12f   :  { %5011 = vmatpush1.bf16.msra.mxu0 %v14192_v17  ;;  %6141 = vmatpush1.bf16.msra.mxu1 %v14195_v18  ;;  %v14290_v17 = vld [vmem:[%s18619_s0 + $0x1e0] ss:$76 sps:$4 sm:$0xff]  }
 0x130   :  { %5012 = vmatprep.subr.bf16.mxu0 %v14203_v19  ;;  %6142 = vmatprep.subr.bf16.mxu1 %v14206_v20  ;;  %v14291_v18 = vld [vmem:[#allocation7 + $0x8c0] ss:$16 sps:$4 sm:$0xff]   ;;  %v14294_v19 = vld [vmem:[#allocation7 + $0x8c8] ss:$16 sps:$4 sm:$0xff]   ;;  %v14299_v20 = vld [vmem:[#allocation7 + $0x8e4] ss:$16 sps:$4 sm:$0xff]  }
 0x132   :  { %4962 = vmatmul.mubr.bf16.gmra.mrb[20].mxu0 %v14200_v21  ;;  %6092 = vmatmul.mubr.bf16.gmra.mrb[20].mxu1 %v14200_v21  ;;  %v14302_v21 = vld [vmem:[#allocation7 + $0x8ec] ss:$16 sps:$4 sm:$0xff]  }
 0x133   :  { %5013 = vmatpush1.bf16.msra.mxu0 %v14201_v22  ;;  %6143 = vmatpush1.bf16.msra.mxu1 %v14204_v23  ;;  %v14303_v22 = vld [vmem:[%s18619_s0 + $0x27c] ss:$76 sps:$4 sm:$0xff]   ;;  %v14297_v23 = vld [vmem:[#allocation7 + $0x8e0] ss:$16 sps:$4 sm:$0xff]  }
 0x134   :  { %5014 = vmatprep.subr.bf16.mxu0 %v14209_v24  ;;  %6144 = vmatprep.subr.bf16.mxu1 %v14212_v25  ;;  %v14300_v24 = vld [vmem:[#allocation7 + $0x8e8] ss:$16 sps:$4 sm:$0xff]   ;;  %v14308_v25 = vld [vmem:[#allocation7 + $0x904] ss:$16 sps:$4 sm:$0xff]  }
 0x135   :  { %4971 = vmatprep.mubr.bf16.mxu0 %v14213_v26  ;;  %6101 = vmatprep.mubr.bf16.mxu1 %v14213_v26  ;;  %v14311_v26 = vld [vmem:[#allocation7 + $0x90c] ss:$16 sps:$4 sm:$0xff]  }
 0x137   :  { %5015 = vmatpush1.bf16.msra.mxu0 %v14207_v27  ;;  %6145 = vmatpush1.bf16.msra.mxu1 %v14210_v28  ;;  %v14305_v27 = vld [vmem:[%s18619_s0 + $0x278] ss:$76 sps:$4 sm:$0xff]   ;;  %v14306_v28 = vld [vmem:[#allocation7 + $0x900] ss:$16 sps:$4 sm:$0xff]  }
 0x138   :  { %5016 = vmatprep.subr.bf16.mxu0 %v14218_v29  ;;  %6146 = vmatprep.subr.bf16.mxu1 %v14221_v30  ;;  %v14309_v29 = vld [vmem:[#allocation7 + $0x908] ss:$16 sps:$4 sm:$0xff]   ;;  %v14314_v30 = vld [vmem:[#allocation7 + $0x924] ss:$16 sps:$4 sm:$0xff]  }
 0x13a   :  { %4972 = vmatmul.mubr.bf16.gmra.mrb[24].mxu0 %v14215_v31  ;;  %6102 = vmatmul.mubr.bf16.gmra.mrb[24].mxu1 %v14215_v31  ;;  %v14317_v31 = vld [vmem:[#allocation7 + $0x92c] ss:$16 sps:$4 sm:$0xff]  }
 0x13b   :  { %5017 = vmatpush1.bf16.msra.mxu0 %v14216_v32  ;;  %6147 = vmatpush1.bf16.msra.mxu1 %v14219_v33  ;;  %v14318_v32 = vld [vmem:[%s18619_s0 + $0x314] ss:$76 sps:$4 sm:$0xff]  }
 0x13c   :  { %5018 = vmatprep.subr.bf16.mxu0 %v14224_v34  ;;  %6148 = vmatprep.subr.bf16.mxu1 %v14227_v35  ;;  %v14312_v33 = vld [vmem:[#allocation7 + $0x920] ss:$16 sps:$4 sm:$0xff]   ;;  %v14315_v34 = vld [vmem:[#allocation7 + $0x928] ss:$16 sps:$4 sm:$0xff]   ;;  %v14323_v35 = vld [vmem:[#allocation7 + $0x944] ss:$16 sps:$4 sm:$0xff]  }
 0x13d   :  { %4981 = vmatprep.mubr.bf16.mxu0 %v14228_v36  ;;  %6111 = vmatprep.mubr.bf16.mxu1 %v14228_v36  ;;  %v14326_v36 = vld [vmem:[#allocation7 + $0x94c] ss:$16 sps:$4 sm:$0xff]  }
 0x13f   :  { %5019 = vmatpush1.bf16.msra.mxu0 %v14222_v37  ;;  %6149 = vmatpush1.bf16.msra.mxu1 %v14225_v38  ;;  %v14320_v37 = vld [vmem:[%s18619_s0 + $0x310] ss:$76 sps:$4 sm:$0xff]  }
 0x140   :  { %5020 = vmatprep.subr.bf16.mxu0 %v14233_v39  ;;  %6150 = vmatprep.subr.bf16.mxu1 %v14236_v40  ;;  %v14321_v38 = vld [vmem:[#allocation7 + $0x940] ss:$16 sps:$4 sm:$0xff]   ;;  %v14324_v39 = vld [vmem:[#allocation7 + $0x948] ss:$16 sps:$4 sm:$0xff]   ;;  %v14329_v40 = vld [vmem:[#allocation7 + $0x964] ss:$16 sps:$4 sm:$0xff]  }
 0x142   :  { %4982 = vmatmul.mubr.bf16.gmra.mrb[36].mxu0 %v14230_v41  ;;  %6112 = vmatmul.mubr.bf16.gmra.mrb[36].mxu1 %v14230_v41  ;;  %v14332_v41 = vld [vmem:[#allocation7 + $0x96c] ss:$16 sps:$4 sm:$0xff]  }
 0x143   :  { %5021 = vmatpush1.bf16.msra.mxu0 %v14231_v42  ;;  %6151 = vmatpush1.bf16.msra.mxu1 %v14234_v43  ;;  %v14333_v42 = vld [vmem:[%s18619_s0 + $0x3ac] ss:$76 sps:$4 sm:$0xff]   ;;  %v14327_v43 = vld [vmem:[#allocation7 + $0x960] ss:$16 sps:$4 sm:$0xff]  }
 0x144   :  { %5022 = vmatprep.subr.bf16.mxu0 %v14239_v44  ;;  %6152 = vmatprep.subr.bf16.mxu1 %v14242_v45  ;;  %v14330_v44 = vld [vmem:[#allocation7 + $0x968] ss:$16 sps:$4 sm:$0xff]   ;;  %v14338_v45 = vld [vmem:[#allocation7 + $0x984] ss:$16 sps:$4 sm:$0xff]  }
 0x145   :  { %5024 = vmatprep.mubr.bf16.mxu0 %v14245_v46  ;;  %6154 = vmatprep.mubr.bf16.mxu1 %v14245_v46  ;;  %v14341_v46 = vld [vmem:[#allocation7 + $0x98c] ss:$16 sps:$4 sm:$0xff]  }
 0x147   :  { %5023 = vmatpush1.bf16.msra.mxu0 %v14237_v47  ;;  %6153 = vmatpush1.bf16.msra.mxu1 %v14240_v48  ;;  %v14335_v47 = vld [vmem:[%s18619_s0 + $0x3a8] ss:$76 sps:$4 sm:$0xff]   ;;  %v14336_v48 = vld [vmem:[#allocation7 + $0x980] ss:$16 sps:$4 sm:$0xff]  }
 0x148   :  { %5105 = vmatprep.subr.bf16.mxu0 %v14248_v49  ;;  %6235 = vmatprep.subr.bf16.mxu1 %v14251_v50  ;;  %v14339_v49 = vld [vmem:[#allocation7 + $0x988] ss:$16 sps:$4 sm:$0xff]   ;;  %v14344_v50 = vld [vmem:[#allocation7 + $0x9a4] ss:$16 sps:$4 sm:$0xff]  }
 0x14a   :  { %5025 = vmatmul.mubr.bf16.vlgmr.msra.gmra.mrb[0].mxu0 %v14243_v51  ;;  %6155 = vmatmul.mubr.bf16.vlgmr.msra.gmra.mrb[0].mxu1 %v14243_v51  ;;  %v14347_v51 = vld [vmem:[#allocation7 + $0x9ac] ss:$16 sps:$4 sm:$0xff]  }
 0x14b   :  { %5106 = vmatpush1.bf16.msra.mxu0 %v14246_v52  ;;  %6236 = vmatpush1.bf16.msra.mxu1 %v14249_v53  ;;  %v14348_v52 = vld [vmem:[%s18619_s0 + $0x444] ss:$76 sps:$4 sm:$0xff]  }
 0x14c   :  { %5107 = vmatprep.subr.bf16.mxu0 %v14254_v54  ;;  %6237 = vmatprep.subr.bf16.mxu1 %v14257_v55  ;;  %v14342_v53 = vld [vmem:[#allocation7 + $0x9a0] ss:$16 sps:$4 sm:$0xff]   ;;  %v14345_v54 = vld [vmem:[#allocation7 + $0x9a8] ss:$16 sps:$4 sm:$0xff]   ;;  %v14353_v55 = vld [vmem:[#allocation7 + $0x9c4] ss:$16 sps:$4 sm:$0xff]  }
 0x14d   :  { %5034 = vmatprep.mubr.bf16.mxu0 %v14258_v56  ;;  %6164 = vmatprep.mubr.bf16.mxu1 %v14258_v56  ;;  %v14356_v56 = vld [vmem:[#allocation7 + $0x9cc] ss:$16 sps:$4 sm:$0xff]  }
 0x14f   :  { %5108 = vmatpush1.bf16.msra.mxu0 %v14252_v57  ;;  %6238 = vmatpush1.bf16.msra.mxu1 %v14255_v58  ;;  %v14350_v57 = vld [vmem:[%s18619_s0 + $0x440] ss:$76 sps:$4 sm:$0xff]  }
 0x150   :  { %5109 = vmatprep.subr.bf16.mxu0 %v14263_v59  ;;  %6239 = vmatprep.subr.bf16.mxu1 %v14266_v60  ;;  %v14351_v58 = vld [vmem:[#allocation7 + $0x9c0] ss:$16 sps:$4 sm:$0xff]   ;;  %v14354_v59 = vld [vmem:[#allocation7 + $0x9c8] ss:$16 sps:$4 sm:$0xff]   ;;  %v14359_v60 = vld [vmem:[#allocation7 + $0x9e4] ss:$16 sps:$4 sm:$0xff]  }
 0x152   :  { %5035 = vmatmul.mubr.bf16.gmra.mrb[4].mxu0 %v14260_v61  ;;  %6165 = vmatmul.mubr.bf16.gmra.mrb[4].mxu1 %v14260_v61  ;;  %v14362_v61 = vld [vmem:[#allocation7 + $0x9ec] ss:$16 sps:$4 sm:$0xff]  }
 0x153   :  { %5110 = vmatpush1.bf16.msra.mxu0 %v14261_v62  ;;  %6240 = vmatpush1.bf16.msra.mxu1 %v14264_v63  ;;  %v14365_v62 = vld [vmem:[%s18619_s0 + $0x24] ss:$76 sps:$4 sm:$0xff]  }
 0x154   :  { %5111 = vmatprep.subr.bf16.mxu0 %v14269_v0  ;;  %6241 = vmatprep.subr.bf16.mxu1 %v14272_v1  ;;  %v14357_v63 = vld [vmem:[#allocation7 + $0x9e0] ss:$16 sps:$4 sm:$0xff]   ;;  %v14360_v0 = vld [vmem:[#allocation7 + $0x9e8] ss:$16 sps:$4 sm:$0xff]   ;;  %v14368_v1 = vld [vmem:[#allocation7 + $0xa04] ss:$16 sps:$4 sm:$0xff]  }
 0x155   :  { %5044 = vmatprep.mubr.bf16.mxu0 %v14273_v2  ;;  %6174 = vmatprep.mubr.bf16.mxu1 %v14273_v2  ;;  %v14371_v2 = vld [vmem:[#allocation7 + $0xa0c] ss:$16 sps:$4 sm:$0xff]  }
 0x157   :  { %5112 = vmatpush1.bf16.msra.mxu0 %v14267_v3  ;;  %6242 = vmatpush1.bf16.msra.mxu1 %v14270_v4  ;;  %v14363_v3 = vld [vmem:[%s18619_s0 + $0x20] ss:$76 sps:$4 sm:$0xff]  }
 0x158   :  { %5113 = vmatprep.subr.bf16.mxu0 %v14278_v5  ;;  %6243 = vmatprep.subr.bf16.mxu1 %v14281_v6  ;;  %v14366_v4 = vld [vmem:[#allocation7 + $0xa00] ss:$16 sps:$4 sm:$0xff]   ;;  %v14369_v5 = vld [vmem:[#allocation7 + $0xa08] ss:$16 sps:$4 sm:$0xff]   ;;  %v14374_v6 = vld [vmem:[#allocation7 + $0xa24] ss:$16 sps:$4 sm:$0xff]  }
 0x15a   :  { %5045 = vmatmul.mubr.bf16.gmra.mrb[8].mxu0 %v14275_v7  ;;  %6175 = vmatmul.mubr.bf16.gmra.mrb[8].mxu1 %v14275_v7  ;;  %v14377_v7 = vld [vmem:[#allocation7 + $0xa2c] ss:$16 sps:$4 sm:$0xff]  }
 0x15b   :  { %5114 = vmatpush1.bf16.msra.mxu0 %v14276_v8  ;;  %6244 = vmatpush1.bf16.msra.mxu1 %v14279_v9  ;;  %v14378_v8 = vld [vmem:[%s18619_s0 + $0xbc] ss:$76 sps:$4 sm:$0xff]   ;;  %v14372_v9 = vld [vmem:[#allocation7 + $0xa20] ss:$16 sps:$4 sm:$0xff]  }
 0x15c   :  { %5115 = vmatprep.subr.bf16.mxu0 %v14284_v10  ;;  %6245 = vmatprep.subr.bf16.mxu1 %v14287_v11  ;;  %v14375_v10 = vld [vmem:[#allocation7 + $0xa28] ss:$16 sps:$4 sm:$0xff]   ;;  %v14383_v11 = vld [vmem:[#allocation7 + $0xa44] ss:$16 sps:$4 sm:$0xff]  }
 0x15d   :  { %5054 = vmatprep.mubr.bf16.mxu0 %v14288_v12  ;;  %6184 = vmatprep.mubr.bf16.mxu1 %v14288_v12  ;;  %v14386_v12 = vld [vmem:[#allocation7 + $0xa4c] ss:$16 sps:$4 sm:$0xff]  }
 0x15f   :  { %5116 = vmatpush1.bf16.msra.mxu0 %v14282_v13  ;;  %6246 = vmatpush1.bf16.msra.mxu1 %v14285_v14  ;;  %v14380_v13 = vld [vmem:[%s18619_s0 + $0xb8] ss:$76 sps:$4 sm:$0xff]   ;;  %v14381_v14 = vld [vmem:[#allocation7 + $0xa40] ss:$16 sps:$4 sm:$0xff]  }
 0x160   :  { %5117 = vmatprep.subr.bf16.mxu0 %v14293_v15  ;;  %6247 = vmatprep.subr.bf16.mxu1 %v14296_v16  ;;  %v14384_v15 = vld [vmem:[#allocation7 + $0xa48] ss:$16 sps:$4 sm:$0xff]   ;;  %v14389_v16 = vld [vmem:[#allocation7 + $0xa64] ss:$16 sps:$4 sm:$0xff]  }
 0x162   :  { %5055 = vmatmul.mubr.bf16.gmra.mrb[12].mxu0 %v14290_v17  ;;  %6185 = vmatmul.mubr.bf16.gmra.mrb[12].mxu1 %v14290_v17  ;;  %v14392_v17 = vld [vmem:[#allocation7 + $0xa6c] ss:$16 sps:$4 sm:$0xff]  }
 0x163   :  { %5118 = vmatpush1.bf16.msra.mxu0 %v14291_v18  ;;  %6248 = vmatpush1.bf16.msra.mxu1 %v14294_v19  ;;  %v14393_v18 = vld [vmem:[%s18619_s0 + $0x154] ss:$76 sps:$4 sm:$0xff]  }
 0x164   :  { %5119 = vmatprep.subr.bf16.mxu0 %v14299_v20  ;;  %6249 = vmatprep.subr.bf16.mxu1 %v14302_v21  ;;  %v14387_v19 = vld [vmem:[#allocation7 + $0xa60] ss:$16 sps:$4 sm:$0xff]   ;;  %v14390_v20 = vld [vmem:[#allocation7 + $0xa68] ss:$16 sps:$4 sm:$0xff]   ;;  %v14398_v21 = vld [vmem:[#allocation7 + $0xa84] ss:$16 sps:$4 sm:$0xff]  }
 0x165   :  { %5064 = vmatprep.mubr.bf16.mxu0 %v14303_v22  ;;  %6194 = vmatprep.mubr.bf16.mxu1 %v14303_v22  ;;  %v14401_v22 = vld [vmem:[#allocation7 + $0xa8c] ss:$16 sps:$4 sm:$0xff]  }
 0x167   :  { %5120 = vmatpush1.bf16.msra.mxu0 %v14297_v23  ;;  %6250 = vmatpush1.bf16.msra.mxu1 %v14300_v24  ;;  %v14395_v24 = vld [vmem:[%s18619_s0 + $0x150] ss:$76 sps:$4 sm:$0xff]  }
 0x168   :  { %5121 = vmatprep.subr.bf16.mxu0 %v14308_v25  ;;  %6251 = vmatprep.subr.bf16.mxu1 %v14311_v26 }
 0x16a   :  { %5065 = vmatmul.mubr.bf16.gmra.mrb[16].mxu0 %v14305_v27  ;;  %6195 = vmatmul.mubr.bf16.gmra.mrb[16].mxu1 %v14305_v27  ;;  %v14396_v27 = vld [vmem:[#allocation7 + $0xa80] ss:$16 sps:$4 sm:$0xff]  }
 0x16b   :  { %5122 = vmatpush1.bf16.msra.mxu0 %v14306_v28  ;;  %6252 = vmatpush1.bf16.msra.mxu1 %v14309_v29 }
 0x16c   :  { %5123 = vmatprep.subr.bf16.mxu0 %v14314_v30  ;;  %6253 = vmatprep.subr.bf16.mxu1 %v14317_v31  ;;  %v14399_v30 = vld [vmem:[#allocation7 + $0xa88] ss:$16 sps:$4 sm:$0xff]  }
 0x16d   :  { %5074 = vmatprep.mubr.bf16.mxu0 %v14318_v32  ;;  %6204 = vmatprep.mubr.bf16.mxu1 %v14318_v32 }
 0x16f   :  { %5124 = vmatpush1.bf16.msra.mxu0 %v14312_v33  ;;  %6254 = vmatpush1.bf16.msra.mxu1 %v14315_v34  ;;  %v14404_v33 = vld [vmem:[#allocation7 + $0xaa4] ss:$16 sps:$4 sm:$0xff]   ;;  %v14407_v34 = vld [vmem:[#allocation7 + $0xaac] ss:$16 sps:$4 sm:$0xff]  }
 0x170   :  { %5125 = vmatprep.subr.bf16.mxu0 %v14323_v35  ;;  %6255 = vmatprep.subr.bf16.mxu1 %v14326_v36  ;;  %v14408_v36 = vld [vmem:[%s18619_s0 + $0x1ec] ss:$76 sps:$4 sm:$0xff]  }
 0x172   :  { %5075 = vmatmul.mubr.bf16.gmra.mrb[20].mxu0 %v14320_v37  ;;  %6205 = vmatmul.mubr.bf16.gmra.mrb[20].mxu1 %v14320_v37  ;;  %v14402_v37 = vld [vmem:[#allocation7 + $0xaa0] ss:$16 sps:$4 sm:$0xff]  }
 0x173   :  { %5126 = vmatpush1.bf16.msra.mxu0 %v14321_v38  ;;  %6256 = vmatpush1.bf16.msra.mxu1 %v14324_v39  ;;  %v14405_v38 = vld [vmem:[#allocation7 + $0xaa8] ss:$16 sps:$4 sm:$0xff]   ;;  %v14413_v39 = vld [vmem:[#allocation7 + $0xac4] ss:$16 sps:$4 sm:$0xff]  }
 0x174   :  { %5127 = vmatprep.subr.bf16.mxu0 %v14329_v40  ;;  %6257 = vmatprep.subr.bf16.mxu1 %v14332_v41  ;;  %v14416_v40 = vld [vmem:[#allocation7 + $0xacc] ss:$16 sps:$4 sm:$0xff]   ;;  %v14410_v41 = vld [vmem:[%s18619_s0 + $0x1e8] ss:$76 sps:$4 sm:$0xff]  }
 0x175   :  { %5084 = vmatprep.mubr.bf16.mxu0 %v14333_v42  ;;  %6214 = vmatprep.mubr.bf16.mxu1 %v14333_v42  ;;  %v14411_v42 = vld [vmem:[#allocation7 + $0xac0] ss:$16 sps:$4 sm:$0xff]  }
 0x177   :  { %5128 = vmatpush1.bf16.msra.mxu0 %v14327_v43  ;;  %6258 = vmatpush1.bf16.msra.mxu1 %v14330_v44  ;;  %v14414_v43 = vld [vmem:[#allocation7 + $0xac8] ss:$16 sps:$4 sm:$0xff]   ;;  %v14419_v44 = vld [vmem:[#allocation7 + $0xae4] ss:$16 sps:$4 sm:$0xff]  }
 0x178   :  { %5129 = vmatprep.subr.bf16.mxu0 %v14338_v45  ;;  %6259 = vmatprep.subr.bf16.mxu1 %v14341_v46  ;;  %v14422_v45 = vld [vmem:[#allocation7 + $0xaec] ss:$16 sps:$4 sm:$0xff]   ;;  %v14423_v46 = vld [vmem:[%s18619_s0 + $0x284] ss:$76 sps:$4 sm:$0xff]  }
 0x17a   :  { %5085 = vmatmul.mubr.bf16.gmra.mrb[24].mxu0 %v14335_v47  ;;  %6215 = vmatmul.mubr.bf16.gmra.mrb[24].mxu1 %v14335_v47  ;;  %v14417_v47 = vld [vmem:[#allocation7 + $0xae0] ss:$16 sps:$4 sm:$0xff]  }
 0x17b   :  { %5130 = vmatpush1.bf16.msra.mxu0 %v14336_v48  ;;  %6260 = vmatpush1.bf16.msra.mxu1 %v14339_v49  ;;  %v14420_v48 = vld [vmem:[#allocation7 + $0xae8] ss:$16 sps:$4 sm:$0xff]   ;;  %v14428_v49 = vld [vmem:[#allocation7 + $0xb04] ss:$16 sps:$4 sm:$0xff]  }
 0x17c   :  { %5131 = vmatprep.subr.bf16.mxu0 %v14344_v50  ;;  %6261 = vmatprep.subr.bf16.mxu1 %v14347_v51  ;;  %v14431_v50 = vld [vmem:[#allocation7 + $0xb0c] ss:$16 sps:$4 sm:$0xff]  }
 0x17d   :  { %5094 = vmatprep.mubr.bf16.mxu0 %v14348_v52  ;;  %6224 = vmatprep.mubr.bf16.mxu1 %v14348_v52  ;;  %v14425_v51 = vld [vmem:[%s18619_s0 + $0x280] ss:$76 sps:$4 sm:$0xff]  }
 0x17e   :  { %v14426_v52 = vld [vmem:[#allocation7 + $0xb00] ss:$16 sps:$4 sm:$0xff]  }
 0x17f   :  { %5132 = vmatpush1.bf16.msra.mxu0 %v14342_v53  ;;  %6262 = vmatpush1.bf16.msra.mxu1 %v14345_v54  ;;  %v14429_v53 = vld [vmem:[#allocation7 + $0xb08] ss:$16 sps:$4 sm:$0xff]   ;;  %v14434_v54 = vld [vmem:[#allocation7 + $0xb24] ss:$16 sps:$4 sm:$0xff]  }
 0x180   :  { %5133 = vmatprep.subr.bf16.mxu0 %v14353_v55  ;;  %6263 = vmatprep.subr.bf16.mxu1 %v14356_v56  ;;  %v14437_v55 = vld [vmem:[#allocation7 + $0xb2c] ss:$16 sps:$4 sm:$0xff]  }
 0x181   :  { %v14438_v56 = vld [vmem:[%s18619_s0 + $0x31c] ss:$76 sps:$4 sm:$0xff]  }
 0x182   :  { %5095 = vmatmul.mubr.bf16.gmra.mrb[40].mxu0 %v14350_v57  ;;  %6225 = vmatmul.mubr.bf16.gmra.mrb[40].mxu1 %v14350_v57  ;;  %v14432_v57 = vld [vmem:[#allocation7 + $0xb20] ss:$16 sps:$4 sm:$0xff]  }
 0x183   :  { %5134 = vmatpush1.bf16.msra.mxu0 %v14351_v58  ;;  %6264 = vmatpush1.bf16.msra.mxu1 %v14354_v59  ;;  %v14435_v58 = vld [vmem:[#allocation7 + $0xb28] ss:$16 sps:$4 sm:$0xff]   ;;  %v14443_v59 = vld [vmem:[#allocation7 + $0xb44] ss:$16 sps:$4 sm:$0xff]  }
 0x184   :  { %5135 = vmatprep.subr.bf16.mxu0 %v14359_v60  ;;  %6265 = vmatprep.subr.bf16.mxu1 %v14362_v61  ;;  %v14446_v60 = vld [vmem:[#allocation7 + $0xb4c] ss:$16 sps:$4 sm:$0xff]   ;;  %v14440_v61 = vld [vmem:[%s18619_s0 + $0x318] ss:$76 sps:$4 sm:$0xff]  }
 0x185   :  { %5137 = vmatprep.mubr.bf16.mxu0 %v14365_v62  ;;  %6267 = vmatprep.mubr.bf16.mxu1 %v14365_v62  ;;  %v14441_v62 = vld [vmem:[#allocation7 + $0xb40] ss:$16 sps:$4 sm:$0xff]  }
 0x187   :  { %5136 = vmatpush1.bf16.msra.mxu0 %v14357_v63  ;;  %6266 = vmatpush1.bf16.msra.mxu1 %v14360_v0  ;;  %v14444_v63 = vld [vmem:[#allocation7 + $0xb48] ss:$16 sps:$4 sm:$0xff]   ;;  %v14449_v0 = vld [vmem:[#allocation7 + $0xb64] ss:$16 sps:$4 sm:$0xff]  }
 0x188   :  { %5218 = vmatprep.subr.bf16.mxu0 %v14368_v1  ;;  %6348 = vmatprep.subr.bf16.mxu1 %v14371_v2  ;;  %v14452_v1 = vld [vmem:[#allocation7 + $0xb6c] ss:$16 sps:$4 sm:$0xff]   ;;  %v14453_v2 = vld [vmem:[%s18619_s0 + $0x3b4] ss:$76 sps:$4 sm:$0xff]  }
 0x18a   :  { %5138 = vmatmul.mubr.bf16.vlgmr.msra.gmra.mrb[0].mxu0 %v14363_v3  ;;  %6268 = vmatmul.mubr.bf16.vlgmr.msra.gmra.mrb[0].mxu1 %v14363_v3  ;;  %v14447_v3 = vld [vmem:[#allocation7 + $0xb60] ss:$16 sps:$4 sm:$0xff]  }
 0x18b   :  { %5219 = vmatpush1.bf16.msra.mxu0 %v14366_v4  ;;  %6349 = vmatpush1.bf16.msra.mxu1 %v14369_v5  ;;  %v14450_v4 = vld [vmem:[#allocation7 + $0xb68] ss:$16 sps:$4 sm:$0xff]   ;;  %v14458_v5 = vld [vmem:[#allocation7 + $0xb84] ss:$16 sps:$4 sm:$0xff]  }
 0x18c   :  { %5220 = vmatprep.subr.bf16.mxu0 %v14374_v6  ;;  %6350 = vmatprep.subr.bf16.mxu1 %v14377_v7  ;;  %v14461_v6 = vld [vmem:[#allocation7 + $0xb8c] ss:$16 sps:$4 sm:$0xff]  }
 0x18d   :  { %5147 = vmatprep.mubr.bf16.mxu0 %v14378_v8  ;;  %6277 = vmatprep.mubr.bf16.mxu1 %v14378_v8  ;;  %v14455_v7 = vld [vmem:[%s18619_s0 + $0x3b0] ss:$76 sps:$4 sm:$0xff]  }
 0x18e   :  { %v14456_v8 = vld [vmem:[#allocation7 + $0xb80] ss:$16 sps:$4 sm:$0xff]  }
 0x18f   :  { %5221 = vmatpush1.bf16.msra.mxu0 %v14372_v9  ;;  %6351 = vmatpush1.bf16.msra.mxu1 %v14375_v10  ;;  %v14459_v9 = vld [vmem:[#allocation7 + $0xb88] ss:$16 sps:$4 sm:$0xff]   ;;  %v14464_v10 = vld [vmem:[#allocation7 + $0xba4] ss:$16 sps:$4 sm:$0xff]  }
 0x190   :  { %5222 = vmatprep.subr.bf16.mxu0 %v14383_v11  ;;  %6352 = vmatprep.subr.bf16.mxu1 %v14386_v12  ;;  %v14467_v11 = vld [vmem:[#allocation7 + $0xbac] ss:$16 sps:$4 sm:$0xff]  }
 0x191   :  { %v14468_v12 = vld [vmem:[%s18619_s0 + $0x44c] ss:$76 sps:$4 sm:$0xff]  }
 0x192   :  { %5148 = vmatmul.mubr.bf16.gmra.mrb[4].mxu0 %v14380_v13  ;;  %6278 = vmatmul.mubr.bf16.gmra.mrb[4].mxu1 %v14380_v13  ;;  %v14462_v13 = vld [vmem:[#allocation7 + $0xba0] ss:$16 sps:$4 sm:$0xff]  }
 0x193   :  { %5223 = vmatpush1.bf16.msra.mxu0 %v14381_v14  ;;  %6353 = vmatpush1.bf16.msra.mxu1 %v14384_v15  ;;  %v14465_v14 = vld [vmem:[#allocation7 + $0xba8] ss:$16 sps:$4 sm:$0xff]   ;;  %v14473_v15 = vld [vmem:[#allocation7 + $0xbc4] ss:$16 sps:$4 sm:$0xff]  }
 0x194   :  { %5224 = vmatprep.subr.bf16.mxu0 %v14389_v16  ;;  %6354 = vmatprep.subr.bf16.mxu1 %v14392_v17  ;;  %v14476_v16 = vld [vmem:[#allocation7 + $0xbcc] ss:$16 sps:$4 sm:$0xff]   ;;  %v14470_v17 = vld [vmem:[%s18619_s0 + $0x448] ss:$76 sps:$4 sm:$0xff]  }
 0x195   :  { %v4757_v23 = vpop.f32.mrb[28].mxu0  ;;  %5157 = vmatprep.mubr.bf16.mxu0 %v14393_v18  ;;  %6287 = vmatprep.mubr.bf16.mxu1 %v14393_v18  ;;  %v5887_v25 = vpop.f32.mrb[28].mxu1  ;;  %v14471_v18 = vld [vmem:[#allocation7 + $0xbc0] ss:$16 sps:$4 sm:$0xff]  }
 0x196   :  { %v4759_v26 = vpop.f32.mrb[29].mxu0  ;;  %v5889_v28 = vpop.f32.mrb[29].mxu1  ;;  %v14477_v23 = vld [vmem:[#allocation7 + $0xbe0] ss:$16 sps:$4 sm:$0xff]   ;;  %v14488_v25 = vld [vmem:[#allocation7 + $0xc04] ss:$16 sps:$4 sm:$0xff]  }
 0x197   :  { %v4761_v29 = vpop.f32.mrb[30].mxu0  ;;  %5225 = vmatpush1.bf16.msra.mxu0 %v14387_v19  ;;  %6355 = vmatpush1.bf16.msra.mxu1 %v14390_v20  ;;  %v5891_v31 = vpop.f32.mrb[30].mxu1  ;;  %v14474_v19 = vld [vmem:[#allocation7 + $0xbc8] ss:$16 sps:$4 sm:$0xff]   ;;  %v14479_v20 = vld [vmem:[#allocation7 + $0xbe4] ss:$16 sps:$4 sm:$0xff]  }
 0x198   :  { %v4763_v32 = vpop.f32.mrb[31].mxu0  ;;  %5226 = vmatprep.subr.bf16.mxu0 %v14398_v21  ;;  %6356 = vmatprep.subr.bf16.mxu1 %v14401_v22  ;;  %v5893_v35 = vpop.f32.mrb[31].mxu1  ;;  %v14482_v21 = vld [vmem:[#allocation7 + $0xbec] ss:$16 sps:$4 sm:$0xff]   ;;  %v14486_v28 = vld [vmem:[#allocation7 + $0xc00] ss:$16 sps:$4 sm:$0xff]  }
 0x199   :  { %v14485_v22 = vld [vmem:[%s18619_s0 + $0x2c] ss:$76 sps:$4 sm:$0xff]   ;;  %v14498_v32 = vld [vmem:[%s18619_s0 + $0xc4] ss:$76 sps:$4 sm:$0xff]  }
 0x19a   :  { %5158 = vmatmul.mubr.bf16.gmra.mrb[8].mxu0 %v14395_v24  ;;  %6288 = vmatmul.mubr.bf16.gmra.mrb[8].mxu1 %v14395_v24  ;;  %v14480_v24 = vld [vmem:[#allocation7 + $0xbe8] ss:$16 sps:$4 sm:$0xff]   ;;  %v14491_v26 = vld [vmem:[#allocation7 + $0xc0c] ss:$16 sps:$4 sm:$0xff]   ;;  %v14503_v35 = vld [vmem:[#allocation7 + $0xc44] ss:$16 sps:$4 sm:$0xff]  }
 0x19b   :  { %5227 = vmatpush1.bf16.msra.mxu0 %v14396_v27  ;;  %6357 = vmatpush1.bf16.msra.mxu1 %v14399_v30  ;;  %v14483_v27 = vld [vmem:[%s18619_s0 + $0x28] ss:$76 sps:$4 sm:$0xff]   ;;  %v14497_v31 = vld [vmem:[#allocation7 + $0xc2c] ss:$16 sps:$4 sm:$0xff]  }
 0x19c   :  { %5228 = vmatprep.subr.bf16.mxu0 %v14404_v33  ;;  %6358 = vmatprep.subr.bf16.mxu1 %v14407_v34  ;;  %v14489_v29 = vld [vmem:[#allocation7 + $0xc08] ss:$16 sps:$4 sm:$0xff]   ;;  %v14494_v30 = vld [vmem:[#allocation7 + $0xc24] ss:$16 sps:$4 sm:$0xff]   ;;  %v14492_v33 = vld [vmem:[#allocation7 + $0xc20] ss:$16 sps:$4 sm:$0xff]  }
 0x19d   :  { %5167 = vmatprep.mubr.bf16.mxu0 %v14408_v36  ;;  %6297 = vmatprep.mubr.bf16.mxu1 %v14408_v36  ;;  %v14495_v34 = vld [vmem:[#allocation7 + $0xc28] ss:$16 sps:$4 sm:$0xff]   ;;  %v14506_v36 = vld [vmem:[#allocation7 + $0xc4c] ss:$16 sps:$4 sm:$0xff]  }
 0x19f   :  { %5229 = vmatpush1.bf16.msra.mxu0 %v14402_v37  ;;  %6359 = vmatpush1.bf16.msra.mxu1 %v14405_v38  ;;  %v14500_v37 = vld [vmem:[%s18619_s0 + $0xc0] ss:$76 sps:$4 sm:$0xff]  }
 0x1a0   :  { %5230 = vmatprep.subr.bf16.mxu0 %v14413_v39  ;;  %6360 = vmatprep.subr.bf16.mxu1 %v14416_v40  ;;  %v14501_v38 = vld [vmem:[#allocation7 + $0xc40] ss:$16 sps:$4 sm:$0xff]   ;;  %v14504_v39 = vld [vmem:[#allocation7 + $0xc48] ss:$16 sps:$4 sm:$0xff]   ;;  %v14509_v40 = vld [vmem:[#allocation7 + $0xc64] ss:$16 sps:$4 sm:$0xff]  }
 0x1a2   :  { %5168 = vmatmul.mubr.bf16.gmra.mrb[12].mxu0 %v14410_v41  ;;  %6298 = vmatmul.mubr.bf16.gmra.mrb[12].mxu1 %v14410_v41  ;;  %v14512_v41 = vld [vmem:[#allocation7 + $0xc6c] ss:$16 sps:$4 sm:$0xff]  }
 0x1a3   :  { %5231 = vmatpush1.bf16.msra.mxu0 %v14411_v42  ;;  %6361 = vmatpush1.bf16.msra.mxu1 %v14414_v43  ;;  %v14513_v42 = vld [vmem:[%s18619_s0 + $0x15c] ss:$76 sps:$4 sm:$0xff]   ;;  %v14507_v43 = vld [vmem:[#allocation7 + $0xc60] ss:$16 sps:$4 sm:$0xff]  }
 0x1a4   :  { %5232 = vmatprep.subr.bf16.mxu0 %v14419_v44  ;;  %6362 = vmatprep.subr.bf16.mxu1 %v14422_v45  ;;  %v14510_v44 = vld [vmem:[#allocation7 + $0xc68] ss:$16 sps:$4 sm:$0xff]   ;;  %v14518_v45 = vld [vmem:[#allocation7 + $0xc84] ss:$16 sps:$4 sm:$0xff]  }
 0x1a5   :  { %5177 = vmatprep.mubr.bf16.mxu0 %v14423_v46  ;;  %6307 = vmatprep.mubr.bf16.mxu1 %v14423_v46  ;;  %v14521_v46 = vld [vmem:[#allocation7 + $0xc8c] ss:$16 sps:$4 sm:$0xff]  }
 0x1a7   :  { %5233 = vmatpush1.bf16.msra.mxu0 %v14417_v47  ;;  %6363 = vmatpush1.bf16.msra.mxu1 %v14420_v48  ;;  %v14515_v48 = vld [vmem:[%s18619_s0 + $0x158] ss:$76 sps:$4 sm:$0xff]  }
 0x1a8   :  { %5234 = vmatprep.subr.bf16.mxu0 %v14428_v49  ;;  %6364 = vmatprep.subr.bf16.mxu1 %v14431_v50 }
 0x1aa   :  { %5178 = vmatmul.mubr.bf16.gmra.mrb[16].mxu0 %v14425_v51  ;;  %6308 = vmatmul.mubr.bf16.gmra.mrb[16].mxu1 %v14425_v51  ;;  %v14516_v51 = vld [vmem:[#allocation7 + $0xc80] ss:$16 sps:$4 sm:$0xff]  }
 0x1ab   :  { %5235 = vmatpush1.bf16.msra.mxu0 %v14426_v52  ;;  %6365 = vmatpush1.bf16.msra.mxu1 %v14429_v53 }
 0x1ac   :  { %5236 = vmatprep.subr.bf16.mxu0 %v14434_v54  ;;  %6366 = vmatprep.subr.bf16.mxu1 %v14437_v55  ;;  %v14519_v54 = vld [vmem:[#allocation7 + $0xc88] ss:$16 sps:$4 sm:$0xff]   ;;  %v14524_v55 = vld [vmem:[#allocation7 + $0xca4] ss:$16 sps:$4 sm:$0xff]  }
 0x1ad   :  { %5187 = vmatprep.mubr.bf16.mxu0 %v14438_v56  ;;  %6317 = vmatprep.mubr.bf16.mxu1 %v14438_v56 }
 0x1af   :  { %5237 = vmatpush1.bf16.msra.mxu0 %v14432_v57  ;;  %6367 = vmatpush1.bf16.msra.mxu1 %v14435_v58  ;;  %v14527_v58 = vld [vmem:[#allocation7 + $0xcac] ss:$16 sps:$4 sm:$0xff]  }
 0x1b0   :  { %5238 = vmatprep.subr.bf16.mxu0 %v14443_v59  ;;  %6368 = vmatprep.subr.bf16.mxu1 %v14446_v60  ;;  %v14528_v60 = vld [vmem:[%s18619_s0 + $0x1f4] ss:$76 sps:$4 sm:$0xff]  }
 0x1b2   :  { %5188 = vmatmul.mubr.bf16.gmra.mrb[20].mxu0 %v14440_v61  ;;  %6318 = vmatmul.mubr.bf16.gmra.mrb[20].mxu1 %v14440_v61  ;;  %v14522_v61 = vld [vmem:[#allocation7 + $0xca0] ss:$16 sps:$4 sm:$0xff]  }
 0x1b3   :  { %5239 = vmatpush1.bf16.msra.mxu0 %v14441_v62  ;;  %6369 = vmatpush1.bf16.msra.mxu1 %v14444_v63  ;;  %v14525_v62 = vld [vmem:[#allocation7 + $0xca8] ss:$16 sps:$4 sm:$0xff]   ;;  %v14533_v63 = vld [vmem:[#allocation7 + $0xcc4] ss:$16 sps:$4 sm:$0xff]  }
 0x1b4   :  { %5240 = vmatprep.subr.bf16.mxu0 %v14449_v0  ;;  %6370 = vmatprep.subr.bf16.mxu1 %v14452_v1  ;;  %v14536_v0 = vld [vmem:[#allocation7 + $0xccc] ss:$16 sps:$4 sm:$0xff]  }
 0x1b5   :  { %5197 = vmatprep.mubr.bf16.mxu0 %v14453_v2  ;;  %6327 = vmatprep.mubr.bf16.mxu1 %v14453_v2  ;;  %v14530_v1 = vld [vmem:[%s18619_s0 + $0x1f0] ss:$76 sps:$4 sm:$0xff]  }
 0x1b6   :  { %v14531_v2 = vld [vmem:[#allocation7 + $0xcc0] ss:$16 sps:$4 sm:$0xff]  }
 0x1b7   :  { %5241 = vmatpush1.bf16.msra.mxu0 %v14447_v3  ;;  %6371 = vmatpush1.bf16.msra.mxu1 %v14450_v4  ;;  %v14534_v3 = vld [vmem:[#allocation7 + $0xcc8] ss:$16 sps:$4 sm:$0xff]   ;;  %v14539_v4 = vld [vmem:[#allocation7 + $0xce4] ss:$16 sps:$4 sm:$0xff]  }
 0x1b8   :  { %5242 = vmatprep.subr.bf16.mxu0 %v14458_v5  ;;  %6372 = vmatprep.subr.bf16.mxu1 %v14461_v6  ;;  %v14542_v5 = vld [vmem:[#allocation7 + $0xcec] ss:$16 sps:$4 sm:$0xff]  }
 0x1b9   :  { %v14543_v6 = vld [vmem:[%s18619_s0 + $0x28c] ss:$76 sps:$4 sm:$0xff]  }
 0x1ba   :  { %5198 = vmatmul.mubr.bf16.gmra.mrb[24].mxu0 %v14455_v7  ;;  %6328 = vmatmul.mubr.bf16.gmra.mrb[24].mxu1 %v14455_v7  ;;  %v14537_v7 = vld [vmem:[#allocation7 + $0xce0] ss:$16 sps:$4 sm:$0xff]  }
 0x1bb   :  { %5243 = vmatpush1.bf16.msra.mxu0 %v14456_v8  ;;  %6373 = vmatpush1.bf16.msra.mxu1 %v14459_v9  ;;  %v14540_v8 = vld [vmem:[#allocation7 + $0xce8] ss:$16 sps:$4 sm:$0xff]   ;;  %v14548_v9 = vld [vmem:[#allocation7 + $0xd04] ss:$16 sps:$4 sm:$0xff]  }
 0x1bc   :  { %5244 = vmatprep.subr.bf16.mxu0 %v14464_v10  ;;  %6374 = vmatprep.subr.bf16.mxu1 %v14467_v11  ;;  %v14551_v10 = vld [vmem:[#allocation7 + $0xd0c] ss:$16 sps:$4 sm:$0xff]   ;;  %v14545_v11 = vld [vmem:[%s18619_s0 + $0x288] ss:$76 sps:$4 sm:$0xff]  }
 0x1bd   :  { %5207 = vmatprep.mubr.bf16.mxu0 %v14468_v12  ;;  %6337 = vmatprep.mubr.bf16.mxu1 %v14468_v12  ;;  %v14546_v12 = vld [vmem:[#allocation7 + $0xd00] ss:$16 sps:$4 sm:$0xff]  }
 0x1bf   :  { %5245 = vmatpush1.bf16.msra.mxu0 %v14462_v13  ;;  %6375 = vmatpush1.bf16.msra.mxu1 %v14465_v14  ;;  %v14549_v13 = vld [vmem:[#allocation7 + $0xd08] ss:$16 sps:$4 sm:$0xff]   ;;  %v14554_v14 = vld [vmem:[#allocation7 + $0xd24] ss:$16 sps:$4 sm:$0xff]  }
 0x1c0   :  { %5246 = vmatprep.subr.bf16.mxu0 %v14473_v15  ;;  %6376 = vmatprep.subr.bf16.mxu1 %v14476_v16  ;;  %v14557_v15 = vld [vmem:[#allocation7 + $0xd2c] ss:$16 sps:$4 sm:$0xff]   ;;  %v14558_v16 = vld [vmem:[%s18619_s0 + $0x324] ss:$76 sps:$4 sm:$0xff]  }
 0x1c2   :  { %5208 = vmatmul.mubr.bf16.gmra.mrb[44].mxu0 %v14470_v17  ;;  %6338 = vmatmul.mubr.bf16.gmra.mrb[44].mxu1 %v14470_v17  ;;  %v14552_v17 = vld [vmem:[#allocation7 + $0xd20] ss:$16 sps:$4 sm:$0xff]  }
 0x1c3   :  { %5247 = vmatpush1.bf16.msra.mxu0 %v14471_v18  ;;  %6377 = vmatpush1.bf16.msra.mxu1 %v14474_v19  ;;  %v14555_v18 = vld [vmem:[#allocation7 + $0xd28] ss:$16 sps:$4 sm:$0xff]   ;;  %v14563_v19 = vld [vmem:[#allocation7 + $0xd44] ss:$16 sps:$4 sm:$0xff]  }
 0x1c4   :  { %5248 = vmatprep.subr.bf16.mxu0 %v14479_v20  ;;  %6378 = vmatprep.subr.bf16.mxu1 %v14482_v21  ;;  %v14566_v20 = vld [vmem:[#allocation7 + $0xd4c] ss:$16 sps:$4 sm:$0xff]  }
 0x1c5   :  { %5250 = vmatprep.mubr.bf16.mxu0 %v14485_v22  ;;  %6380 = vmatprep.mubr.bf16.mxu1 %v14485_v22  ;;  %v14560_v21 = vld [vmem:[%s18619_s0 + $0x320] ss:$76 sps:$4 sm:$0xff]  }
 0x1c6   :  { %v14561_v22 = vld [vmem:[#allocation7 + $0xd40] ss:$16 sps:$4 sm:$0xff]  }
 0x1c7   :  { %5249 = vmatpush1.bf16.msra.mxu0 %v14477_v23  ;;  %6379 = vmatpush1.bf16.msra.mxu1 %v14480_v24  ;;  %v14564_v23 = vld [vmem:[#allocation7 + $0xd48] ss:$16 sps:$4 sm:$0xff]   ;;  %v14569_v24 = vld [vmem:[#allocation7 + $0xd64] ss:$16 sps:$4 sm:$0xff]  }
 0x1c8   :  { %5331 = vmatprep.subr.bf16.mxu0 %v14488_v25  ;;  %6461 = vmatprep.subr.bf16.mxu1 %v14491_v26  ;;  %v14572_v25 = vld [vmem:[#allocation7 + $0xd6c] ss:$16 sps:$4 sm:$0xff]  }
 0x1c9   :  { %v14573_v26 = vld [vmem:[%s18619_s0 + $0x3bc] ss:$76 sps:$4 sm:$0xff]  }
 0x1ca   :  { %5251 = vmatmul.mubr.bf16.vlgmr.msra.gmra.mrb[0].mxu0 %v14483_v27  ;;  %6381 = vmatmul.mubr.bf16.vlgmr.msra.gmra.mrb[0].mxu1 %v14483_v27  ;;  %v14567_v27 = vld [vmem:[#allocation7 + $0xd60] ss:$16 sps:$4 sm:$0xff]  }
 0x1cb   :  { %5332 = vmatpush1.bf16.msra.mxu0 %v14486_v28  ;;  %6462 = vmatpush1.bf16.msra.mxu1 %v14489_v29  ;;  %v14570_v28 = vld [vmem:[#allocation7 + $0xd68] ss:$16 sps:$4 sm:$0xff]   ;;  %v14578_v29 = vld [vmem:[#allocation7 + $0xd84] ss:$16 sps:$4 sm:$0xff]  }
 0x1cc   :  { %5333 = vmatprep.subr.bf16.mxu0 %v14494_v30  ;;  %6463 = vmatprep.subr.bf16.mxu1 %v14497_v31  ;;  %v14581_v30 = vld [vmem:[#allocation7 + $0xd8c] ss:$16 sps:$4 sm:$0xff]   ;;  %v14575_v31 = vld [vmem:[%s18619_s0 + $0x3b8] ss:$76 sps:$4 sm:$0xff]  }
 0x1cd   :  { %5260 = vmatprep.mubr.bf16.mxu0 %v14498_v32  ;;  %6390 = vmatprep.mubr.bf16.mxu1 %v14498_v32  ;;  %v14576_v32 = vld [vmem:[#allocation7 + $0xd80] ss:$16 sps:$4 sm:$0xff]  }
 0x1cf   :  { %5334 = vmatpush1.bf16.msra.mxu0 %v14492_v33  ;;  %6464 = vmatpush1.bf16.msra.mxu1 %v14495_v34  ;;  %v14579_v33 = vld [vmem:[#allocation7 + $0xd88] ss:$16 sps:$4 sm:$0xff]   ;;  %v14584_v34 = vld [vmem:[#allocation7 + $0xda4] ss:$16 sps:$4 sm:$0xff]  }
 0x1d0   :  { %5335 = vmatprep.subr.bf16.mxu0 %v14503_v35  ;;  %6465 = vmatprep.subr.bf16.mxu1 %v14506_v36  ;;  %v14587_v35 = vld [vmem:[#allocation7 + $0xdac] ss:$16 sps:$4 sm:$0xff]   ;;  %v14588_v36 = vld [vmem:[%s18619_s0 + $0x454] ss:$76 sps:$4 sm:$0xff]  }
 0x1d2   :  { %5261 = vmatmul.mubr.bf16.gmra.mrb[4].mxu0 %v14500_v37  ;;  %6391 = vmatmul.mubr.bf16.gmra.mrb[4].mxu1 %v14500_v37  ;;  %v14582_v37 = vld [vmem:[#allocation7 + $0xda0] ss:$16 sps:$4 sm:$0xff]  }
 0x1d3   :  { %5336 = vmatpush1.bf16.msra.mxu0 %v14501_v38  ;;  %6466 = vmatpush1.bf16.msra.mxu1 %v14504_v39  ;;  %v14585_v38 = vld [vmem:[#allocation7 + $0xda8] ss:$16 sps:$4 sm:$0xff]   ;;  %v14593_v39 = vld [vmem:[#allocation7 + $0xdc4] ss:$16 sps:$4 sm:$0xff]  }
 0x1d4   :  { %5337 = vmatprep.subr.bf16.mxu0 %v14509_v40  ;;  %6467 = vmatprep.subr.bf16.mxu1 %v14512_v41  ;;  %v14596_v40 = vld [vmem:[#allocation7 + $0xdcc] ss:$16 sps:$4 sm:$0xff]  }
 0x1d5   :  { %v4870_v47 = vpop.f32.mrb[32].mxu0  ;;  %5270 = vmatprep.mubr.bf16.mxu0 %v14513_v42  ;;  %6400 = vmatprep.mubr.bf16.mxu1 %v14513_v42  ;;  %v6000_v49 = vpop.f32.mrb[32].mxu1  ;;  %v14590_v41 = vld [vmem:[%s18619_s0 + $0x450] ss:$76 sps:$4 sm:$0xff]  }
 0x1d6   :  { %v4872_v50 = vpop.f32.mrb[33].mxu0  ;;  %v6002_v52 = vpop.f32.mrb[33].mxu1  ;;  %v14591_v42 = vld [vmem:[#allocation7 + $0xdc0] ss:$16 sps:$4 sm:$0xff]   ;;  %v14608_v49 = vld [vmem:[#allocation7 + $0xe04] ss:$16 sps:$4 sm:$0xff]  }
 0x1d7   :  { %v4874_v53 = vpop.f32.mrb[34].mxu0  ;;  %5338 = vmatpush1.bf16.msra.mxu0 %v14507_v43  ;;  %6468 = vmatpush1.bf16.msra.mxu1 %v14510_v44  ;;  %v6004_v56 = vpop.f32.mrb[34].mxu1  ;;  %v14594_v43 = vld [vmem:[#allocation7 + $0xdc8] ss:$16 sps:$4 sm:$0xff]   ;;  %v14599_v44 = vld [vmem:[#allocation7 + $0xde4] ss:$16 sps:$4 sm:$0xff]  }
 0x1d8   :  { %v4876_v57 = vpop.f32.mrb[35].mxu0  ;;  %5339 = vmatprep.subr.bf16.mxu0 %v14518_v45  ;;  %6469 = vmatprep.subr.bf16.mxu1 %v14521_v46  ;;  %v6006_v59 = vpop.f32.mrb[35].mxu1  ;;  %v14602_v45 = vld [vmem:[#allocation7 + $0xdec] ss:$16 sps:$4 sm:$0xff]   ;;  %v14605_v46 = vld [vmem:[%s18619_s0 + $0x34] ss:$76 sps:$4 sm:$0xff]  }
 0x1d9   :  { %v14597_v47 = vld [vmem:[#allocation7 + $0xde0] ss:$16 sps:$4 sm:$0xff]   ;;  %v14611_v50 = vld [vmem:[#allocation7 + $0xe0c] ss:$16 sps:$4 sm:$0xff]   ;;  %v14609_v53 = vld [vmem:[#allocation7 + $0xe08] ss:$16 sps:$4 sm:$0xff]  }
 0x1da   :  { %5271 = vmatmul.mubr.bf16.gmra.mrb[8].mxu0 %v14515_v48  ;;  %6401 = vmatmul.mubr.bf16.gmra.mrb[8].mxu1 %v14515_v48  ;;  %v14600_v48 = vld [vmem:[#allocation7 + $0xde8] ss:$16 sps:$4 sm:$0xff]   ;;  %v14606_v52 = vld [vmem:[#allocation7 + $0xe00] ss:$16 sps:$4 sm:$0xff]   ;;  %v14623_v59 = vld [vmem:[#allocation7 + $0xe44] ss:$16 sps:$4 sm:$0xff]  }
 0x1db   :  { %5340 = vmatpush1.bf16.msra.mxu0 %v14516_v51  ;;  %6470 = vmatpush1.bf16.msra.mxu1 %v14519_v54  ;;  %v14603_v51 = vld [vmem:[%s18619_s0 + $0x30] ss:$76 sps:$4 sm:$0xff]   ;;  %v14614_v54 = vld [vmem:[#allocation7 + $0xe24] ss:$16 sps:$4 sm:$0xff]   ;;  %v14618_v56 = vld [vmem:[%s18619_s0 + $0xcc] ss:$76 sps:$4 sm:$0xff]  }
 0x1dc   :  { %5341 = vmatprep.subr.bf16.mxu0 %v14524_v55  ;;  %6471 = vmatprep.subr.bf16.mxu1 %v14527_v58  ;;  %v14617_v55 = vld [vmem:[#allocation7 + $0xe2c] ss:$16 sps:$4 sm:$0xff]   ;;  %v14612_v57 = vld [vmem:[#allocation7 + $0xe20] ss:$16 sps:$4 sm:$0xff]   ;;  %v14615_v58 = vld [vmem:[#allocation7 + $0xe28] ss:$16 sps:$4 sm:$0xff]  }
 0x1dd   :  { %5280 = vmatprep.mubr.bf16.mxu0 %v14528_v60  ;;  %6410 = vmatprep.mubr.bf16.mxu1 %v14528_v60  ;;  %v14626_v60 = vld [vmem:[#allocation7 + $0xe4c] ss:$16 sps:$4 sm:$0xff]  }
 0x1df   :  { %5342 = vmatpush1.bf16.msra.mxu0 %v14522_v61  ;;  %6472 = vmatpush1.bf16.msra.mxu1 %v14525_v62  ;;  %v14620_v61 = vld [vmem:[%s18619_s0 + $0xc8] ss:$76 sps:$4 sm:$0xff]   ;;  %v14621_v62 = vld [vmem:[#allocation7 + $0xe40] ss:$16 sps:$4 sm:$0xff]  }
 0x1e0   :  { %5343 = vmatprep.subr.bf16.mxu0 %v14533_v63  ;;  %6473 = vmatprep.subr.bf16.mxu1 %v14536_v0  ;;  %v14624_v63 = vld [vmem:[#allocation7 + $0xe48] ss:$16 sps:$4 sm:$0xff]   ;;  %v14629_v0 = vld [vmem:[#allocation7 + $0xe64] ss:$16 sps:$4 sm:$0xff]  }
 0x1e2   :  { %5281 = vmatmul.mubr.bf16.gmra.mrb[12].mxu0 %v14530_v1  ;;  %6411 = vmatmul.mubr.bf16.gmra.mrb[12].mxu1 %v14530_v1  ;;  %v14632_v1 = vld [vmem:[#allocation7 + $0xe6c] ss:$16 sps:$4 sm:$0xff]  }
 0x1e3   :  { %5344 = vmatpush1.bf16.msra.mxu0 %v14531_v2  ;;  %6474 = vmatpush1.bf16.msra.mxu1 %v14534_v3  ;;  %v14633_v2 = vld [vmem:[%s18619_s0 + $0x164] ss:$76 sps:$4 sm:$0xff]  }
 0x1e4   :  { %5345 = vmatprep.subr.bf16.mxu0 %v14539_v4  ;;  %6475 = vmatprep.subr.bf16.mxu1 %v14542_v5  ;;  %v14627_v3 = vld [vmem:[#allocation7 + $0xe60] ss:$16 sps:$4 sm:$0xff]   ;;  %v14630_v4 = vld [vmem:[#allocation7 + $0xe68] ss:$16 sps:$4 sm:$0xff]   ;;  %v14638_v5 = vld [vmem:[#allocation7 + $0xe84] ss:$16 sps:$4 sm:$0xff]  }
 0x1e5   :  { %5290 = vmatprep.mubr.bf16.mxu0 %v14543_v6  ;;  %6420 = vmatprep.mubr.bf16.mxu1 %v14543_v6  ;;  %v14641_v6 = vld [vmem:[#allocation7 + $0xe8c] ss:$16 sps:$4 sm:$0xff]  }
 0x1e7   :  { %5346 = vmatpush1.bf16.msra.mxu0 %v14537_v7  ;;  %6476 = vmatpush1.bf16.msra.mxu1 %v14540_v8  ;;  %v14635_v8 = vld [vmem:[%s18619_s0 + $0x160] ss:$76 sps:$4 sm:$0xff]  }
 0x1e8   :  { %5347 = vmatprep.subr.bf16.mxu0 %v14548_v9  ;;  %6477 = vmatprep.subr.bf16.mxu1 %v14551_v10 }
 0x1ea   :  { %5291 = vmatmul.mubr.bf16.gmra.mrb[16].mxu0 %v14545_v11  ;;  %6421 = vmatmul.mubr.bf16.gmra.mrb[16].mxu1 %v14545_v11  ;;  %v14636_v11 = vld [vmem:[#allocation7 + $0xe80] ss:$16 sps:$4 sm:$0xff]  }
 0x1eb   :  { %5348 = vmatpush1.bf16.msra.mxu0 %v14546_v12  ;;  %6478 = vmatpush1.bf16.msra.mxu1 %v14549_v13  ;;  %v14639_v12 = vld [vmem:[#allocation7 + $0xe88] ss:$16 sps:$4 sm:$0xff]  }
 0x1ec   :  { %5349 = vmatprep.subr.bf16.mxu0 %v14554_v14  ;;  %6479 = vmatprep.subr.bf16.mxu1 %v14557_v15  ;;  %v14644_v15 = vld [vmem:[#allocation7 + $0xea4] ss:$16 sps:$4 sm:$0xff]  }
 0x1ed   :  { %5300 = vmatprep.mubr.bf16.mxu0 %v14558_v16  ;;  %6430 = vmatprep.mubr.bf16.mxu1 %v14558_v16 }
 0x1ef   :  { %5350 = vmatpush1.bf16.msra.mxu0 %v14552_v17  ;;  %6480 = vmatpush1.bf16.msra.mxu1 %v14555_v18  ;;  %v14647_v18 = vld [vmem:[#allocation7 + $0xeac] ss:$16 sps:$4 sm:$0xff]  }
 0x1f0   :  { %5351 = vmatprep.subr.bf16.mxu0 %v14563_v19  ;;  %6481 = vmatprep.subr.bf16.mxu1 %v14566_v20  ;;  %v14648_v20 = vld [vmem:[%s18619_s0 + $0x1fc] ss:$76 sps:$4 sm:$0xff]  }
 0x1f2   :  { %5301 = vmatmul.mubr.bf16.gmra.mrb[20].mxu0 %v14560_v21  ;;  %6431 = vmatmul.mubr.bf16.gmra.mrb[20].mxu1 %v14560_v21  ;;  %v14642_v21 = vld [vmem:[#allocation7 + $0xea0] ss:$16 sps:$4 sm:$0xff]  }
 0x1f3   :  { %5352 = vmatpush1.bf16.msra.mxu0 %v14561_v22  ;;  %6482 = vmatpush1.bf16.msra.mxu1 %v14564_v23  ;;  %v14645_v22 = vld [vmem:[#allocation7 + $0xea8] ss:$16 sps:$4 sm:$0xff]   ;;  %v14653_v23 = vld [vmem:[#allocation7 + $0xec4] ss:$16 sps:$4 sm:$0xff]  }
 0x1f4   :  { %5353 = vmatprep.subr.bf16.mxu0 %v14569_v24  ;;  %6483 = vmatprep.subr.bf16.mxu1 %v14572_v25  ;;  %v14656_v24 = vld [vmem:[#allocation7 + $0xecc] ss:$16 sps:$4 sm:$0xff]   ;;  %v14650_v25 = vld [vmem:[%s18619_s0 + $0x1f8] ss:$76 sps:$4 sm:$0xff]  }
 0x1f5   :  { %5310 = vmatprep.mubr.bf16.mxu0 %v14573_v26  ;;  %6440 = vmatprep.mubr.bf16.mxu1 %v14573_v26  ;;  %v14651_v26 = vld [vmem:[#allocation7 + $0xec0] ss:$16 sps:$4 sm:$0xff]  }
 0x1f7   :  { %5354 = vmatpush1.bf16.msra.mxu0 %v14567_v27  ;;  %6484 = vmatpush1.bf16.msra.mxu1 %v14570_v28  ;;  %v14654_v27 = vld [vmem:[#allocation7 + $0xec8] ss:$16 sps:$4 sm:$0xff]   ;;  %v14659_v28 = vld [vmem:[#allocation7 + $0xee4] ss:$16 sps:$4 sm:$0xff]  }
 0x1f8   :  { %5355 = vmatprep.subr.bf16.mxu0 %v14578_v29  ;;  %6485 = vmatprep.subr.bf16.mxu1 %v14581_v30  ;;  %v14662_v29 = vld [vmem:[#allocation7 + $0xeec] ss:$16 sps:$4 sm:$0xff]   ;;  %v14663_v30 = vld [vmem:[%s18619_s0 + $0x294] ss:$76 sps:$4 sm:$0xff]  }
 0x1fa   :  { %5311 = vmatmul.mubr.bf16.gmra.mrb[24].mxu0 %v14575_v31  ;;  %6441 = vmatmul.mubr.bf16.gmra.mrb[24].mxu1 %v14575_v31  ;;  %v14657_v31 = vld [vmem:[#allocation7 + $0xee0] ss:$16 sps:$4 sm:$0xff]  }
 0x1fb   :  { %5356 = vmatpush1.bf16.msra.mxu0 %v14576_v32  ;;  %6486 = vmatpush1.bf16.msra.mxu1 %v14579_v33  ;;  %v14660_v32 = vld [vmem:[#allocation7 + $0xee8] ss:$16 sps:$4 sm:$0xff]   ;;  %v14668_v33 = vld [vmem:[#allocation7 + $0xf04] ss:$16 sps:$4 sm:$0xff]  }
 0x1fc   :  { %5357 = vmatprep.subr.bf16.mxu0 %v14584_v34  ;;  %6487 = vmatprep.subr.bf16.mxu1 %v14587_v35  ;;  %v14671_v34 = vld [vmem:[#allocation7 + $0xf0c] ss:$16 sps:$4 sm:$0xff]  }
 0x1fd   :  { %5320 = vmatprep.mubr.bf16.mxu0 %v14588_v36  ;;  %6450 = vmatprep.mubr.bf16.mxu1 %v14588_v36  ;;  %v14665_v35 = vld [vmem:[%s18619_s0 + $0x290] ss:$76 sps:$4 sm:$0xff]  }
 0x1fe   :  { %v14666_v36 = vld [vmem:[#allocation7 + $0xf00] ss:$16 sps:$4 sm:$0xff]  }
 0x1ff   :  { %5358 = vmatpush1.bf16.msra.mxu0 %v14582_v37  ;;  %6488 = vmatpush1.bf16.msra.mxu1 %v14585_v38  ;;  %v14669_v37 = vld [vmem:[#allocation7 + $0xf08] ss:$16 sps:$4 sm:$0xff]   ;;  %v14674_v38 = vld [vmem:[#allocation7 + $0xf24] ss:$16 sps:$4 sm:$0xff]  }
 0x200   :  { %5359 = vmatprep.subr.bf16.mxu0 %v14593_v39  ;;  %6489 = vmatprep.subr.bf16.mxu1 %v14596_v40  ;;  %v14677_v39 = vld [vmem:[#allocation7 + $0xf2c] ss:$16 sps:$4 sm:$0xff]  }
 0x201   :  { %v14678_v40 = vld [vmem:[%s18619_s0 + $0x32c] ss:$76 sps:$4 sm:$0xff]  }
 0x202   :  { %5321 = vmatmul.mubr.bf16.gmra.mrb[48].mxu0 %v14590_v41  ;;  %6451 = vmatmul.mubr.bf16.gmra.mrb[48].mxu1 %v14590_v41  ;;  %v14672_v41 = vld [vmem:[#allocation7 + $0xf20] ss:$16 sps:$4 sm:$0xff]  }
 0x203   :  { %5360 = vmatpush1.bf16.msra.mxu0 %v14591_v42  ;;  %6490 = vmatpush1.bf16.msra.mxu1 %v14594_v43  ;;  %v14675_v42 = vld [vmem:[#allocation7 + $0xf28] ss:$16 sps:$4 sm:$0xff]   ;;  %v14683_v43 = vld [vmem:[#allocation7 + $0xf44] ss:$16 sps:$4 sm:$0xff]  }
 0x204   :  { %5361 = vmatprep.subr.bf16.mxu0 %v14599_v44  ;;  %6491 = vmatprep.subr.bf16.mxu1 %v14602_v45  ;;  %v14686_v44 = vld [vmem:[#allocation7 + $0xf4c] ss:$16 sps:$4 sm:$0xff]   ;;  %v14680_v45 = vld [vmem:[%s18619_s0 + $0x328] ss:$76 sps:$4 sm:$0xff]  }
 0x205   :  { %5363 = vmatprep.mubr.bf16.mxu0 %v14605_v46  ;;  %6493 = vmatprep.mubr.bf16.mxu1 %v14605_v46  ;;  %v14681_v46 = vld [vmem:[#allocation7 + $0xf40] ss:$16 sps:$4 sm:$0xff]  }
 0x207   :  { %5362 = vmatpush1.bf16.msra.mxu0 %v14597_v47  ;;  %6492 = vmatpush1.bf16.msra.mxu1 %v14600_v48  ;;  %v14684_v47 = vld [vmem:[#allocation7 + $0xf48] ss:$16 sps:$4 sm:$0xff]   ;;  %v14689_v48 = vld [vmem:[#allocation7 + $0xf64] ss:$16 sps:$4 sm:$0xff]  }
 0x208   :  { %5444 = vmatprep.subr.bf16.mxu0 %v14608_v49  ;;  %6574 = vmatprep.subr.bf16.mxu1 %v14611_v50  ;;  %v14692_v49 = vld [vmem:[#allocation7 + $0xf6c] ss:$16 sps:$4 sm:$0xff]   ;;  %v14693_v50 = vld [vmem:[%s18619_s0 + $0x3c4] ss:$76 sps:$4 sm:$0xff]  }
 0x20a   :  { %5364 = vmatmul.mubr.bf16.vlgmr.msra.gmra.mrb[0].mxu0 %v14603_v51  ;;  %6494 = vmatmul.mubr.bf16.vlgmr.msra.gmra.mrb[0].mxu1 %v14603_v51  ;;  %v14687_v51 = vld [vmem:[#allocation7 + $0xf60] ss:$16 sps:$4 sm:$0xff]  }
 0x20b   :  { %5445 = vmatpush1.bf16.msra.mxu0 %v14606_v52  ;;  %6575 = vmatpush1.bf16.msra.mxu1 %v14609_v53  ;;  %v14690_v52 = vld [vmem:[#allocation7 + $0xf68] ss:$16 sps:$4 sm:$0xff]   ;;  %v14698_v53 = vld [vmem:[#allocation7 + $0xf84] ss:$16 sps:$4 sm:$0xff]  }
 0x20c   :  { %5446 = vmatprep.subr.bf16.mxu0 %v14614_v54  ;;  %6576 = vmatprep.subr.bf16.mxu1 %v14617_v55  ;;  %v14695_v54 = vld [vmem:[%s18619_s0 + $0x3c0] ss:$76 sps:$4 sm:$0xff]  }
 0x20d   :  { %5373 = vmatprep.mubr.bf16.mxu0 %v14618_v56  ;;  %6503 = vmatprep.mubr.bf16.mxu1 %v14618_v56  ;;  %v14701_v55 = vld [vmem:[#allocation7 + $0xf8c] ss:$16 sps:$4 sm:$0xff]   ;;  %v14696_v56 = vld [vmem:[#allocation7 + $0xf80] ss:$16 sps:$4 sm:$0xff]  }
 0x20f   :  { %5447 = vmatpush1.bf16.msra.mxu0 %v14612_v57  ;;  %6577 = vmatpush1.bf16.msra.mxu1 %v14615_v58  ;;  %v14699_v57 = vld [vmem:[#allocation7 + $0xf88] ss:$16 sps:$4 sm:$0xff]   ;;  %v14704_v58 = vld [vmem:[#allocation7 + $0xfa4] ss:$16 sps:$4 sm:$0xff]  }
 0x210   :  { %5448 = vmatprep.subr.bf16.mxu0 %v14623_v59  ;;  %6578 = vmatprep.subr.bf16.mxu1 %v14626_v60  ;;  %v14707_v59 = vld [vmem:[#allocation7 + $0xfac] ss:$16 sps:$4 sm:$0xff]  }
 0x211   :  { %v14708_v60 = vld [vmem:[%s18619_s0 + $0x45c] ss:$76 sps:$4 sm:$0xff]  }
 0x212   :  { %5374 = vmatmul.mubr.bf16.gmra.mrb[4].mxu0 %v14620_v61  ;;  %6504 = vmatmul.mubr.bf16.gmra.mrb[4].mxu1 %v14620_v61  ;;  %v14702_v61 = vld [vmem:[#allocation7 + $0xfa0] ss:$16 sps:$4 sm:$0xff]  }
 0x213   :  { %5449 = vmatpush1.bf16.msra.mxu0 %v14621_v62  ;;  %6579 = vmatpush1.bf16.msra.mxu1 %v14624_v63  ;;  %v14705_v62 = vld [vmem:[#allocation7 + $0xfa8] ss:$16 sps:$4 sm:$0xff]   ;;  %v14713_v63 = vld [vmem:[#allocation7 + $0xfc4] ss:$16 sps:$4 sm:$0xff]  }
 0x214   :  { %5450 = vmatprep.subr.bf16.mxu0 %v14629_v0  ;;  %6580 = vmatprep.subr.bf16.mxu1 %v14632_v1  ;;  %v14716_v0 = vld [vmem:[#allocation7 + $0xfcc] ss:$16 sps:$4 sm:$0xff]   ;;  %v14710_v1 = vld [vmem:[%s18619_s0 + $0x458] ss:$76 sps:$4 sm:$0xff]  }
 0x215   :  { %v4983_v7 = vpop.f32.mrb[36].mxu0  ;;  %5383 = vmatprep.mubr.bf16.mxu0 %v14633_v2  ;;  %6513 = vmatprep.mubr.bf16.mxu1 %v14633_v2  ;;  %v6113_v9 = vpop.f32.mrb[36].mxu1  ;;  %v14711_v2 = vld [vmem:[#allocation7 + $0xfc0] ss:$16 sps:$4 sm:$0xff]  }
 0x216   :  { %v4985_v10 = vpop.f32.mrb[37].mxu0  ;;  %v6115_v13 = vpop.f32.mrb[37].mxu1  ;;  %v14717_v7 = vld [vmem:[#allocation7 + $0xfe0] ss:$16 sps:$4 sm:$0xff]   ;;  %v14728_v9 = vld [vmem:[#allocation7 + $0x1004] ss:$16 sps:$4 sm:$0xff]  }
 0x217   :  { %v4987_v14 = vpop.f32.mrb[38].mxu0  ;;  %5451 = vmatpush1.bf16.msra.mxu0 %v14627_v3  ;;  %6581 = vmatpush1.bf16.msra.mxu1 %v14630_v4  ;;  %v6117_v16 = vpop.f32.mrb[38].mxu1  ;;  %v14714_v3 = vld [vmem:[#allocation7 + $0xfc8] ss:$16 sps:$4 sm:$0xff]   ;;  %v14719_v4 = vld [vmem:[#allocation7 + $0xfe4] ss:$16 sps:$4 sm:$0xff]  }
 0x218   :  { %v4989_v17 = vpop.f32.mrb[39].mxu0  ;;  %5452 = vmatprep.subr.bf16.mxu0 %v14638_v5  ;;  %6582 = vmatprep.subr.bf16.mxu1 %v14641_v6  ;;  %v6119_v19 = vpop.f32.mrb[39].mxu1  ;;  %v14722_v5 = vld [vmem:[#allocation7 + $0xfec] ss:$16 sps:$4 sm:$0xff]   ;;  %v14726_v13 = vld [vmem:[#allocation7 + $0x1000] ss:$16 sps:$4 sm:$0xff]  }
 0x219   :  { %v14725_v6 = vld [vmem:[%s18619_s0 + $0x3c] ss:$76 sps:$4 sm:$0xff]   ;;  %v14738_v17 = vld [vmem:[%s18619_s0 + $0xd4] ss:$76 sps:$4 sm:$0xff]  }
 0x21a   :  { %5384 = vmatmul.mubr.bf16.gmra.mrb[8].mxu0 %v14635_v8  ;;  %6514 = vmatmul.mubr.bf16.gmra.mrb[8].mxu1 %v14635_v8  ;;  %v14720_v8 = vld [vmem:[#allocation7 + $0xfe8] ss:$16 sps:$4 sm:$0xff]   ;;  %v14731_v10 = vld [vmem:[#allocation7 + $0x100c] ss:$16 sps:$4 sm:$0xff]  }
 0x21b   :  { %5453 = vmatpush1.bf16.msra.mxu0 %v14636_v11  ;;  %6583 = vmatpush1.bf16.msra.mxu1 %v14639_v12  ;;  %v14723_v11 = vld [vmem:[%s18619_s0 + $0x38] ss:$76 sps:$4 sm:$0xff]   ;;  %v18627_v12 = vmov 0   ;;  %v14737_v16 = vld [vmem:[#allocation7 + $0x102c] ss:$16 sps:$4 sm:$0xff]  }
 0x21c   :  { %5454 = vmatprep.subr.bf16.mxu0 %v14644_v15  ;;  %6584 = vmatprep.subr.bf16.mxu1 %v14647_v18  ;;  %11661 = vst [vmem:[%s18625_s6] sm:$0xf] %v18627_v12  ;;  %11662 = vst [vmem:[%s18625_s6 + $0x4] sm:$0xf] %v18627_v12  ;;  %v14729_v14 = vld [vmem:[#allocation7 + $0x1008] ss:$16 sps:$4 sm:$0xff]  }
 0x21d   :  { %5393 = vmatprep.mubr.bf16.mxu0 %v14648_v20  ;;  %6523 = vmatprep.mubr.bf16.mxu1 %v14648_v20  ;;  %v14734_v15 = vld [vmem:[#allocation7 + $0x1024] ss:$16 sps:$4 sm:$0xff]   ;;  %v14732_v18 = vld [vmem:[#allocation7 + $0x1020] ss:$16 sps:$4 sm:$0xff]   ;;  %v14735_v19 = vld [vmem:[#allocation7 + $0x1028] ss:$16 sps:$4 sm:$0xff]  }
 0x21e   :  { %v14743_v20 = vld [vmem:[#allocation7 + $0x1044] ss:$16 sps:$4 sm:$0xff]  }
 0x21f   :  { %5455 = vmatpush1.bf16.msra.mxu0 %v14642_v21  ;;  %6585 = vmatpush1.bf16.msra.mxu1 %v14645_v22  ;;  %v14746_v21 = vld [vmem:[#allocation7 + $0x104c] ss:$16 sps:$4 sm:$0xff]  }
 0x220   :  { %5456 = vmatprep.subr.bf16.mxu0 %v14653_v23  ;;  %6586 = vmatprep.subr.bf16.mxu1 %v14656_v24  ;;  %v14740_v22 = vld [vmem:[%s18619_s0 + $0xd0] ss:$76 sps:$4 sm:$0xff]   ;;  %v14744_v24 = vld [vmem:[#allocation7 + $0x1048] ss:$16 sps:$4 sm:$0xff]  }
 0x221   :  { %v14741_v23 = vld [vmem:[#allocation7 + $0x1040] ss:$16 sps:$4 sm:$0xff]  }
 0x222   :  { %5394 = vmatmul.mubr.bf16.gmra.mrb[12].mxu0 %v14650_v25  ;;  %6524 = vmatmul.mubr.bf16.gmra.mrb[12].mxu1 %v14650_v25  ;;  %v14749_v25 = vld [vmem:[#allocation7 + $0x1064] ss:$16 sps:$4 sm:$0xff]  }
 0x223   :  { %5457 = vmatpush1.bf16.msra.mxu0 %v14651_v26  ;;  %6587 = vmatpush1.bf16.msra.mxu1 %v14654_v27  ;;  %v14752_v26 = vld [vmem:[#allocation7 + $0x106c] ss:$16 sps:$4 sm:$0xff]  }
 0x224   :  { %5458 = vmatprep.subr.bf16.mxu0 %v14659_v28  ;;  %6588 = vmatprep.subr.bf16.mxu1 %v14662_v29  ;;  %v14753_v27 = vld [vmem:[%s18619_s0 + $0x16c] ss:$76 sps:$4 sm:$0xff]   ;;  %v14747_v28 = vld [vmem:[#allocation7 + $0x1060] ss:$16 sps:$4 sm:$0xff]  }
 0x225   :  { %5403 = vmatprep.mubr.bf16.mxu0 %v14663_v30  ;;  %6533 = vmatprep.mubr.bf16.mxu1 %v14663_v30  ;;  %v14750_v29 = vld [vmem:[#allocation7 + $0x1068] ss:$16 sps:$4 sm:$0xff]   ;;  %v14758_v30 = vld [vmem:[#allocation7 + $0x1084] ss:$16 sps:$4 sm:$0xff]  }
 0x227   :  { %5459 = vmatpush1.bf16.msra.mxu0 %v14657_v31  ;;  %6589 = vmatpush1.bf16.msra.mxu1 %v14660_v32  ;;  %v14761_v31 = vld [vmem:[#allocation7 + $0x108c] ss:$16 sps:$4 sm:$0xff]   ;;  %v14755_v32 = vld [vmem:[%s18619_s0 + $0x168] ss:$76 sps:$4 sm:$0xff]  }
 0x228   :  { %5460 = vmatprep.subr.bf16.mxu0 %v14668_v33  ;;  %6590 = vmatprep.subr.bf16.mxu1 %v14671_v34  ;;  %v14756_v34 = vld [vmem:[#allocation7 + $0x1080] ss:$16 sps:$4 sm:$0xff]  }
 0x22a   :  { %5404 = vmatmul.mubr.bf16.gmra.mrb[16].mxu0 %v14665_v35  ;;  %6534 = vmatmul.mubr.bf16.gmra.mrb[16].mxu1 %v14665_v35  ;;  %v14759_v35 = vld [vmem:[#allocation7 + $0x1088] ss:$16 sps:$4 sm:$0xff]  }
 0x22b   :  { %5461 = vmatpush1.bf16.msra.mxu0 %v14666_v36  ;;  %6591 = vmatpush1.bf16.msra.mxu1 %v14669_v37 }
 0x22c   :  { %5462 = vmatprep.subr.bf16.mxu0 %v14674_v38  ;;  %6592 = vmatprep.subr.bf16.mxu1 %v14677_v39  ;;  %v14764_v38 = vld [vmem:[#allocation7 + $0x10a4] ss:$16 sps:$4 sm:$0xff]   ;;  %v14767_v39 = vld [vmem:[#allocation7 + $0x10ac] ss:$16 sps:$4 sm:$0xff]  }
 0x22d   :  { %5413 = vmatprep.mubr.bf16.mxu0 %v14678_v40  ;;  %6543 = vmatprep.mubr.bf16.mxu1 %v14678_v40 }
 0x22f   :  { %5463 = vmatpush1.bf16.msra.mxu0 %v14672_v41  ;;  %6593 = vmatpush1.bf16.msra.mxu1 %v14675_v42 }
 0x230   :  { %5464 = vmatprep.subr.bf16.mxu0 %v14683_v43  ;;  %6594 = vmatprep.subr.bf16.mxu1 %v14686_v44  ;;  %v14768_v44 = vld [vmem:[%s18619_s0 + $0x204] ss:$76 sps:$4 sm:$0xff]  }
 0x232   :  { %5414 = vmatmul.mubr.bf16.gmra.mrb[20].mxu0 %v14680_v45  ;;  %6544 = vmatmul.mubr.bf16.gmra.mrb[20].mxu1 %v14680_v45 }
 0x233   :  { %5465 = vmatpush1.bf16.msra.mxu0 %v14681_v46  ;;  %6595 = vmatpush1.bf16.msra.mxu1 %v14684_v47  ;;  %v14762_v46 = vld [vmem:[#allocation7 + $0x10a0] ss:$16 sps:$4 sm:$0xff]   ;;  %v14765_v47 = vld [vmem:[#allocation7 + $0x10a8] ss:$16 sps:$4 sm:$0xff]  }
 0x234   :  { %5466 = vmatprep.subr.bf16.mxu0 %v14689_v48  ;;  %6596 = vmatprep.subr.bf16.mxu1 %v14692_v49  ;;  %v14773_v48 = vld [vmem:[#allocation7 + $0x10c4] ss:$16 sps:$4 sm:$0xff]   ;;  %v14776_v49 = vld [vmem:[#allocation7 + $0x10cc] ss:$16 sps:$4 sm:$0xff]  }
 0x235   :  { %5423 = vmatprep.mubr.bf16.mxu0 %v14693_v50  ;;  %6553 = vmatprep.mubr.bf16.mxu1 %v14693_v50  ;;  %v14770_v50 = vld [vmem:[%s18619_s0 + $0x200] ss:$76 sps:$4 sm:$0xff]  }
 0x237   :  { %5467 = vmatpush1.bf16.msra.mxu0 %v14687_v51  ;;  %6597 = vmatpush1.bf16.msra.mxu1 %v14690_v52  ;;  %v14771_v51 = vld [vmem:[#allocation7 + $0x10c0] ss:$16 sps:$4 sm:$0xff]   ;;  %v14774_v52 = vld [vmem:[#allocation7 + $0x10c8] ss:$16 sps:$4 sm:$0xff]  }
 0x238   :  { %5468 = vmatprep.subr.bf16.mxu0 %v14698_v53  ;;  %6598 = vmatprep.subr.bf16.mxu1 %v14701_v55  ;;  %v14779_v53 = vld [vmem:[#allocation7 + $0x10e4] ss:$16 sps:$4 sm:$0xff]   ;;  %v14783_v55 = vld [vmem:[%s18619_s0 + $0x29c] ss:$76 sps:$4 sm:$0xff]  }
 0x23a   :  { %5424 = vmatmul.mubr.bf16.gmra.mrb[24].mxu0 %v14695_v54  ;;  %6554 = vmatmul.mubr.bf16.gmra.mrb[24].mxu1 %v14695_v54  ;;  %v14782_v54 = vld [vmem:[#allocation7 + $0x10ec] ss:$16 sps:$4 sm:$0xff]  }
 0x23b   :  { %5469 = vmatpush1.bf16.msra.mxu0 %v14696_v56  ;;  %6599 = vmatpush1.bf16.msra.mxu1 %v14699_v57  ;;  %v14777_v56 = vld [vmem:[#allocation7 + $0x10e0] ss:$16 sps:$4 sm:$0xff]   ;;  %v14780_v57 = vld [vmem:[#allocation7 + $0x10e8] ss:$16 sps:$4 sm:$0xff]  }
 0x23c   :  { %5470 = vmatprep.subr.bf16.mxu0 %v14704_v58  ;;  %6600 = vmatprep.subr.bf16.mxu1 %v14707_v59  ;;  %v14788_v58 = vld [vmem:[#allocation7 + $0x1104] ss:$16 sps:$4 sm:$0xff]   ;;  %v14791_v59 = vld [vmem:[#allocation7 + $0x110c] ss:$16 sps:$4 sm:$0xff]  }
 0x23d   :  { %5433 = vmatprep.mubr.bf16.mxu0 %v14708_v60  ;;  %6563 = vmatprep.mubr.bf16.mxu1 %v14708_v60  ;;  %v14785_v60 = vld [vmem:[%s18619_s0 + $0x298] ss:$76 sps:$4 sm:$0xff]  }
 0x23f   :  { %5471 = vmatpush1.bf16.msra.mxu0 %v14702_v61  ;;  %6601 = vmatpush1.bf16.msra.mxu1 %v14705_v62  ;;  %v14786_v61 = vld [vmem:[#allocation7 + $0x1100] ss:$16 sps:$4 sm:$0xff]   ;;  %v14789_v62 = vld [vmem:[#allocation7 + $0x1108] ss:$16 sps:$4 sm:$0xff]  }
 0x240   :  { %5472 = vmatprep.subr.bf16.mxu0 %v14713_v63  ;;  %6602 = vmatprep.subr.bf16.mxu1 %v14716_v0  ;;  %v14794_v63 = vld [vmem:[#allocation7 + $0x1124] ss:$16 sps:$4 sm:$0xff]   ;;  %v14797_v0 = vld [vmem:[#allocation7 + $0x112c] ss:$16 sps:$4 sm:$0xff]  }
 0x242   :  { %5434 = vmatmul.mubr.bf16.gmra.mrb[52].mxu0 %v14710_v1  ;;  %6564 = vmatmul.mubr.bf16.gmra.mrb[52].mxu1 %v14710_v1  ;;  %v14798_v1 = vld [vmem:[%s18619_s0 + $0x334] ss:$76 sps:$4 sm:$0xff]  }
 0x243   :  { %5473 = vmatpush1.bf16.msra.mxu0 %v14711_v2  ;;  %6603 = vmatpush1.bf16.msra.mxu1 %v14714_v3  ;;  %v14792_v2 = vld [vmem:[#allocation7 + $0x1120] ss:$16 sps:$4 sm:$0xff]   ;;  %v14795_v3 = vld [vmem:[#allocation7 + $0x1128] ss:$16 sps:$4 sm:$0xff]  }
 0x244   :  { %5474 = vmatprep.subr.bf16.mxu0 %v14719_v4  ;;  %6604 = vmatprep.subr.bf16.mxu1 %v14722_v5  ;;  %v14803_v4 = vld [vmem:[#allocation7 + $0x1144] ss:$16 sps:$4 sm:$0xff]   ;;  %v14806_v5 = vld [vmem:[#allocation7 + $0x114c] ss:$16 sps:$4 sm:$0xff]  }
 0x245   :  { %5476 = vmatprep.mubr.bf16.mxu0 %v14725_v6  ;;  %6606 = vmatprep.mubr.bf16.mxu1 %v14725_v6  ;;  %v14800_v6 = vld [vmem:[%s18619_s0 + $0x330] ss:$76 sps:$4 sm:$0xff]  }
 0x247   :  { %5475 = vmatpush1.bf16.msra.mxu0 %v14717_v7  ;;  %6605 = vmatpush1.bf16.msra.mxu1 %v14720_v8  ;;  %v14801_v7 = vld [vmem:[#allocation7 + $0x1140] ss:$16 sps:$4 sm:$0xff]   ;;  %v14804_v8 = vld [vmem:[#allocation7 + $0x1148] ss:$16 sps:$4 sm:$0xff]  }
 0x248   :  { %5557 = vmatprep.subr.bf16.mxu0 %v14728_v9  ;;  %6687 = vmatprep.subr.bf16.mxu1 %v14731_v10  ;;  %v14809_v9 = vld [vmem:[#allocation7 + $0x1164] ss:$16 sps:$4 sm:$0xff]   ;;  %v14812_v10 = vld [vmem:[#allocation7 + $0x116c] ss:$16 sps:$4 sm:$0xff]  }
 0x24a   :  { %5477 = vmatmul.mubr.bf16.vlgmr.msra.gmra.mrb[0].mxu0 %v14723_v11  ;;  %6607 = vmatmul.mubr.bf16.vlgmr.msra.gmra.mrb[0].mxu1 %v14723_v11  ;;  %v14813_v11 = vld [vmem:[%s18619_s0 + $0x3cc] ss:$76 sps:$4 sm:$0xff]  }
 0x24b   :  { %5558 = vmatpush1.bf16.msra.mxu0 %v14726_v13  ;;  %6688 = vmatpush1.bf16.msra.mxu1 %v14729_v14  ;;  %v14807_v13 = vld [vmem:[#allocation7 + $0x1160] ss:$16 sps:$4 sm:$0xff]   ;;  %v14810_v14 = vld [vmem:[#allocation7 + $0x1168] ss:$16 sps:$4 sm:$0xff]  }
 0x24c   :  { %5559 = vmatprep.subr.bf16.mxu0 %v14734_v15  ;;  %6689 = vmatprep.subr.bf16.mxu1 %v14737_v16  ;;  %v14818_v15 = vld [vmem:[#allocation7 + $0x1184] ss:$16 sps:$4 sm:$0xff]   ;;  %v14821_v16 = vld [vmem:[#allocation7 + $0x118c] ss:$16 sps:$4 sm:$0xff]  }
 0x24d   :  { %5486 = vmatprep.mubr.bf16.mxu0 %v14738_v17  ;;  %6616 = vmatprep.mubr.bf16.mxu1 %v14738_v17  ;;  %v14815_v17 = vld [vmem:[%s18619_s0 + $0x3c8] ss:$76 sps:$4 sm:$0xff]  }
 0x24f   :  { %5560 = vmatpush1.bf16.msra.mxu0 %v14732_v18  ;;  %6690 = vmatpush1.bf16.msra.mxu1 %v14735_v19  ;;  %v14816_v18 = vld [vmem:[#allocation7 + $0x1180] ss:$16 sps:$4 sm:$0xff]   ;;  %v14819_v19 = vld [vmem:[#allocation7 + $0x1188] ss:$16 sps:$4 sm:$0xff]  }
 0x250   :  { %5561 = vmatprep.subr.bf16.mxu0 %v14743_v20  ;;  %6691 = vmatprep.subr.bf16.mxu1 %v14746_v21  ;;  %v14824_v20 = vld [vmem:[#allocation7 + $0x11a4] ss:$16 sps:$4 sm:$0xff]   ;;  %v14827_v21 = vld [vmem:[#allocation7 + $0x11ac] ss:$16 sps:$4 sm:$0xff]  }
 0x252   :  { %5487 = vmatmul.mubr.bf16.gmra.mrb[4].mxu0 %v14740_v22  ;;  %6617 = vmatmul.mubr.bf16.gmra.mrb[4].mxu1 %v14740_v22  ;;  %v14828_v22 = vld [vmem:[%s18619_s0 + $0x464] ss:$76 sps:$4 sm:$0xff]  }
 0x253   :  { %5562 = vmatpush1.bf16.msra.mxu0 %v14741_v23  ;;  %6692 = vmatpush1.bf16.msra.mxu1 %v14744_v24  ;;  %v14822_v23 = vld [vmem:[#allocation7 + $0x11a0] ss:$16 sps:$4 sm:$0xff]   ;;  %v14825_v24 = vld [vmem:[#allocation7 + $0x11a8] ss:$16 sps:$4 sm:$0xff]  }
 0x254   :  { %5563 = vmatprep.subr.bf16.mxu0 %v14749_v25  ;;  %6693 = vmatprep.subr.bf16.mxu1 %v14752_v26  ;;  %v14833_v25 = vld [vmem:[#allocation7 + $0x11c4] ss:$16 sps:$4 sm:$0xff]   ;;  %v14836_v26 = vld [vmem:[#allocation7 + $0x11cc] ss:$16 sps:$4 sm:$0xff]  }
 0x255   :  { %v5096_v33 = vpop.f32.mrb[40].mxu0  ;;  %5496 = vmatprep.mubr.bf16.mxu0 %v14753_v27  ;;  %6626 = vmatprep.mubr.bf16.mxu1 %v14753_v27  ;;  %v6226_v36 = vpop.f32.mrb[40].mxu1  ;;  %v14830_v27 = vld [vmem:[%s18619_s0 + $0x460] ss:$76 sps:$4 sm:$0xff]  }
 0x256   :  { %v5098_v37 = vpop.f32.mrb[41].mxu0  ;;  %v6228_v40 = vpop.f32.mrb[41].mxu1  ;;  %v14837_v33 = vld [vmem:[#allocation7 + $0x11e0] ss:$16 sps:$4 sm:$0xff]   ;;  %v14875_v36 = vld [vmem:[#allocation7 + $0x120c] ss:$16 sps:$4 sm:$0xff]  }
 0x257   :  { %v5100_v41 = vpop.f32.mrb[42].mxu0  ;;  %5564 = vmatpush1.bf16.msra.mxu0 %v14747_v28  ;;  %6694 = vmatpush1.bf16.msra.mxu1 %v14750_v29  ;;  %v6230_v42 = vpop.f32.mrb[42].mxu1  ;;  %v14831_v28 = vld [vmem:[#allocation7 + $0x11c0] ss:$16 sps:$4 sm:$0xff]   ;;  %v14834_v29 = vld [vmem:[#allocation7 + $0x11c8] ss:$16 sps:$4 sm:$0xff]  }
 0x258   :  { %v5102_v43 = vpop.f32.mrb[43].mxu0  ;;  %5565 = vmatprep.subr.bf16.mxu0 %v14758_v30  ;;  %6695 = vmatprep.subr.bf16.mxu1 %v14761_v31  ;;  %v6232_v45 = vpop.f32.mrb[43].mxu1  ;;  %v14839_v30 = vld [vmem:[#allocation7 + $0x11e4] ss:$16 sps:$4 sm:$0xff]   ;;  %v14842_v31 = vld [vmem:[#allocation7 + $0x11ec] ss:$16 sps:$4 sm:$0xff]  }
 0x259   :  { %v14843_v37 = vld [vmem:[%s18619_s0 + $0x40] ss:$76 sps:$4 sm:$0xff]   ;;  %v14854_v40 = vld [vmem:[#allocation7 + $0x1224] ss:$16 sps:$4 sm:$0xff]   ;;  %v14873_v41 = vld [vmem:[#allocation7 + $0x1208] ss:$16 sps:$4 sm:$0xff]  }
 0x25a   :  { %5497 = vmatmul.mubr.bf16.gmra.mrb[8].mxu0 %v14755_v32  ;;  %6627 = vmatmul.mubr.bf16.gmra.mrb[8].mxu1 %v14755_v32  ;;  %v14845_v32 = vld [vmem:[%s18619_s0 + $0x44] ss:$76 sps:$4 sm:$0xff]   ;;  %v14878_v42 = vld [vmem:[#allocation7 + $0x122c] ss:$16 sps:$4 sm:$0xff]   ;;  %v14876_v45 = vld [vmem:[#allocation7 + $0x1228] ss:$16 sps:$4 sm:$0xff]  }
 0x25b   :  { %5566 = vmatpush1.bf16.msra.mxu0 %v14756_v34  ;;  %6696 = vmatpush1.bf16.msra.mxu1 %v14759_v35  ;;  %v14840_v34 = vld [vmem:[#allocation7 + $0x11e8] ss:$16 sps:$4 sm:$0xff]   ;;  %v14848_v35 = vld [vmem:[#allocation7 + $0x1204] ss:$16 sps:$4 sm:$0xff]   ;;  %v14852_v43 = vld [vmem:[#allocation7 + $0x1220] ss:$16 sps:$4 sm:$0xff]  }
 0x25c   :  { %5567 = vmatprep.subr.bf16.mxu0 %v14764_v38  ;;  %6697 = vmatprep.subr.bf16.mxu1 %v14767_v39  ;;  %v14846_v38 = vld [vmem:[#allocation7 + $0x1200] ss:$16 sps:$4 sm:$0xff]   ;;  %v14849_v39 = vld [vmem:[%s18619_s0 + $0xdc] ss:$76 sps:$4 sm:$0xff]  }
 0x25d   :  { %5506 = vmatprep.mubr.bf16.mxu0 %v14768_v44  ;;  %6636 = vmatprep.mubr.bf16.mxu1 %v14768_v44  ;;  %v14860_v44 = vld [vmem:[#allocation7 + $0x1244] ss:$16 sps:$4 sm:$0xff]  }
 0x25f   :  { %5568 = vmatpush1.bf16.msra.mxu0 %v14762_v46  ;;  %6698 = vmatpush1.bf16.msra.mxu1 %v14765_v47  ;;  %v14851_v46 = vld [vmem:[%s18619_s0 + $0xd8] ss:$76 sps:$4 sm:$0xff]   ;;  %v14855_v47 = vld [vmem:[%s18619_s0 + $0x174] ss:$76 sps:$4 sm:$0xff]  }
 0x260   :  { %5569 = vmatprep.subr.bf16.mxu0 %v14773_v48  ;;  %6699 = vmatprep.subr.bf16.mxu1 %v14776_v49  ;;  %v14858_v48 = vld [vmem:[#allocation7 + $0x1240] ss:$16 sps:$4 sm:$0xff]   ;;  %v14887_v49 = vld [vmem:[#allocation7 + $0x124c] ss:$16 sps:$4 sm:$0xff]  }
 0x262   :  { %5507 = vmatmul.mubr.bf16.gmra.mrb[12].mxu0 %v14770_v50  ;;  %6637 = vmatmul.mubr.bf16.gmra.mrb[12].mxu1 %v14770_v50  ;;  %v14866_v50 = vld [vmem:[#allocation7 + $0x1264] ss:$16 sps:$4 sm:$0xff]  }
 0x263   :  { %5570 = vmatpush1.bf16.msra.mxu0 %v14771_v51  ;;  %6700 = vmatpush1.bf16.msra.mxu1 %v14774_v52  ;;  %v14885_v51 = vld [vmem:[#allocation7 + $0x1248] ss:$16 sps:$4 sm:$0xff]   ;;  %v14890_v52 = vld [vmem:[#allocation7 + $0x126c] ss:$16 sps:$4 sm:$0xff]  }
 0x264   :  { %5571 = vmatprep.subr.bf16.mxu0 %v14779_v53  ;;  %6701 = vmatprep.subr.bf16.mxu1 %v14782_v54  ;;  %v14864_v53 = vld [vmem:[#allocation7 + $0x1260] ss:$16 sps:$4 sm:$0xff]  }
 0x265   :  { %5516 = vmatprep.mubr.bf16.mxu0 %v14783_v55  ;;  %6646 = vmatprep.mubr.bf16.mxu1 %v14783_v55  ;;  %v14872_v55 = vld [vmem:[#allocation7 + $0x1284] ss:$16 sps:$4 sm:$0xff]  }
 0x267   :  { %5572 = vmatpush1.bf16.msra.mxu0 %v14777_v56  ;;  %6702 = vmatpush1.bf16.msra.mxu1 %v14780_v57  ;;  %v14888_v56 = vld [vmem:[#allocation7 + $0x1268] ss:$16 sps:$4 sm:$0xff]  }
 0x268   :  { %5573 = vmatprep.subr.bf16.mxu0 %v14788_v58  ;;  %6703 = vmatprep.subr.bf16.mxu1 %v14791_v59  ;;  %v14857_v59 = vld [vmem:[%s18619_s0 + $0x170] ss:$76 sps:$4 sm:$0xff]  }
 0x26a   :  { %5517 = vmatmul.mubr.bf16.gmra.mrb[16].mxu0 %v14785_v60  ;;  %6647 = vmatmul.mubr.bf16.gmra.mrb[16].mxu1 %v14785_v60 }
 0x26b   :  { %5574 = vmatpush1.bf16.msra.mxu0 %v14786_v61  ;;  %6704 = vmatpush1.bf16.msra.mxu1 %v14789_v62  ;;  %v14861_v62 = vld [vmem:[%s18619_s0 + $0x20c] ss:$76 sps:$4 sm:$0xff]  }
 0x26c   :  { %5575 = vmatprep.subr.bf16.mxu0 %v14794_v63  ;;  %6705 = vmatprep.subr.bf16.mxu1 %v14797_v0 }
 0x26d   :  { %5526 = vmatprep.mubr.bf16.mxu0 %v14798_v1  ;;  %6656 = vmatprep.mubr.bf16.mxu1 %v14798_v1  ;;  %v14870_v1 = vld [vmem:[#allocation7 + $0x1280] ss:$16 sps:$4 sm:$0xff]  }
 0x26f   :  { %5576 = vmatpush1.bf16.msra.mxu0 %v14792_v2  ;;  %6706 = vmatpush1.bf16.msra.mxu1 %v14795_v3  ;;  %v14899_v2 = vld [vmem:[#allocation7 + $0x128c] ss:$16 sps:$4 sm:$0xff]  }
 0x270   :  { %5577 = vmatprep.subr.bf16.mxu0 %v14803_v4  ;;  %6707 = vmatprep.subr.bf16.mxu1 %v14806_v5  ;;  %v14884_v4 = vld [vmem:[#allocation7 + $0x12a4] ss:$16 sps:$4 sm:$0xff]   ;;  %v14897_v5 = vld [vmem:[#allocation7 + $0x1288] ss:$16 sps:$4 sm:$0xff]  }
 0x272   :  { %5527 = vmatmul.mubr.bf16.gmra.mrb[20].mxu0 %v14800_v6  ;;  %6657 = vmatmul.mubr.bf16.gmra.mrb[20].mxu1 %v14800_v6  ;;  %v14902_v6 = vld [vmem:[#allocation7 + $0x12ac] ss:$16 sps:$4 sm:$0xff]  }
 0x273   :  { %5578 = vmatpush1.bf16.msra.mxu0 %v14801_v7  ;;  %6708 = vmatpush1.bf16.msra.mxu1 %v14804_v8  ;;  %v14882_v7 = vld [vmem:[#allocation7 + $0x12a0] ss:$16 sps:$4 sm:$0xff]   ;;  %v14896_v8 = vld [vmem:[#allocation7 + $0x12c4] ss:$16 sps:$4 sm:$0xff]  }
 0x274   :  { %5579 = vmatprep.subr.bf16.mxu0 %v14809_v9  ;;  %6709 = vmatprep.subr.bf16.mxu1 %v14812_v10  ;;  %v14900_v9 = vld [vmem:[#allocation7 + $0x12a8] ss:$16 sps:$4 sm:$0xff]  }
 0x275   :  { %5536 = vmatprep.mubr.bf16.mxu0 %v14813_v11  ;;  %6666 = vmatprep.mubr.bf16.mxu1 %v14813_v11  ;;  %v14863_v10 = vld [vmem:[%s18619_s0 + $0x208] ss:$76 sps:$4 sm:$0xff]   ;;  %v14867_v11 = vld [vmem:[%s18619_s0 + $0x2a4] ss:$76 sps:$4 sm:$0xff]  }
 0x277   :  { %5580 = vmatpush1.bf16.msra.mxu0 %v14807_v13  ;;  %6710 = vmatpush1.bf16.msra.mxu1 %v14810_v14  ;;  %v14894_v13 = vld [vmem:[#allocation7 + $0x12c0] ss:$16 sps:$4 sm:$0xff]   ;;  %v14911_v14 = vld [vmem:[#allocation7 + $0x12cc] ss:$16 sps:$4 sm:$0xff]  }
 0x278   :  { %5581 = vmatprep.subr.bf16.mxu0 %v14818_v15  ;;  %6711 = vmatprep.subr.bf16.mxu1 %v14821_v16  ;;  %v14908_v15 = vld [vmem:[#allocation7 + $0x12e4] ss:$16 sps:$4 sm:$0xff]   ;;  %v14909_v16 = vld [vmem:[#allocation7 + $0x12c8] ss:$16 sps:$4 sm:$0xff]  }
 0x27a   :  { %5537 = vmatmul.mubr.bf16.gmra.mrb[24].mxu0 %v14815_v17  ;;  %6667 = vmatmul.mubr.bf16.gmra.mrb[24].mxu1 %v14815_v17  ;;  %v14914_v17 = vld [vmem:[#allocation7 + $0x12ec] ss:$16 sps:$4 sm:$0xff]  }
 0x27b   :  { %5582 = vmatpush1.bf16.msra.mxu0 %v14816_v18  ;;  %6712 = vmatpush1.bf16.msra.mxu1 %v14819_v19  ;;  %v14906_v18 = vld [vmem:[#allocation7 + $0x12e0] ss:$16 sps:$4 sm:$0xff]   ;;  %v14912_v19 = vld [vmem:[#allocation7 + $0x12e8] ss:$16 sps:$4 sm:$0xff]  }
 0x27c   :  { %5583 = vmatprep.subr.bf16.mxu0 %v14824_v20  ;;  %6713 = vmatprep.subr.bf16.mxu1 %v14827_v21  ;;  %v14869_v20 = vld [vmem:[%s18619_s0 + $0x2a0] ss:$76 sps:$4 sm:$0xff]   ;;  %v14879_v21 = vld [vmem:[%s18619_s0 + $0x33c] ss:$76 sps:$4 sm:$0xff]  }
 0x27d   :  { %5546 = vmatprep.mubr.bf16.mxu0 %v14828_v22  ;;  %6676 = vmatprep.mubr.bf16.mxu1 %v14828_v22  ;;  %v14881_v22 = vld [vmem:[%s18619_s0 + $0x338] ss:$76 sps:$4 sm:$0xff]  }
 0x27f   :  { %5584 = vmatpush1.bf16.msra.mxu0 %v14822_v23  ;;  %6714 = vmatpush1.bf16.msra.mxu1 %v14825_v24  ;;  %v14891_v23 = vld [vmem:[%s18619_s0 + $0x3d4] ss:$76 sps:$4 sm:$0xff]   ;;  %v14893_v24 = vld [vmem:[%s18619_s0 + $0x3d0] ss:$76 sps:$4 sm:$0xff]  }
 0x280   :  { %5585 = vmatprep.subr.bf16.mxu0 %v14833_v25  ;;  %6715 = vmatprep.subr.bf16.mxu1 %v14836_v26  ;;  %v14903_v25 = vld [vmem:[%s18619_s0 + $0x46c] ss:$76 sps:$4 sm:$0xff]   ;;  %v14905_v26 = vld [vmem:[%s18619_s0 + $0x468] ss:$76 sps:$4 sm:$0xff]  }
 0x282   :  { %5547 = vmatmul.mubr.bf16.gmra.mrb[56].mxu0 %v14830_v27  ;;  %6677 = vmatmul.mubr.bf16.gmra.mrb[56].mxu1 %v14830_v27  ;;  %v14915_v27 = vld [vmem:[%s18619_s0 + $0x48] ss:$76 sps:$4 sm:$0xff]  }
 0x283   :  { %5586 = vmatpush1.bf16.msra.mxu0 %v14831_v28  ;;  %6716 = vmatpush1.bf16.msra.mxu1 %v14834_v29  ;;  %v14916_v28 = vld [vmem:[%s18619_s0 + $0xe0] ss:$76 sps:$4 sm:$0xff]  }
 0x284   :  { %5587 = vmatprep.subr.bf16.mxu0 %v14839_v30  ;;  %6717 = vmatprep.subr.bf16.mxu1 %v14842_v31 }
 0x285   :  { %5589 = vmatprep.mubr.bf16.mxu0 %v14845_v32  ;;  %6719 = vmatprep.mubr.bf16.mxu1 %v14845_v32  ;;  %v14917_v32 = vld [vmem:[%s18619_s0 + $0x178] ss:$76 sps:$4 sm:$0xff]  }
 0x287   :  { %5588 = vmatpush1.bf16.msra.mxu0 %v14837_v33  ;;  %6718 = vmatpush1.bf16.msra.mxu1 %v14840_v34 }
 0x288   :  { %5670 = vmatprep.subr.bf16.mxu0 %v14848_v35  ;;  %6800 = vmatprep.subr.bf16.mxu1 %v14875_v36 }
 0x28a   :  { %5590 = vmatmul.mubr.bf16.vlgmr.msra.gmra.mrb[0].mxu0 %v14843_v37  ;;  %6720 = vmatmul.mubr.bf16.vlgmr.msra.gmra.mrb[0].mxu1 %v14843_v37 }
 0x28b   :  { %5671 = vmatpush1.bf16.msra.mxu0 %v14846_v38  ;;  %5599 = vmatprep.mubr.bf16.mxu0 %v14849_v39  ;;  %v14924_v38 = vld [vmem:[%s18621_s2 + $0x4] ss:$16 sps:$4 sm:$0xff]  }
 0x28c   :  { %6729 = vmatprep.mubr.bf16.mxu1 %v14849_v39  ;;  %5672 = vmatprep.subr.bf16.mxu0 %v14854_v40  ;;  %v14922_v39 = vld [vmem:[%s18621_s2] ss:$16 sps:$4 sm:$0xff]   ;;  %v14925_v40 = vld [vmem:[%s18621_s2 + $0x8] ss:$16 sps:$4 sm:$0xff]  }
 0x28d   :  { %6801 = vmatpush1.bf16.msra.mxu1 %v14873_v41  ;;  %v14927_v41 = vld [vmem:[%s18621_s2 + $0xc] ss:$16 sps:$4 sm:$0xff]  }
 0x28e   :  { %6802 = vmatprep.subr.bf16.mxu1 %v14878_v42  ;;  %v14930_v42 = vld [vmem:[%s18621_s2 + $0x24] ss:$16 sps:$4 sm:$0xff]  }
 0x28f   :  { %5673 = vmatpush1.bf16.msra.mxu0 %v14852_v43  ;;  %v14933_v43 = vld [vmem:[%s18621_s2 + $0x2c] ss:$16 sps:$4 sm:$0xff]  }
 0x290   :  { %5674 = vmatprep.subr.bf16.mxu0 %v14860_v44  ;;  %v14928_v44 = vld [vmem:[%s18621_s2 + $0x20] ss:$16 sps:$4 sm:$0xff]  }
 0x291   :  { %6803 = vmatpush1.bf16.msra.mxu1 %v14876_v45  ;;  %v14931_v45 = vld [vmem:[%s18621_s2 + $0x28] ss:$16 sps:$4 sm:$0xff]  }
 0x292   :  { %5600 = vmatmul.mubr.bf16.gmra.mrb[4].mxu0 %v14851_v46  ;;  %6730 = vmatmul.mubr.bf16.gmra.mrb[4].mxu1 %v14851_v46  ;;  %v14918_v46 = vld [vmem:[%s18619_s0 + $0x210] ss:$76 sps:$4 sm:$0xff]  }
 0x293   :  { %5609 = vmatprep.mubr.bf16.mxu0 %v14855_v47  ;;  %6739 = vmatprep.mubr.bf16.mxu1 %v14855_v47  ;;  %v14936_v47 = vld [vmem:[%s18621_s2 + $0x44] ss:$16 sps:$4 sm:$0xff]  }
 0x294   :  { %5675 = vmatpush1.bf16.msra.mxu0 %v14858_v48  ;;  %6804 = vmatprep.subr.bf16.mxu1 %v14887_v49  ;;  %v14939_v48 = vld [vmem:[%s18621_s2 + $0x4c] ss:$16 sps:$4 sm:$0xff]   ;;  %v14934_v49 = vld [vmem:[%s18621_s2 + $0x40] ss:$16 sps:$4 sm:$0xff]  }
 0x295   :  { %v5209_v54 = vpop.f32.mrb[44].mxu0  ;;  %5676 = vmatprep.subr.bf16.mxu0 %v14866_v50  ;;  %6805 = vmatpush1.bf16.msra.mxu1 %v14885_v51  ;;  %v6339_v57 = vpop.f32.mrb[44].mxu1  ;;  %v14937_v50 = vld [vmem:[%s18621_s2 + $0x48] ss:$16 sps:$4 sm:$0xff]   ;;  %v14942_v51 = vld [vmem:[%s18621_s2 + $0x64] ss:$16 sps:$4 sm:$0xff]  }
 0x296   :  { %v5211_v58 = vpop.f32.mrb[45].mxu0  ;;  %6806 = vmatprep.subr.bf16.mxu1 %v14890_v52  ;;  %v6341_v60 = vpop.f32.mrb[45].mxu1  ;;  %v14945_v52 = vld [vmem:[%s18621_s2 + $0x6c] ss:$16 sps:$4 sm:$0xff]   ;;  %v14943_v54 = vld [vmem:[%s18621_s2 + $0x68] ss:$16 sps:$4 sm:$0xff]  }
 0x297   :  { %v5213_v61 = vpop.f32.mrb[46].mxu0  ;;  %v6343_v63 = vpop.f32.mrb[46].mxu1  ;;  %v14951_v57 = vld [vmem:[%s18621_s2 + $0x8c] ss:$16 sps:$4 sm:$0xff]   ;;  %v14946_v58 = vld [vmem:[%s18621_s2 + $0x80] ss:$16 sps:$4 sm:$0xff]  }
 0x298   :  { %v5215_v0 = vpop.f32.mrb[47].mxu0  ;;  %5677 = vmatpush1.bf16.msra.mxu0 %v14864_v53  ;;  %v6345_v3 = vpop.f32.mrb[47].mxu1  ;;  %v14940_v53 = vld [vmem:[%s18621_s2 + $0x60] ss:$16 sps:$4 sm:$0xff]   ;;  %v14954_v60 = vld [vmem:[%s18621_s2 + $0xa4] ss:$16 sps:$4 sm:$0xff]  }
 0x299   :  { %5678 = vmatprep.subr.bf16.mxu0 %v14872_v55  ;;  %6807 = vmatpush1.bf16.msra.mxu1 %v14888_v56  ;;  %v14919_v55 = vld [vmem:[%s18619_s0 + $0x2a8] ss:$76 sps:$4 sm:$0xff]   ;;  %v14957_v61 = vld [vmem:[%s18621_s2 + $0xac] ss:$16 sps:$4 sm:$0xff]   ;;  %v14958_v3 = vld [vmem:[%s18621_s2 + $0xc0] ss:$16 sps:$4 sm:$0xff]  }
 0x29a   :  { %5610 = vmatmul.mubr.bf16.gmra.mrb[8].mxu0 %v14857_v59  ;;  %6740 = vmatmul.mubr.bf16.gmra.mrb[8].mxu1 %v14857_v59  ;;  %v14948_v56 = vld [vmem:[%s18621_s2 + $0x84] ss:$16 sps:$4 sm:$0xff]   ;;  %v14949_v59 = vld [vmem:[%s18621_s2 + $0x88] ss:$16 sps:$4 sm:$0xff]   ;;  %v14920_v0 = vld [vmem:[%s18619_s0 + $0x340] ss:$76 sps:$4 sm:$0xff]  }
 0x29b   :  { %5619 = vmatprep.mubr.bf16.mxu0 %v14861_v62  ;;  %6749 = vmatprep.mubr.bf16.mxu1 %v14861_v62  ;;  %v14952_v62 = vld [vmem:[%s18621_s2 + $0xa0] ss:$16 sps:$4 sm:$0xff]   ;;  %v14955_v63 = vld [vmem:[%s18621_s2 + $0xa8] ss:$16 sps:$4 sm:$0xff]  }
 0x29c   :  { %5679 = vmatpush1.bf16.msra.mxu0 %v14870_v1  ;;  %6808 = vmatprep.subr.bf16.mxu1 %v14899_v2  ;;  %v14960_v1 = vld [vmem:[%s18621_s2 + $0xc4] ss:$16 sps:$4 sm:$0xff]   ;;  %v14963_v2 = vld [vmem:[%s18621_s2 + $0xcc] ss:$16 sps:$4 sm:$0xff]  }
 0x29d   :  { %5680 = vmatprep.subr.bf16.mxu0 %v14884_v4  ;;  %6809 = vmatpush1.bf16.msra.mxu1 %v14897_v5  ;;  %v14961_v4 = vld [vmem:[%s18621_s2 + $0xc8] ss:$16 sps:$4 sm:$0xff]   ;;  %v14966_v5 = vld [vmem:[%s18621_s2 + $0xe4] ss:$16 sps:$4 sm:$0xff]  }
 0x29e   :  { %6810 = vmatprep.subr.bf16.mxu1 %v14902_v6  ;;  %v14969_v6 = vld [vmem:[%s18621_s2 + $0xec] ss:$16 sps:$4 sm:$0xff]  }
 0x2a0   :  { %5681 = vmatpush1.bf16.msra.mxu0 %v14882_v7  ;;  %v14964_v7 = vld [vmem:[%s18621_s2 + $0xe0] ss:$16 sps:$4 sm:$0xff]  }
 0x2a1   :  { %5682 = vmatprep.subr.bf16.mxu0 %v14896_v8  ;;  %6811 = vmatpush1.bf16.msra.mxu1 %v14900_v9  ;;  %v14967_v8 = vld [vmem:[%s18621_s2 + $0xe8] ss:$16 sps:$4 sm:$0xff]  }
 0x2a2   :  { %5620 = vmatmul.mubr.bf16.gmra.mrb[12].mxu0 %v14863_v10  ;;  %6750 = vmatmul.mubr.bf16.gmra.mrb[12].mxu1 %v14863_v10  ;;  %v14921_v9 = vld [vmem:[%s18619_s0 + $0x3d8] ss:$76 sps:$4 sm:$0xff]  }
 0x2a3   :  { %5629 = vmatprep.mubr.bf16.mxu0 %v14867_v11  ;;  %6759 = vmatprep.mubr.bf16.mxu1 %v14867_v11  ;;  %v14972_v10 = vld [vmem:[%s18621_s2 + $0x104] ss:$16 sps:$4 sm:$0xff]   ;;  %v14975_v11 = vld [vmem:[%s18621_s2 + $0x10c] ss:$16 sps:$4 sm:$0xff]  }
 0x2a4   :  { %5683 = vmatpush1.bf16.msra.mxu0 %v14894_v13  ;;  %6812 = vmatprep.subr.bf16.mxu1 %v14911_v14  ;;  %v14970_v13 = vld [vmem:[%s18621_s2 + $0x100] ss:$16 sps:$4 sm:$0xff]   ;;  %v14973_v14 = vld [vmem:[%s18621_s2 + $0x108] ss:$16 sps:$4 sm:$0xff]  }
 0x2a5   :  { %5684 = vmatprep.subr.bf16.mxu0 %v14908_v15  ;;  %6813 = vmatpush1.bf16.msra.mxu1 %v14909_v16  ;;  %v14978_v15 = vld [vmem:[%s18621_s2 + $0x124] ss:$16 sps:$4 sm:$0xff]   ;;  %v14981_v16 = vld [vmem:[%s18621_s2 + $0x12c] ss:$16 sps:$4 sm:$0xff]  }
 0x2a6   :  { %6814 = vmatprep.subr.bf16.mxu1 %v14914_v17  ;;  %v14976_v17 = vld [vmem:[%s18621_s2 + $0x120] ss:$16 sps:$4 sm:$0xff]  }
 0x2a8   :  { %5685 = vmatpush1.bf16.msra.mxu0 %v14906_v18  ;;  %v14979_v18 = vld [vmem:[%s18621_s2 + $0x128] ss:$16 sps:$4 sm:$0xff]  }
 0x2a9   :  { %6815 = vmatpush1.bf16.msra.mxu1 %v14912_v19  ;;  %9217 = vmatprep.subr.bf16.mxu0 %v14924_v38  ;;  %v14984_v19 = vld [vmem:[%s18621_s2 + $0x144] ss:$16 sps:$4 sm:$0xff]  }
 0x2aa   :  { %5630 = vmatmul.mubr.bf16.gmra.mrb[16].mxu0 %v14869_v20  ;;  %6760 = vmatmul.mubr.bf16.gmra.mrb[16].mxu1 %v14869_v20  ;;  %v14987_v20 = vld [vmem:[%s18621_s2 + $0x14c] ss:$16 sps:$4 sm:$0xff]  }
 0x2ab   :  { %5639 = vmatprep.mubr.bf16.mxu0 %v14879_v21  ;;  %6769 = vmatprep.mubr.bf16.mxu1 %v14879_v21  ;;  %v14982_v21 = vld [vmem:[%s18621_s2 + $0x140] ss:$16 sps:$4 sm:$0xff]  }
 0x2ac   :  { %9443 = vmatprep.subr.bf16.mxu1 %v14927_v41 }
 0x2b2   :  { %5640 = vmatmul.mubr.bf16.gmra.mrb[20].mxu0 %v14881_v22  ;;  %6770 = vmatmul.mubr.bf16.gmra.mrb[20].mxu1 %v14881_v22  ;;  %v14985_v22 = vld [vmem:[%s18621_s2 + $0x148] ss:$16 sps:$4 sm:$0xff]  }
 0x2b3   :  { %5649 = vmatprep.mubr.bf16.mxu0 %v14891_v23  ;;  %6779 = vmatprep.mubr.bf16.mxu1 %v14891_v23  ;;  %v14990_v23 = vld [vmem:[%s18621_s2 + $0x164] ss:$16 sps:$4 sm:$0xff]  }
 0x2ba   :  { %5650 = vmatmul.mubr.bf16.gmra.mrb[24].mxu0 %v14893_v24  ;;  %6780 = vmatmul.mubr.bf16.gmra.mrb[24].mxu1 %v14893_v24  ;;  %v14993_v24 = vld [vmem:[%s18621_s2 + $0x16c] ss:$16 sps:$4 sm:$0xff]  }
 0x2bb   :  { %5659 = vmatprep.mubr.bf16.mxu0 %v14903_v25  ;;  %6789 = vmatprep.mubr.bf16.mxu1 %v14903_v25  ;;  %v14988_v25 = vld [vmem:[%s18621_s2 + $0x160] ss:$16 sps:$4 sm:$0xff]  }
 0x2c2   :  { %5660 = vmatmul.mubr.bf16.gmra.mrb[60].mxu0 %v14905_v26  ;;  %6790 = vmatmul.mubr.bf16.gmra.mrb[60].mxu1 %v14905_v26  ;;  %v14991_v26 = vld [vmem:[%s18621_s2 + $0x168] ss:$16 sps:$4 sm:$0xff]  }
 0x2c3   :  { %5702 = vmatprep.mubr.bf16.mxu0 %v18627_v12  ;;  %6832 = vmatprep.mubr.bf16.mxu1 %v18627_v12 }
 0x2ca   :  { %5703 = vmatmul.mubr.bf16.vlgmr.msra.gmra.mrb[0].mxu0 %v14915_v27  ;;  %6833 = vmatmul.mubr.bf16.vlgmr.msra.gmra.mrb[0].mxu1 %v14915_v27  ;;  %v14996_v27 = vld [vmem:[%s18621_s2 + $0x184] ss:$16 sps:$4 sm:$0xff]  }
 0x2cb   :  { %5712 = vmatprep.mubr.bf16.mxu0 %v18627_v12  ;;  %6842 = vmatprep.mubr.bf16.mxu1 %v18627_v12 }
 0x2cc   :  { %9218 = vmatpush1.bf16.msra.mxu0 %v14922_v39  ;;  %9444 = vmatpush1.bf16.msra.mxu1 %v14925_v40  ;;  %v15006_v39 = vld [vmem:[%s18619_s0 + $0x470] ss:$76 sps:$4 sm:$0xff]   ;;  %v15009_v40 = vld [vmem:[%s18621_s2 + $0x1c4] ss:$16 sps:$4 sm:$0xff]  }
 0x2cd   :  { %9219 = vmatprep.subr.bf16.mxu0 %v14930_v42  ;;  %9445 = vmatprep.subr.bf16.mxu1 %v14933_v43  ;;  %v15007_v43 = vld [vmem:[%s18621_s2 + $0x1c0] ss:$16 sps:$4 sm:$0xff]  }
 0x2d0   :  { %9220 = vmatpush1.bf16.msra.mxu0 %v14928_v44  ;;  %9446 = vmatpush1.bf16.msra.mxu1 %v14931_v45  ;;  %v15010_v44 = vld [vmem:[%s18621_s2 + $0x1c8] ss:$16 sps:$4 sm:$0xff]  }
 0x2d1   :  { %9221 = vmatprep.subr.bf16.mxu0 %v14936_v47  ;;  %9447 = vmatprep.subr.bf16.mxu1 %v14939_v48  ;;  %v15012_v47 = vld [vmem:[%s18621_s2 + $0x1cc] ss:$16 sps:$4 sm:$0xff]   ;;  %v15015_v48 = vld [vmem:[%s18621_s2 + $0x1e4] ss:$16 sps:$4 sm:$0xff]  }
 0x2d2   :  { %5713 = vmatmul.mubr.bf16.gmra.mrb[4].mxu0 %v14916_v28  ;;  %6843 = vmatmul.mubr.bf16.gmra.mrb[4].mxu1 %v14916_v28  ;;  %v14999_v28 = vld [vmem:[%s18621_s2 + $0x18c] ss:$16 sps:$4 sm:$0xff]  }
 0x2d3   :  { %5722 = vmatprep.mubr.bf16.mxu0 %v18627_v12  ;;  %6852 = vmatprep.mubr.bf16.mxu1 %v18627_v12 }
 0x2d4   :  { %9222 = vmatpush1.bf16.msra.mxu0 %v14934_v49  ;;  %9448 = vmatpush1.bf16.msra.mxu1 %v14937_v50  ;;  %v15018_v49 = vld [vmem:[%s18621_s2 + $0x1ec] ss:$16 sps:$4 sm:$0xff]   ;;  %v15013_v50 = vld [vmem:[%s18621_s2 + $0x1e0] ss:$16 sps:$4 sm:$0xff]  }
 0x2d5   :  { %v5322_v29 = vpop.f32.mrb[48].mxu0  ;;  %v6452_v30 = vpop.f32.mrb[48].mxu1  ;;  %9223 = vmatprep.subr.bf16.mxu0 %v14942_v51  ;;  %9449 = vmatprep.subr.bf16.mxu1 %v14945_v52  ;;  %v15016_v51 = vld [vmem:[%s18621_s2 + $0x1e8] ss:$16 sps:$4 sm:$0xff]   ;;  %v18641_v52 = vmov 0.0  }
 0x2d6   :  { %v5324_v31 = vpop.f32.mrb[49].mxu0  ;;  %v6454_v33 = vpop.f32.mrb[49].mxu1  ;;  %v14994_v29 = vld [vmem:[%s18621_s2 + $0x180] ss:$16 sps:$4 sm:$0xff]   ;;  %v14997_v30 = vld [vmem:[%s18621_s2 + $0x188] ss:$16 sps:$4 sm:$0xff]   ;;  %7658 = vadd.xlane.f32.xlu0 %v18641_v52 }
 0x2d7   :  { %v5326_v34 = vpop.f32.mrb[50].mxu0  ;;  %v6456_v35 = vpop.f32.mrb[50].mxu1  ;;  %v15002_v31 = vld [vmem:[%s18621_s2 + $0x1a4] ss:$16 sps:$4 sm:$0xff]   ;;  %v15000_v33 = vld [vmem:[%s18621_s2 + $0x1a0] ss:$16 sps:$4 sm:$0xff]  }
 0x2d8   :  { %v5328_v36 = vpop.f32.mrb[51].mxu0  ;;  %v6458_v37 = vpop.f32.mrb[51].mxu1  ;;  %9224 = vmatpush1.bf16.msra.mxu0 %v14940_v53  ;;  %9450 = vmatpush1.bf16.msra.mxu1 %v14943_v54  ;;  %v15003_v34 = vld [vmem:[%s18621_s2 + $0x1a8] ss:$16 sps:$4 sm:$0xff]   ;;  %v15021_v53 = vld [vmem:[%s18621_s2 + $0x204] ss:$16 sps:$4 sm:$0xff]  }
 0x2d9   :  { %9225 = vmatprep.subr.bf16.mxu0 %v14948_v56  ;;  %9451 = vmatprep.subr.bf16.mxu1 %v14951_v57  ;;  %v15024_v54 = vld [vmem:[%s18621_s2 + $0x20c] ss:$16 sps:$4 sm:$0xff]   ;;  %v15022_v56 = vld [vmem:[%s18621_s2 + $0x208] ss:$16 sps:$4 sm:$0xff]  }
 0x2da   :  { %5723 = vmatmul.mubr.bf16.gmra.mrb[8].mxu0 %v14917_v32  ;;  %6853 = vmatmul.mubr.bf16.gmra.mrb[8].mxu1 %v14917_v32  ;;  %v15005_v32 = vld [vmem:[%s18621_s2 + $0x1ac] ss:$16 sps:$4 sm:$0xff]  }
 0x2db   :  { %5732 = vmatprep.mubr.bf16.mxu0 %v18627_v12  ;;  %6862 = vmatprep.mubr.bf16.mxu1 %v18627_v12 }
 0x2dc   :  { %9226 = vmatpush1.bf16.msra.mxu0 %v14946_v58  ;;  %9452 = vmatpush1.bf16.msra.mxu1 %v14949_v59 }
 0x2dd   :  { %9227 = vmatprep.subr.bf16.mxu0 %v14954_v60  ;;  %9453 = vmatprep.subr.bf16.mxu1 %v14957_v61 }
 0x2e0   :  { %9228 = vmatpush1.bf16.msra.mxu0 %v14952_v62  ;;  %9454 = vmatpush1.bf16.msra.mxu1 %v14955_v63 }
 0x2e1   :  { %9229 = vmatprep.subr.bf16.mxu0 %v14960_v1  ;;  %9455 = vmatprep.subr.bf16.mxu1 %v14963_v2  ;;  %v15025_v1 = vld [vmem:[%s18621_s2 + $0x220] ss:$16 sps:$4 sm:$0xff]   ;;  %v15027_v2 = vld [vmem:[%s18621_s2 + $0x224] ss:$16 sps:$4 sm:$0xff]  }
 0x2e2   :  { %5733 = vmatmul.mubr.bf16.gmra.mrb[12].mxu0 %v14918_v46  ;;  %6863 = vmatmul.mubr.bf16.gmra.mrb[12].mxu1 %v14918_v46 }
 0x2e3   :  { %5742 = vmatprep.mubr.bf16.mxu0 %v18627_v12  ;;  %6872 = vmatprep.mubr.bf16.mxu1 %v18627_v12 }
 0x2e4   :  { %9230 = vmatpush1.bf16.msra.mxu0 %v14958_v3  ;;  %9456 = vmatpush1.bf16.msra.mxu1 %v14961_v4  ;;  %v15028_v3 = vld [vmem:[%s18621_s2 + $0x228] ss:$16 sps:$4 sm:$0xff]   ;;  %v15030_v4 = vld [vmem:[%s18621_s2 + $0x22c] ss:$16 sps:$4 sm:$0xff]  }
 0x2e5   :  { %9231 = vmatprep.subr.bf16.mxu0 %v14966_v5  ;;  %9457 = vmatprep.subr.bf16.mxu1 %v14969_v6  ;;  %v15031_v5 = vld [vmem:[%s18621_s2 + $0x240] ss:$16 sps:$4 sm:$0xff]   ;;  %v15033_v6 = vld [vmem:[%s18621_s2 + $0x244] ss:$16 sps:$4 sm:$0xff]  }
 0x2e8   :  { %9232 = vmatpush1.bf16.msra.mxu0 %v14964_v7  ;;  %9458 = vmatpush1.bf16.msra.mxu1 %v14967_v8  ;;  %v15034_v7 = vld [vmem:[%s18621_s2 + $0x248] ss:$16 sps:$4 sm:$0xff]   ;;  %v15036_v8 = vld [vmem:[%s18621_s2 + $0x24c] ss:$16 sps:$4 sm:$0xff]  }
 0x2e9   :  { %9233 = vmatprep.subr.bf16.mxu0 %v14972_v10  ;;  %9459 = vmatprep.subr.bf16.mxu1 %v14975_v11  ;;  %v15039_v10 = vld [vmem:[%s18621_s2 + $0x264] ss:$16 sps:$4 sm:$0xff]   ;;  %v15040_v11 = vld [vmem:[%s18621_s2 + $0x268] ss:$16 sps:$4 sm:$0xff]  }
 0x2ea   :  { %5743 = vmatmul.mubr.bf16.gmra.mrb[16].mxu0 %v14919_v55  ;;  %6873 = vmatmul.mubr.bf16.gmra.mrb[16].mxu1 %v14919_v55  ;;  %v15019_v55 = vld [vmem:[%s18621_s2 + $0x200] ss:$16 sps:$4 sm:$0xff]  }
 0x2eb   :  { %5752 = vmatprep.mubr.bf16.mxu0 %v18627_v12  ;;  %6882 = vmatprep.mubr.bf16.mxu1 %v18627_v12 }
 0x2ec   :  { %9234 = vmatpush1.bf16.msra.mxu0 %v14970_v13  ;;  %9460 = vmatpush1.bf16.msra.mxu1 %v14973_v14  ;;  %v15042_v13 = vld [vmem:[%s18621_s2 + $0x26c] ss:$16 sps:$4 sm:$0xff]   ;;  %v15043_v14 = vld [vmem:[%s18621_s2 + $0x280] ss:$16 sps:$4 sm:$0xff]  }
 0x2ed   :  { %9235 = vmatprep.subr.bf16.mxu0 %v14978_v15  ;;  %9461 = vmatprep.subr.bf16.mxu1 %v14981_v16  ;;  %v15045_v15 = vld [vmem:[%s18621_s2 + $0x284] ss:$16 sps:$4 sm:$0xff]   ;;  %v15046_v16 = vld [vmem:[%s18621_s2 + $0x288] ss:$16 sps:$4 sm:$0xff]  }
 0x2f0   :  { %9236 = vmatpush1.bf16.msra.mxu0 %v14976_v17  ;;  %9462 = vmatpush1.bf16.msra.mxu1 %v14979_v18  ;;  %v15048_v17 = vld [vmem:[%s18621_s2 + $0x28c] ss:$16 sps:$4 sm:$0xff]   ;;  %v7681_v18 = vlaneseq }
 0x2f1   :  { %9237 = vmatprep.subr.bf16.mxu0 %v14984_v19  ;;  %9463 = vmatprep.subr.bf16.mxu1 %v14987_v20  ;;  %v15049_v19 = vld [vmem:[%s18621_s2 + $0x2a0] ss:$16 sps:$4 sm:$0xff]   ;;  %v15051_v20 = vld [vmem:[%s18621_s2 + $0x2a4] ss:$16 sps:$4 sm:$0xff]  }
 0x2f2   :  { %5753 = vmatmul.mubr.bf16.gmra.mrb[20].mxu0 %v14920_v0  ;;  %6883 = vmatmul.mubr.bf16.gmra.mrb[20].mxu1 %v14920_v0 }
 0x2f3   :  { %5762 = vmatprep.mubr.bf16.mxu0 %v18627_v12  ;;  %6892 = vmatprep.mubr.bf16.mxu1 %v18627_v12 }
 0x2f4   :  { %9238 = vmatpush1.bf16.msra.mxu0 %v14982_v21  ;;  %9464 = vmatpush1.bf16.msra.mxu1 %v14985_v22  ;;  %v15052_v21 = vld [vmem:[%s18621_s2 + $0x2a8] ss:$16 sps:$4 sm:$0xff]   ;;  %v15054_v22 = vld [vmem:[%s18621_s2 + $0x2ac] ss:$16 sps:$4 sm:$0xff]  }
 0x2f5   :  { %9239 = vmatprep.subr.bf16.mxu0 %v14990_v23  ;;  %9465 = vmatprep.subr.bf16.mxu1 %v14993_v24  ;;  %v16088_v23 = vshrl.u32 %v7681_v18, 7 }
 0x2f7   :  { %18762 = vst [vmem:[#allocation17_spill] sm:$0xff] %v16088_v23 }
 0x2f8   :  { %9240 = vmatpush1.bf16.msra.mxu0 %v14988_v25  ;;  %9466 = vmatpush1.bf16.msra.mxu1 %v14991_v26 }
 0x2f9   :  { %9241 = vmatprep.subr.bf16.mxu0 %v14996_v27  ;;  %9467 = vmatprep.subr.bf16.mxu1 %v14999_v28  ;;  %v7651_v28 = vld [vmem:[#allocation11 + $0x1] ss:$8 sm:$0xf] }
 0x2fa   :  { %5763 = vmatmul.mubr.bf16.gmra.mrb[24].mxu0 %v14921_v9  ;;  %6893 = vmatmul.mubr.bf16.gmra.mrb[24].mxu1 %v14921_v9  ;;  %v15037_v9 = vld [vmem:[%s18621_s2 + $0x260] ss:$16 sps:$4 sm:$0xff]  }
 0x2fb   :  { %5772 = vmatprep.mubr.bf16.mxu0 %v18627_v12  ;;  %6902 = vmatprep.mubr.bf16.mxu1 %v18627_v12 }
 0x2fc   :  { %9242 = vmatpush1.bf16.msra.mxu0 %v14994_v29  ;;  %9468 = vmatpush1.bf16.msra.mxu1 %v14997_v30  ;;  %v16091_v29 = vsub.s32 0, %v16088_v23 }
 0x2fd   :  { %9243 = vmatprep.subr.bf16.mxu0 %v15002_v31  ;;  %9469 = vmatprep.subr.bf16.mxu1 %v15005_v32  ;;  %v16094_v32 = vsub.s32 1, %v16088_v23 }
 0x2fe   :  { %18763 = vst [vmem:[#allocation18_spill] sm:$0xff] %v16091_v29 }
 0x2ff   :  { %18764 = vst [vmem:[#allocation19_spill] sm:$0xff] %v16094_v32 }
 0x300   :  { %9244 = vmatpush1.bf16.msra.mxu0 %v15000_v33  ;;  %9470 = vmatpush1.bf16.msra.mxu1 %v15003_v34  ;;  %v16097_v33 = vsub.s32 2, %v16088_v23 }
 0x301   :  { %9245 = vmatprep.subr.bf16.mxu0 %v15009_v40  ;;  %9471 = vmatprep.subr.bf16.mxu1 %v15012_v47  ;;  %v15055_v40 = vld [vmem:[%s18621_s2 + $0x2c0] ss:$16 sps:$4 sm:$0xff]   ;;  %v15060_v47 = vld [vmem:[%s18621_s2 + $0x2cc] ss:$16 sps:$4 sm:$0xff]  }
 0x302   :  { %5773 = vmatmul.mubr.bf16.gmra.mrb[64].mxu0 %v15006_v39  ;;  %6903 = vmatmul.mubr.bf16.gmra.mrb[64].mxu1 %v15006_v39  ;;  %18765 = vst [vmem:[#allocation20_spill] sm:$0xff] %v16097_v33  ;;  %v16103_v39 = vrot.slane %v7651_v28, %v16091_v29 }
 0x303   :  { %9249 = vmatprep.mubr.bf16.mxu0 %v18627_v12  ;;  %9475 = vmatprep.mubr.bf16.mxu1 %v18627_v12 }
 0x304   :  { %9246 = vmatpush1.bf16.msra.mxu0 %v15007_v43  ;;  %9472 = vmatpush1.bf16.msra.mxu1 %v15010_v44  ;;  %v16115_v43 = vrot.slane %v7651_v28, %v16094_v32 }
 0x305   :  { %9247 = vmatprep.subr.bf16.mxu0 %v15015_v48  ;;  %9473 = vmatprep.subr.bf16.mxu1 %v15018_v49  ;;  %v16133_v49 = vrot.slane %v7651_v28, %v16097_v33 }
 0x307   :  { %18767 = vst [vmem:[#allocation22_spill] sm:$0xff] %v16133_v49 }
 0x308   :  { %9248 = vmatpush1.bf16.msra.mxu0 %v15013_v50  ;;  %9474 = vmatpush1.bf16.msra.mxu1 %v15016_v51 }
 0x309   :  { %9330 = vmatprep.subr.bf16.mxu0 %v15021_v53  ;;  %9556 = vmatprep.subr.bf16.mxu1 %v15024_v54 }
 0x30b   :  { %9250 = vmatmul.mubr.bf16.vlgmr.msra.gmra.mrb[68].mxu0 %v18627_v12  ;;  %9476 = vmatmul.mubr.bf16.vlgmr.msra.gmra.mrb[68].mxu1 %v18627_v12 }
 0x30c   :  { %9331 = vmatpush1.bf16.msra.mxu0 %v15019_v55  ;;  %9557 = vmatpush1.bf16.msra.mxu1 %v15022_v56 }
 0x30d   :  { %9332 = vmatprep.subr.bf16.mxu0 %v15027_v2  ;;  %9558 = vmatprep.subr.bf16.mxu1 %v15030_v4 }
 0x310   :  { %9333 = vmatpush1.bf16.msra.mxu0 %v15025_v1  ;;  %9559 = vmatpush1.bf16.msra.mxu1 %v15028_v3 }
 0x311   :  { %9334 = vmatprep.subr.bf16.mxu0 %v15033_v6  ;;  %9560 = vmatprep.subr.bf16.mxu1 %v15036_v8 }
 0x314   :  { %9335 = vmatpush1.bf16.msra.mxu0 %v15031_v5  ;;  %9561 = vmatpush1.bf16.msra.mxu1 %v15034_v7 }
 0x315   :  { %v5435_v35 = vpop.f32.mrb[52].mxu0  ;;  %v6565_v36 = vpop.f32.mrb[52].mxu1  ;;  %9336 = vmatprep.subr.bf16.mxu0 %v15039_v10  ;;  %9562 = vmatprep.subr.bf16.mxu1 %v15042_v13 }
 0x316   :  { %v5437_v37 = vpop.f32.mrb[53].mxu0  ;;  %v6567_v38 = vpop.f32.mrb[53].mxu1  ;;  %v7649_v36 = vld [vmem:[#allocation11] ss:$8 sm:$0xf] }
 0x317   :  { %v5439_v41 = vpop.f32.mrb[54].mxu0  ;;  %v6569_v42 = vpop.f32.mrb[54].mxu1  ;;  %v16100_v37 = vsub.s32 3, %v16088_v23  ;;  %v7653_v38 = vld [vmem:[#allocation11 + $0x2] ss:$8 sm:$0xf]  ;;  %v16118_v44 = vrot.slane %v7649_v36, %v16094_v32 }
 0x318   :  { %v5441_v45 = vpop.f32.mrb[55].mxu0  ;;  %v6571_v46 = vpop.f32.mrb[55].mxu1  ;;  %9337 = vmatpush1.bf16.msra.mxu0 %v15037_v9  ;;  %9563 = vmatpush1.bf16.msra.mxu1 %v15040_v11  ;;  %v15057_v41 = vld [vmem:[%s18621_s2 + $0x2c4] ss:$16 sps:$4 sm:$0xff]   ;;  %v15058_v42 = vld [vmem:[%s18621_s2 + $0x2c8] ss:$16 sps:$4 sm:$0xff]   ;;  %v16139_v51 = vrot.slane %v7653_v38, %v16094_v32  ;;  %v16142_v55 = vrot.slane %v7653_v38, %v16091_v29  ;;  %v16145_v56 = vrot.slane %v7653_v38, %v16097_v33 }
 0x319   :  { %9338 = vmatprep.subr.bf16.mxu0 %v15045_v15  ;;  %9564 = vmatprep.subr.bf16.mxu1 %v15048_v17  ;;  %18766 = vst [vmem:[#allocation21_spill] sm:$0xff] %v16100_v37  ;;  %v16121_v45 = vrot.slane %v7649_v36, %v16091_v29  ;;  %v16124_v46 = vrot.slane %v7649_v36, %v16097_v33 }
 0x31a   :  { %v16130_v48 = vrot.slane %v7649_v36, %v16100_v37  ;;  %v16136_v50 = vrot.slane %v7651_v28, %v16100_v37  ;;  %18769 = vst [vmem:[#allocation24_spill] sm:$0xff] %v16139_v51  ;;  %18770 = vst [vmem:[#allocation25_spill] sm:$0xff] %v16142_v55  ;;  %v15072_v55 = vld [vmem:[%s18621_s2 + $0x30c] ss:$16 sps:$4 sm:$0xff]  }
 0x31b   :  { %18771 = vst [vmem:[#allocation26_spill] sm:$0xff] %v16145_v56 }
 0x31c   :  { %9339 = vmatpush1.bf16.msra.mxu0 %v15043_v14  ;;  %9565 = vmatpush1.bf16.msra.mxu1 %v15046_v16  ;;  %18768 = vst [vmem:[#allocation23_spill] sm:$0xff] %v16136_v50 }
 0x31d   :  { %9340 = vmatprep.subr.bf16.mxu0 %v15051_v20  ;;  %9566 = vmatprep.subr.bf16.mxu1 %v15054_v22 }
 0x320   :  { %9341 = vmatpush1.bf16.msra.mxu0 %v15049_v19  ;;  %9567 = vmatpush1.bf16.msra.mxu1 %v15052_v21 }
 0x321   :  { %9342 = vmatprep.subr.bf16.mxu0 %v15057_v41  ;;  %9568 = vmatprep.subr.bf16.mxu1 %v15060_v47 }
 0x324   :  { %9343 = vmatpush1.bf16.msra.mxu0 %v15055_v40  ;;  %9569 = vmatpush1.bf16.msra.mxu1 %v15058_v42 }
 0x355   :  { %v5548_v57 = vpop.f32.mrb[56].mxu0  ;;  %v6678_v58 = vpop.f32.mrb[56].mxu1 }
 0x356   :  { %v5550_v59 = vpop.f32.mrb[57].mxu0  ;;  %v6680_v60 = vpop.f32.mrb[57].mxu1  ;;  %v16148_v57 = vrot.slane %v7653_v38, %v16100_v37 }
 0x357   :  { %v5552_v61 = vpop.f32.mrb[58].mxu0  ;;  %v6682_v62 = vpop.f32.mrb[58].mxu1 }
 0x358   :  { %v5554_v63 = vpop.f32.mrb[59].mxu0  ;;  %v6684_v0 = vpop.f32.mrb[59].mxu1  ;;  %18772 = vst [vmem:[#allocation27_spill] sm:$0xff] %v16148_v57 }
 0x395   :  { %v5661_v24 = vpop.f32.mrb[60].mxu0  ;;  %v6791_v25 = vpop.f32.mrb[60].mxu1 }
 0x396   :  { %v5663_v26 = vpop.f32.mrb[61].mxu0  ;;  %v6793_v27 = vpop.f32.mrb[61].mxu1 }
 0x397   :  { %v5665_v30 = vpop.f32.mrb[62].mxu0  ;;  %v6795_v31 = vpop.f32.mrb[62].mxu1 }
 0x398   :  { %v5667_v34 = vpop.f32.mrb[63].mxu0  ;;  %v6797_v35 = vpop.f32.mrb[63].mxu1 }
 0x39d   :  { %v5704_v53 = vpop.f32.mrb[0].mxu0  ;;  %v6834_v54 = vpop.f32.mrb[0].mxu1 }
 0x39e   :  { %vm7001_vm0 = vcmp.ge.f32.partialorder %v5704_v53, 1.25  ;;  %vm7003_vm1 = vcmp.ge.f32.partialorder %v6834_v54, 1.25  ;;  %v5706_v58 = vpop.f32.mrb[1].mxu0  ;;  %v6836_v59 = vpop.f32.mrb[1].mxu1  ;;  %v7057_v60 = vmul.f32 0.75, %v5704_v53  ;;  %v7059_v61 = vmul.f32 0.75, %v6834_v54 }
 0x39f   :  { %v16151_v62 = vsel %vm7001_vm0, 1.0, %v18641_v52  ;;  %v16154_v63 = vsel %vm7003_vm1, 1.0, %v18641_v52  ;;  %vm7002_vm2 = vcmp.ge.f32.partialorder %v5706_v58, 1.25  ;;  %vm7004_vm3 = vcmp.ge.f32.partialorder %v6836_v59, 1.25  ;;  %v5708_v0 = vpop.f32.mrb[2].mxu0  ;;  %v6838_v1 = vpop.f32.mrb[2].mxu1 }
 0x3a0   :  { %18773 = vst [vmem:[#allocation28_spill] sm:$0xff] %v16154_v63  ;;  %v7025_v2 = vsub.f32 1.0, %v16151_v62  ;;  %v7027_v3 = vsub.f32 1.0, %v16154_v63  ;;  %v16159_v4 = vsel %vm7002_vm2, 1.0, %v18641_v52  ;;  %v16162_v5 = vsel %vm7004_vm3, 1.0, %v18641_v52  ;;  %v16164_v6 = vpop.f32.mrb[3].mxu0 }
 0x3a1   :  { %18774 = vst [vmem:[#allocation29_spill] sm:$0xff] %v16162_v5  ;;  %v16166_v7 = vpop.f32.mrb[3].mxu1  ;;  %v7026_v8 = vsub.f32 1.0, %v16159_v4  ;;  %v7028_v9 = vsub.f32 1.0, %v16162_v5  ;;  %vm7005_vm4 = vcmp.ge.f32.partialorder %v5708_v0, 1.25  ;;  %vm7007_vm5 = vcmp.ge.f32.partialorder %v6838_v1, 1.25 }
 0x3a2   :  { %v7033_v10 = vmul.f32 %v7025_v2, %v5704_v53  ;;  %v7035_v11 = vmul.f32 %v7027_v3, %v6834_v54  ;;  %v16171_v13 = vsel %vm7005_vm4, 1.0, %v18641_v52  ;;  %v16174_v14 = vsel %vm7007_vm5, 1.0, %v18641_v52 }
 0x3a3   :  { %18775 = vst [vmem:[#allocation30_spill] sm:$0xff] %v16174_v14  ;;  %v7034_v15 = vmul.f32 %v7026_v8, %v5706_v58  ;;  %v7036_v16 = vmul.f32 %v7028_v9, %v6836_v59  ;;  %v7029_v17 = vsub.f32 1.0, %v16171_v13  ;;  %v7031_v18 = vsub.f32 1.0, %v16174_v14  ;;  %v15061_v9 = vld [vmem:[%s18621_s2 + $0x2e0] ss:$16 sps:$4 sm:$0xff]  }
 0x3a4   :  { %v7073_v19 = vmul.f32 0.97021484, %v7033_v10  ;;  %v7075_v20 = vmul.f32 0.97021484, %v7035_v11  ;;  %vm7006_vm6 = vcmp.ge.f32.partialorder %v16164_v6, 1.25  ;;  %vm7008_vm7 = vcmp.ge.f32.partialorder %v16166_v7, 1.25 }
 0x3a5   :  { %v7074_v21 = vmul.f32 0.97021484, %v7034_v15  ;;  %v7076_v22 = vmul.f32 0.97021484, %v7036_v16  ;;  %v7037_v24 = vmul.f32 %v7029_v17, %v5708_v0  ;;  %v7039_v25 = vmul.f32 %v7031_v18, %v6838_v1  ;;  %v5714_v26 = vpop.f32.mrb[4].mxu0  ;;  %v6844_v27 = vpop.f32.mrb[4].mxu1  ;;  %v15063_v17 = vld [vmem:[%s18621_s2 + $0x2e4] ss:$16 sps:$4 sm:$0xff]  }
 0x3a6   :  { %v16181_v28 = vsel %vm7006_vm6, 1.0, %v18641_v52  ;;  %v16184_v30 = vsel %vm7008_vm7, 1.0, %v18641_v52  ;;  %v16186_v31 = vadd.f32 %v7057_v60, %v5714_v26  ;;  %v16188_v34 = vadd.f32 %v7059_v61, %v6844_v27  ;;  %v5716_v35 = vpop.f32.mrb[5].mxu0  ;;  %v6846_v36 = vpop.f32.mrb[5].mxu1  ;;  %9344 = vmatprep.subr.bf16.mxu0 %v15063_v17 }
 0x3a7   :  { %18776 = vst [vmem:[#allocation31_spill] sm:$0xff] %v16184_v30  ;;  %v7077_v38 = vmul.f32 0.97021484, %v7037_v24  ;;  %v7079_v40 = vmul.f32 0.97021484, %v7039_v25  ;;  %v7030_v41 = vsub.f32 1.0, %v16181_v28  ;;  %v7032_v42 = vsub.f32 1.0, %v16184_v30  ;;  %v5718_v47 = vpop.f32.mrb[6].mxu0  ;;  %9345 = vmatpush1.bf16.msra.mxu0 %v15061_v9 }
 0x3a8   :  { %v6848_v53 = vpop.f32.mrb[6].mxu1  ;;  %v7081_v54 = vadd.f32 %v7073_v19, %v16186_v31  ;;  %v7083_v2 = vadd.f32 %v7075_v20, %v16188_v34  ;;  %v7058_v3 = vmul.f32 0.75, %v5706_v58  ;;  %v7060_v8 = vmul.f32 0.75, %v6836_v59  ;;  %v16194_v60 = vpop.f32.mrb[7].mxu0  ;;  %v15064_v58 = vld [vmem:[%s18621_s2 + $0x2e8] ss:$16 sps:$4 sm:$0xff]  }
 0x3a9   :  { %v16196_v61 = vpop.f32.mrb[7].mxu1  ;;  %v7038_v10 = vmul.f32 %v7030_v41, %v16164_v6  ;;  %v7040_v11 = vmul.f32 %v7032_v42, %v16166_v7  ;;  %v7061_v15 = vmul.f32 0.75, %v5708_v0  ;;  %v7063_v16 = vmul.f32 0.75, %v6838_v1  ;;  %v15066_v19 = vld [vmem:[%s18621_s2 + $0x2ec] ss:$16 sps:$4 sm:$0xff]  }
 0x3aa   :  { %vm7089_vm8 = vcmp.ge.f32.partialorder %v7081_v54, 1.25  ;;  %vm7091_vm9 = vcmp.ge.f32.partialorder %v7083_v2, 1.25  ;;  %v16209_v59 = vadd.f32 %v7058_v3, %v5716_v35  ;;  %v16211_v18 = vadd.f32 %v7060_v8, %v6846_v36  ;;  %9570 = vmatprep.subr.bf16.mxu1 %v15066_v19 }
 0x3ab   :  { %v16216_v0 = vmul.f32 0.97021484, %v7038_v10  ;;  %v16218_v1 = vmul.f32 0.97021484, %v7040_v11  ;;  %v16221_v20 = vsel %vm7089_vm8, 1.0, %v18641_v52  ;;  %v16224_v24 = vsel %vm7091_vm9, 1.0, %v18641_v52  ;;  %9571 = vmatpush1.bf16.msra.mxu1 %v15064_v58 }
 0x3ac   :  { %18777 = vst [vmem:[#allocation32_spill] sm:$0xff] %v16221_v20  ;;  %v7113_v25 = vsub.f32 1.0, %v16221_v20  ;;  %v16229_v26 = vmul.f32 %v16221_v20, %v16103_v39  ;;  %v7115_v27 = vsub.f32 1.0, %v16224_v24  ;;  %v7082_v35 = vadd.f32 %v7074_v21, %v16209_v59  ;;  %9572 = vmatprep.subr.bf16.mxu1 %v15072_v55 }
 0x3ad   :  { %v7084_v36 = vadd.f32 %v7076_v22, %v16211_v18  ;;  %v16234_v41 = vadd.f32 %v7061_v15, %v5718_v47  ;;  %v16236_v42 = vadd.f32 %v7063_v16, %v6848_v53  ;;  %v7702_v3 = vmul.f32 %v16159_v4, %v16118_v44  ;;  %v16240_v8 = vpop.f32.mrb[8].mxu0  ;;  %v16242_v10 = vpop.f32.mrb[8].mxu1 }
 0x3ae   :  { %18778 = vst [vmem:[#allocation33_spill] sm:$0xff] %v16229_v26  ;;  %v16244_v11 = vmul.f32 %v7113_v25, %v7081_v54  ;;  %v16246_v17 = vmul.f32 %v7115_v27, %v7083_v2  ;;  %vm7090_vm10 = vcmp.ge.f32.partialorder %v7082_v35, 1.25  ;;  %v7706_v21 = vmul.f32 %v16181_v28, %v16118_v44  ;;  %v16250_v22 = vpop.f32.mrb[9].mxu0  ;;  %v16252_v47 = vpop.f32.mrb[9].mxu1 }
 0x3af   :  { %v16255_v53 = vsel %vm7090_vm10, 1.0, %v18641_v52  ;;  %vm7092_vm11 = vcmp.ge.f32.partialorder %v7084_v36, 1.25  ;;  %v7085_v9 = vadd.f32 %v7077_v38, %v16234_v41  ;;  %v7087_v15 = vadd.f32 %v7079_v40, %v16236_v42  ;;  %v16259_v54 = vpop.f32.mrb[10].mxu0  ;;  %v16261_v2 = vpop.f32.mrb[10].mxu1 }
 0x3b0   :  { %18779 = vst [vmem:[#allocation34_spill] sm:$0xff] %v16255_v53  ;;  %v7114_v16 = vsub.f32 1.0, %v16255_v53  ;;  %v16266_v58 = vmul.f32 %v16255_v53, %v16115_v43  ;;  %v16269_v19 = vsel %vm7092_vm11, 1.0, %v18641_v52  ;;  %v7718_v25 = vpack.c.bf16 %v7706_v21, %v7702_v3  ;;  %v16271_v27 = vpop.f32.mrb[11].mxu0  ;;  %v16273_v12 = vpop.f32.mrb[11].mxu1 }
 0x3b1   :  { %v7116_v38 = vsub.f32 1.0, %v16269_v19  ;;  %vm7093_vm12 = vcmp.ge.f32.partialorder %v7085_v9, 1.25  ;;  %vm7095_vm13 = vcmp.ge.f32.partialorder %v7087_v15, 1.25  ;;  %v7062_v40 = vmul.f32 0.75, %v16164_v6 }
 0x3b2   :  { %18780 = vst [vmem:[#allocation35_spill] sm:$0xff] %v16266_v58  ;;  %v16277_v23 = vmul.f32 %v7114_v16, %v7082_v35  ;;  %v16280_v37 = vsel %vm7093_vm12, 1.0, %v18641_v52  ;;  %v16283_v32 = vsel %vm7095_vm13, 1.0, %v18641_v52  ;;  %9259 = vmatprep.mubr.bf16.mxu0 %v7718_v25  ;;  %9485 = vmatprep.mubr.bf16.mxu1 %v7718_v25  ;;  %v7064_v33 = vmul.f32 0.75, %v16166_v7  ;;  %v15067_v35 = vld [vmem:[%s18621_s2 + $0x300] ss:$16 sps:$4 sm:$0xff]  }
 0x3b3   :  { %18781 = vst [vmem:[#allocation36_spill] sm:$0xff] %v16280_v37  ;;  %18782 = vst [vmem:[#allocation37_spill] sm:$0xff] %v16283_v32  ;;  %v16286_v29 = vmul.f32 %v7116_v38, %v7084_v36  ;;  %v7117_v57 = vsub.f32 1.0, %v16280_v37  ;;  %v16291_v56 = vmul.f32 %v16280_v37, %v16103_v39  ;;  %v7119_v6 = vsub.f32 1.0, %v16283_v32  ;;  %v15069_v16 = vld [vmem:[%s18621_s2 + $0x304] ss:$16 sps:$4 sm:$0xff]  }
 0x3b4   :  { %v16301_v7 = vadd.f32 %v7062_v40, %v16194_v60  ;;  %v16304_v36 = vadd.f32 %v7064_v33, %v16196_v61  ;;  %v7701_v25 = vmul.f32 %v16151_v62, %v16121_v45  ;;  %v7705_v38 = vmul.f32 %v16171_v13, %v16121_v45  ;;  %v15070_v52 = vld [vmem:[%s18621_s2 + $0x308] ss:$16 sps:$4 sm:$0xff]   ;;  %9346 = vmatprep.subr.bf16.mxu0 %v15069_v16  ;;  %v15073_v16 = vld [vmem:[%s18621_s2 + $0x320] ss:$16 sps:$4 sm:$0xff]  }
 0x3b5   :  { %18783 = vst [vmem:[#allocation38_spill] sm:$0xff] %v16291_v56  ;;  %v16316_v56 = vmul.f32 %v7117_v57, %v7085_v9  ;;  %v16318_v60 = vmul.f32 %v7119_v6, %v7087_v15  ;;  %v16322_v33 = vmul.f32 %v16154_v63, %v16124_v46  ;;  %v16326_v61 = vmul.f32 %v16162_v5, %v16130_v48  ;;  %v16328_v40 = vpop.f32.mrb[12].mxu0  ;;  %v16330_v26 = vpop.f32.mrb[12].mxu1  ;;  %v15075_v57 = vld [vmem:[%s18621_s2 + $0x324] ss:$16 sps:$4 sm:$0xff]  }
 0x3b6   :  { %v7086_v9 = vadd.f32 %v16216_v0, %v16301_v7  ;;  %v7088_v15 = vadd.f32 %v16218_v1, %v16304_v36  ;;  %v7717_v6 = vpack.c.bf16 %v7705_v38, %v7701_v25  ;;  %v7725_v51 = vadd.f32 %v7702_v3, %v7701_v25  ;;  %v16339_v58 = vpop.f32.mrb[13].mxu0  ;;  %v16341_v32 = vpop.f32.mrb[13].mxu1  ;;  %v15078_v5 = vld [vmem:[%s18621_s2 + $0x32c] ss:$16 sps:$4 sm:$0xff]   ;;  %9347 = vmatpush1.bf16.msra.mxu0 %v15067_v35  ;;  %v15076_v63 = vld [vmem:[%s18621_s2 + $0x328] ss:$16 sps:$4 sm:$0xff]  }
 0x3b7   :  { %18784 = vst [vmem:[#allocation39_spill] sm:$0xff] %v16322_v33  ;;  %18785 = vst [vmem:[#allocation40_spill] sm:$0xff] %v16326_v61  ;;  %v16351_v0 = vmul.f32 %v16174_v14, %v16124_v46  ;;  %v16355_v1 = vmul.f32 %v16184_v30, %v16130_v48  ;;  %v7730_v3 = vadd.f32 %v7706_v21, %v7705_v38  ;;  %v7145_v25 = vmul.f32 0.75, %v16186_v31  ;;  %v16358_v55 = vpop.f32.mrb[14].mxu1  ;;  %v16360_v50 = vpop.f32.mrb[14].mxu0 }
 0x3b8   :  { %18788 = vst [vmem:[#allocation43_spill] sm:$0xff] %v16360_v50  ;;  %9573 = vmatpush1.bf16.msra.mxu1 %v15070_v52  ;;  %vm7094_vm14 = vcmp.ge.f32.partialorder %v7086_v9, 1.25  ;;  %vm7096_vm15 = vcmp.ge.f32.partialorder %v7088_v15, 1.25  ;;  %9260 = vmatmul.mubr.bf16.gmra.mrb[72].mxu0 %v7717_v6  ;;  %v7726_v30 = vadd.f32 %v7725_v51, %v16322_v33  ;;  %v7161_v21 = vmul.f32 0.97021484, %v16244_v11  ;;  %v16367_v38 = vpop.f32.mrb[15].mxu0  ;;  %v16369_v31 = vpop.f32.mrb[15].mxu1 }
 0x3b9   :  { %18786 = vst [vmem:[#allocation41_spill] sm:$0xff] %v16351_v0  ;;  %18787 = vst [vmem:[#allocation42_spill] sm:$0xff] %v16355_v1  ;;  %9486 = vmatmul.mubr.bf16.gmra.mrb[72].mxu1 %v7717_v6  ;;  %v18791_v14 = vmov 0.0   ;;  %v7731_v35 = vadd.f32 %v7730_v3, %v16351_v0  ;;  %v16379_v49 = vadd.f32 %v7145_v25, %v16240_v8  ;;  %9348 = vmatprep.subr.bf16.mxu0 %v15075_v57  ;;  %v7147_v3 = vmul.f32 0.75, %v16188_v34 }
 0x3ba   :  { %18789 = vst [vmem:[#allocation44_spill] sm:$0xff] %v16367_v38  ;;  %18790 = vst [vmem:[#allocation45_spill] sm:$0xff] %v16369_v31  ;;  %v16372_v50 = vsel %vm7094_vm14, 1.0, %v18791_v14  ;;  %v16375_v52 = vsel %vm7096_vm15, 1.0, %v18791_v14  ;;  %9574 = vmatprep.subr.bf16.mxu1 %v15078_v5  ;;  %v7727_v33 = vadd.f32 %v7726_v30, %v16326_v61  ;;  %v7163_v8 = vmul.f32 0.97021484, %v16246_v17  ;;  %9349 = vmatpush1.bf16.msra.mxu0 %v15073_v16 }
 0x3bb   :  { %18792 = vst [vmem:[#allocation46_spill] sm:$0xff] %v16372_v50  ;;  %v7118_v51 = vsub.f32 1.0, %v16372_v50  ;;  %v16384_v11 = vmul.f32 %v16372_v50, %v16115_v43  ;;  %v7120_v6 = vsub.f32 1.0, %v16375_v52  ;;  %v7732_v31 = vadd.f32 %v7731_v35, %v16355_v1 }
 0x3bc   :  { %v7169_v38 = vadd.f32 %v7161_v21, %v16379_v49  ;;  %9575 = vmatpush1.bf16.msra.mxu1 %v15076_v63  ;;  %7728 = vadd.xlane.f32.xlu0 %v7727_v33  ;;  %v7146_v25 = vmul.f32 0.75, %v16209_v59  ;;  %v7162_v0 = vmul.f32 0.97021484, %v16277_v23  ;;  %v16399_v30 = vadd.f32 %v7147_v3, %v16242_v10 }
 0x3bd   :  { %v16392_v5 = vmul.f32 %v7118_v51, %v7086_v9  ;;  %v16394_v57 = vmul.f32 %v7120_v6, %v7088_v15  ;;  %7733 = vadd.xlane.f32.xlu1 %v7732_v31  ;;  %v7148_v34 = vmul.f32 0.75, %v16211_v18  ;;  %v7164_v17 = vmul.f32 0.97021484, %v16286_v29  ;;  %v16403_v16 = vpop.f32.mrb[16].mxu0  ;;  %v16405_v63 = vpop.f32.mrb[16].mxu1 }
 0x3be   :  { %vm7177_vm0 = vcmp.ge.f32.partialorder %v7169_v38, 1.25  ;;  %v16411_v59 = vadd.f32 %v7146_v25, %v16250_v22  ;;  %v7149_v23 = vmul.f32 0.75, %v16234_v41  ;;  %v7165_v33 = vmul.f32 0.97021484, %v16316_v56  ;;  %v16415_v10 = vpop.f32.mrb[17].mxu0  ;;  %v16417_v15 = vpop.f32.mrb[17].mxu1 }
 0x3bf   :  { %v16408_v9 = vsel %vm7177_vm0, 1.0, %v18791_v14  ;;  %v7171_v22 = vadd.f32 %v7163_v8, %v16399_v30  ;;  %v16429_v31 = vpop.f32.mrb[18].mxu0  ;;  %v16431_v41 = vpop.f32.mrb[18].mxu1  ;;  %v16435_v35 = vadd.f32 %v7148_v34, %v16252_v47  ;;  %v7151_v6 = vmul.f32 0.75, %v16236_v42  ;;  %v15079_v8 = vld [vmem:[%s18621_s2 + $0x340] ss:$16 sps:$4 sm:$0xff]  }
 0x3c0   :  { %18793 = vst [vmem:[#allocation47_spill] sm:$0xff] %v16408_v9  ;;  %v7201_v29 = vsub.f32 1.0, %v16408_v9  ;;  %v16422_v18 = vmul.f32 %v16408_v9, %v16121_v45  ;;  %v16426_v21 = vmul.f32 %v16408_v9, %v16103_v39  ;;  %v7170_v56 = vadd.f32 %v7162_v0, %v16411_v59  ;;  %v16441_v3 = vpop.f32.mrb[19].mxu0  ;;  %v16443_v25 = vpop.f32.mrb[19].mxu1 }
 0x3c1   :  { %v16438_v51 = vadd.f32 %v7149_v23, %v16259_v54  ;;  %vm7179_vm1 = vcmp.ge.f32.partialorder %v7171_v22, 1.25  ;;  %v7167_v0 = vmul.f32 0.97021484, %v16318_v60  ;;  %v7150_v47 = vmul.f32 0.75, %v16301_v7  ;;  %v15081_v54 = vld [vmem:[%s18621_s2 + $0x344] ss:$16 sps:$4 sm:$0xff]  }
 0x3c2   :  { %18794 = vst [vmem:[#allocation48_spill] sm:$0xff] %v16422_v18  ;;  %18795 = vst [vmem:[#allocation49_spill] sm:$0xff] %v16426_v21  ;;  %v16448_v1 = vmul.f32 %v7201_v29, %v7169_v38  ;;  %v16456_v42 = vsel %vm7179_vm1, 1.0, %v18791_v14  ;;  %vm7178_vm2 = vcmp.ge.f32.partialorder %v7170_v56, 1.25  ;;  %v7172_v34 = vadd.f32 %v7164_v17, %v16435_v35  ;;  %v15082_v38 = vld [vmem:[%s18621_s2 + $0x348] ss:$16 sps:$4 sm:$0xff]   ;;  %9350 = vmatprep.subr.bf16.mxu0 %v15081_v54 }
 0x3c3   :  { %18796 = vst [vmem:[#allocation50_spill] sm:$0xff] %v16456_v42  ;;  %v7173_v23 = vadd.f32 %v7165_v33, %v16438_v51  ;;  %v15084_v7 = vld [vmem:[%s18621_s2 + $0x34c] ss:$16 sps:$4 sm:$0xff]   ;;  %v7203_v60 = vsub.f32 1.0, %v16456_v42  ;;  %v16468_v29 = vsel %vm7178_vm2, 1.0, %v18791_v14  ;;  %v16471_v61 = vadd.f32 %v7151_v6, %v16261_v2  ;;  %9351 = vmatpush1.bf16.msra.mxu0 %v15079_v8 }
 0x3c4   :  { %18797 = vst [vmem:[#allocation51_spill] sm:$0xff] %v16468_v29  ;;  %v16474_v17 = vadd.f32 %v7150_v47, %v16271_v27  ;;  %v15087_v33 = vld [vmem:[%s18621_s2 + $0x364] ss:$16 sps:$4 sm:$0xff]   ;;  %v7202_v9 = vsub.f32 1.0, %v16468_v29  ;;  %v16482_v21 = vmul.f32 %v16468_v29, %v16118_v44  ;;  %v16486_v42 = vmul.f32 %v16468_v29, %v16115_v43  ;;  %9576 = vmatprep.subr.bf16.mxu1 %v15084_v7  ;;  %v15085_v2 = vld [vmem:[%s18621_s2 + $0x360] ss:$16 sps:$4 sm:$0xff]  }
 0x3c5   :  { %vm7180_vm3 = vcmp.ge.f32.partialorder %v7172_v34, 1.25  ;;  %v15090_v27 = vld [vmem:[%s18621_s2 + $0x36c] ss:$16 sps:$4 sm:$0xff]   ;;  %v7211_v6 = vmul.f32 %v7203_v60, %v7171_v22  ;;  %vm7181_vm4 = vcmp.ge.f32.partialorder %v7173_v23, 1.25  ;;  %v7175_v54 = vadd.f32 %v7167_v0, %v16471_v61  ;;  %v16498_v29 = vpop.f32.mrb[20].mxu1  ;;  %9577 = vmatpush1.bf16.msra.mxu1 %v15082_v38  ;;  %9352 = vmatprep.subr.bf16.mxu0 %v15087_v33 }
 0x3c6   :  { %18798 = vst [vmem:[#allocation52_spill] sm:$0xff] %v16486_v42  ;;  %v16495_v47 = vsel %vm7180_vm3, 1.0, %v18791_v14  ;;  %18800 = vst [vmem:[#allocation54_spill] sm:$0xff] %v16498_v29  ;;  %v16500_v42 = vpop.f32.mrb[20].mxu0  ;;  %v15088_v8 = vld [vmem:[%s18621_s2 + $0x368] ss:$16 sps:$4 sm:$0xff]   ;;  %v16505_v7 = vmul.f32 %v7202_v9, %v7170_v56  ;;  %9578 = vmatprep.subr.bf16.mxu1 %v15090_v27 }
 0x3c7   :  { %18799 = vst [vmem:[#allocation53_spill] sm:$0xff] %v16495_v47  ;;  %18801 = vst [vmem:[#allocation55_spill] sm:$0xff] %v16500_v42  ;;  %v7204_v22 = vsub.f32 1.0, %v16495_v47  ;;  %v16509_v60 = vsel %vm7181_vm4, 1.0, %v18791_v14  ;;  %v7166_v18 = vmul.f32 0.97021484, %v16392_v5  ;;  %v16512_v0 = vpop.f32.mrb[21].mxu0  ;;  %9353 = vmatpush1.bf16.msra.mxu0 %v15085_v2 }
 0x3c8   :  { %18802 = vst [vmem:[#allocation56_spill] sm:$0xff] %v16509_v60  ;;  %18803 = vst [vmem:[#allocation57_spill] sm:$0xff] %v16512_v0  ;;  %v16514_v29 = vpop.f32.mrb[21].mxu1  ;;  %v7205_v38 = vsub.f32 1.0, %v16509_v60  ;;  %v16519_v33 = vmul.f32 %v16509_v60, %v16121_v45  ;;  %v16523_v9 = vmul.f32 %v16509_v60, %v16103_v39  ;;  %vm7183_vm5 = vcmp.ge.f32.partialorder %v7175_v54, 1.25  ;;  %v16525_v56 = vpop.f32.mrb[22].mxu0 }
 0x3c9   :  { %18804 = vst [vmem:[#allocation58_spill] sm:$0xff] %v16514_v29  ;;  %18807 = vst [vmem:[#allocation61_spill] sm:$0xff] %v16525_v56  ;;  %v16527_v42 = vpop.f32.mrb[22].mxu1  ;;  %v15091_v5 = vld [vmem:[%s18621_s2 + $0x380] ss:$16 sps:$4 sm:$0xff]   ;;  %v16532_v27 = vmul.f32 %v7204_v22, %v7172_v34  ;;  %v16535_v29 = vsel %vm7183_vm5, 1.0, %v18791_v14  ;;  %v7174_v0 = vadd.f32 %v7166_v18, %v16474_v17  ;;  %9579 = vmatpush1.bf16.msra.mxu1 %v15088_v8 }
 0x3ca   :  { %18805 = vst [vmem:[#allocation59_spill] sm:$0xff] %v16519_v33  ;;  %18806 = vst [vmem:[#allocation60_spill] sm:$0xff] %v16523_v9  ;;  %v7152_v47 = vmul.f32 0.75, %v16304_v36  ;;  %v16539_v60 = vpop.f32.mrb[23].mxu0  ;;  %v16541_v9 = vpop.f32.mrb[23].mxu1  ;;  %v16546_v56 = vmul.f32 %v7205_v38, %v7173_v23  ;;  %v7207_v34 = vsub.f32 1.0, %v16535_v29 }
 0x3cb   :  { %18808 = vst [vmem:[#allocation62_spill] sm:$0xff] %v16527_v42  ;;  %18809 = vst [vmem:[#allocation63_spill] sm:$0xff] %v16535_v29  ;;  %v15093_v42 = vld [vmem:[%s18621_s2 + $0x384] ss:$16 sps:$4 sm:$0xff]   ;;  %v7168_v22 = vmul.f32 0.97021484, %v16394_v57  ;;  %v7233_v33 = vmul.f32 0.75, %v16379_v49 }
 0x3cc   :  { %18810 = vst [vmem:[#allocation64_spill] sm:$0xff] %v16539_v60  ;;  %18811 = vst [vmem:[#allocation65_spill] sm:$0xff] %v16541_v9  ;;  %v15094_v36 = vld [vmem:[%s18621_s2 + $0x388] ss:$16 sps:$4 sm:$0xff]   ;;  %vm7182_vm6 = vcmp.ge.f32.partialorder %v7174_v0, 1.25  ;;  %v16555_v18 = vadd.f32 %v7152_v47, %v16273_v12  ;;  %v7249_v2 = vmul.f32 0.97021484, %v16448_v1  ;;  %9354 = vmatprep.subr.bf16.mxu0 %v15093_v42  ;;  %v16562_v38 = vmul.f32 %v7207_v34, %v7175_v54 }
 0x3cd   :  { %v7235_v23 = vmul.f32 0.75, %v16399_v30  ;;  %v15096_v57 = vld [vmem:[%s18621_s2 + $0x38c] ss:$16 sps:$4 sm:$0xff]   ;;  %v16565_v49 = vsel %vm7182_vm6, 1.0, %v18791_v14  ;;  %v16568_v8 = vadd.f32 %v7233_v33, %v16328_v40  ;;  %v7251_v9 = vmul.f32 0.97021484, %v7211_v6  ;;  %9355 = vmatpush1.bf16.msra.mxu0 %v15091_v5  ;;  %v16597_v5 = vpop.f32.mrb[24].mxu1 }
 0x3ce   :  { %18812 = vst [vmem:[#allocation66_spill] sm:$0xff] %v16565_v49  ;;  %v15099_v12 = vld [vmem:[%s18621_s2 + $0x3a4] ss:$16 sps:$4 sm:$0xff]   ;;  %v7206_v1 = vsub.f32 1.0, %v16565_v49  ;;  %v16576_v30 = vmul.f32 %v16565_v49, %v16118_v44  ;;  %v16580_v42 = vmul.f32 %v16565_v49, %v16115_v43  ;;  %v7176_v47 = vadd.f32 %v7168_v22, %v16555_v18  ;;  %9580 = vmatprep.subr.bf16.mxu1 %v15096_v57  ;;  %v15097_v40 = vld [vmem:[%s18621_s2 + $0x3a0] ss:$16 sps:$4 sm:$0xff]  }
 0x3cf   :  { %v15102_v6 = vld [vmem:[%s18621_s2 + $0x3ac] ss:$16 sps:$4 sm:$0xff]   ;;  %v7257_v54 = vadd.f32 %v7249_v2, %v16568_v8  ;;  %v16591_v33 = vadd.f32 %v7235_v23, %v16330_v26  ;;  %v7756_v34 = vmul.f32 %v16255_v53, %v16118_v44  ;;  %v7760_v22 = vmul.f32 %v16372_v50, %v16118_v44  ;;  %18814 = vst [vmem:[#allocation68_spill] sm:$0xff] %v16597_v5  ;;  %v16599_v57 = vpop.f32.mrb[24].mxu0  ;;  %v15100_v49 = vld [vmem:[%s18621_s2 + $0x3a8] ss:$16 sps:$4 sm:$0xff]  }
 0x3d0   :  { %18813 = vst [vmem:[#allocation67_spill] sm:$0xff] %v16580_v42  ;;  %18815 = vst [vmem:[#allocation69_spill] sm:$0xff] %v16599_v57  ;;  %9581 = vmatpush1.bf16.msra.mxu1 %v15094_v36  ;;  %v15105_v26 = vld [vmem:[%s18621_s2 + $0x3c4] ss:$16 sps:$4 sm:$0xff]   ;;  %v16607_v2 = vmul.f32 %v7206_v1, %v7174_v0  ;;  %vm7184_vm7 = vcmp.ge.f32.partialorder %v7176_v47, 1.25  ;;  %v7805_v23 = vmul.f32 %v16159_v4, %v16115_v43  ;;  %v16613_v50 = vpop.f32.mrb[25].mxu0  ;;  %9356 = vmatprep.subr.bf16.mxu0 %v15099_v12 }
 0x3d1   :  { %v7809_v5 = vmul.f32 %v16181_v28, %v16115_v43  ;;  %18816 = vst [vmem:[#allocation70_spill] sm:$0xff] %v16613_v50  ;;  %v16615_v36 = vpop.f32.mrb[25].mxu1  ;;  %9582 = vmatprep.subr.bf16.mxu1 %v15102_v6  ;;  %v16618_v57 = vsel %vm7184_vm7, 1.0, %v18791_v14  ;;  %vm7265_vm8 = vcmp.ge.f32.partialorder %v7257_v54, 1.25  ;;  %v7259_v0 = vadd.f32 %v7251_v9, %v16591_v33  ;;  %v16624_v42 = vpop.f32.mrb[26].mxu0  ;;  %9357 = vmatpush1.bf16.msra.mxu0 %v15097_v40 }
 0x3d2   :  { %18817 = vst [vmem:[#allocation71_spill] sm:$0xff] %v16615_v36  ;;  %18818 = vst [vmem:[#allocation72_spill] sm:$0xff] %v16618_v57  ;;  %v7234_v1 = vmul.f32 0.75, %v16411_v59  ;;  %v16622_v53 = vpop.f32.mrb[26].mxu1  ;;  %v7208_v60 = vsub.f32 1.0, %v16618_v57  ;;  %v16628_v50 = vsel %vm7265_vm8, 1.0, %v18791_v14  ;;  %v16630_v36 = vadd.f32 %v7805_v23, %v7756_v34  ;;  %9358 = vmatprep.subr.bf16.mxu0 %v15105_v26 }
 0x3d3   :  { %18819 = vst [vmem:[#allocation73_spill] sm:$0xff] %v16622_v53  ;;  %18820 = vst [vmem:[#allocation74_spill] sm:$0xff] %v16624_v42  ;;  %v16632_v12 = vadd.f32 %v7809_v5, %v7760_v22  ;;  %v16634_v6 = vpop.f32.mrb[27].mxu0  ;;  %v16636_v29 = vpop.f32.mrb[27].mxu1  ;;  %v15108_v59 = vld [vmem:[%s18621_s2 + $0x3cc] ss:$16 sps:$4 sm:$0xff]   ;;  %v16644_v42 = vmul.f32 %v16628_v50, %v16121_v45  ;;  %v16648_v34 = vmul.f32 %v16628_v50, %v16103_v39 }
 0x3d4   :  { %18821 = vst [vmem:[#allocation75_spill] sm:$0xff] %v16628_v50  ;;  %18822 = vst [vmem:[#allocation76_spill] sm:$0xff] %v16634_v6  ;;  %v7289_v9 = vsub.f32 1.0, %v16628_v50  ;;  %vm7267_vm9 = vcmp.ge.f32.partialorder %v7259_v0, 1.25  ;;  %9583 = vmatpush1.bf16.msra.mxu1 %v15100_v49  ;;  %v15103_v40 = vld [vmem:[%s18621_s2 + $0x3c0] ss:$16 sps:$4 sm:$0xff]   ;;  %v16653_v22 = vmul.f32 %v7208_v60, %v7176_v47 }
 0x3d5   :  { %18823 = vst [vmem:[#allocation77_spill] sm:$0xff] %v16636_v29  ;;  %18824 = vst [vmem:[#allocation78_spill] sm:$0xff] %v16644_v42  ;;  %v16656_v5 = vsel %vm7267_vm9, 1.0, %v18791_v14  ;;  %v7821_v23 = vpack.c.bf16 %v16632_v12, %v16630_v36  ;;  %v16661_v29 = vadd.f32 %v7234_v1, %v16339_v58  ;;  %v15106_v49 = vld [vmem:[%s18621_s2 + $0x3c8] ss:$16 sps:$4 sm:$0xff]   ;;  %9584 = vmatprep.subr.bf16.mxu1 %v15108_v59  ;;  %v7250_v50 = vmul.f32 0.97021484, %v16505_v7 }
 0x3d6   :  { %18825 = vst [vmem:[#allocation79_spill] sm:$0xff] %v16648_v34  ;;  %18826 = vst [vmem:[#allocation80_spill] sm:$0xff] %v16656_v5  ;;  %v15111_v26 = vld [vmem:[%s18621_s2 + $0x3e4] ss:$16 sps:$4 sm:$0xff]   ;;  %v16669_v60 = vmul.f32 %v7289_v9, %v7257_v54  ;;  %v7291_v47 = vsub.f32 1.0, %v16656_v5  ;;  %v7236_v34 = vmul.f32 0.75, %v16435_v35  ;;  %v7755_v59 = vmul.f32 %v16221_v20, %v16121_v45  ;;  %9359 = vmatpush1.bf16.msra.mxu0 %v15103_v40 }
 0x3d7   :  { %v15114_v58 = vld [vmem:[%s18621_s2 + $0x3ec] ss:$16 sps:$4 sm:$0xff]   ;;  %9269 = vmatprep.mubr.bf16.mxu0 %v7821_v23  ;;  %9495 = vmatprep.mubr.bf16.mxu1 %v7821_v23  ;;  %v7252_v1 = vmul.f32 0.97021484, %v16532_v27  ;;  %v7759_v54 = vmul.f32 %v16280_v37, %v16121_v45  ;;  %v7804_v9 = vmul.f32 %v16151_v62, %v16103_v39  ;;  %v7258_v35 = vadd.f32 %v7250_v50, %v16661_v29  ;;  %v15109_v27 = vld [vmem:[%s18621_s2 + $0x3e0] ss:$16 sps:$4 sm:$0xff]  }
 0x3d8   :  { %v16684_v7 = vmul.f32 %v7291_v47, %v7259_v0  ;;  %v16688_v6 = vadd.f32 %v7236_v34, %v16341_v32  ;;  %v7808_v23 = vmul.f32 %v16171_v13, %v16103_v39  ;;  %v7239_v5 = vmul.f32 0.75, %v16471_v61  ;;  %9585 = vmatpush1.bf16.msra.mxu1 %v15106_v49  ;;  %9360 = vmatprep.subr.bf16.mxu0 %v15111_v26  ;;  %v15112_v32 = vld [vmem:[%s18621_s2 + $0x3e8] ss:$16 sps:$4 sm:$0xff]  }
 0x3d9   :  { %v7812_v53 = vadd.f32 %v7804_v9, %v7755_v59  ;;  %v7255_v37 = vmul.f32 0.97021484, %v16562_v38  ;;  %v7757_v0 = vmul.f32 %v16224_v24, %v16124_v46  ;;  %vm7266_vm10 = vcmp.ge.f32.partialorder %v7258_v35, 1.25  ;;  %9586 = vmatprep.subr.bf16.mxu1 %v15114_v58  ;;  %v18828_v49 = vld [vmem:[#allocation22_spill] sm:$0xff]  ;;  %v18829_v26 = vld [vmem:[#allocation28_spill] sm:$0xff]  ;;  %v18830_v59 = vld [vmem:[#allocation23_spill] sm:$0xff] }
 0x3da   :  { %v7260_v50 = vadd.f32 %v7252_v1, %v16688_v6  ;;  %v7816_v34 = vadd.f32 %v7808_v23, %v7759_v54  ;;  %v7758_v40 = vmul.f32 %v16269_v19, %v16130_v48  ;;  %v16706_v61 = vsel %vm7266_vm10, 1.0, %v18791_v14  ;;  %v18831_v9 = vld [vmem:[#allocation29_spill] sm:$0xff]  ;;  %9361 = vmatpush1.bf16.msra.mxu0 %v15109_v27 }
 0x3db   :  { %18827 = vst [vmem:[#allocation81_spill] sm:$0xff] %v16706_v61  ;;  %v16709_v38 = vadd.f32 %v7239_v5, %v16358_v55  ;;  %v7806_v47 = vmul.f32 %v18829_v26, %v18828_v49  ;;  %v7807_v20 = vmul.f32 %v18831_v9, %v18830_v59  ;;  %v7290_v42 = vsub.f32 1.0, %v16706_v61 }
 0x3dc   :  { %v16718_v1 = vmul.f32 %v16706_v61, %v16118_v44  ;;  %v16722_v58 = vmul.f32 %v16706_v61, %v16115_v43  ;;  %vm7268_vm11 = vcmp.ge.f32.partialorder %v7260_v50, 1.25  ;;  %v7820_v5 = vpack.c.bf16 %v7816_v34, %v7812_v53  ;;  %9587 = vmatpush1.bf16.msra.mxu1 %v15112_v32  ;;  %v18838_v32 = vld [vmem:[#allocation44_spill] sm:$0xff] }
 0x3dd   :  { %v16725_v55 = vsel %vm7268_vm11, 1.0, %v18791_v14  ;;  %v7263_v54 = vadd.f32 %v7255_v37, %v16709_v38  ;;  %v16728_v23 = vadd.f32 %v7806_v47, %v7757_v0  ;;  %v7298_v57 = vmul.f32 %v7290_v42, %v7258_v35 }
 0x3de   :  { %18832 = vst [vmem:[#allocation22_spill] sm:$0xff] %v16718_v1  ;;  %18833 = vst [vmem:[#allocation23_spill] sm:$0xff] %v16722_v58  ;;  %v7292_v9 = vsub.f32 1.0, %v16725_v55  ;;  %v16731_v26 = vadd.f32 %v7807_v20, %v7758_v40  ;;  %v7828_v1 = vadd.f32 %v16630_v36, %v7812_v53  ;;  %9270 = vmatmul.mubr.bf16.gmra.mrb[76].mxu0 %v7820_v5  ;;  %9496 = vmatmul.mubr.bf16.gmra.mrb[76].mxu1 %v7820_v5  ;;  %v18837_v53 = vld [vmem:[#allocation43_spill] sm:$0xff] }
 0x3df   :  { %18834 = vst [vmem:[#allocation82_spill] sm:$0xff] %v16728_v23  ;;  %vm7271_vm12 = vcmp.ge.f32.partialorder %v7263_v54, 1.25  ;;  %v7237_v27 = vmul.f32 0.75, %v16438_v51  ;;  %v7253_v61 = vmul.f32 0.97021484, %v16546_v56  ;;  %v7238_v58 = vmul.f32 0.75, %v16474_v17 }
 0x3e0   :  { %18835 = vst [vmem:[#allocation83_spill] sm:$0xff] %v16731_v26  ;;  %v7300_v37 = vmul.f32 %v7292_v9, %v7260_v50  ;;  %v16738_v0 = vsel %vm7271_vm12, 1.0, %v18791_v14  ;;  %v7829_v42 = vadd.f32 %v7828_v1, %v16728_v23  ;;  %v7254_v20 = vmul.f32 0.97021484, %v16607_v2  ;;  %v18839_v50 = vld [vmem:[#allocation37_spill] sm:$0xff] }
 0x3e1   :  { %18836 = vst [vmem:[#allocation84_spill] sm:$0xff] %v16738_v0  ;;  %v7295_v35 = vsub.f32 1.0, %v16738_v0  ;;  %v7245_v36 = vadd.f32 %v7237_v27, %v18837_v53  ;;  %v16745_v40 = vadd.f32 %v7238_v58, %v18838_v32  ;;  %v7240_v51 = vmul.f32 0.75, %v16555_v18  ;;  %v18840_v27 = vld [vmem:[#allocation45_spill] sm:$0xff]  ;;  %v18841_v18 = vld [vmem:[#allocation30_spill] sm:$0xff] }
 0x3e2   :  { %v7830_v56 = vadd.f32 %v7829_v42, %v16731_v26  ;;  %v7256_v17 = vmul.f32 0.97021484, %v16653_v22  ;;  %v7761_v47 = vmul.f32 %v18839_v50, %v16124_v46  ;;  %v7762_v9 = vmul.f32 %v16375_v52, %v16130_v48  ;;  %v18842_v22 = vld [vmem:[#allocation31_spill] sm:$0xff] }
 0x3e3   :  { %v16754_v2 = vmul.f32 %v7295_v35, %v7263_v54  ;;  %v7261_v1 = vadd.f32 %v7253_v61, %v7245_v36  ;;  %v7262_v5 = vadd.f32 %v7254_v20, %v16745_v40  ;;  %v16758_v58 = vadd.f32 %v7240_v51, %v18840_v27 }
 0x3e4   :  { %7831 = vadd.xlane.f32.xlu1 %v7830_v56  ;;  %v7810_v42 = vmul.f32 %v18841_v18, %v18828_v49  ;;  %v7811_v53 = vmul.f32 %v18842_v22, %v18830_v59  ;;  %v7833_v32 = vadd.f32 %v16632_v12, %v7816_v34  ;;  %v7321_v23 = vmul.f32 0.75, %v16568_v8 }
 0x3e5   :  { %vm7269_vm13 = vcmp.ge.f32.partialorder %v7261_v1, 1.25  ;;  %vm7270_vm14 = vcmp.ge.f32.partialorder %v7262_v5, 1.25  ;;  %v7264_v61 = vadd.f32 %v7256_v17, %v16758_v58  ;;  %v7337_v54 = vmul.f32 0.97021484, %v16669_v60 }
 0x3e6   :  { %v16769_v20 = vsel %vm7269_vm13, 1.0, %v18791_v14  ;;  %v16772_v35 = vsel %vm7270_vm14, 1.0, %v18791_v14  ;;  %v16774_v51 = vadd.f32 %v7810_v42, %v7761_v47  ;;  %v16776_v56 = vadd.f32 %v7811_v53, %v7762_v9 }
 0x3e7   :  { %18843 = vst [vmem:[#allocation43_spill] sm:$0xff] %v16769_v20  ;;  %18844 = vst [vmem:[#allocation44_spill] sm:$0xff] %v16772_v35  ;;  %v7293_v12 = vsub.f32 1.0, %v16769_v20  ;;  %v16781_v8 = vmul.f32 %v16769_v20, %v16121_v45  ;;  %v16785_v34 = vmul.f32 %v16769_v20, %v16103_v39  ;;  %v7294_v60 = vsub.f32 1.0, %v16772_v35 }
 0x3e8   :  { %18845 = vst [vmem:[#allocation37_spill] sm:$0xff] %v16774_v51  ;;  %18846 = vst [vmem:[#allocation45_spill] sm:$0xff] %v16776_v56  ;;  %v16790_v17 = vmul.f32 %v16772_v35, %v16118_v44  ;;  %v16794_v47 = vmul.f32 %v16772_v35, %v16115_v43  ;;  %vm7272_vm15 = vcmp.ge.f32.partialorder %v7264_v61, 1.25  ;;  %v7834_v9 = vadd.f32 %v7833_v32, %v16774_v51 }
 0x3e9   :  { %18847 = vst [vmem:[#allocation30_spill] sm:$0xff] %v16785_v34  ;;  %v7301_v27 = vmul.f32 %v7293_v12, %v7261_v1  ;;  %v7302_v42 = vmul.f32 %v7294_v60, %v7262_v5  ;;  %v16798_v53 = vsel %vm7272_vm15, 1.0, %v18791_v14  ;;  %v16801_v26 = vadd.f32 %v7321_v23, %v16403_v16 }
 0x3ea   :  { %18848 = vst [vmem:[#allocation31_spill] sm:$0xff] %v16794_v47  ;;  %v7296_v20 = vsub.f32 1.0, %v16798_v53  ;;  %v7835_v34 = vadd.f32 %v7834_v9, %v16776_v56  ;;  %v7323_v0 = vmul.f32 0.75, %v16591_v33  ;;  %v7339_v35 = vmul.f32 0.97021484, %v16684_v7 }
 0x3eb   :  { %v7345_v47 = vadd.f32 %v7337_v54, %v16801_v26  ;;  %v7322_v32 = vmul.f32 0.75, %v16661_v29  ;;  %v7338_v1 = vmul.f32 0.97021484, %v7298_v57  ;;  %v7324_v5 = vmul.f32 0.75, %v16688_v6 }
 0x3ec   :  { %v7304_v12 = vmul.f32 %v7296_v20, %v7264_v61  ;;  %7836 = vadd.xlane.f32.xlu0 %v7835_v34  ;;  %v16811_v16 = vadd.f32 %v7323_v0, %v16405_v63  ;;  %v7340_v23 = vmul.f32 0.97021484, %v7300_v37  ;;  %v7325_v60 = vmul.f32 0.75, %v7245_v36  ;;  %v5774_v37 = vpop.f32.mrb[64].mxu0  ;;  %v6904_v0 = vpop.f32.mrb[64].mxu1 }
 0x3ed   :  { %vm7353_vm0 = vcmp.ge.f32.partialorder %v7345_v47, 1.25  ;;  %v16814_v9 = vadd.f32 %v7322_v32, %v16415_v10  ;;  %v16817_v33 = vadd.f32 %v7324_v5, %v16417_v15  ;;  %v7341_v7 = vmul.f32 0.97021484, %v7301_v27  ;;  %v5776_v54 = vpop.f32.mrb[65].mxu0  ;;  %v6906_v20 = vpop.f32.mrb[65].mxu1 }
 0x3ee   :  { %v16820_v29 = vsel %vm7353_vm0, 1.0, %v18791_v14  ;;  %v7347_v57 = vadd.f32 %v7339_v35, %v16811_v16  ;;  %v16824_v6 = vadd.f32 %v7325_v60, %v16429_v31  ;;  %v7327_v63 = vmul.f32 0.75, %v16709_v38  ;;  %v5778_v34 = vpop.f32.mrb[66].mxu0  ;;  %v6908_v27 = vpop.f32.mrb[66].mxu1 }
 0x3ef   :  { %18849 = vst [vmem:[#allocation85_spill] sm:$0xff] %v16820_v29  ;;  %v7377_v36 = vsub.f32 1.0, %v16820_v29  ;;  %v16830_v10 = vmul.f32 %v16820_v29, %v16121_v45  ;;  %v16834_v15 = vmul.f32 %v16820_v29, %v16103_v39  ;;  %v7346_v61 = vadd.f32 %v7338_v1, %v16814_v9  ;;  %v5780_v60 = vpop.f32.mrb[67].mxu0  ;;  %v6910_v37 = vpop.f32.mrb[67].mxu1  ;;  %v15115_v29 = vld [vmem:[#allocation9 + $0x40] sm:$0xff]  }
 0x3f0   :  { %vm7355_vm1 = vcmp.ge.f32.partialorder %v7347_v57, 1.25  ;;  %v7348_v31 = vadd.f32 %v7340_v23, %v16817_v33  ;;  %v7349_v38 = vadd.f32 %v7341_v7, %v16824_v6  ;;  %v16840_v35 = vadd.f32 %v7327_v63, %v16431_v41  ;;  %13089 = vmatprep.subr.bf16.mxu0 %v15115_v29 }
 0x3f1   :  { %18850 = vst [vmem:[#allocation86_spill] sm:$0xff] %v16830_v10  ;;  %18851 = vst [vmem:[#allocation87_spill] sm:$0xff] %v16834_v15  ;;  %v16842_v32 = vmul.f32 %v7377_v36, %v7345_v47  ;;  %v16845_v5 = vsel %vm7355_vm1, 1.0, %v18791_v14  ;;  %vm7354_vm2 = vcmp.ge.f32.partialorder %v7346_v61, 1.25  ;;  %v7343_v1 = vmul.f32 0.97021484, %v16754_v2 }
 0x3f2   :  { %18852 = vst [vmem:[#allocation88_spill] sm:$0xff] %v16845_v5  ;;  %v7379_v0 = vsub.f32 1.0, %v16845_v5  ;;  %v16850_v23 = vsel %vm7354_vm2, 1.0, %v18791_v14  ;;  %vm7356_vm3 = vcmp.ge.f32.partialorder %v7348_v31, 1.25  ;;  %vm7357_vm4 = vcmp.ge.f32.partialorder %v7349_v38, 1.25 }
 0x3f3   :  { %18853 = vst [vmem:[#allocation89_spill] sm:$0xff] %v16850_v23  ;;  %v7378_v41 = vsub.f32 1.0, %v16850_v23  ;;  %v16855_v47 = vmul.f32 %v16850_v23, %v16118_v44  ;;  %v16859_v7 = vmul.f32 %v16850_v23, %v16115_v43  ;;  %v16862_v2 = vsel %vm7356_vm3, 1.0, %v18791_v14  ;;  %v15116_v23 = vld [vmem:[#allocation9 + $0xc0] sm:$0xff]  }
 0x3f4   :  { %18856 = vst [vmem:[#allocation92_spill] sm:$0xff] %v16862_v2  ;;  %v16864_v63 = vmul.f32 %v7379_v0, %v7347_v57  ;;  %v7380_v36 = vsub.f32 1.0, %v16862_v2  ;;  %v16868_v54 = vsel %vm7357_vm4, 1.0, %v18791_v14  ;;  %v7351_v20 = vadd.f32 %v7343_v1, %v16840_v35  ;;  %13153 = vmatprep.subr.bf16.mxu1 %v15116_v23 }
 0x3f5   :  { %18854 = vst [vmem:[#allocation90_spill] sm:$0xff] %v16855_v47  ;;  %18855 = vst [vmem:[#allocation91_spill] sm:$0xff] %v16859_v7  ;;  %v16871_v34 = vmul.f32 %v7378_v41, %v7346_v61  ;;  %v7381_v27 = vsub.f32 1.0, %v16868_v54  ;;  %v16876_v60 = vmul.f32 %v16868_v54, %v16121_v45  ;;  %v16880_v37 = vmul.f32 %v16868_v54, %v16103_v39  ;;  %v18879_v47 = vld [vmem:[#allocation72_spill] sm:$0xff] }
 0x3f6   :  { %18857 = vst [vmem:[#allocation93_spill] sm:$0xff] %v16868_v54  ;;  %v16882_v57 = vmul.f32 %v7380_v36, %v7348_v31  ;;  %vm7359_vm5 = vcmp.ge.f32.partialorder %v7351_v20, 1.25  ;;  %v7326_v0 = vmul.f32 0.75, %v16745_v40  ;;  %v7342_v51 = vmul.f32 0.97021484, %v7302_v42  ;;  %v18861_v31 = vld [vmem:[#allocation35_spill] sm:$0xff] }
 0x3f7   :  { %18858 = vst [vmem:[#allocation94_spill] sm:$0xff] %v16876_v60  ;;  %18859 = vst [vmem:[#allocation95_spill] sm:$0xff] %v16880_v37  ;;  %v16885_v56 = vmul.f32 %v7381_v27, %v7349_v38  ;;  %v16888_v61 = vsel %vm7359_vm5, 1.0, %v18791_v14  ;;  %v7328_v1 = vmul.f32 0.75, %v16758_v58  ;;  %v7344_v41 = vmul.f32 0.97021484, %v7304_v12  ;;  %v18862_v38 = vld [vmem:[#allocation24_spill] sm:$0xff] }
 0x3f8   :  { %18860 = vst [vmem:[#allocation96_spill] sm:$0xff] %v16888_v61  ;;  %v7383_v15 = vsub.f32 1.0, %v16888_v61  ;;  %v16893_v54 = vadd.f32 %v7326_v0, %v16441_v3  ;;  %v7895_v36 = vadd.f32 %v18861_v31, %v16482_v21  ;;  %v7899_v40 = vadd.f32 %v16384_v11, %v16576_v30  ;;  %v18863_v27 = vld [vmem:[#allocation48_spill] sm:$0xff]  ;;  %v18864_v37 = vld [vmem:[#allocation33_spill] sm:$0xff]  ;;  %v18865_v0 = vld [vmem:[#allocation59_spill] sm:$0xff] }
 0x3f9   :  { %v16900_v42 = vadd.f32 %v7328_v1, %v16443_v25  ;;  %v7936_v58 = vmul.f32 %v16159_v4, %v18862_v38  ;;  %v7940_v12 = vmul.f32 %v16181_v28, %v18862_v38  ;;  %v7894_v7 = vadd.f32 %v18864_v37, %v18863_v27  ;;  %v18866_v31 = vld [vmem:[#allocation38_spill] sm:$0xff]  ;;  %v18867_v30 = vld [vmem:[#allocation25_spill] sm:$0xff] }
 0x3fa   :  { %v16908_v3 = vmul.f32 %v7383_v15, %v7351_v20  ;;  %v7350_v21 = vadd.f32 %v7342_v51, %v16893_v54  ;;  %v7898_v11 = vadd.f32 %v18866_v31, %v18865_v0  ;;  %v7935_v25 = vmul.f32 %v16151_v62, %v18867_v30  ;;  %v18868_v15 = vld [vmem:[#allocation50_spill] sm:$0xff]  ;;  %v18869_v51 = vld [vmem:[#allocation53_spill] sm:$0xff] }
 0x3fb   :  { %v7352_v4 = vadd.f32 %v7344_v41, %v16900_v42  ;;  %v7944_v1 = vadd.f32 %v7936_v58, %v7895_v36  ;;  %v7948_v61 = vadd.f32 %v7940_v12, %v7899_v40  ;;  %v7939_v28 = vmul.f32 %v16171_v13, %v18867_v30 }
 0x3fc   :  { %vm7358_vm6 = vcmp.ge.f32.partialorder %v7350_v21, 1.25  ;;  %v7943_v29 = vadd.f32 %v7935_v25, %v7894_v7  ;;  %v7860_v20 = vmul.f32 %v18868_v15, %v16124_v46  ;;  %v7861_v37 = vmul.f32 %v18869_v51, %v16130_v48  ;;  %v18875_v25 = vld [vmem:[#allocation28_spill] sm:$0xff] }
 0x3fd   :  { %v16923_v27 = vsel %vm7358_vm6, 1.0, %v18791_v14  ;;  %vm7360_vm7 = vcmp.ge.f32.partialorder %v7352_v4, 1.25  ;;  %v7952_v62 = vpack.c.bf16 %v7948_v61, %v7944_v1  ;;  %v7947_v23 = vadd.f32 %v7939_v28, %v7898_v11  ;;  %v18874_v11 = vld [vmem:[#allocation26_spill] sm:$0xff] }
 0x3fe   :  { %18870 = vst [vmem:[#allocation35_spill] sm:$0xff] %v16923_v27  ;;  %v7382_v41 = vsub.f32 1.0, %v16923_v27  ;;  %v16928_v36 = vmul.f32 %v16923_v27, %v16118_v44  ;;  %v16932_v13 = vmul.f32 %v16923_v27, %v16115_v43  ;;  %v16935_v7 = vsel %vm7360_vm7, 1.0, %v18791_v14  ;;  %v18876_v27 = vld [vmem:[#allocation27_spill] sm:$0xff] }
 0x3ff   :  { %18873 = vst [vmem:[#allocation33_spill] sm:$0xff] %v16935_v7  ;;  %v7384_v40 = vsub.f32 1.0, %v16935_v7  ;;  %9279 = vmatprep.mubr.bf16.mxu0 %v7952_v62  ;;  %9505 = vmatprep.mubr.bf16.mxu1 %v7952_v62  ;;  %v7951_v58 = vpack.c.bf16 %v7947_v23, %v7943_v29  ;;  %v7888_v12 = vmul.f32 %v16224_v24, %v18828_v49  ;;  %v7411_v10 = vmul.f32 0.75, %v16811_v16 }
 0x400   :  { %18871 = vst [vmem:[#allocation24_spill] sm:$0xff] %v16928_v36  ;;  %18872 = vst [vmem:[#allocation48_spill] sm:$0xff] %v16932_v13  ;;  %v7889_v0 = vmul.f32 %v16269_v19, %v18830_v59  ;;  %v16942_v31 = vmul.f32 %v7382_v41, %v7350_v21  ;;  %v7937_v28 = vmul.f32 %v18875_v25, %v18874_v11  ;;  %v18877_v13 = vld [vmem:[#allocation29_spill] sm:$0xff]  ;;  %v7427_v36 = vmul.f32 0.97021484, %v16864_v63  ;;  %v18878_v21 = vld [vmem:[#allocation63_spill] sm:$0xff] }
 0x401   :  { %v7938_v2 = vmul.f32 %v18877_v13, %v18876_v27  ;;  %v7959_v5 = vadd.f32 %v7944_v1, %v7943_v29  ;;  %v16948_v60 = vmul.f32 %v7384_v40, %v7352_v4  ;;  %9280 = vmatmul.mubr.bf16.gmra.mrb[80].mxu0 %v7951_v58  ;;  %9506 = vmatmul.mubr.bf16.gmra.mrb[80].mxu1 %v7951_v58  ;;  %v18882_v29 = vld [vmem:[#allocation54_spill] sm:$0xff] }
 0x402   :  { %v7896_v62 = vadd.f32 %v7888_v12, %v7860_v20  ;;  %v7897_v7 = vadd.f32 %v7889_v0, %v7861_v37  ;;  %v7864_v41 = vmul.f32 %v18878_v21, %v16124_v46  ;;  %v7865_v25 = vmul.f32 %v18879_v47, %v16130_v48 }
 0x403   :  { %v7892_v13 = vmul.f32 %v18839_v50, %v18828_v49  ;;  %v16963_v20 = vadd.f32 %v7411_v10, %v18882_v29  ;;  %v7893_v16 = vmul.f32 %v16375_v52, %v18830_v59  ;;  %v7941_v37 = vmul.f32 %v18841_v18, %v18874_v11 }
 0x404   :  { %v16958_v1 = vadd.f32 %v7937_v28, %v7896_v62  ;;  %v16960_v4 = vadd.f32 %v7938_v2, %v7897_v7  ;;  %v7942_v40 = vmul.f32 %v18842_v22, %v18876_v27  ;;  %v7964_v58 = vadd.f32 %v7948_v61, %v7947_v23  ;;  %v18885_v61 = vld [vmem:[#allocation55_spill] sm:$0xff] }
 0x405   :  { %v7900_v63 = vadd.f32 %v7892_v13, %v7864_v41  ;;  %v7435_v0 = vadd.f32 %v7427_v36, %v16963_v20  ;;  %v7901_v2 = vadd.f32 %v7893_v16, %v7865_v25  ;;  %v7409_v7 = vmul.f32 0.75, %v16801_v26  ;;  %v18886_v36 = vld [vmem:[#allocation57_spill] sm:$0xff] }
 0x406   :  { %18880 = vst [vmem:[#allocation59_spill] sm:$0xff] %v16958_v1  ;;  %18881 = vst [vmem:[#allocation38_spill] sm:$0xff] %v16960_v4  ;;  %v7960_v12 = vadd.f32 %v7959_v5, %v16958_v1  ;;  %v7425_v28 = vmul.f32 0.97021484, %v16842_v32  ;;  %v7410_v62 = vmul.f32 0.75, %v16814_v9  ;;  %v7426_v41 = vmul.f32 0.97021484, %v16871_v34 }
 0x407   :  { %v16974_v10 = vadd.f32 %v7941_v37, %v7900_v63  ;;  %vm7443_vm8 = vcmp.ge.f32.partialorder %v7435_v0, 1.25  ;;  %v16980_v22 = vadd.f32 %v7942_v40, %v7901_v2  ;;  %v16983_v5 = vadd.f32 %v7409_v7, %v18885_v61  ;;  %v18888_v37 = vld [vmem:[#allocation58_spill] sm:$0xff] }
 0x408   :  { %v7961_v18 = vadd.f32 %v7960_v12, %v16960_v4  ;;  %v12773_v23 = vsel %vm7443_vm8, 1.0, %v18791_v14  ;;  %v16988_v25 = vadd.f32 %v7410_v62, %v18886_v36  ;;  %v7412_v32 = vmul.f32 0.75, %v16817_v33 }
 0x409   :  { %18883 = vst [vmem:[#allocation25_spill] sm:$0xff] %v16974_v10  ;;  %18884 = vst [vmem:[#allocation50_spill] sm:$0xff] %v16980_v22  ;;  %v7965_v26 = vadd.f32 %v7964_v58, %v16974_v10  ;;  %v7467_v9 = vsub.f32 1.0, %v12773_v23  ;;  %v16992_v34 = vmul.f32 %v12773_v23, %v16124_v46  ;;  %v16995_v13 = vmul.f32 %v12773_v23, %v18828_v49  ;;  %v18896_v10 = vld [vmem:[#allocation52_spill] sm:$0xff] }
 0x40a   :  { %7962 = vadd.xlane.f32.xlu1 %v7961_v18  ;;  %v7433_v29 = vadd.f32 %v7425_v28, %v16983_v5  ;;  %v7434_v63 = vadd.f32 %v7426_v41, %v16988_v25  ;;  %v17001_v40 = vadd.f32 %v7412_v32, %v18888_v37  ;;  %v7428_v58 = vmul.f32 0.97021484, %v16882_v57  ;;  %v18893_v32 = vld [vmem:[#allocation62_spill] sm:$0xff] }
 0x40b   :  { %18887 = vst [vmem:[#allocation26_spill] sm:$0xff] %v16992_v34  ;;  %v7966_v16 = vadd.f32 %v7965_v26, %v16980_v22  ;;  %v17004_v33 = vmul.f32 %v7467_v9, %v7435_v0  ;;  %v7413_v12 = vmul.f32 0.75, %v16824_v6  ;;  %v7429_v2 = vmul.f32 0.97021484, %v16885_v56  ;;  %v18892_v26 = vld [vmem:[#allocation61_spill] sm:$0xff] }
 0x40c   :  { %vm7441_vm9 = vcmp.ge.f32.partialorder %v7433_v29, 1.25  ;;  %vm7442_vm10 = vcmp.ge.f32.partialorder %v7434_v63, 1.25  ;;  %v7436_v28 = vadd.f32 %v7428_v58, %v17001_v40  ;;  %v7415_v62 = vmul.f32 0.75, %v16840_v35 }
 0x40d   :  { %7967 = vadd.xlane.f32.xlu0 %v7966_v16  ;;  %v12771_v7 = vsel %vm7441_vm9, 1.0, %v18791_v14  ;;  %v12772_v0 = vsel %vm7442_vm10, 1.0, %v18791_v14  ;;  %v17030_v36 = vadd.f32 %v7413_v12, %v18892_v26  ;;  %v7431_v58 = vmul.f32 0.97021484, %v16908_v3 }
 0x40e   :  { %v7465_v41 = vsub.f32 1.0, %v12771_v7  ;;  %v17012_v18 = vmul.f32 %v12771_v7, %v16121_v45  ;;  %v17015_v57 = vmul.f32 %v12771_v7, %v16103_v39  ;;  %v7466_v6 = vsub.f32 1.0, %v12772_v0 }
 0x40f   :  { %v17019_v56 = vmul.f32 %v12772_v0, %v16118_v44  ;;  %v17022_v61 = vmul.f32 %v12772_v0, %v16115_v43  ;;  %vm7444_vm11 = vcmp.ge.f32.partialorder %v7436_v28, 1.25  ;;  %v17033_v9 = vadd.f32 %v7415_v62, %v18893_v32  ;;  %v18895_v32 = vld [vmem:[#allocation22_spill] sm:$0xff] }
 0x410   :  { %18889 = vst [vmem:[#allocation28_spill] sm:$0xff] %v17012_v18  ;;  %v17024_v23 = vmul.f32 %v7465_v41, %v7433_v29  ;;  %v17027_v35 = vsel %vm7444_vm11, 1.0, %v18791_v14  ;;  %v17035_v16 = vmul.f32 %v7466_v6, %v7434_v63  ;;  %v7414_v7 = vmul.f32 0.75, %v16893_v54  ;;  %v18894_v63 = vld [vmem:[#allocation64_spill] sm:$0xff]  ;;  %v18897_v54 = vld [vmem:[#allocation65_spill] sm:$0xff] }
 0x411   :  { %18890 = vst [vmem:[#allocation27_spill] sm:$0xff] %v17019_v56  ;;  %18891 = vst [vmem:[#allocation29_spill] sm:$0xff] %v17027_v35  ;;  %v7468_v37 = vsub.f32 1.0, %v17027_v35  ;;  %v7437_v29 = vadd.f32 %v7429_v2, %v17030_v36  ;;  %v7430_v41 = vmul.f32 0.97021484, %v16942_v31  ;;  %v7416_v0 = vmul.f32 0.75, %v16900_v42  ;;  %v18898_v31 = vld [vmem:[#allocation67_spill] sm:$0xff] }
 0x412   :  { %v7432_v12 = vmul.f32 0.97021484, %v16948_v60  ;;  %v7439_v62 = vadd.f32 %v7431_v58, %v17033_v9  ;;  %v17048_v6 = vadd.f32 %v7414_v7, %v18894_v63  ;;  %v8026_v3 = vadd.f32 %v18896_v10, %v18895_v32  ;;  %v18899_v42 = vld [vmem:[#allocation34_spill] sm:$0xff]  ;;  %v18905_v35 = vld [vmem:[#allocation49_spill] sm:$0xff] }
 0x413   :  { %v17044_v26 = vmul.f32 %v7468_v37, %v7436_v28  ;;  %vm7445_vm12 = vcmp.ge.f32.partialorder %v7437_v29, 1.25  ;;  %v17053_v1 = vadd.f32 %v7416_v0, %v18897_v54  ;;  %v8030_v2 = vadd.f32 %v18898_v31, %v16790_v17  ;;  %v18900_v58 = vld [vmem:[#allocation46_spill] sm:$0xff] }
 0x414   :  { %v8046_v60 = vmul.f32 %v18899_v42, %v18862_v38  ;;  %v12775_v28 = vsel %vm7445_vm12, 1.0, %v18791_v14  ;;  %vm7447_vm13 = vcmp.ge.f32.partialorder %v7439_v62, 1.25  ;;  %v7438_v37 = vadd.f32 %v7430_v41, %v17048_v6 }
 0x415   :  { %v8050_v7 = vmul.f32 %v18900_v58, %v18862_v38  ;;  %v7469_v63 = vsub.f32 1.0, %v12775_v28  ;;  %v17064_v10 = vmul.f32 %v12775_v28, %v16121_v45  ;;  %v17067_v0 = vmul.f32 %v12775_v28, %v16103_v39 }
 0x416   :  { %v12777_v17 = vsel %vm7447_vm13, 1.0, %v18791_v14  ;;  %vm7446_vm14 = vcmp.ge.f32.partialorder %v7438_v37, 1.25  ;;  %v7440_v58 = vadd.f32 %v7432_v12, %v17053_v1  ;;  %v8054_v22 = vadd.f32 %v8046_v60, %v8026_v3 }
 0x417   :  { %18901 = vst [vmem:[#allocation63_spill] sm:$0xff] %v17064_v10  ;;  %v7471_v32 = vsub.f32 1.0, %v12777_v17  ;;  %v17071_v54 = vmul.f32 %v12777_v17, %v16124_v46  ;;  %v17074_v31 = vmul.f32 %v12777_v17, %v18828_v49  ;;  %v17076_v41 = vmul.f32 %v7469_v63, %v7437_v29  ;;  %v18904_v17 = vld [vmem:[#allocation78_spill] sm:$0xff]  ;;  %v18906_v63 = vld [vmem:[#allocation60_spill] sm:$0xff] }
 0x418   :  { %v12776_v42 = vsel %vm7446_vm14, 1.0, %v18791_v14  ;;  %vm7448_vm15 = vcmp.ge.f32.partialorder %v7440_v58, 1.25  ;;  %v8025_v29 = vadd.f32 %v18905_v35, %v18904_v17  ;;  %v8029_v10 = vadd.f32 %v18906_v63, %v16781_v8 }
 0x419   :  { %18902 = vst [vmem:[#allocation72_spill] sm:$0xff] %v17071_v54  ;;  %v7479_v4 = vmul.f32 %v7471_v32, %v7439_v62  ;;  %v7470_v39 = vsub.f32 1.0, %v12776_v42  ;;  %v17081_v28 = vmul.f32 %v12776_v42, %v16118_v44  ;;  %v17084_v34 = vmul.f32 %v12776_v42, %v16115_v43  ;;  %v18908_v62 = vld [vmem:[#allocation32_spill] sm:$0xff] }
 0x41a   :  { %v17086_v54 = vadd.f32 %v8050_v7, %v8030_v2  ;;  %v17095_v12 = vsel %vm7448_vm15, 1.0, %v18791_v14  ;;  %v8045_v3 = vmul.f32 %v18908_v62, %v18867_v30  ;;  %v18909_v43 = vld [vmem:[#allocation36_spill] sm:$0xff]  ;;  %v7499_v35 = vmul.f32 0.75, %v16963_v20 }
 0x41b   :  { %18903 = vst [vmem:[#allocation54_spill] sm:$0xff] %v17081_v28  ;;  %v17092_v18 = vmul.f32 %v7470_v39, %v7438_v37  ;;  %18907 = vst [vmem:[#allocation55_spill] sm:$0xff] %v17095_v12  ;;  %v8049_v60 = vmul.f32 %v18909_v43, %v18867_v30  ;;  %v7472_v2 = vsub.f32 1.0, %v17095_v12  ;;  %v7515_v32 = vmul.f32 0.97021484, %v17004_v33  ;;  %v18910_v42 = vld [vmem:[#allocation80_spill] sm:$0xff] }
 0x41c   :  { %v8062_v7 = vpack.c.bf16 %v17086_v54, %v8054_v22  ;;  %v8053_v8 = vadd.f32 %v8045_v3, %v8025_v29  ;;  %v7991_v39 = vmul.f32 %v18910_v42, %v16124_v46  ;;  %v7992_v17 = vmul.f32 %v16725_v55, %v16130_v48  ;;  %v18911_v62 = vld [vmem:[#allocation68_spill] sm:$0xff] }
 0x41d   :  { %v17105_v37 = vadd.f32 %v8049_v60, %v8029_v10  ;;  %v17111_v63 = vmul.f32 %v7472_v2, %v7440_v58  ;;  %v7507_v43 = vadd.f32 %v7499_v35, %v18911_v62  ;;  %v8019_v20 = vmul.f32 %v18868_v15, %v18828_v49  ;;  %v18912_v35 = vld [vmem:[#allocation69_spill] sm:$0xff] }
 0x41e   :  { %9289 = vmatprep.mubr.bf16.mxu0 %v8062_v7  ;;  %9515 = vmatprep.mubr.bf16.mxu1 %v8062_v7  ;;  %v7497_v33 = vmul.f32 0.75, %v16983_v5  ;;  %v8020_v29 = vmul.f32 %v18869_v51, %v18830_v59  ;;  %v8047_v3 = vmul.f32 %v16224_v24, %v18874_v11  ;;  %v8048_v58 = vmul.f32 %v16269_v19, %v18876_v27 }
 0x41f   :  { %v8061_v10 = vpack.c.bf16 %v17105_v37, %v8053_v8  ;;  %v7523_v60 = vadd.f32 %v7515_v32, %v7507_v43  ;;  %v8027_v2 = vadd.f32 %v8019_v20, %v7991_v39  ;;  %v8069_v7 = vadd.f32 %v8054_v22, %v8053_v8  ;;  %v18913_v39 = vld [vmem:[#allocation70_spill] sm:$0xff]  ;;  %v18914_v43 = vld [vmem:[#allocation71_spill] sm:$0xff] }
 0x420   :  { %v7505_v62 = vadd.f32 %v7497_v33, %v18912_v35  ;;  %v8028_v12 = vadd.f32 %v8020_v29, %v7992_v17  ;;  %v7513_v5 = vmul.f32 0.97021484, %v17024_v23  ;;  %v7498_v28 = vmul.f32 0.75, %v16988_v25 }
 0x421   :  { %9290 = vmatmul.mubr.bf16.gmra.mrb[84].mxu0 %v8061_v10  ;;  %9516 = vmatmul.mubr.bf16.gmra.mrb[84].mxu1 %v8061_v10  ;;  %v7514_v56 = vmul.f32 0.97021484, %v17035_v16  ;;  %vm7531_vm0 = vcmp.ge.f32.partialorder %v7523_v60, 1.25  ;;  %v17128_v51 = vadd.f32 %v8047_v3, %v8027_v2  ;;  %v7500_v24 = vmul.f32 0.75, %v17001_v40  ;;  %v18916_v60 = vld [vmem:[#allocation73_spill] sm:$0xff] }
 0x422   :  { %v7516_v19 = vmul.f32 0.97021484, %v17044_v26  ;;  %v12781_v22 = vsel %vm7531_vm0, 1.0, %v18791_v14  ;;  %v17133_v32 = vadd.f32 %v8048_v58, %v8028_v12  ;;  %v7521_v8 = vadd.f32 %v7513_v5, %v7505_v62  ;;  %v18915_v26 = vld [vmem:[#allocation84_spill] sm:$0xff] }
 0x423   :  { %v7506_v17 = vadd.f32 %v7498_v28, %v18913_v39  ;;  %v8321_v23 = vmul.f32 %v12781_v22, %v16124_v46  ;;  %v8070_v25 = vadd.f32 %v8069_v7, %v17128_v51  ;;  %v7508_v16 = vadd.f32 %v7500_v24, %v18914_v43 }
 0x424   :  { %v7503_v20 = vmul.f32 0.75, %v17033_v9  ;;  %vm7529_vm1 = vcmp.ge.f32.partialorder %v7521_v8, 1.25  ;;  %v7519_v40 = vmul.f32 0.97021484, %v7479_v4  ;;  %v7995_v10 = vmul.f32 %v18915_v26, %v16124_v46 }
 0x425   :  { %v7522_v33 = vadd.f32 %v7514_v56, %v7506_v17  ;;  %v17143_v12 = vadd.f32 %v16995_v13, %v8321_v23  ;;  %v8071_v29 = vadd.f32 %v8070_v25, %v17133_v32  ;;  %v12779_v28 = vsel %vm7529_vm1, 1.0, %v18791_v14 }
 0x426   :  { %v7524_v3 = vadd.f32 %v7516_v19, %v7508_v16  ;;  %v8319_v58 = vmul.f32 %v12779_v28, %v16121_v45  ;;  %v7511_v2 = vadd.f32 %v7503_v20, %v18916_v60  ;;  %v7996_v56 = vmul.f32 %v16798_v53, %v16130_v48  ;;  %v18919_v28 = vld [vmem:[#allocation90_spill] sm:$0xff]  ;;  %v18921_v60 = vld [vmem:[#allocation24_spill] sm:$0xff] }
 0x427   :  { %vm7530_vm2 = vcmp.ge.f32.partialorder %v7522_v33, 1.25  ;;  %8072 = vadd.xlane.f32.xlu1 %v8071_v29  ;;  %v8023_v13 = vmul.f32 %v18878_v21, %v18828_v49  ;;  %v8024_v9 = vmul.f32 %v18879_v47, %v18830_v59  ;;  %v8051_v8 = vmul.f32 %v18839_v50, %v18874_v11 }
 0x428   :  { %v12780_v4 = vsel %vm7530_vm2, 1.0, %v18791_v14  ;;  %vm7532_vm3 = vcmp.ge.f32.partialorder %v7524_v3, 1.25  ;;  %v17157_v7 = vadd.f32 %v17015_v57, %v8319_v58  ;;  %v7527_v5 = vadd.f32 %v7519_v40, %v7511_v2  ;;  %v18917_v40 = vld [vmem:[#allocation74_spill] sm:$0xff]  ;;  %v18920_v3 = vld [vmem:[#allocation23_spill] sm:$0xff] }
 0x429   :  { %v8320_v35 = vmul.f32 %v12780_v4, %v16118_v44  ;;  %v12782_v62 = vsel %vm7532_vm3, 1.0, %v18791_v14  ;;  %v8031_v19 = vadd.f32 %v8023_v13, %v7995_v10  ;;  %v8032_v22 = vadd.f32 %v8024_v9, %v7996_v56  ;;  %v18923_v4 = vld [vmem:[#allocation77_spill] sm:$0xff] }
 0x42a   :  { %v17162_v24 = vmul.f32 %v12782_v62, %v16130_v48  ;;  %vm7535_vm4 = vcmp.ge.f32.partialorder %v7527_v5, 1.25  ;;  %v8052_v57 = vmul.f32 %v16375_v52, %v18876_v27  ;;  %v8074_v17 = vadd.f32 %v17086_v54, %v17105_v37  ;;  %v18926_v62 = vld [vmem:[#allocation86_spill] sm:$0xff]  ;;  %v18927_v5 = vld [vmem:[#allocation79_spill] sm:$0xff] }
 0x42b   :  { %v17167_v39 = vadd.f32 %v17022_v61, %v8320_v35  ;;  %v12785_v23 = vsel %vm7535_vm4, 1.0, %v18791_v14  ;;  %v17174_v25 = vadd.f32 %v8051_v8, %v8031_v19  ;;  %v7501_v43 = vmul.f32 0.75, %v17030_v36  ;;  %v18929_v8 = vld [vmem:[#allocation30_spill] sm:$0xff] }
 0x42c   :  { %v7517_v16 = vmul.f32 0.97021484, %v17076_v41  ;;  %v8325_v50 = vmul.f32 %v12785_v23, %v16124_v46  ;;  %v17179_v20 = vadd.f32 %v8052_v57, %v8032_v22  ;;  %v7502_v61 = vmul.f32 0.75, %v17048_v6  ;;  %v18918_v41 = vld [vmem:[#allocation76_spill] sm:$0xff]  ;;  %v18922_v6 = vld [vmem:[#allocation31_spill] sm:$0xff]  ;;  %v18928_v22 = vld [vmem:[#allocation94_spill] sm:$0xff] }
 0x42d   :  { %v7518_v33 = vmul.f32 0.97021484, %v17092_v18  ;;  %v8075_v52 = vadd.f32 %v8074_v17, %v17174_v25  ;;  %v7509_v54 = vadd.f32 %v7501_v43, %v18917_v40  ;;  %v7504_v37 = vmul.f32 0.75, %v17053_v1  ;;  %v18924_v1 = vld [vmem:[#allocation51_spill] sm:$0xff] }
 0x42e   :  { %v7520_v10 = vmul.f32 0.97021484, %v17111_v63  ;;  %v17188_v36 = vadd.f32 %v17074_v31, %v8325_v50  ;;  %v7510_v29 = vadd.f32 %v7502_v61, %v18918_v41  ;;  %v8136_v58 = vadd.f32 %v18920_v3, %v18919_v28  ;;  %v18925_v31 = vld [vmem:[#allocation66_spill] sm:$0xff]  ;;  %v18930_v43 = vld [vmem:[#allocation47_spill] sm:$0xff] }
 0x42f   :  { %v8140_v2 = vadd.f32 %v18922_v6, %v18921_v60  ;;  %v8076_v18 = vadd.f32 %v8075_v52, %v17179_v20  ;;  %v7525_v56 = vadd.f32 %v7517_v16, %v7509_v54  ;;  %v7512_v13 = vadd.f32 %v7504_v37, %v18923_v4  ;;  %v18932_v60 = vld [vmem:[#allocation88_spill] sm:$0xff] }
 0x430   :  { %v8156_v9 = vmul.f32 %v18924_v1, %v18862_v38  ;;  %v7526_v63 = vadd.f32 %v7518_v33, %v7510_v29  ;;  %v8160_v35 = vmul.f32 %v18925_v31, %v18862_v38  ;;  %v8135_v19 = vadd.f32 %v18927_v5, %v18926_v62  ;;  %v18931_v33 = vld [vmem:[#allocation56_spill] sm:$0xff] }
 0x431   :  { %v8139_v57 = vadd.f32 %v18929_v8, %v18928_v22  ;;  %8077 = vadd.xlane.f32.xlu0 %v8076_v18  ;;  %vm7533_vm5 = vcmp.ge.f32.partialorder %v7525_v56, 1.25  ;;  %v7528_v17 = vadd.f32 %v7520_v10, %v7512_v13  ;;  %v8155_v16 = vmul.f32 %v18930_v43, %v18867_v30  ;;  %v18934_v13 = vld [vmem:[#allocation53_spill] sm:$0xff] }
 0x432   :  { %v8164_v23 = vadd.f32 %v8156_v9, %v8136_v58  ;;  %v12783_v50 = vsel %vm7533_vm5, 1.0, %v18791_v14  ;;  %vm7534_vm6 = vcmp.ge.f32.partialorder %v7526_v63, 1.25  ;;  %v8168_v61 = vadd.f32 %v8160_v35, %v8140_v2  ;;  %v18935_v63 = vld [vmem:[#allocation96_spill] sm:$0xff]  ;;  %v18936_v35 = vld [vmem:[#allocation33_spill] sm:$0xff] }
 0x433   :  { %v8159_v52 = vmul.f32 %v18931_v33, %v18867_v30  ;;  %v8323_v40 = vmul.f32 %v12783_v50, %v16121_v45  ;;  %v12784_v54 = vsel %vm7534_vm6, 1.0, %v18791_v14  ;;  %vm7536_vm7 = vcmp.ge.f32.partialorder %v7528_v17, 1.25  ;;  %v18933_v45 = vld [vmem:[#allocation92_spill] sm:$0xff] }
 0x434   :  { %v8163_v37 = vadd.f32 %v8155_v16, %v8135_v19  ;;  %v8324_v41 = vmul.f32 %v12784_v54, %v16118_v44  ;;  %v12786_v10 = vsel %vm7536_vm7, 1.0, %v18791_v14  ;;  %v8172_v29 = vpack.c.bf16 %v8168_v61, %v8164_v23 }
 0x435   :  { %v8167_v28 = vadd.f32 %v8159_v52, %v8139_v57  ;;  %v17215_v3 = vadd.f32 %v17067_v0, %v8323_v40  ;;  %v17218_v58 = vmul.f32 %v12786_v10, %v16130_v48  ;;  %v8101_v6 = vmul.f32 %v18932_v60, %v16124_v46  ;;  %v18939_v52 = vld [vmem:[#allocation54_spill] sm:$0xff]  ;;  %v18940_v40 = vld [vmem:[#allocation48_spill] sm:$0xff] }
 0x436   :  { %v8102_v2 = vmul.f32 %v18933_v45, %v16130_v48  ;;  %v17225_v18 = vadd.f32 %v17084_v34, %v8324_v41  ;;  %9299 = vmatprep.mubr.bf16.mxu0 %v8172_v29  ;;  %9525 = vmatprep.mubr.bf16.mxu1 %v8172_v29  ;;  %v8129_v56 = vmul.f32 %v18910_v42, %v18828_v49  ;;  %v18942_v10 = vld [vmem:[#allocation44_spill] sm:$0xff] }
 0x437   :  { %v8171_v44 = vpack.c.bf16 %v8167_v28, %v8163_v37  ;;  %v8130_v0 = vmul.f32 %v16725_v55, %v18830_v59  ;;  %v8157_v4 = vmul.f32 %v18868_v15, %v18874_v11  ;;  %v8158_v1 = vmul.f32 %v18934_v13, %v18876_v27 }
 0x438   :  { %v8179_v9 = vadd.f32 %v8164_v23, %v8163_v37  ;;  %v8137_v34 = vadd.f32 %v8129_v56, %v8101_v6  ;;  %v8105_v31 = vmul.f32 %v18935_v63, %v16124_v46  ;;  %v8106_v62 = vmul.f32 %v18936_v35, %v16130_v48  ;;  %v18937_v46 = vld [vmem:[#allocation27_spill] sm:$0xff] }
 0x439   :  { %9300 = vmatmul.mubr.bf16.gmra.mrb[88].mxu0 %v8171_v44  ;;  %9526 = vmatmul.mubr.bf16.gmra.mrb[88].mxu1 %v8171_v44  ;;  %v8138_v5 = vadd.f32 %v8130_v0, %v8102_v2  ;;  %v8133_v19 = vmul.f32 %v18915_v26, %v18828_v49  ;;  %v8134_v15 = vmul.f32 %v16798_v53, %v18830_v59  ;;  %v18938_v23 = vld [vmem:[#allocation91_spill] sm:$0xff] }
 0x43a   :  { %v8161_v22 = vmul.f32 %v18878_v21, %v18874_v11  ;;  %v17245_v8 = vadd.f32 %v8157_v4, %v8137_v34  ;;  %v8162_v57 = vmul.f32 %v18879_v47, %v18876_v27  ;;  %v8184_v17 = vadd.f32 %v8168_v61, %v8167_v28  ;;  %v18941_v21 = vld [vmem:[#allocation81_spill] sm:$0xff]  ;;  %v18943_v47 = vld [vmem:[#allocation28_spill] sm:$0xff]  ;;  %v18944_v61 = vld [vmem:[#allocation87_spill] sm:$0xff] }
 0x43b   :  { %v8246_v43 = vadd.f32 %v18938_v23, %v18937_v46  ;;  %v17251_v16 = vadd.f32 %v8158_v1, %v8138_v5  ;;  %v8141_v50 = vadd.f32 %v8133_v19, %v8105_v31  ;;  %v8142_v33 = vadd.f32 %v8134_v15, %v8106_v62  ;;  %v18945_v44 = vld [vmem:[#allocation63_spill] sm:$0xff]  ;;  %v18949_v15 = vld [vmem:[#allocation29_spill] sm:$0xff] }
 0x43c   :  { %v8250_v54 = vadd.f32 %v18940_v40, %v18939_v52  ;;  %v8180_v37 = vadd.f32 %v8179_v9, %v17245_v8  ;;  %v8266_v41 = vmul.f32 %v18941_v21, %v18862_v38  ;;  %v8270_v29 = vmul.f32 %v18942_v10, %v18862_v38  ;;  %v18946_v56 = vld [vmem:[#allocation95_spill] sm:$0xff]  ;;  %v18950_v52 = vld [vmem:[#allocation26_spill] sm:$0xff] }
 0x43d   :  { %v8245_v28 = vadd.f32 %v18944_v61, %v18943_v47  ;;  %v17262_v6 = vadd.f32 %v8161_v22, %v8141_v50  ;;  %v17264_v2 = vadd.f32 %v8162_v57, %v8142_v33  ;;  %v8249_v0 = vadd.f32 %v18946_v56, %v18945_v44  ;;  %v18947_v4 = vld [vmem:[#allocation75_spill] sm:$0xff] }
 0x43e   :  { %v8265_v13 = vmul.f32 %v18947_v4, %v18867_v30  ;;  %v8181_v1 = vadd.f32 %v8180_v37, %v17251_v16  ;;  %v8274_v9 = vadd.f32 %v8266_v41, %v8246_v43  ;;  %v8278_v34 = vadd.f32 %v8270_v29, %v8250_v54  ;;  %v18948_v31 = vld [vmem:[#allocation43_spill] sm:$0xff] }
 0x43f   :  { %v8269_v62 = vmul.f32 %v18948_v31, %v18867_v30  ;;  %v8185_v5 = vadd.f32 %v8184_v17, %v17262_v6  ;;  %v8212_v22 = vmul.f32 %v18949_v15, %v16130_v48  ;;  %v8239_v57 = vmul.f32 %v18932_v60, %v18828_v49  ;;  %v18951_v41 = vld [vmem:[#allocation55_spill] sm:$0xff]  ;;  %v18955_v31 = vld [vmem:[#allocation85_spill] sm:$0xff] }
 0x440   :  { %v8273_v19 = vadd.f32 %v8265_v13, %v8245_v28  ;;  %8182 = vadd.xlane.f32.xlu1 %v8181_v1  ;;  %v8282_v46 = vpack.c.bf16 %v8278_v34, %v8274_v9  ;;  %v8240_v50 = vmul.f32 %v18933_v45, %v18830_v59  ;;  %v8267_v43 = vmul.f32 %v18910_v42, %v18874_v11  ;;  %v18953_v13 = vld [vmem:[#allocation89_spill] sm:$0xff]  ;;  %v18954_v1 = vld [vmem:[#allocation35_spill] sm:$0xff] }
 0x441   :  { %v8277_v23 = vadd.f32 %v8269_v62, %v8249_v0  ;;  %v8186_v33 = vadd.f32 %v8185_v5, %v17264_v2  ;;  %v8247_v17 = vadd.f32 %v8239_v57, %v18950_v52  ;;  %v8268_v40 = vmul.f32 %v16725_v55, %v18876_v27  ;;  %v18956_v62 = vld [vmem:[#allocation93_spill] sm:$0xff] }
 0x442   :  { %v8289_v54 = vadd.f32 %v8274_v9, %v8273_v19  ;;  %9309 = vmatprep.mubr.bf16.mxu0 %v8282_v46  ;;  %9535 = vmatprep.mubr.bf16.mxu1 %v8282_v46  ;;  %v8248_v21 = vadd.f32 %v8240_v50, %v8212_v22  ;;  %v8216_v10 = vmul.f32 %v18951_v41, %v16130_v48  ;;  %v18952_v48 = vld [vmem:[#allocation72_spill] sm:$0xff] }
 0x443   :  { %v8281_v37 = vpack.c.bf16 %v8277_v23, %v8273_v19  ;;  %8187 = vadd.xlane.f32.xlu0 %v8186_v33  ;;  %v8275_v29 = vadd.f32 %v8267_v43, %v8247_v17  ;;  %v8243_v42 = vmul.f32 %v18935_v63, %v18828_v49  ;;  %v8244_v47 = vmul.f32 %v18936_v35, %v18830_v59 }
 0x444   :  { %v8271_v61 = vmul.f32 %v18915_v26, %v18874_v11  ;;  %v8276_v55 = vadd.f32 %v8268_v40, %v8248_v21  ;;  %v8272_v28 = vmul.f32 %v16798_v53, %v18876_v27  ;;  %v8294_v44 = vadd.f32 %v8278_v34, %v8277_v23 }
 0x445   :  { %9310 = vmatmul.mubr.bf16.gmra.mrb[92].mxu0 %v8281_v37  ;;  %9536 = vmatmul.mubr.bf16.gmra.mrb[92].mxu1 %v8281_v37  ;;  %v8290_v56 = vadd.f32 %v8289_v54, %v8275_v29  ;;  %v8251_v0 = vadd.f32 %v8243_v42, %v18952_v48  ;;  %v8252_v4 = vadd.f32 %v8244_v47, %v8216_v10  ;;  %v7659_v54 = vpop.xlane.xlu0 %7658  ;;  %v18957_v21 = vmov 0   ;;  %v15119_v48 = vld [vmem:[#allocation9 + $0x48] sm:$0xff]  }
 0x446   :  { %v8376_v49 = vmul.f32 %v18953_v13, %v18862_v38  ;;  %v8380_v9 = vmul.f32 %v18954_v1, %v18862_v38  ;;  %v8375_v26 = vmul.f32 %v18955_v31, %v18867_v30  ;;  %v8379_v5 = vmul.f32 %v18956_v62, %v18867_v30  ;;  %v15122_v13 = vld [vmem:[#allocation9 + $0x88] sm:$0xff]   ;;  %v15124_v31 = vld [vmem:[#allocation9 + $0xd0] sm:$0xff]  }
 0x447   :  { %v8350_v53 = vmul.f32 %v18949_v15, %v18830_v59  ;;  %v8291_v34 = vadd.f32 %v8290_v56, %v8276_v55  ;;  %v8279_v19 = vadd.f32 %v8271_v61, %v8251_v0  ;;  %v8280_v22 = vadd.f32 %v8272_v28, %v8252_v4  ;;  %v15117_v28 = vld [vmem:[#allocation9] sm:$0xff]   ;;  %v15121_v4 = vld [vmem:[#allocation9 + $0x8] sm:$0xff]  }
 0x448   :  { %v8384_v57 = vadd.f32 %v8376_v49, %v17167_v39  ;;  %v8388_v46 = vadd.f32 %v8380_v9, %v17225_v18  ;;  %v8383_v23 = vadd.f32 %v8375_v26, %v17157_v7  ;;  %v8387_v38 = vadd.f32 %v8379_v5, %v17215_v3  ;;  %v15118_v56 = vld [vmem:[#allocation9 + $0x80] sm:$0xff]   ;;  %v15123_v49 = vld [vmem:[#allocation9 + $0x50] sm:$0xff]  }
 0x449   :  { %v8358_v50 = vadd.f32 %v8350_v53, %v17162_v24  ;;  %8292 = vadd.xlane.f32.xlu1 %v8291_v34  ;;  %v8295_v43 = vadd.f32 %v8294_v44, %v8279_v19  ;;  %v8377_v30 = vmul.f32 %v18932_v60, %v18874_v11  ;;  %v8378_v15 = vmul.f32 %v18933_v45, %v18876_v27  ;;  %v18960_v5 = vld [vmem:[#allocation39_spill] sm:$0xff]  ;;  %v18961_v53 = vld [vmem:[#allocation41_spill] sm:$0xff] }
 0x44a   :  { %v8354_v33 = vmul.f32 %v18951_v41, %v18830_v59  ;;  %v8392_v39 = vpack.c.bf16 %v8388_v46, %v8384_v57  ;;  %v8391_v52 = vpack.c.bf16 %v8387_v38, %v8383_v23  ;;  %v8399_v18 = vadd.f32 %v8384_v57, %v8383_v23  ;;  %v18963_v57 = vld [vmem:[#allocation45_spill] sm:$0xff]  ;;  %v15126_v23 = vld [vmem:[#allocation9 + $0x90] sm:$0xff]  }
 0x44b   :  { %v8381_v7 = vmul.f32 %v18935_v63, %v18874_v11  ;;  %v8296_v3 = vadd.f32 %v8295_v43, %v8280_v22  ;;  %v8385_v24 = vadd.f32 %v8377_v30, %v17143_v12  ;;  %v8386_v17 = vadd.f32 %v8378_v15, %v8358_v50  ;;  %v15128_v30 = vld [vmem:[#allocation9 + $0xd8] sm:$0xff]  }
 0x44c   :  { %v8362_v40 = vadd.f32 %v8354_v33, %v17218_v58  ;;  %9319 = vmatprep.mubr.bf16.mxu0 %v8392_v39  ;;  %9545 = vmatprep.mubr.bf16.mxu1 %v8392_v39  ;;  %v8382_v60 = vmul.f32 %v18936_v35, %v18876_v27  ;;  %v8404_v45 = vadd.f32 %v8388_v46, %v8387_v38  ;;  %v7734_v58 = vpop.xlane.xlu1 %7733  ;;  %v15127_v38 = vld [vmem:[#allocation9 + $0x58] sm:$0xff]  }
 0x44d   :  { %v8389_v59 = vadd.f32 %v8381_v7, %v17188_v36  ;;  %8297 = vadd.xlane.f32.xlu0 %v8296_v3  ;;  %9320 = vmatmul.mubr.bf16.gmra.mrb[96].mxu0 %v8391_v52  ;;  %v8400_v37 = vadd.f32 %v8399_v18, %v8385_v24  ;;  %v17329_v10 = vpack.c.bf16 %v17179_v20, %v17133_v32  ;;  %v7729_v32 = vpop.xlane.xlu0 %7728  ;;  %v15129_v39 = vld [vmem:[#allocation9 + $0x18] sm:$0xff]   ;;  %v15131_v18 = vld [vmem:[#allocation9 + $0x60] sm:$0xff]  }
 0x44e   :  { %9546 = vmatmul.mubr.bf16.gmra.mrb[96].mxu1 %v8391_v52  ;;  %v8390_v11 = vadd.f32 %v8382_v60, %v8362_v40  ;;  %9362 = vmatprep.mubr.bf16.mxu0 %v18957_v21  ;;  %v17333_v27 = vpack.c.bf16 %v17174_v25, %v17128_v51  ;;  %v17337_v36 = vpack.c.bf16 %v17264_v2, %v17251_v16  ;;  %v18958_v16 = vld [vmem:[#allocation40_spill] sm:$0xff]  ;;  %v18959_v2 = vld [vmem:[#allocation42_spill] sm:$0xff]  ;;  %v15132_v3 = vld [vmem:[#allocation9 + $0xe0] sm:$0xff]  }
 0x44f   :  { %v8405_v63 = vadd.f32 %v8404_v45, %v8389_v59  ;;  %v8401_v12 = vadd.f32 %v8400_v37, %v8386_v17  ;;  %9588 = vmatprep.mubr.bf16.mxu1 %v18957_v21  ;;  %v17341_v35 = vpack.c.bf16 %v17262_v6, %v17245_v8  ;;  %v17343_v42 = vpack.c.bf16 %v8280_v22, %v8276_v55  ;;  %v18962_v22 = vld [vmem:[#allocation83_spill] sm:$0xff]  ;;  %v15130_v52 = vld [vmem:[#allocation9 + $0x98] sm:$0xff]   ;;  %v18967_v60 = vld [vmem:[#allocation38_spill] sm:$0xff] }
 0x450   :  { %v17345_v47 = vpack.c.bf16 %v8279_v19, %v8275_v29  ;;  %v17347_v61 = vpack.c.bf16 %v8390_v11, %v8386_v17  ;;  %v17349_v20 = vpack.c.bf16 %v8389_v59, %v8385_v24  ;;  %v7660_v51 = vadd.f32 %v7659_v54, %v7659_v54  ;;  %v15120_v29 = vld [vmem:[#allocation9 + $0xc8] sm:$0xff]   ;;  %v15125_v19 = vld [vmem:[#allocation9 + $0x10] sm:$0xff]   ;;  %v18966_v17 = vld [vmem:[#allocation37_spill] sm:$0xff] }
 0x451   :  { %v8406_v41 = vadd.f32 %v8405_v63, %v8390_v11  ;;  %8402 = vadd.xlane.f32.xlu1 %v8401_v12  ;;  %v7735_v25 = vadd.f32 %v7734_v58, %v7729_v32  ;;  %v7720_v44 = vpack.c.bf16 %v18959_v2, %v18958_v16  ;;  %v7719_v34 = vpack.c.bf16 %v18961_v53, %v18960_v5  ;;  %v18965_v24 = vld [vmem:[#allocation82_spill] sm:$0xff]  ;;  %v15133_v54 = vld [vmem:[#allocation9 + $0x20] sm:$0xff]   ;;  %v15140_v32 = vld [vmem:[#allocation9 + $0xf0] sm:$0xff]  }
 0x452   :  { %v7661_v8 = vrot.slane %v7660_v51, 4  ;;  %v7823_v46 = vpack.c.bf16 %v18963_v57, %v18962_v22  ;;  %v7822_v40 = vpack.c.bf16 %v18966_v17, %v18965_v24  ;;  %v18968_v59 = vld [vmem:[#allocation50_spill] sm:$0xff]  ;;  %v15134_v37 = vld [vmem:[#allocation9 + $0xa0] sm:$0xff]   ;;  %v15141_v16 = vld [vmem:[#allocation9 + $0x30] sm:$0xff]  }
 0x453   :  { %8407 = vadd.xlane.f32.xlu0 %v8406_v41  ;;  %v7736_v6 = vrot.slane %v7735_v25, 4  ;;  %v7954_v45 = vpack.c.bf16 %v18968_v59, %v18967_v60  ;;  %v15135_v11 = vld [vmem:[#allocation9 + $0x68] sm:$0xff]   ;;  %v15139_v41 = vld [vmem:[#allocation9 + $0x70] sm:$0xff]  }
 0x454   :  { %v7662_v55 = vadd.f32 %v7661_v8, %v7660_v51  ;;  %v15136_v63 = vld [vmem:[#allocation9 + $0xe8] sm:$0xff]   ;;  %v18969_v51 = vld [vmem:[#allocation59_spill] sm:$0xff]  ;;  %v15146_v8 = vld [vmem:[#allocation9 + $0xb8] sm:$0xff]  }
 0x455   :  { %9363 = vmatmul.mubr.bf16.vlgmr.msra.gmra.mrb[68].mxu0 %v18957_v21  ;;  %v7737_v0 = vadd.f32 %v7736_v6, %v7735_v25  ;;  %v15137_v12 = vld [vmem:[#allocation9 + $0x28] sm:$0xff]   ;;  %v18970_v25 = vld [vmem:[#allocation25_spill] sm:$0xff]  ;;  %v15142_v2 = vld [vmem:[#allocation9 + $0xb0] sm:$0xff]  }
 0x456   :  { %9589 = vmatmul.mubr.bf16.vlgmr.msra.gmra.mrb[68].mxu1 %v18957_v21  ;;  %9372 = vmatprep.mubr.bf16.mxu0 %v7720_v44  ;;  %v7663_v1 = vrot.slane %v7662_v55, 2  ;;  %v15138_v58 = vld [vmem:[#allocation9 + $0xa8] sm:$0xff]   ;;  %v18974_v57 = vld [vmem:[#allocation19_spill] sm:$0xff] }
 0x457   :  { %9598 = vmatprep.mubr.bf16.mxu1 %v7720_v44  ;;  %13090 = vmatpush3.bf16.msra.mxu0 %v15117_v28  ;;  %v7738_v9 = vrot.slane %v7737_v0, 2  ;;  %v7953_v28 = vpack.c.bf16 %v18970_v25, %v18969_v51  ;;  %v15143_v44 = vld [vmem:[#allocation9 + $0x78] sm:$0xff]  }
 0x458   :  { %13154 = vmatpush3.bf16.msra.mxu1 %v15118_v56  ;;  %13091 = vmatprep.subr.bf16.mxu0 %v15119_v48  ;;  %v7664_v26 = vadd.f32 %v7663_v1, %v7662_v55  ;;  %v15144_v56 = vld [vmem:[#allocation9 + $0xf8] sm:$0xff]  }
 0x459   :  { %13155 = vmatprep.subr.bf16.mxu1 %v15120_v29  ;;  %v7739_v62 = vadd.f32 %v7738_v9, %v7737_v0  ;;  %v15145_v48 = vld [vmem:[#allocation9 + $0x38] sm:$0xff]  }
 0x45a   :  { %v7665_v50 = vrot.slane %v7664_v26, 1  ;;  %v10405_v5 = vld [vmem:[#allocation12] ss:$8 sm:$0xf] }
 0x45b   :  { %13092 = vmatpush3.bf16.msra.mxu0 %v15121_v4  ;;  %v7740_v43 = vrot.slane %v7739_v62, 1  ;;  %v10409_v53 = vld [vmem:[#allocation12 + $0x2] ss:$8 sm:$0xf] }
 0x45c   :  { %13156 = vmatpush3.bf16.msra.mxu1 %v15122_v13  ;;  %13093 = vmatprep.subr.bf16.mxu0 %v15123_v49  ;;  %v17359_v15 = vadd.f32 %v7665_v50, %v7664_v26  ;;  %v10407_v26 = vld [vmem:[#allocation12 + $0x1] ss:$8 sm:$0xf] }
 0x45d   :  { %9373 = vmatmul.mubr.bf16.gmra.mrb[72].mxu0 %v7719_v34  ;;  %13157 = vmatprep.subr.bf16.mxu1 %v15124_v31  ;;  %v7741_v33 = vadd.f32 %v7740_v43, %v7739_v62 }
 0x45e   :  { %9599 = vmatmul.mubr.bf16.gmra.mrb[72].mxu1 %v7719_v34  ;;  %9382 = vmatprep.mubr.bf16.mxu0 %v7823_v46  ;;  %18964 = vst [vmem:[#allocation57_spill] sm:$0xff] %v17359_v15 }
 0x45f   :  { %9608 = vmatprep.mubr.bf16.mxu1 %v7823_v46  ;;  %13094 = vmatpush3.bf16.msra.mxu0 %v15125_v19  ;;  %v17362_v7 = vadd.f32 %v7741_v33, %v17359_v15  ;;  %v18973_v19 = vld [vmem:[#allocation20_spill] sm:$0xff]  ;;  %v17400_v46 = vrot.slane %v10407_v26, %v18974_v57 }
 0x460   :  { %13158 = vmatpush3.bf16.msra.mxu1 %v15126_v23  ;;  %13095 = vmatprep.subr.bf16.mxu0 %v15127_v38  ;;  %v17397_v22 = vrot.slane %v10407_v26, %v18973_v19  ;;  %v17406_v38 = vrot.slane %v10405_v5, %v18974_v57  ;;  %v17415_v33 = vrot.slane %v10405_v5, %v18973_v19 }
 0x461   :  { %13159 = vmatprep.subr.bf16.mxu1 %v15128_v30  ;;  %v17427_v17 = vrot.slane %v10409_v53, %v18973_v19 }
 0x463   :  { %13096 = vmatpush3.bf16.msra.mxu0 %v15129_v39  ;;  %v17418_v39 = vrot.slane %v10409_v53, %v18974_v57  ;;  %18979 = vst [vmem:[#allocation22_spill] sm:$0xff] %v17427_v17 }
 0x464   :  { %13160 = vmatpush3.bf16.msra.mxu1 %v15130_v52  ;;  %13097 = vmatprep.subr.bf16.mxu0 %v15131_v18 }
 0x465   :  { %9383 = vmatmul.mubr.bf16.gmra.mrb[76].mxu0 %v7822_v40  ;;  %13161 = vmatprep.subr.bf16.mxu1 %v15132_v3  ;;  %18976 = vst [vmem:[#allocation61_spill] sm:$0xff] %v17418_v39 }
 0x466   :  { %9609 = vmatmul.mubr.bf16.gmra.mrb[76].mxu1 %v7822_v40  ;;  %9392 = vmatprep.mubr.bf16.mxu0 %v7954_v45 }
 0x467   :  { %9618 = vmatprep.mubr.bf16.mxu1 %v7954_v45  ;;  %13098 = vmatpush3.bf16.msra.mxu0 %v15133_v54 }
 0x468   :  { %13162 = vmatpush3.bf16.msra.mxu1 %v15134_v37  ;;  %13099 = vmatprep.subr.bf16.mxu0 %v15135_v11 }
 0x469   :  { %13163 = vmatprep.subr.bf16.mxu1 %v15136_v63 }
 0x46b   :  { %13100 = vmatpush3.bf16.msra.mxu0 %v15137_v12 }
 0x46c   :  { %13164 = vmatpush3.bf16.msra.mxu1 %v15138_v58  ;;  %13101 = vmatprep.subr.bf16.mxu0 %v15139_v41 }
 0x46d   :  { %9393 = vmatmul.mubr.bf16.gmra.mrb[80].mxu0 %v7953_v28  ;;  %13165 = vmatprep.subr.bf16.mxu1 %v15140_v32 }
 0x46e   :  { %9619 = vmatmul.mubr.bf16.gmra.mrb[80].mxu1 %v7953_v28  ;;  %9402 = vmatprep.mubr.bf16.mxu0 %v17329_v10 }
 0x46f   :  { %9628 = vmatprep.mubr.bf16.mxu1 %v17329_v10  ;;  %13102 = vmatpush3.bf16.msra.mxu0 %v15141_v16 }
 0x470   :  { %13166 = vmatpush3.bf16.msra.mxu1 %v15142_v2  ;;  %13103 = vmatprep.subr.bf16.mxu0 %v15143_v44 }
 0x471   :  { %13167 = vmatprep.subr.bf16.mxu1 %v15144_v56  ;;  %v7832_v6 = vpop.xlane.xlu1 %7831 }
 0x473   :  { %13104 = vmatpush3.bf16.msra.mxu0 %v15145_v48 }
 0x474   :  { %13168 = vmatpush3.bf16.msra.mxu1 %v15146_v8 }
 0x475   :  { %9403 = vmatmul.mubr.bf16.gmra.mrb[84].mxu0 %v17333_v27 }
 0x476   :  { %9629 = vmatmul.mubr.bf16.gmra.mrb[84].mxu1 %v17333_v27  ;;  %9412 = vmatprep.mubr.bf16.mxu0 %v17337_v36 }
 0x477   :  { %9638 = vmatprep.mubr.bf16.mxu1 %v17337_v36 }
 0x479   :  { %v7837_v29 = vpop.xlane.xlu0 %7836 }
 0x47a   :  { %v7838_v55 = vadd.f32 %v7837_v29, %v7832_v6 }
 0x47c   :  { %v7839_v10 = vrot.slane %v7838_v55, 4 }
 0x47d   :  { %9413 = vmatmul.mubr.bf16.gmra.mrb[88].mxu0 %v17341_v35 }
 0x47e   :  { %9639 = vmatmul.mubr.bf16.gmra.mrb[88].mxu1 %v17341_v35  ;;  %9422 = vmatprep.mubr.bf16.mxu0 %v17343_v42  ;;  %v7840_v0 = vadd.f32 %v7839_v10, %v7838_v55 }
 0x47f   :  { %9648 = vmatprep.mubr.bf16.mxu1 %v17343_v42 }
 0x480   :  { %v7841_v4 = vrot.slane %v7840_v0, 2 }
 0x482   :  { %v7842_v13 = vadd.f32 %v7841_v4, %v7840_v0 }
 0x484   :  { %v7843_v27 = vrot.slane %v7842_v13, 1 }
 0x485   :  { %9423 = vmatmul.mubr.bf16.gmra.mrb[92].mxu0 %v17345_v47 }
 0x486   :  { %9649 = vmatmul.mubr.bf16.gmra.mrb[92].mxu1 %v17345_v47  ;;  %9432 = vmatprep.mubr.bf16.mxu0 %v17347_v61  ;;  %v7844_v36 = vadd.f32 %v7843_v27, %v7842_v13 }
 0x487   :  { %9658 = vmatprep.mubr.bf16.mxu1 %v17347_v61 }
 0x488   :  { %v17385_v49 = vadd.f32 %v7844_v36, %v17362_v7 }
 0x48a   :  { %18971 = vst [vmem:[#allocation58_spill] sm:$0xff] %v17385_v49 }
 0x48d   :  { %9433 = vmatmul.mubr.bf16.gmra.mrb[100].mxu0 %v17349_v20 }
 0x48e   :  { %9659 = vmatmul.mubr.bf16.gmra.mrb[100].mxu1 %v17349_v20  ;;  %11483 = vmatprep.mubr.bf16.mxu0 %v18957_v21  ;;  %v18972_v20 = vld [vmem:[#allocation18_spill] sm:$0xff] }
 0x48f   :  { %11580 = vmatprep.mubr.bf16.mxu1 %v18957_v21  ;;  %v17394_v34 = vrot.slane %v10407_v26, %v18972_v20  ;;  %v17412_v30 = vrot.slane %v10405_v5, %v18972_v20  ;;  %v17424_v24 = vrot.slane %v10409_v53, %v18972_v20 }
 0x491   :  { %18978 = vst [vmem:[#allocation64_spill] sm:$0xff] %v17424_v24 }
 0x495   :  { %11484 = vmatmul.mubr.bf16.vlgmr.msra.gmra.mrb[104].mxu0 %v18957_v21 }
 0x496   :  { %11581 = vmatmul.mubr.bf16.vlgmr.msra.gmra.mrb[104].mxu1 %v18957_v21  ;;  %v18975_v21 = vld [vmem:[#allocation21_spill] sm:$0xff] }
 0x497   :  { %v17403_v23 = vrot.slane %v10407_v26, %v18975_v21  ;;  %v17409_v50 = vrot.slane %v10405_v5, %v18975_v21  ;;  %v17421_v52 = vrot.slane %v10409_v53, %v18975_v21 }
 0x499   :  { %18977 = vst [vmem:[#allocation62_spill] sm:$0xff] %v17421_v52 }
 0x520   :  { %v9321_v35 = vpop.f32.mrb[96].mxu0 }
 0x521   :  { %v9547_v42 = vpop.f32.mrb[96].mxu1  ;;  %v9323_v47 = vpop.f32.mrb[97].mxu0 }
 0x522   :  { %v9549_v1 = vpop.f32.mrb[97].mxu1  ;;  %v9325_v61 = vpop.f32.mrb[98].mxu0 }
 0x523   :  { %v9551_v9 = vpop.f32.mrb[98].mxu1  ;;  %v9327_v31 = vpop.f32.mrb[99].mxu0 }
 0x524   :  { %v9553_v62 = vpop.f32.mrb[99].mxu1 }
 0x528   :  { %v9364_v43 = vpop.f32.mrb[68].mxu0 }
 0x529   :  { %vm9757_vm8 = vcmp.ge.f32.partialorder %v9364_v43, 1.25  ;;  %v9590_v18 = vpop.f32.mrb[68].mxu1  ;;  %v9366_v7 = vpop.f32.mrb[69].mxu0  ;;  %v9813_v3 = vmul.f32 0.75, %v9364_v43 }
 0x52a   :  { %v17430_v40 = vsel %vm9757_vm8, 1.0, %v18791_v14  ;;  %vm9759_vm9 = vcmp.ge.f32.partialorder %v9590_v18, 1.25  ;;  %vm9758_vm10 = vcmp.ge.f32.partialorder %v9366_v7, 1.25  ;;  %v9592_v54 = vpop.f32.mrb[69].mxu1  ;;  %v9368_v60 = vpop.f32.mrb[70].mxu0  ;;  %v9815_v59 = vmul.f32 0.75, %v9590_v18 }
 0x52b   :  { %18980 = vst [vmem:[#allocation52_spill] sm:$0xff] %v17430_v40  ;;  %v9781_v45 = vsub.f32 1.0, %v17430_v40  ;;  %v17434_v37 = vsel %vm9759_vm9, 1.0, %v18791_v14  ;;  %v17437_v11 = vsel %vm9758_vm10, 1.0, %v18791_v14  ;;  %vm9760_vm11 = vcmp.ge.f32.partialorder %v9592_v54, 1.25  ;;  %v9594_v63 = vpop.f32.mrb[70].mxu1 }
 0x52c   :  { %18981 = vst [vmem:[#allocation65_spill] sm:$0xff] %v17434_v37  ;;  %18982 = vst [vmem:[#allocation67_spill] sm:$0xff] %v17437_v11  ;;  %v17439_v12 = vpop.f32.mrb[71].mxu0  ;;  %v9783_v58 = vsub.f32 1.0, %v17434_v37  ;;  %v9782_v41 = vsub.f32 1.0, %v17437_v11  ;;  %v17444_v32 = vsel %vm9760_vm11, 1.0, %v18791_v14  ;;  %v10449_v39 = vmul.f32 %v17434_v37, %v17415_v33 }
 0x52d   :  { %18983 = vst [vmem:[#allocation34_spill] sm:$0xff] %v17444_v32  ;;  %vm9761_vm12 = vcmp.ge.f32.partialorder %v9368_v60, 1.25  ;;  %v17446_v51 = vpop.f32.mrb[71].mxu1  ;;  %v9789_v25 = vmul.f32 %v9781_v45, %v9364_v43  ;;  %v9784_v28 = vsub.f32 1.0, %v17444_v32  ;;  %vm9763_vm13 = vcmp.ge.f32.partialorder %v9594_v63, 1.25 }
 0x52e   :  { %v17450_v16 = vsel %vm9761_vm12, 1.0, %v18791_v14  ;;  %v9791_v2 = vmul.f32 %v9783_v58, %v9590_v18  ;;  %v9790_v44 = vmul.f32 %v9782_v41, %v9366_v7  ;;  %v17454_v48 = vsel %vm9763_vm13, 1.0, %v18791_v14 }
 0x52f   :  { %18984 = vst [vmem:[#allocation46_spill] sm:$0xff] %v17450_v16  ;;  %v9785_v56 = vsub.f32 1.0, %v17450_v16  ;;  %18985 = vst [vmem:[#allocation78_spill] sm:$0xff] %v17454_v48  ;;  %v9829_v8 = vmul.f32 0.97021484, %v9789_v25  ;;  %v9792_v6 = vmul.f32 %v9784_v28, %v9592_v54  ;;  %v9787_v29 = vsub.f32 1.0, %v17454_v48 }
 0x530   :  { %vm9762_vm14 = vcmp.ge.f32.partialorder %v17439_v12, 1.25  ;;  %v9831_v55 = vmul.f32 0.97021484, %v9791_v2  ;;  %v9830_v10 = vmul.f32 0.97021484, %v9790_v44  ;;  %v9374_v13 = vpop.f32.mrb[72].mxu0  ;;  %vm9764_vm15 = vcmp.ge.f32.partialorder %v17446_v51, 1.25 }
 0x531   :  { %v9793_v0 = vmul.f32 %v9785_v56, %v9368_v60  ;;  %v17459_v4 = vsel %vm9762_vm14, 1.0, %v18791_v14  ;;  %v9832_v27 = vmul.f32 0.97021484, %v9792_v6  ;;  %v9795_v36 = vmul.f32 %v9787_v29, %v9594_v63  ;;  %v9600_v42 = vpop.f32.mrb[72].mxu1  ;;  %v9376_v47 = vpop.f32.mrb[73].mxu0 }
 0x532   :  { %18986 = vst [vmem:[#allocation49_spill] sm:$0xff] %v17459_v4  ;;  %v9786_v35 = vsub.f32 1.0, %v17459_v4  ;;  %v17464_v61 = vsel %vm9764_vm15, 1.0, %v18791_v14  ;;  %v17466_v9 = vadd.f32 %v9813_v3, %v9374_v13  ;;  %v17468_v31 = vadd.f32 %v9815_v59, %v9600_v42  ;;  %v9602_v26 = vpop.f32.mrb[73].mxu1  ;;  %v9378_v62 = vpop.f32.mrb[74].mxu0 }
 0x533   :  { %v9833_v1 = vmul.f32 0.97021484, %v9793_v0  ;;  %18987 = vst [vmem:[#allocation60_spill] sm:$0xff] %v17464_v61  ;;  %v9835_v5 = vmul.f32 0.97021484, %v9795_v36  ;;  %v9788_v20 = vsub.f32 1.0, %v17464_v61  ;;  %v9814_v19 = vmul.f32 0.75, %v9366_v7  ;;  %v9604_v57 = vpop.f32.mrb[74].mxu1 }
 0x534   :  { %v9794_v53 = vmul.f32 %v9786_v35, %v17439_v12  ;;  %v17472_v21 = vpop.f32.mrb[75].mxu0  ;;  %v9837_v43 = vadd.f32 %v9829_v8, %v17466_v9  ;;  %v9839_v18 = vadd.f32 %v9831_v55, %v17468_v31  ;;  %v9816_v45 = vmul.f32 0.75, %v9592_v54  ;;  %v17476_v58 = vpop.f32.mrb[75].mxu1 }
 0x535   :  { %v9817_v3 = vmul.f32 0.75, %v9368_v60  ;;  %v9796_v41 = vmul.f32 %v9788_v20, %v17446_v51  ;;  %v17481_v25 = vadd.f32 %v9814_v19, %v9376_v47  ;;  %v9819_v28 = vmul.f32 0.75, %v9594_v63 }
 0x536   :  { %v17478_v59 = vmul.f32 0.97021484, %v9794_v53  ;;  %vm9845_vm0 = vcmp.ge.f32.partialorder %v9837_v43, 1.25  ;;  %vm9847_vm1 = vcmp.ge.f32.partialorder %v9839_v18, 1.25  ;;  %v17483_v7 = vadd.f32 %v9816_v45, %v9602_v26 }
 0x537   :  { %v17485_v2 = vadd.f32 %v9817_v3, %v9378_v62  ;;  %v17487_v44 = vmul.f32 0.97021484, %v9796_v41  ;;  %v17490_v54 = vsel %vm9845_vm0, 1.0, %v18791_v14  ;;  %v17493_v60 = vsel %vm9847_vm1, 1.0, %v18791_v14 }
 0x538   :  { %18988 = vst [vmem:[#allocation32_spill] sm:$0xff] %v17490_v54  ;;  %18989 = vst [vmem:[#allocation36_spill] sm:$0xff] %v17493_v60  ;;  %v9838_v56 = vadd.f32 %v9830_v10, %v17481_v25  ;;  %v9869_v8 = vsub.f32 1.0, %v17490_v54  ;;  %v17499_v63 = vmul.f32 %v17490_v54, %v17394_v34  ;;  %v9871_v6 = vsub.f32 1.0, %v17493_v60  ;;  %v17506_v55 = vpop.f32.mrb[76].mxu0 }
 0x539   :  { %v17504_v29 = vmul.f32 %v17493_v60, %v17397_v22  ;;  %v9840_v0 = vadd.f32 %v9832_v27, %v17483_v7  ;;  %v9841_v13 = vadd.f32 %v9833_v1, %v17485_v2  ;;  %v17510_v10 = vadd.f32 %v9819_v28, %v9604_v57  ;;  %v17512_v36 = vpop.f32.mrb[76].mxu1  ;;  %v17514_v35 = vpop.f32.mrb[77].mxu0 }
 0x53a   :  { %18990 = vst [vmem:[#allocation80_spill] sm:$0xff] %v17499_v63  ;;  %vm9846_vm2 = vcmp.ge.f32.partialorder %v9838_v56, 1.25  ;;  %v9877_v42 = vmul.f32 %v9869_v8, %v9837_v43  ;;  %v17516_v47 = vmul.f32 %v9871_v6, %v9839_v18  ;;  %v10448_v62 = vmul.f32 %v17437_v11, %v17406_v38  ;;  %v17523_v53 = vpop.f32.mrb[77].mxu1  ;;  %v17525_v27 = vpop.f32.mrb[78].mxu0 }
 0x53b   :  { %18991 = vst [vmem:[#allocation68_spill] sm:$0xff] %v17504_v29  ;;  %v17519_v26 = vsel %vm9846_vm2, 1.0, %v18791_v14  ;;  %vm9848_vm3 = vcmp.ge.f32.partialorder %v9840_v0, 1.25  ;;  %vm9849_vm4 = vcmp.ge.f32.partialorder %v9841_v13, 1.25  ;;  %v17532_v19 = vpop.f32.mrb[78].mxu1  ;;  %v17534_v57 = vpop.f32.mrb[79].mxu0  ;;  %v9843_v45 = vadd.f32 %v9835_v5, %v17510_v10 }
 0x53c   :  { %18992 = vst [vmem:[#allocation69_spill] sm:$0xff] %v17519_v26  ;;  %v9870_v1 = vsub.f32 1.0, %v17519_v26  ;;  %v17530_v20 = vmul.f32 %v17519_v26, %v17400_v46  ;;  %v17537_v43 = vsel %vm9848_vm3, 1.0, %v18791_v14  ;;  %v17540_v18 = vsel %vm9849_vm4, 1.0, %v18791_v14  ;;  %v17545_v41 = vpop.f32.mrb[79].mxu1 }
 0x53d   :  { %18994 = vst [vmem:[#allocation71_spill] sm:$0xff] %v17537_v43  ;;  %18995 = vst [vmem:[#allocation84_spill] sm:$0xff] %v17540_v18  ;;  %v10452_v3 = vmul.f32 %v17459_v4, %v17406_v38  ;;  %v9872_v8 = vsub.f32 1.0, %v17537_v43  ;;  %v17552_v6 = vmul.f32 %v17537_v43, %v17403_v23  ;;  %v9873_v15 = vsub.f32 1.0, %v17540_v18 }
 0x53e   :  { %18993 = vst [vmem:[#allocation70_spill] sm:$0xff] %v17530_v20  ;;  %v17547_v28 = vmul.f32 %v9870_v1, %v9838_v56  ;;  %v17557_v49 = vmul.f32 %v17540_v18, %v17394_v34  ;;  %vm9851_vm5 = vcmp.ge.f32.partialorder %v9843_v45, 1.25  ;;  %v10450_v17 = vmul.f32 %v17444_v32, %v17409_v50 }
 0x53f   :  { %18996 = vst [vmem:[#allocation73_spill] sm:$0xff] %v17552_v6  ;;  %v10464_v5 = vpack.c.bf16 %v10452_v3, %v10448_v62  ;;  %v17561_v29 = vmul.f32 %v9872_v8, %v9840_v0  ;;  %v17563_v56 = vmul.f32 %v9873_v15, %v9841_v13  ;;  %v17566_v1 = vsel %vm9851_vm5, 1.0, %v18791_v14 }
 0x540   :  { %18997 = vst [vmem:[#allocation74_spill] sm:$0xff] %v17557_v49  ;;  %18998 = vst [vmem:[#allocation76_spill] sm:$0xff] %v17566_v1  ;;  %v10454_v24 = vmul.f32 %v17464_v61, %v17409_v50  ;;  %v9875_v63 = vsub.f32 1.0, %v17566_v1  ;;  %v17573_v49 = vmul.f32 %v17566_v1, %v17397_v22  ;;  %v9818_v52 = vmul.f32 0.75, %v17439_v12  ;;  %v17577_v8 = vpop.f32.mrb[80].mxu0 }
 0x541   :  { %11491 = vmatprep.mubr.bf16.mxu0 %v10464_v5  ;;  %v9820_v0 = vmul.f32 0.75, %v17446_v51  ;;  %v10447_v13 = vmul.f32 %v17430_v40, %v17412_v30  ;;  %v10451_v6 = vmul.f32 %v17450_v16, %v17412_v30  ;;  %v17585_v20 = vpop.f32.mrb[80].mxu1  ;;  %v10453_v1 = vmul.f32 %v17454_v48, %v17415_v33 }
 0x542   :  { %18999 = vst [vmem:[#allocation90_spill] sm:$0xff] %v17573_v49  ;;  %v10466_v15 = vpack.c.bf16 %v10454_v24, %v10450_v17  ;;  %v17587_v49 = vpop.f32.mrb[81].mxu0  ;;  %v17589_v5 = vmul.f32 %v9875_v63, %v9843_v45  ;;  %v17592_v12 = vadd.f32 %v9818_v52, %v17472_v21  ;;  %v17599_v60 = vpop.f32.mrb[81].mxu1  ;;  %v9901_v63 = vmul.f32 0.75, %v17466_v9 }
 0x543   :  { %v17595_v51 = vadd.f32 %v9820_v0, %v17476_v58  ;;  %19000 = vst [vmem:[#allocation23_spill] sm:$0xff] %v17599_v60  ;;  %v17601_v16 = vpop.f32.mrb[82].mxu0  ;;  %v10463_v37 = vpack.c.bf16 %v10451_v6, %v10447_v13  ;;  %v10471_v40 = vadd.f32 %v10448_v62, %v10447_v13  ;;  %v10476_v18 = vadd.f32 %v10452_v3, %v10451_v6  ;;  %v17604_v45 = vpop.f32.mrb[82].mxu1 }
 0x544   :  { %11588 = vmatprep.mubr.bf16.mxu1 %v10466_v15  ;;  %v17606_v52 = vpop.f32.mrb[83].mxu0  ;;  %v9842_v21 = vadd.f32 %v17478_v59, %v17592_v12  ;;  %v10465_v0 = vpack.c.bf16 %v10453_v1, %v10449_v39  ;;  %v9917_v48 = vmul.f32 0.97021484, %v9877_v42  ;;  %v17612_v60 = vpop.f32.mrb[83].mxu1  ;;  %v17615_v3 = vadd.f32 %v9901_v63, %v17506_v55 }
 0x545   :  { %v9844_v58 = vadd.f32 %v17487_v44, %v17595_v51  ;;  %11492 = vmatmul.mubr.bf16.gmra.mrb[108].mxu0 %v10463_v37  ;;  %v10472_v15 = vadd.f32 %v10471_v40, %v10449_v39  ;;  %v10477_v62 = vadd.f32 %v10476_v18, %v10453_v1  ;;  %v9903_v9 = vmul.f32 0.75, %v17468_v31 }
 0x546   :  { %vm9850_vm6 = vcmp.ge.f32.partialorder %v9842_v21, 1.25  ;;  %11589 = vmatmul.mubr.bf16.gmra.mrb[108].mxu1 %v10465_v0  ;;  %v9919_v59 = vmul.f32 0.97021484, %v17516_v47  ;;  %v9902_v6 = vmul.f32 0.75, %v17481_v25  ;;  %v9925_v18 = vadd.f32 %v9917_v48, %v17615_v3 }
 0x547   :  { %vm9852_vm7 = vcmp.ge.f32.partialorder %v9844_v58, 1.25  ;;  %v17621_v44 = vsel %vm9850_vm6, 1.0, %v18791_v14  ;;  %v10473_v39 = vadd.f32 %v10472_v15, %v10450_v17  ;;  %v10478_v40 = vadd.f32 %v10477_v62, %v10454_v24 }
 0x548   :  { %19001 = vst [vmem:[#allocation24_spill] sm:$0xff] %v17621_v44  ;;  %v17624_v42 = vsel %vm9852_vm7, 1.0, %v18791_v14  ;;  %v9874_v37 = vsub.f32 1.0, %v17621_v44  ;;  %v17629_v31 = vmul.f32 %v17621_v44, %v17400_v46  ;;  %v17636_v25 = vpop.f32.mrb[84].mxu0  ;;  %v17640_v24 = vadd.f32 %v9903_v9, %v17512_v36 }
 0x549   :  { %19002 = vst [vmem:[#allocation31_spill] sm:$0xff] %v17624_v42  ;;  %v9876_v55 = vsub.f32 1.0, %v17624_v42  ;;  %v17634_v47 = vmul.f32 %v17624_v42, %v17403_v23  ;;  %10474 = vadd.xlane.f32.xlu1 %v10473_v39  ;;  %10479 = vadd.xlane.f32.xlu0 %v10478_v40  ;;  %v17643_v17 = vadd.f32 %v9902_v6, %v17514_v35  ;;  %v9918_v1 = vmul.f32 0.97021484, %v17547_v28  ;;  %v17646_v13 = vpop.f32.mrb[84].mxu1  ;;  %v17648_v63 = vpop.f32.mrb[85].mxu0 }
 0x54a   :  { %v9882_v0 = vmul.f32 %v9874_v37, %v9842_v21  ;;  %v9904_v62 = vmul.f32 0.75, %v17483_v7  ;;  %v9920_v39 = vmul.f32 0.97021484, %v17561_v29  ;;  %v17652_v40 = vpop.f32.mrb[85].mxu1  ;;  %v17654_v48 = vpop.f32.mrb[86].mxu0  ;;  %vm9933_vm8 = vcmp.ge.f32.partialorder %v9925_v18, 1.25 }
 0x54b   :  { %19003 = vst [vmem:[#allocation77_spill] sm:$0xff] %v17634_v47  ;;  %v9884_v15 = vmul.f32 %v9876_v55, %v9844_v58  ;;  %v9927_v36 = vadd.f32 %v9919_v59, %v17640_v24  ;;  %v9926_v35 = vadd.f32 %v9918_v1, %v17643_v17  ;;  %v9905_v28 = vmul.f32 0.75, %v17485_v2  ;;  %v17659_v9 = vpop.f32.mrb[86].mxu1  ;;  %v17661_v6 = vpop.f32.mrb[87].mxu0 }
 0x54c   :  { %v17664_v21 = vsel %vm9933_vm8, 1.0, %v18791_v14  ;;  %v17667_v7 = vadd.f32 %v9904_v62, %v17523_v53  ;;  %v9921_v29 = vmul.f32 0.97021484, %v17563_v56  ;;  %v9907_v58 = vmul.f32 0.75, %v17510_v10  ;;  %v17671_v37 = vpop.f32.mrb[87].mxu1 }
 0x54d   :  { %19004 = vst [vmem:[#allocation51_spill] sm:$0xff] %v17664_v21  ;;  %v9957_v59 = vsub.f32 1.0, %v17664_v21  ;;  %v17676_v2 = vmul.f32 %v17664_v21, %v17412_v30  ;;  %v17680_v55 = vmul.f32 %v17664_v21, %v17394_v34  ;;  %vm9935_vm9 = vcmp.ge.f32.partialorder %v9927_v36, 1.25 }
 0x54e   :  { %v17683_v53 = vsel %vm9935_vm9, 1.0, %v18791_v14  ;;  %vm9934_vm10 = vcmp.ge.f32.partialorder %v9926_v35, 1.25  ;;  %v9928_v56 = vadd.f32 %v9920_v39, %v17667_v7  ;;  %v17687_v10 = vadd.f32 %v9905_v28, %v17525_v27 }
 0x54f   :  { %19005 = vst [vmem:[#allocation66_spill] sm:$0xff] %v17676_v2  ;;  %19006 = vst [vmem:[#allocation86_spill] sm:$0xff] %v17680_v55  ;;  %v9965_v1 = vmul.f32 %v9957_v59, %v9925_v18  ;;  %v9959_v62 = vsub.f32 1.0, %v17683_v53  ;;  %v17692_v2 = vmul.f32 %v17683_v53, %v17415_v33  ;;  %v17696_v21 = vmul.f32 %v17683_v53, %v17397_v22 }
 0x550   :  { %19007 = vst [vmem:[#allocation79_spill] sm:$0xff] %v17683_v53  ;;  %v17699_v55 = vsel %vm9934_vm10, 1.0, %v18791_v14  ;;  %vm9936_vm11 = vcmp.ge.f32.partialorder %v9928_v56, 1.25  ;;  %v9929_v39 = vadd.f32 %v9921_v29, %v17687_v10  ;;  %v17703_v27 = vadd.f32 %v9907_v58, %v17532_v19  ;;  %v17705_v18 = vpop.f32.mrb[88].mxu0 }
 0x551   :  { %19008 = vst [vmem:[#allocation94_spill] sm:$0xff] %v17692_v2  ;;  %19009 = vst [vmem:[#allocation30_spill] sm:$0xff] %v17696_v21  ;;  %v9967_v28 = vmul.f32 %v9959_v62, %v9927_v36  ;;  %v9958_v59 = vsub.f32 1.0, %v17699_v55  ;;  %v17710_v2 = vmul.f32 %v17699_v55, %v17406_v38  ;;  %v17714_v53 = vmul.f32 %v17699_v55, %v17400_v46  ;;  %v17716_v21 = vpop.f32.mrb[88].mxu1  ;;  %v17718_v47 = vpop.f32.mrb[89].mxu0 }
 0x552   :  { %19010 = vst [vmem:[#allocation47_spill] sm:$0xff] %v17699_v55  ;;  %19011 = vst [vmem:[#allocation56_spill] sm:$0xff] %v17705_v18  ;;  %v17721_v19 = vsel %vm9936_vm11, 1.0, %v18791_v14  ;;  %vm9937_vm12 = vcmp.ge.f32.partialorder %v9929_v39, 1.25  ;;  %v9923_v36 = vmul.f32 0.97021484, %v17589_v5  ;;  %v9906_v29 = vmul.f32 0.75, %v17592_v12 }
 0x553   :  { %19012 = vst [vmem:[#allocation88_spill] sm:$0xff] %v17714_v53  ;;  %19013 = vst [vmem:[#allocation92_spill] sm:$0xff] %v17716_v21  ;;  %v17725_v58 = vpop.f32.mrb[89].mxu1  ;;  %v17727_v62 = vpop.f32.mrb[90].mxu0  ;;  %v17729_v18 = vmul.f32 %v9958_v59, %v9926_v35  ;;  %v9960_v55 = vsub.f32 1.0, %v17721_v19  ;;  %v17734_v53 = vmul.f32 %v17721_v19, %v17409_v50  ;;  %v17745_v12 = vsel %vm9937_vm12, 1.0, %v18791_v14 }
 0x554   :  { %19014 = vst [vmem:[#allocation53_spill] sm:$0xff] %v17718_v47  ;;  %19015 = vst [vmem:[#allocation96_spill] sm:$0xff] %v17721_v19  ;;  %v17738_v47 = vmul.f32 %v17721_v19, %v17403_v23  ;;  %v17740_v21 = vpop.f32.mrb[90].mxu1  ;;  %v17742_v5 = vpop.f32.mrb[91].mxu0  ;;  %v9931_v35 = vadd.f32 %v9923_v36, %v17703_v27  ;;  %v17749_v59 = vadd.f32 %v9906_v29, %v17534_v57  ;;  %v9961_v19 = vsub.f32 1.0, %v17745_v12 }
 0x555   :  { %19016 = vst [vmem:[#allocation33_spill] sm:$0xff] %v17725_v58  ;;  %19017 = vst [vmem:[#allocation27_spill] sm:$0xff] %v17727_v62  ;;  %v9922_v62 = vmul.f32 0.97021484, %v9882_v0  ;;  %v17751_v58 = vpop.f32.mrb[91].mxu1  ;;  %v9908_v57 = vmul.f32 0.75, %v17595_v51  ;;  %v9924_v0 = vmul.f32 0.97021484, %v9884_v15 }
 0x556   :  { %19018 = vst [vmem:[#allocation91_spill] sm:$0xff] %v17734_v53  ;;  %19019 = vst [vmem:[#allocation54_spill] sm:$0xff] %v17738_v47  ;;  %v17753_v53 = vmul.f32 %v9960_v55, %v9928_v56  ;;  %v17758_v47 = vmul.f32 %v17745_v12, %v17412_v30  ;;  %vm9939_vm13 = vcmp.ge.f32.partialorder %v9931_v35, 1.25  ;;  %v17766_v29 = vmul.f32 %v9961_v19, %v9929_v39 }
 0x557   :  { %19020 = vst [vmem:[#allocation48_spill] sm:$0xff] %v17740_v21  ;;  %19021 = vst [vmem:[#allocation81_spill] sm:$0xff] %v17742_v5  ;;  %v17762_v5 = vmul.f32 %v17745_v12, %v17394_v34  ;;  %v9930_v36 = vadd.f32 %v9922_v62, %v17749_v59  ;;  %v17769_v55 = vsel %vm9939_vm13, 1.0, %v18791_v14  ;;  %v9989_v56 = vmul.f32 0.75, %v17615_v3 }
 0x558   :  { %19022 = vst [vmem:[#allocation44_spill] sm:$0xff] %v17745_v12  ;;  %19023 = vst [vmem:[#allocation28_spill] sm:$0xff] %v17751_v58  ;;  %v10005_v58 = vmul.f32 0.97021484, %v9965_v1  ;;  %v9963_v21 = vsub.f32 1.0, %v17769_v55  ;;  %v17775_v12 = vmul.f32 %v17769_v55, %v17415_v33  ;;  %v17779_v62 = vmul.f32 %v17769_v55, %v17397_v22  ;;  %v17781_v51 = vpop.f32.mrb[92].mxu0 }
 0x559   :  { %19024 = vst [vmem:[#allocation87_spill] sm:$0xff] %v17758_v47  ;;  %19025 = vst [vmem:[#allocation63_spill] sm:$0xff] %v17762_v5  ;;  %vm9938_vm14 = vcmp.ge.f32.partialorder %v9930_v36, 1.25  ;;  %v17787_v39 = vadd.f32 %v9908_v57, %v17545_v41  ;;  %v17790_v3 = vadd.f32 %v9989_v56, %v17577_v8  ;;  %v9991_v1 = vmul.f32 0.75, %v17640_v24  ;;  %v17793_v19 = vpop.f32.mrb[92].mxu1  ;;  %v17795_v5 = vpop.f32.mrb[93].mxu0 }
 0x55a   :  { %19026 = vst [vmem:[#allocation95_spill] sm:$0xff] %v17769_v55  ;;  %19027 = vst [vmem:[#allocation75_spill] sm:$0xff] %v17775_v12  ;;  %v17784_v15 = vsel %vm9938_vm14, 1.0, %v18791_v14  ;;  %v17797_v55 = vmul.f32 %v9963_v21, %v9931_v35  ;;  %v17808_v8 = vpop.f32.mrb[93].mxu1  ;;  %v17810_v57 = vpop.f32.mrb[94].mxu0  ;;  %v10007_v35 = vmul.f32 0.97021484, %v9967_v28  ;;  %v10555_v28 = vmul.f32 %v17459_v4, %v17400_v46 }
 0x55b   :  { %19028 = vst [vmem:[#allocation43_spill] sm:$0xff] %v17779_v62  ;;  %19029 = vst [vmem:[#allocation29_spill] sm:$0xff] %v17781_v51  ;;  %v9962_v62 = vsub.f32 1.0, %v17784_v15  ;;  %v17802_v51 = vmul.f32 %v17784_v15, %v17406_v38  ;;  %v17806_v41 = vmul.f32 %v17784_v15, %v17400_v46  ;;  %v9932_v24 = vadd.f32 %v9924_v0, %v17787_v39 }
 0x55c   :  { %19030 = vst [vmem:[#allocation26_spill] sm:$0xff] %v17784_v15  ;;  %19031 = vst [vmem:[#allocation55_spill] sm:$0xff] %v17793_v19  ;;  %v10013_v56 = vadd.f32 %v10005_v58, %v17790_v3  ;;  %v17815_v21 = vadd.f32 %v9991_v1, %v17585_v20  ;;  %v17819_v19 = vpop.f32.mrb[95].mxu0  ;;  %v10502_v15 = vmul.f32 %v17519_v26, %v17406_v38  ;;  %v10011_v4 = vmul.f32 0.97021484, %v17797_v55 }
 0x55d   :  { %19032 = vst [vmem:[#allocation72_spill] sm:$0xff] %v17795_v5  ;;  %19033 = vst [vmem:[#allocation89_spill] sm:$0xff] %v17806_v41  ;;  %v17817_v5 = vpop.f32.mrb[94].mxu1  ;;  %v17821_v12 = vmul.f32 %v9962_v62, %v9930_v36  ;;  %v10551_v0 = vmul.f32 %v17437_v11, %v17400_v46  ;;  %vm9940_vm15 = vcmp.ge.f32.partialorder %v9932_v24, 1.25 }
 0x55e   :  { %19034 = vst [vmem:[#allocation35_spill] sm:$0xff] %v17808_v8  ;;  %19035 = vst [vmem:[#allocation85_spill] sm:$0xff] %v17810_v57  ;;  %v10506_v57 = vmul.f32 %v17621_v44, %v17406_v38  ;;  %v17829_v58 = vpop.f32.mrb[95].mxu1  ;;  %vm10021_vm0 = vcmp.ge.f32.partialorder %v10013_v56, 1.25  ;;  %v10015_v20 = vadd.f32 %v10007_v35, %v17815_v21  ;;  %v17835_v36 = vsel %vm9940_vm15, 1.0, %v18791_v14 }
 0x55f   :  { %19036 = vst [vmem:[#allocation93_spill] sm:$0xff] %v17817_v5  ;;  %19037 = vst [vmem:[#allocation40_spill] sm:$0xff] %v17819_v19  ;;  %v17838_v62 = vsel %vm10021_vm0, 1.0, %v18791_v14  ;;  %v17840_v1 = vadd.f32 %v10551_v0, %v10502_v15  ;;  %v10504_v19 = vmul.f32 %v17537_v43, %v17409_v50  ;;  %v17847_v5 = vmul.f32 %v17835_v36, %v17409_v50 }
 0x560   :  { %19038 = vst [vmem:[#allocation42_spill] sm:$0xff] %v17829_v58  ;;  %19039 = vst [vmem:[#allocation39_spill] sm:$0xff] %v17835_v36  ;;  %v9964_v58 = vsub.f32 1.0, %v17835_v36  ;;  %v17851_v35 = vmul.f32 %v17835_v36, %v17403_v23  ;;  %v10045_v8 = vsub.f32 1.0, %v17838_v62  ;;  %v17856_v44 = vmul.f32 %v17838_v62, %v17412_v30  ;;  %v9434_v43 = vpop.f32.mrb[100].mxu0 }
 0x561   :  { %19040 = vst [vmem:[#allocation41_spill] sm:$0xff] %v17838_v62  ;;  %19041 = vst [vmem:[#allocation83_spill] sm:$0xff] %v17847_v5  ;;  %v17860_v15 = vmul.f32 %v17838_v62, %v17394_v34  ;;  %vm10023_vm1 = vcmp.ge.f32.partialorder %v10015_v20, 1.25  ;;  %v17862_v0 = vadd.f32 %v10555_v28, %v10506_v57  ;;  %v9660_v47 = vpop.f32.mrb[100].mxu1 }
 0x562   :  { %19042 = vst [vmem:[#allocation45_spill] sm:$0xff] %v17851_v35  ;;  %19043 = vst [vmem:[#allocation82_spill] sm:$0xff] %v17856_v44  ;;  %v17864_v26 = vmul.f32 %v9964_v58, %v9932_v24  ;;  %v17866_v41 = vmul.f32 %v10045_v8, %v10013_v56  ;;  %v17869_v36 = vsel %vm10023_vm1, 1.0, %v18791_v14  ;;  %v10508_v35 = vmul.f32 %v17624_v42, %v17409_v50  ;;  %v9436_v44 = vpop.f32.mrb[101].mxu0  ;;  %v9662_v57 = vpop.f32.mrb[101].mxu1 }
 0x563   :  { %19044 = vst [vmem:[#allocation37_spill] sm:$0xff] %v17860_v15  ;;  %19045 = vst [vmem:[#allocation38_spill] sm:$0xff] %v17869_v36  ;;  %v10047_v5 = vsub.f32 1.0, %v17869_v36  ;;  %v17876_v62 = vmul.f32 %v17869_v36, %v17415_v33  ;;  %v17880_v43 = vmul.f32 %v17869_v36, %v17397_v22  ;;  %v10567_v8 = vpack.c.bf16 %v17862_v0, %v17840_v1  ;;  %v9438_v24 = vpop.f32.mrb[102].mxu0  ;;  %v9664_v28 = vpop.f32.mrb[102].mxu1 }
 0x564   :  { %v10553_v56 = vmul.f32 %v17444_v32, %v17403_v23  ;;  %v10557_v44 = vmul.f32 %v17464_v61, %v17403_v23  ;;  %v9990_v47 = vmul.f32 0.75, %v17643_v17  ;;  %v10006_v58 = vmul.f32 0.97021484, %v17729_v18  ;;  %v9440_v15 = vpop.f32.mrb[103].mxu0  ;;  %v19048_v18 = vld [vmem:[#allocation84_spill] sm:$0xff] }
 0x565   :  { %19046 = vst [vmem:[#allocation50_spill] sm:$0xff] %v17876_v62  ;;  %19047 = vst [vmem:[#allocation59_spill] sm:$0xff] %v17880_v43  ;;  %v17890_v62 = vmul.f32 %v10047_v5, %v10015_v20  ;;  %11499 = vmatprep.mubr.bf16.mxu0 %v10567_v8  ;;  %v9992_v36 = vmul.f32 0.75, %v17667_v7  ;;  %v10008_v57 = vmul.f32 0.97021484, %v17753_v53  ;;  %v10501_v24 = vmul.f32 %v17490_v54, %v17412_v30  ;;  %v9666_v43 = vpop.f32.mrb[103].mxu1  ;;  %v19049_v5 = vld [vmem:[#allocation23_spill] sm:$0xff] }
 0x566   :  { %v10561_v42 = vadd.f32 %v10553_v56, %v10504_v19  ;;  %v17896_v32 = vadd.f32 %v10557_v44, %v10508_v35  ;;  %v17899_v17 = vadd.f32 %v9990_v47, %v17587_v49  ;;  %v10505_v15 = vmul.f32 %v19048_v18, %v17412_v30  ;;  %v19050_v7 = vld [vmem:[#allocation52_spill] sm:$0xff]  ;;  %v19051_v53 = vld [vmem:[#allocation46_spill] sm:$0xff]  ;;  %v19054_v47 = vld [vmem:[#allocation65_spill] sm:$0xff] }
 0x567   :  { %v17904_v20 = vadd.f32 %v9992_v36, %v19049_v5  ;;  %v10550_v8 = vmul.f32 %v19050_v7, %v17394_v34  ;;  %v10554_v28 = vmul.f32 %v19051_v53, %v17394_v34  ;;  %v19052_v43 = vld [vmem:[#allocation36_spill] sm:$0xff]  ;;  %v10552_v36 = vmul.f32 %v19054_v47, %v17397_v22  ;;  %v19055_v7 = vld [vmem:[#allocation78_spill] sm:$0xff] }
 0x568   :  { %v10503_v19 = vmul.f32 %v19052_v43, %v17415_v33  ;;  %v10569_v35 = vpack.c.bf16 %v17896_v32, %v10561_v42  ;;  %v10014_v49 = vadd.f32 %v10006_v58, %v17899_v17  ;;  %v19053_v56 = vld [vmem:[#allocation76_spill] sm:$0xff]  ;;  %v10556_v53 = vmul.f32 %v19055_v7, %v17397_v22  ;;  %v17921_v61 = vpop.f32.mrb[104].mxu0 }
 0x569   :  { %v10507_v44 = vmul.f32 %v19053_v56, %v17415_v33  ;;  %v10016_v5 = vadd.f32 %v10008_v57, %v17904_v20  ;;  %v10558_v18 = vadd.f32 %v10550_v8, %v10501_v24  ;;  %v10562_v54 = vadd.f32 %v10554_v28, %v10505_v15  ;;  %19056 = vst [vmem:[#allocation25_spill] sm:$0xff] %v17921_v61  ;;  %v17925_v56 = vpop.f32.mrb[104].mxu1  ;;  %v17927_v11 = vpop.f32.mrb[105].mxu0 }
 0x56a   :  { %11596 = vmatprep.mubr.bf16.mxu1 %v10569_v35  ;;  %vm10022_vm2 = vcmp.ge.f32.partialorder %v10014_v49, 1.25  ;;  %v10560_v43 = vadd.f32 %v10552_v36, %v10503_v19  ;;  %v9995_v58 = vmul.f32 0.75, %v17703_v27  ;;  %19057 = vst [vmem:[#allocation18_spill] sm:$0xff] %v17925_v56  ;;  %19058 = vst [vmem:[#allocation20_spill] sm:$0xff] %v17927_v11  ;;  %v17932_v8 = vpop.f32.mrb[105].mxu1  ;;  %v17934_v28 = vpop.f32.mrb[106].mxu0 }
 0x56b   :  { %v17930_v57 = vsel %vm10022_vm2, 1.0, %v18791_v14  ;;  %vm10024_vm3 = vcmp.ge.f32.partialorder %v10016_v5, 1.25  ;;  %v10566_v24 = vpack.c.bf16 %v10562_v54, %v10558_v18  ;;  %v10564_v15 = vadd.f32 %v10556_v53, %v10507_v44  ;;  %19060 = vst [vmem:[#allocation21_spill] sm:$0xff] %v17932_v8  ;;  %19061 = vst [vmem:[#allocation23_spill] sm:$0xff] %v17934_v28  ;;  %v17948_v36 = vpop.f32.mrb[106].mxu1  ;;  %v17950_v53 = vpop.f32.mrb[107].mxu0 }
 0x56c   :  { %19059 = vst [vmem:[#allocation19_spill] sm:$0xff] %v17930_v57  ;;  %v10046_v19 = vsub.f32 1.0, %v17930_v57  ;;  %v17939_v27 = vmul.f32 %v17930_v57, %v17406_v38  ;;  %v17943_v55 = vmul.f32 %v17930_v57, %v17400_v46  ;;  %v17946_v35 = vsel %vm10024_vm3, 1.0, %v18791_v14  ;;  %19065 = vst [vmem:[#allocation98_spill] sm:$0xff] %v17948_v36  ;;  %v17961_v11 = vpop.f32.mrb[107].mxu1 }
 0x56d   :  { %19064 = vst [vmem:[#allocation97_spill] sm:$0xff] %v17946_v35  ;;  %19066 = vst [vmem:[#allocation99_spill] sm:$0xff] %v17950_v53  ;;  %v10048_v44 = vsub.f32 1.0, %v17946_v35  ;;  %v17955_v28 = vmul.f32 %v17946_v35, %v17409_v50  ;;  %v17959_v8 = vmul.f32 %v17946_v35, %v17403_v23  ;;  %11500 = vmatmul.mubr.bf16.gmra.mrb[112].mxu0 %v10566_v24  ;;  %v9993_v53 = vmul.f32 0.75, %v17687_v10 }
 0x56e   :  { %19062 = vst [vmem:[#allocation65_spill] sm:$0xff] %v17939_v27  ;;  %19063 = vst [vmem:[#allocation78_spill] sm:$0xff] %v17943_v55  ;;  %v10568_v56 = vpack.c.bf16 %v10564_v15, %v10560_v43  ;;  %v10054_v61 = vmul.f32 %v10046_v19, %v10014_v49  ;;  %v17964_v57 = vadd.f32 %v9995_v58, %v17604_v45  ;;  %v9994_v27 = vmul.f32 0.75, %v17749_v59 }
 0x56f   :  { %19067 = vst [vmem:[#allocation100_spill] sm:$0xff] %v17955_v28  ;;  %19068 = vst [vmem:[#allocation101_spill] sm:$0xff] %v17959_v8  ;;  %v10574_v36 = vadd.f32 %v17840_v1, %v10558_v18  ;;  %v10056_v55 = vmul.f32 %v10048_v44, %v10016_v5  ;;  %v10009_v28 = vmul.f32 0.97021484, %v17766_v29  ;;  %v10010_v35 = vmul.f32 0.97021484, %v17821_v12 }
 0x570   :  { %19069 = vst [vmem:[#allocation102_spill] sm:$0xff] %v17961_v11  ;;  %11597 = vmatmul.mubr.bf16.gmra.mrb[112].mxu1 %v10568_v56  ;;  %v10019_v24 = vadd.f32 %v10011_v4, %v17964_v57  ;;  %v10001_v49 = vadd.f32 %v9993_v53, %v17601_v16  ;;  %v9996_v45 = vmul.f32 0.75, %v17787_v39  ;;  %v17975_v58 = vadd.f32 %v9994_v27, %v17606_v52 }
 0x571   :  { %v10575_v8 = vadd.f32 %v10574_v36, %v10560_v43  ;;  %v10012_v10 = vmul.f32 0.97021484, %v17864_v26  ;;  %v10579_v1 = vadd.f32 %v17862_v0, %v10562_v54  ;;  %v10077_v29 = vmul.f32 0.75, %v17790_v3 }
 0x572   :  { %vm10027_vm4 = vcmp.ge.f32.partialorder %v10019_v24, 1.25  ;;  %v10017_v18 = vadd.f32 %v10009_v28, %v10001_v49  ;;  %v17981_v12 = vadd.f32 %v9996_v45, %v17612_v60  ;;  %v10018_v16 = vadd.f32 %v10010_v35, %v17975_v58 }
 0x573   :  { %v10576_v59 = vadd.f32 %v10575_v8, %v10561_v42  ;;  %v17984_v4 = vsel %vm10027_vm4, 1.0, %v18791_v14  ;;  %v10580_v39 = vadd.f32 %v10579_v1, %v10564_v15  ;;  %v17988_v52 = vadd.f32 %v10077_v29, %v17636_v25 }
 0x574   :  { %19070 = vst [vmem:[#allocation103_spill] sm:$0xff] %v17984_v4  ;;  %v10051_v26 = vsub.f32 1.0, %v17984_v4  ;;  %v17993_v54 = vmul.f32 %v17984_v4, %v17415_v33  ;;  %v17997_v42 = vmul.f32 %v17984_v4, %v17397_v22  ;;  %vm10025_vm5 = vcmp.ge.f32.partialorder %v10017_v18, 1.25 }
 0x575   :  { %10577 = vadd.xlane.f32.xlu1 %v10576_v59  ;;  %v18000_v60 = vsel %vm10025_vm5, 1.0, %v18791_v14  ;;  %vm10026_vm6 = vcmp.ge.f32.partialorder %v10018_v16, 1.25  ;;  %v10020_v3 = vadd.f32 %v10012_v10, %v17981_v12  ;;  %v10581_v25 = vadd.f32 %v10580_v39, %v17896_v32 }
 0x576   :  { %19071 = vst [vmem:[#allocation104_spill] sm:$0xff] %v17997_v42  ;;  %19072 = vst [vmem:[#allocation105_spill] sm:$0xff] %v18000_v60  ;;  %v10059_v0 = vmul.f32 %v10051_v26, %v10019_v24  ;;  %v10049_v43 = vsub.f32 1.0, %v18000_v60  ;;  %v18007_v56 = vmul.f32 %v18000_v60, %v17412_v30  ;;  %v18011_v5 = vmul.f32 %v18000_v60, %v17394_v34  ;;  %v19101_v60 = vld [vmem:[#allocation83_spill] sm:$0xff]  ;;  %v19107_v42 = vld [vmem:[#allocation80_spill] sm:$0xff] }
 0x577   :  { %v18014_v15 = vsel %vm10026_vm6, 1.0, %v18791_v14  ;;  %vm10028_vm7 = vcmp.ge.f32.partialorder %v10020_v3, 1.25  ;;  %10582 = vadd.xlane.f32.xlu0 %v10581_v25  ;;  %v10093_v8 = vmul.f32 0.97021484, %v17866_v41  ;;  %v10079_v32 = vmul.f32 0.75, %v17815_v21 }
 0x578   :  { %19073 = vst [vmem:[#allocation106_spill] sm:$0xff] %v18011_v5  ;;  %19074 = vst [vmem:[#allocation107_spill] sm:$0xff] %v18014_v15  ;;  %v10057_v28 = vmul.f32 %v10049_v43, %v10017_v18  ;;  %v10050_v19 = vsub.f32 1.0, %v18014_v15  ;;  %v18021_v27 = vmul.f32 %v18014_v15, %v17406_v38  ;;  %v18025_v35 = vmul.f32 %v18014_v15, %v17400_v46  ;;  %v19105_v15 = vld [vmem:[#allocation60_spill] sm:$0xff] }
 0x579   :  { %v18028_v36 = vsel %vm10028_vm7, 1.0, %v18791_v14  ;;  %v10101_v53 = vadd.f32 %v10093_v8, %v17988_v52  ;;  %v18032_v41 = vadd.f32 %v10079_v32, %v17646_v13  ;;  %v10095_v21 = vmul.f32 0.97021484, %v17890_v62 }
 0x57a   :  { %19075 = vst [vmem:[#allocation108_spill] sm:$0xff] %v18028_v36  ;;  %v10058_v44 = vmul.f32 %v10050_v19, %v10018_v16  ;;  %v10052_v24 = vsub.f32 1.0, %v18028_v36  ;;  %v18038_v45 = vmul.f32 %v18028_v36, %v17409_v50  ;;  %v18042_v10 = vmul.f32 %v18028_v36, %v17403_v23  ;;  %v19103_v36 = vld [vmem:[#allocation62_spill] sm:$0xff] }
 0x57b   :  { %vm10109_vm8 = vcmp.ge.f32.partialorder %v10101_v53, 1.25  ;;  %v10103_v1 = vadd.f32 %v10095_v21, %v18032_v41  ;;  %v10078_v29 = vmul.f32 0.75, %v17899_v17  ;;  %v10094_v13 = vmul.f32 0.97021484, %v10054_v61 }
 0x57c   :  { %19076 = vst [vmem:[#allocation109_spill] sm:$0xff] %v18042_v10  ;;  %v10060_v59 = vmul.f32 %v10052_v24, %v10020_v3  ;;  %v18047_v62 = vsel %vm10109_vm8, 1.0, %v18791_v14  ;;  %v10080_v18 = vmul.f32 0.75, %v17904_v20  ;;  %v10096_v16 = vmul.f32 0.97021484, %v10056_v55 }
 0x57d   :  { %19077 = vst [vmem:[#allocation110_spill] sm:$0xff] %v18047_v62  ;;  %v10133_v39 = vsub.f32 1.0, %v18047_v62  ;;  %v18053_v26 = vmul.f32 %v18047_v62, %v17412_v30  ;;  %v18057_v25 = vmul.f32 %v18047_v62, %v17394_v34  ;;  %vm10111_vm9 = vcmp.ge.f32.partialorder %v10103_v1, 1.25 }
 0x57e   :  { %v18060_v61 = vsel %vm10111_vm9, 1.0, %v18791_v14  ;;  %v18063_v17 = vadd.f32 %v10078_v29, %v17648_v63  ;;  %v18066_v20 = vadd.f32 %v10080_v18, %v17652_v40  ;;  %v10081_v55 = vmul.f32 0.75, %v10001_v49 }
 0x57f   :  { %19078 = vst [vmem:[#allocation111_spill] sm:$0xff] %v18053_v26  ;;  %19079 = vst [vmem:[#allocation112_spill] sm:$0xff] %v18057_v25  ;;  %v18068_v3 = vmul.f32 %v10133_v39, %v10101_v53  ;;  %v10135_v43 = vsub.f32 1.0, %v18060_v61  ;;  %v18073_v8 = vmul.f32 %v18060_v61, %v17415_v33  ;;  %v18077_v32 = vmul.f32 %v18060_v61, %v17397_v22 }
 0x580   :  { %19080 = vst [vmem:[#allocation113_spill] sm:$0xff] %v18060_v61  ;;  %v10102_v19 = vadd.f32 %v10094_v13, %v18063_v17  ;;  %v10104_v63 = vadd.f32 %v10096_v16, %v18066_v20  ;;  %v18082_v40 = vadd.f32 %v10081_v55, %v17654_v48  ;;  %v10097_v49 = vmul.f32 0.97021484, %v10057_v28 }
 0x581   :  { %19081 = vst [vmem:[#allocation114_spill] sm:$0xff] %v18073_v8  ;;  %19082 = vst [vmem:[#allocation115_spill] sm:$0xff] %v18077_v32  ;;  %v18084_v53 = vmul.f32 %v10135_v43, %v10103_v1  ;;  %v10083_v21 = vmul.f32 0.75, %v17964_v57  ;;  %v10099_v24 = vmul.f32 0.97021484, %v10059_v0  ;;  %v10082_v29 = vmul.f32 0.75, %v17975_v58  ;;  %v19119_v8 = vld [vmem:[#allocation90_spill] sm:$0xff] }
 0x582   :  { %vm10110_vm10 = vcmp.ge.f32.partialorder %v10102_v19, 1.25  ;;  %vm10112_vm11 = vcmp.ge.f32.partialorder %v10104_v63, 1.25  ;;  %v10105_v18 = vadd.f32 %v10097_v49, %v18082_v40  ;;  %v10098_v39 = vmul.f32 0.97021484, %v10058_v44 }
 0x583   :  { %v18090_v13 = vsel %vm10110_vm10, 1.0, %v18791_v14  ;;  %v18093_v16 = vsel %vm10112_vm11, 1.0, %v18791_v14  ;;  %v18096_v48 = vadd.f32 %v10083_v21, %v17659_v9  ;;  %v18099_v28 = vadd.f32 %v10082_v29, %v17661_v6 }
 0x584   :  { %19083 = vst [vmem:[#allocation116_spill] sm:$0xff] %v18090_v13  ;;  %19084 = vst [vmem:[#allocation117_spill] sm:$0xff] %v18093_v16  ;;  %v10134_v57 = vsub.f32 1.0, %v18090_v13  ;;  %v18104_v58 = vmul.f32 %v18090_v13, %v17406_v38  ;;  %v18108_v0 = vmul.f32 %v18090_v13, %v17400_v46  ;;  %v10136_v44 = vsub.f32 1.0, %v18093_v16 }
 0x585   :  { %v18113_v1 = vmul.f32 %v18093_v16, %v17409_v50  ;;  %v18117_v9 = vmul.f32 %v18093_v16, %v17403_v23  ;;  %vm10113_vm12 = vcmp.ge.f32.partialorder %v10105_v18, 1.25  ;;  %v10107_v6 = vadd.f32 %v10099_v24, %v18096_v48 }
 0x586   :  { %19085 = vst [vmem:[#allocation118_spill] sm:$0xff] %v18108_v0  ;;  %v18120_v55 = vmul.f32 %v10134_v57, %v10102_v19  ;;  %v18122_v43 = vmul.f32 %v10136_v44, %v10104_v63  ;;  %v18125_v49 = vsel %vm10113_vm12, 1.0, %v18791_v14  ;;  %v10106_v21 = vadd.f32 %v10098_v39, %v18099_v28  ;;  %v19106_v0 = vld [vmem:[#allocation66_spill] sm:$0xff] }
 0x587   :  { %19086 = vst [vmem:[#allocation119_spill] sm:$0xff] %v18117_v9  ;;  %19087 = vst [vmem:[#allocation120_spill] sm:$0xff] %v18125_v49  ;;  %v10137_v29 = vsub.f32 1.0, %v18125_v49  ;;  %v18131_v61 = vmul.f32 %v18125_v49, %v17412_v30  ;;  %v18135_v62 = vmul.f32 %v18125_v49, %v17394_v34  ;;  %vm10115_vm13 = vcmp.ge.f32.partialorder %v10107_v6, 1.25  ;;  %v19104_v9 = vld [vmem:[#allocation34_spill] sm:$0xff] }
 0x588   :  { %v18138_v19 = vsel %vm10115_vm13, 1.0, %v18791_v14  ;;  %vm10114_vm14 = vcmp.ge.f32.partialorder %v10106_v21, 1.25  ;;  %v10084_v63 = vmul.f32 0.75, %v17981_v12  ;;  %v10100_v24 = vmul.f32 0.97021484, %v10060_v59  ;;  %v19094_v12 = vld [vmem:[#allocation70_spill] sm:$0xff] }
 0x589   :  { %19088 = vst [vmem:[#allocation121_spill] sm:$0xff] %v18131_v61  ;;  %19089 = vst [vmem:[#allocation122_spill] sm:$0xff] %v18135_v62  ;;  %v18141_v57 = vmul.f32 %v10137_v29, %v10105_v18  ;;  %v10139_v39 = vsub.f32 1.0, %v18138_v19  ;;  %v18146_v44 = vmul.f32 %v18138_v19, %v17415_v33  ;;  %v18150_v49 = vmul.f32 %v18138_v19, %v17397_v22  ;;  %v19102_v62 = vld [vmem:[#allocation77_spill] sm:$0xff]  ;;  %v19120_v61 = vld [vmem:[#allocation22_spill] sm:$0xff] }
 0x58a   :  { %19090 = vst [vmem:[#allocation123_spill] sm:$0xff] %v18138_v19  ;;  %v18153_v16 = vsel %vm10114_vm14, 1.0, %v18791_v14  ;;  %v18156_v13 = vadd.f32 %v10084_v63, %v17671_v37  ;;  %v10641_v59 = vadd.f32 %v19094_v12, %v17710_v2  ;;  %v10645_v18 = vadd.f32 %v17629_v31, %v17802_v51  ;;  %v19096_v63 = vld [vmem:[#allocation61_spill] sm:$0xff]  ;;  %v19099_v51 = vld [vmem:[#allocation91_spill] sm:$0xff] }
 0x58b   :  { %19091 = vst [vmem:[#allocation124_spill] sm:$0xff] %v18146_v44  ;;  %19092 = vst [vmem:[#allocation125_spill] sm:$0xff] %v18150_v49  ;;  %v18162_v29 = vmul.f32 %v10139_v39, %v10107_v6  ;;  %v10138_v11 = vsub.f32 1.0, %v18153_v16  ;;  %v18167_v19 = vmul.f32 %v18153_v16, %v17406_v38  ;;  %v18171_v4 = vmul.f32 %v18153_v16, %v17400_v46  ;;  %v19097_v49 = vld [vmem:[#allocation67_spill] sm:$0xff]  ;;  %v19098_v12 = vld [vmem:[#allocation49_spill] sm:$0xff] }
 0x58c   :  { %19093 = vst [vmem:[#allocation126_spill] sm:$0xff] %v18153_v16  ;;  %v10108_v37 = vadd.f32 %v10100_v24, %v18156_v13  ;;  %v10682_v2 = vmul.f32 %v19097_v49, %v19096_v63  ;;  %v10686_v31 = vmul.f32 %v19098_v12, %v19096_v63  ;;  %v19100_v6 = vld [vmem:[#allocation73_spill] sm:$0xff]  ;;  %v10647_v25 = vadd.f32 %v19102_v62, %v19101_v60 }
 0x58d   :  { %19095 = vst [vmem:[#allocation70_spill] sm:$0xff] %v18171_v4  ;;  %v10643_v39 = vadd.f32 %v19100_v6, %v19099_v51  ;;  %v18180_v32 = vmul.f32 %v10138_v11, %v10106_v21  ;;  %v10684_v16 = vmul.f32 %v19104_v9, %v19103_v36  ;;  %v10688_v24 = vmul.f32 %v19105_v15, %v19103_v36  ;;  %v19109_v51 = vld [vmem:[#allocation87_spill] sm:$0xff]  ;;  %v19110_v6 = vld [vmem:[#allocation74_spill] sm:$0xff] }
 0x58e   :  { %vm10116_vm15 = vcmp.ge.f32.partialorder %v10108_v37, 1.25  ;;  %v10690_v4 = vadd.f32 %v10682_v2, %v10641_v59  ;;  %v10694_v49 = vadd.f32 %v10686_v31, %v10645_v18  ;;  %v10640_v12 = vadd.f32 %v19107_v42, %v19106_v0  ;;  %v19113_v0 = vld [vmem:[#allocation64_spill] sm:$0xff]  ;;  %v19116_v31 = vld [vmem:[#allocation94_spill] sm:$0xff] }
 0x58f   :  { %v18191_v44 = vsel %vm10116_vm15, 1.0, %v18791_v14  ;;  %v10692_v11 = vadd.f32 %v10684_v16, %v10643_v39  ;;  %v10696_v21 = vadd.f32 %v10688_v24, %v10647_v25  ;;  %v10644_v60 = vadd.f32 %v19110_v6, %v19109_v51  ;;  %v19114_v18 = vld [vmem:[#allocation52_spill] sm:$0xff]  ;;  %v19115_v25 = vld [vmem:[#allocation46_spill] sm:$0xff]  ;;  %v19118_v6 = vld [vmem:[#allocation75_spill] sm:$0xff] }
 0x590   :  { %19108 = vst [vmem:[#allocation61_spill] sm:$0xff] %v18191_v44  ;;  %v10140_v62 = vsub.f32 1.0, %v18191_v44  ;;  %v18198_v9 = vmul.f32 %v18191_v44, %v17409_v50  ;;  %v18202_v15 = vmul.f32 %v18191_v44, %v17403_v23  ;;  %v10698_v59 = vpack.c.bf16 %v10694_v49, %v10690_v4  ;;  %v19117_v39 = vld [vmem:[#allocation68_spill] sm:$0xff] }
 0x591   :  { %v10700_v42 = vpack.c.bf16 %v10696_v21, %v10692_v11  ;;  %v10681_v2 = vmul.f32 %v19114_v18, %v19113_v0  ;;  %v10685_v16 = vmul.f32 %v19115_v25, %v19113_v0  ;;  %v10642_v24 = vadd.f32 %v19117_v39, %v19116_v31 }
 0x592   :  { %19111 = vst [vmem:[#allocation67_spill] sm:$0xff] %v18198_v9  ;;  %19112 = vst [vmem:[#allocation49_spill] sm:$0xff] %v18202_v15  ;;  %v18210_v51 = vmul.f32 %v10140_v62, %v10108_v37  ;;  %11507 = vmatprep.mubr.bf16.mxu0 %v10698_v59  ;;  %v10646_v5 = vadd.f32 %v19119_v8, %v19118_v6  ;;  %v10683_v44 = vmul.f32 %v19054_v47, %v19120_v61  ;;  %v19121_v6 = vld [vmem:[#allocation92_spill] sm:$0xff] }
 0x593   :  { %v10687_v15 = vmul.f32 %v19055_v7, %v19120_v61  ;;  %11604 = vmatprep.mubr.bf16.mxu1 %v10700_v42  ;;  %v10689_v18 = vadd.f32 %v10681_v2, %v10640_v12  ;;  %v10693_v26 = vadd.f32 %v10685_v16, %v10644_v60  ;;  %v10167_v25 = vmul.f32 0.75, %v18032_v41  ;;  %v19122_v42 = vld [vmem:[#allocation56_spill] sm:$0xff]  ;;  %v19123_v60 = vld [vmem:[#allocation53_spill] sm:$0xff] }
 0x594   :  { %v10183_v10 = vmul.f32 0.97021484, %v18084_v53  ;;  %v10691_v31 = vadd.f32 %v10683_v44, %v10642_v24  ;;  %v10165_v62 = vmul.f32 0.75, %v17988_v52  ;;  %v10181_v59 = vmul.f32 0.97021484, %v18068_v3  ;;  %v19124_v2 = vld [vmem:[#allocation33_spill] sm:$0xff] }
 0x595   :  { %v10695_v37 = vadd.f32 %v10687_v15, %v10646_v5  ;;  %v10697_v8 = vpack.c.bf16 %v10693_v26, %v10689_v18  ;;  %v10705_v39 = vadd.f32 %v10690_v4, %v10689_v18  ;;  %v18223_v47 = vadd.f32 %v10167_v25, %v19121_v6 }
 0x596   :  { %v10710_v9 = vadd.f32 %v10694_v49, %v10693_v26  ;;  %v18226_v12 = vadd.f32 %v10165_v62, %v19122_v42  ;;  %v10166_v41 = vmul.f32 0.75, %v18063_v17  ;;  %v10182_v53 = vmul.f32 0.97021484, %v18120_v55 }
 0x597   :  { %v10699_v7 = vpack.c.bf16 %v10695_v37, %v10691_v31  ;;  %11508 = vmatmul.mubr.bf16.gmra.mrb[116].mxu0 %v10697_v8  ;;  %v10706_v5 = vadd.f32 %v10705_v39, %v10691_v31  ;;  %v10191_v52 = vadd.f32 %v10183_v10, %v18223_v47  ;;  %v10168_v3 = vmul.f32 0.75, %v18066_v20 }
 0x598   :  { %v10711_v44 = vadd.f32 %v10710_v9, %v10695_v37  ;;  %v10189_v4 = vadd.f32 %v10181_v59, %v18226_v12  ;;  %v18234_v26 = vadd.f32 %v10166_v41, %v19123_v60  ;;  %v10184_v49 = vmul.f32 0.97021484, %v18122_v43  ;;  %v19125_v9 = vld [vmem:[#allocation27_spill] sm:$0xff] }
 0x599   :  { %11605 = vmatmul.mubr.bf16.gmra.mrb[116].mxu1 %v10699_v7  ;;  %v10169_v15 = vmul.f32 0.75, %v18082_v40  ;;  %v10707_v17 = vadd.f32 %v10706_v5, %v10692_v11  ;;  %vm10199_vm0 = vcmp.ge.f32.partialorder %v10191_v52, 1.25  ;;  %v18239_v16 = vadd.f32 %v10168_v3, %v19124_v2 }
 0x59a   :  { %v10712_v55 = vadd.f32 %v10711_v44, %v10696_v21  ;;  %v12965_v10 = vsel %vm10199_vm0, 1.0, %v18791_v14  ;;  %vm10197_vm1 = vcmp.ge.f32.partialorder %v10189_v4, 1.25  ;;  %v10190_v20 = vadd.f32 %v10182_v53, %v18234_v26 }
 0x59b   :  { %v18244_v24 = vadd.f32 %v10169_v15, %v19125_v9  ;;  %10708 = vadd.xlane.f32.xlu1 %v10707_v17  ;;  %v10223_v18 = vsub.f32 1.0, %v12965_v10  ;;  %v18247_v43 = vmul.f32 %v12965_v10, %v17415_v33  ;;  %v18250_v40 = vmul.f32 %v12965_v10, %v17397_v22  ;;  %v19130_v15 = vld [vmem:[#allocation48_spill] sm:$0xff]  ;;  %v19131_v17 = vld [vmem:[#allocation81_spill] sm:$0xff] }
 0x59c   :  { %10713 = vadd.xlane.f32.xlu0 %v10712_v55  ;;  %v12963_v11 = vsel %vm10197_vm1, 1.0, %v18791_v14  ;;  %vm10198_vm2 = vcmp.ge.f32.partialorder %v10190_v20, 1.25  ;;  %v10192_v59 = vadd.f32 %v10184_v49, %v18239_v16  ;;  %v10185_v8 = vmul.f32 0.97021484, %v18141_v57 }
 0x59d   :  { %19126 = vst [vmem:[#allocation91_spill] sm:$0xff] %v18247_v43  ;;  %v10221_v21 = vsub.f32 1.0, %v12963_v11  ;;  %v18254_v25 = vmul.f32 %v12963_v11, %v17412_v30  ;;  %v18257_v31 = vmul.f32 %v12963_v11, %v17394_v34  ;;  %v18259_v37 = vmul.f32 %v10223_v18, %v10191_v52  ;;  %v19133_v11 = vld [vmem:[#allocation28_spill] sm:$0xff] }
 0x59e   :  { %v12964_v62 = vsel %vm10198_vm2, 1.0, %v18791_v14  ;;  %vm10200_vm3 = vcmp.ge.f32.partialorder %v10192_v59, 1.25  ;;  %v10193_v41 = vadd.f32 %v10185_v8, %v18244_v24  ;;  %v10171_v53 = vmul.f32 0.75, %v18096_v48  ;;  %v19151_v43 = vld [vmem:[#allocation32_spill] sm:$0xff] }
 0x59f   :  { %19127 = vst [vmem:[#allocation73_spill] sm:$0xff] %v18254_v25  ;;  %v18264_v39 = vmul.f32 %v10221_v21, %v10189_v4  ;;  %v10222_v6 = vsub.f32 1.0, %v12964_v62  ;;  %v18267_v7 = vmul.f32 %v12964_v62, %v17406_v38  ;;  %v18270_v42 = vmul.f32 %v12964_v62, %v17400_v46  ;;  %v19153_v25 = vld [vmem:[#allocation50_spill] sm:$0xff] }
 0x5a0   :  { %v10187_v5 = vmul.f32 0.97021484, %v18162_v29  ;;  %v12966_v57 = vsel %vm10200_vm3, 1.0, %v18791_v14  ;;  %v10170_v44 = vmul.f32 0.75, %v18099_v28  ;;  %v10186_v3 = vmul.f32 0.97021484, %v18180_v32 }
 0x5a1   :  { %19128 = vst [vmem:[#allocation83_spill] sm:$0xff] %v18267_v7  ;;  %v18275_v52 = vmul.f32 %v10222_v6, %v10190_v20  ;;  %v10224_v4 = vsub.f32 1.0, %v12966_v57  ;;  %v18281_v60 = vmul.f32 %v12966_v57, %v17409_v50  ;;  %v18284_v49 = vmul.f32 %v12966_v57, %v17403_v23 }
 0x5a2   :  { %vm10201_vm4 = vcmp.ge.f32.partialorder %v10193_v41, 1.25  ;;  %v18288_v29 = vadd.f32 %v10171_v53, %v19130_v15  ;;  %v18291_v55 = vadd.f32 %v10170_v44, %v19131_v17  ;;  %v10172_v28 = vmul.f32 0.75, %v18156_v13  ;;  %v19134_v13 = vld [vmem:[#allocation65_spill] sm:$0xff]  ;;  %v19139_v15 = vld [vmem:[#allocation100_spill] sm:$0xff]  ;;  %v19140_v17 = vld [vmem:[#allocation54_spill] sm:$0xff] }
 0x5a3   :  { %19129 = vst [vmem:[#allocation77_spill] sm:$0xff] %v18281_v60  ;;  %v12967_v48 = vsel %vm10201_vm4, 1.0, %v18791_v14  ;;  %v18294_v2 = vmul.f32 %v10224_v4, %v10192_v59  ;;  %v10188_v62 = vmul.f32 0.97021484, %v18210_v51  ;;  %v19135_v59 = vld [vmem:[#allocation88_spill] sm:$0xff]  ;;  %v19136_v53 = vld [vmem:[#allocation89_spill] sm:$0xff] }
 0x5a4   :  { %v10225_v32 = vsub.f32 1.0, %v12967_v48  ;;  %v18297_v10 = vmul.f32 %v12967_v48, %v17412_v30  ;;  %v18300_v20 = vmul.f32 %v12967_v48, %v17394_v34  ;;  %v10195_v9 = vadd.f32 %v10187_v5, %v18288_v29  ;;  %v19137_v34 = vld [vmem:[#allocation69_spill] sm:$0xff] }
 0x5a5   :  { %v10194_v18 = vadd.f32 %v10186_v3, %v18291_v55  ;;  %v18305_v21 = vadd.f32 %v10172_v28, %v19133_v11  ;;  %v10772_v6 = vadd.f32 %v19135_v59, %v19134_v13  ;;  %v10776_v57 = vadd.f32 %v19136_v53, %v18021_v27  ;;  %v19138_v3 = vld [vmem:[#allocation24_spill] sm:$0xff] }
 0x5a6   :  { %19132 = vst [vmem:[#allocation62_spill] sm:$0xff] %v18297_v10  ;;  %v18308_v8 = vmul.f32 %v10225_v32, %v10193_v41  ;;  %v10792_v44 = vmul.f32 %v19137_v34, %v19096_v63  ;;  %vm10203_vm5 = vcmp.ge.f32.partialorder %v10195_v9, 1.25  ;;  %v10796_v4 = vmul.f32 %v19138_v3, %v19096_v63  ;;  %v19143_v3 = vld [vmem:[#allocation45_spill] sm:$0xff] }
 0x5a7   :  { %vm10202_vm6 = vcmp.ge.f32.partialorder %v10194_v18, 1.25  ;;  %v10196_v5 = vadd.f32 %v10188_v62, %v18305_v21  ;;  %v12969_v51 = vsel %vm10203_vm5, 1.0, %v18791_v14  ;;  %v10774_v28 = vadd.f32 %v19140_v17, %v19139_v15 }
 0x5a8   :  { %v12968_v41 = vsel %vm10202_vm6, 1.0, %v18791_v14  ;;  %v10800_v48 = vadd.f32 %v10792_v44, %v10772_v6  ;;  %v10227_v32 = vsub.f32 1.0, %v12969_v51  ;;  %v18324_v27 = vmul.f32 %v12969_v51, %v17415_v33 }
 0x5a9   :  { %v18327_v11 = vmul.f32 %v12969_v51, %v17397_v22  ;;  %v10226_v13 = vsub.f32 1.0, %v12968_v41  ;;  %v18330_v62 = vmul.f32 %v12968_v41, %v17406_v38  ;;  %v18333_v59 = vmul.f32 %v12968_v41, %v17400_v46  ;;  %v19146_v46 = vld [vmem:[#allocation71_spill] sm:$0xff] }
 0x5aa   :  { %19141 = vst [vmem:[#allocation34_spill] sm:$0xff] %v18324_v27  ;;  %vm10204_vm7 = vcmp.ge.f32.partialorder %v10196_v5, 1.25  ;;  %v10804_v53 = vadd.f32 %v10796_v4, %v10776_v57  ;;  %v10235_v6 = vmul.f32 %v10227_v32, %v10195_v9  ;;  %v10778_v15 = vadd.f32 %v19143_v3, %v18038_v45  ;;  %v19147_v9 = vld [vmem:[#allocation31_spill] sm:$0xff]  ;;  %v19148_v57 = vld [vmem:[#allocation82_spill] sm:$0xff] }
 0x5ab   :  { %19142 = vst [vmem:[#allocation60_spill] sm:$0xff] %v18330_v62  ;;  %v18335_v34 = vmul.f32 %v10226_v13, %v10194_v18  ;;  %v12970_v44 = vsel %vm10204_vm7, 1.0, %v18791_v14  ;;  %v10794_v41 = vmul.f32 %v19146_v46, %v19103_v36  ;;  %v10798_v18 = vmul.f32 %v19147_v9, %v19103_v36  ;;  %v19149_v4 = vld [vmem:[#allocation86_spill] sm:$0xff]  ;;  %v19150_v13 = vld [vmem:[#allocation63_spill] sm:$0xff] }
 0x5ac   :  { %v10228_v17 = vsub.f32 1.0, %v12970_v44  ;;  %v18341_v22 = vmul.f32 %v12970_v44, %v17409_v50  ;;  %v18344_v51 = vmul.f32 %v12970_v44, %v17403_v23  ;;  %v10808_v27 = vpack.c.bf16 %v10804_v53, %v10800_v48  ;;  %v19152_v44 = vld [vmem:[#allocation84_spill] sm:$0xff]  ;;  %v19154_v46 = vld [vmem:[#allocation30_spill] sm:$0xff]  ;;  %v19155_v62 = vld [vmem:[#allocation43_spill] sm:$0xff] }
 0x5ad   :  { %v10771_v32 = vadd.f32 %v19149_v4, %v19148_v57  ;;  %v10775_v45 = vadd.f32 %v19150_v13, %v18007_v56  ;;  %v10791_v23 = vmul.f32 %v19151_v43, %v19113_v0  ;;  %v10795_v10 = vmul.f32 %v19152_v44, %v19113_v0  ;;  %v19156_v4 = vld [vmem:[#allocation36_spill] sm:$0xff] }
 0x5ae   :  { %19144 = vst [vmem:[#allocation66_spill] sm:$0xff] %v18341_v22  ;;  %19145 = vst [vmem:[#allocation80_spill] sm:$0xff] %v18344_v51  ;;  %v18354_v3 = vmul.f32 %v10228_v17, %v10196_v5  ;;  %11515 = vmatprep.mubr.bf16.mxu0 %v10808_v27  ;;  %v10773_v22 = vadd.f32 %v19154_v46, %v19153_v25  ;;  %v10802_v60 = vadd.f32 %v10794_v41, %v10774_v28  ;;  %v19157_v27 = vld [vmem:[#allocation76_spill] sm:$0xff]  ;;  %v19158_v41 = vld [vmem:[#allocation55_spill] sm:$0xff] }
 0x5af   :  { %v10806_v9 = vadd.f32 %v10798_v18, %v10778_v15  ;;  %v10777_v57 = vadd.f32 %v19155_v62, %v17993_v54  ;;  %v10793_v56 = vmul.f32 %v19156_v4, %v19120_v61  ;;  %v10799_v5 = vadd.f32 %v10791_v23, %v10771_v32  ;;  %v19159_v18 = vld [vmem:[#allocation29_spill] sm:$0xff] }
 0x5b0   :  { %v10803_v17 = vadd.f32 %v10795_v10, %v10775_v45  ;;  %v10797_v13 = vmul.f32 %v19157_v27, %v19120_v61  ;;  %v10255_v43 = vmul.f32 0.75, %v18223_v47  ;;  %v10271_v51 = vmul.f32 0.97021484, %v18259_v37  ;;  %v19162_v27 = vld [vmem:[#allocation93_spill] sm:$0xff] }
 0x5b1   :  { %v10810_v7 = vpack.c.bf16 %v10806_v9, %v10802_v60  ;;  %v10801_v44 = vadd.f32 %v10793_v56, %v10773_v22  ;;  %v10253_v25 = vmul.f32 0.75, %v18226_v12  ;;  %v10815_v62 = vadd.f32 %v10800_v48, %v10799_v5  ;;  %v19161_v56 = vld [vmem:[#allocation35_spill] sm:$0xff] }
 0x5b2   :  { %v10807_v28 = vpack.c.bf16 %v10803_v17, %v10799_v5  ;;  %v10805_v15 = vadd.f32 %v10797_v13, %v10777_v57  ;;  %v10263_v54 = vadd.f32 %v10255_v43, %v19158_v41  ;;  %v10269_v10 = vmul.f32 0.97021484, %v18264_v39  ;;  %v19160_v57 = vld [vmem:[#allocation72_spill] sm:$0xff] }
 0x5b3   :  { %11612 = vmatprep.mubr.bf16.mxu1 %v10810_v7  ;;  %v10261_v32 = vadd.f32 %v10253_v25, %v19159_v18  ;;  %v10254_v45 = vmul.f32 0.75, %v18234_v26  ;;  %v10270_v47 = vmul.f32 0.97021484, %v18275_v52  ;;  %v10816_v37 = vadd.f32 %v10815_v62, %v10801_v44 }
 0x5b4   :  { %11516 = vmatmul.mubr.bf16.gmra.mrb[120].mxu0 %v10807_v28  ;;  %v10809_v22 = vpack.c.bf16 %v10805_v15, %v10801_v44  ;;  %v10279_v23 = vadd.f32 %v10271_v51, %v10263_v54  ;;  %v10256_v12 = vmul.f32 0.75, %v18239_v16  ;;  %v10272_v48 = vmul.f32 0.97021484, %v18294_v2 }
 0x5b5   :  { %v10277_v46 = vadd.f32 %v10269_v10, %v10261_v32  ;;  %v10262_v4 = vadd.f32 %v10254_v45, %v19160_v57  ;;  %v10259_v7 = vmul.f32 0.75, %v18288_v29  ;;  %v10817_v39 = vadd.f32 %v10816_v37, %v10802_v60  ;;  %v19163_v32 = vld [vmem:[#allocation85_spill] sm:$0xff] }
 0x5b6   :  { %11613 = vmatmul.mubr.bf16.gmra.mrb[120].mxu1 %v10809_v22  ;;  %vm10287_vm8 = vcmp.ge.f32.partialorder %v10279_v23, 1.25  ;;  %v10264_v26 = vadd.f32 %v10256_v12, %v19161_v56  ;;  %v10275_v5 = vmul.f32 0.97021484, %v10235_v6  ;;  %v10820_v44 = vadd.f32 %v10804_v53, %v10803_v17  ;;  %v19164_v12 = vld [vmem:[#allocation40_spill] sm:$0xff]  ;;  %v19171_v56 = vld [vmem:[#allocation109_spill] sm:$0xff] }
 0x5b7   :  { %v12973_v52 = vsel %vm10287_vm8, 1.0, %v18791_v14  ;;  %vm10285_vm9 = vcmp.ge.f32.partialorder %v10277_v46, 1.25  ;;  %v10278_v51 = vadd.f32 %v10270_v47, %v10262_v4  ;;  %v10267_v13 = vadd.f32 %v10259_v7, %v19162_v27  ;;  %10818 = vadd.xlane.f32.xlu1 %v10817_v39  ;;  %v19170_v39 = vld [vmem:[#allocation67_spill] sm:$0xff] }
 0x5b8   :  { %v11067_v16 = vmul.f32 %v12973_v52, %v17415_v33  ;;  %v12971_v43 = vsel %vm10285_vm9, 1.0, %v18791_v14  ;;  %v10280_v2 = vadd.f32 %v10272_v48, %v10264_v26  ;;  %v10257_v25 = vmul.f32 0.75, %v18244_v24  ;;  %v19169_v48 = vld [vmem:[#allocation101_spill] sm:$0xff] }
 0x5b9   :  { %v11065_v29 = vmul.f32 %v12971_v43, %v17412_v30  ;;  %vm10286_vm10 = vcmp.ge.f32.partialorder %v10278_v51, 1.25  ;;  %v10283_v60 = vadd.f32 %v10275_v5, %v10267_v13  ;;  %v10821_v41 = vadd.f32 %v10820_v44, %v10805_v15  ;;  %v19173_v13 = vld [vmem:[#allocation39_spill] sm:$0xff]  ;;  %v19175_v44 = vld [vmem:[#allocation37_spill] sm:$0xff] }
 0x5ba   :  { %v18388_v6 = vadd.f32 %v18250_v40, %v11067_v16  ;;  %v12972_v28 = vsel %vm10286_vm10, 1.0, %v18791_v14  ;;  %vm10288_vm11 = vcmp.ge.f32.partialorder %v10280_v2, 1.25  ;;  %v10265_v40 = vadd.f32 %v10257_v25, %v19163_v32  ;;  %v19174_v2 = vld [vmem:[#allocation111_spill] sm:$0xff] }
 0x5bb   :  { %v18392_v54 = vadd.f32 %v18257_v31, %v11065_v29  ;;  %v11066_v62 = vmul.f32 %v12972_v28, %v17406_v38  ;;  %v12974_v53 = vsel %vm10288_vm11, 1.0, %v18791_v14  ;;  %vm10291_vm12 = vcmp.ge.f32.partialorder %v10283_v60, 1.25 }
 0x5bc   :  { %v11068_v17 = vmul.f32 %v12974_v53, %v17409_v50  ;;  %v12977_v18 = vsel %vm10291_vm12, 1.0, %v18791_v14  ;;  %v10822_v24 = vadd.f32 %v10821_v41, %v10806_v9  ;;  %v10273_v31 = vmul.f32 0.97021484, %v18308_v8  ;;  %v19165_v8 = vld [vmem:[#allocation78_spill] sm:$0xff]  ;;  %v19176_v53 = vld [vmem:[#allocation121_spill] sm:$0xff] }
 0x5bd   :  { %v18400_v10 = vadd.f32 %v18270_v42, %v11066_v62  ;;  %v11071_v15 = vmul.f32 %v12977_v18, %v17415_v33  ;;  %v10258_v45 = vmul.f32 0.75, %v18291_v55  ;;  %v10274_v22 = vmul.f32 0.97021484, %v18335_v34  ;;  %v19166_v55 = vld [vmem:[#allocation42_spill] sm:$0xff]  ;;  %v19167_v34 = vld [vmem:[#allocation47_spill] sm:$0xff] }
 0x5be   :  { %v18406_v47 = vadd.f32 %v18284_v49, %v11068_v17  ;;  %10823 = vadd.xlane.f32.xlu0 %v10822_v24  ;;  %v10260_v23 = vmul.f32 0.75, %v18305_v21  ;;  %v10276_v9 = vmul.f32 0.97021484, %v18354_v3  ;;  %v10281_v42 = vadd.f32 %v10273_v31, %v10265_v40  ;;  %v19168_v21 = vld [vmem:[#allocation26_spill] sm:$0xff]  ;;  %v19178_v24 = vld [vmem:[#allocation51_spill] sm:$0xff] }
 0x5bf   :  { %v18412_v37 = vadd.f32 %v18327_v11, %v11071_v15  ;;  %v10266_v33 = vadd.f32 %v10258_v45, %v19164_v12  ;;  %v10882_v46 = vadd.f32 %v19165_v8, %v18104_v58  ;;  %v10886_v49 = vadd.f32 %v18025_v35, %v18167_v19  ;;  %v19172_v19 = vld [vmem:[#allocation96_spill] sm:$0xff]  ;;  %v19177_v17 = vld [vmem:[#allocation106_spill] sm:$0xff]  ;;  %v19181_v31 = vld [vmem:[#allocation59_spill] sm:$0xff] }
 0x5c0   :  { %v10268_v57 = vadd.f32 %v10260_v23, %v19166_v55  ;;  %v10902_v4 = vmul.f32 %v19167_v34, %v19096_v63  ;;  %v10906_v3 = vmul.f32 %v19168_v21, %v19096_v63  ;;  %vm10289_vm13 = vcmp.ge.f32.partialorder %v10281_v42, 1.25  ;;  %v19183_v23 = vld [vmem:[#allocation104_spill] sm:$0xff]  ;;  %v19185_v8 = vld [vmem:[#allocation79_spill] sm:$0xff]  ;;  %v19188_v34 = vld [vmem:[#allocation118_spill] sm:$0xff] }
 0x5c1   :  { %v10282_v11 = vadd.f32 %v10274_v22, %v10266_v33  ;;  %v10884_v7 = vadd.f32 %v19169_v48, %v18113_v1  ;;  %v10888_v26 = vadd.f32 %v19171_v56, %v19170_v39  ;;  %v12975_v58 = vsel %vm10289_vm13, 1.0, %v18791_v14  ;;  %v19182_v22 = vld [vmem:[#allocation124_spill] sm:$0xff]  ;;  %v19191_v39 = vld [vmem:[#allocation19_spill] sm:$0xff] }
 0x5c2   :  { %v10284_v5 = vadd.f32 %v10276_v9, %v10268_v57  ;;  %v10910_v52 = vadd.f32 %v10902_v4, %v10882_v46  ;;  %v10914_v51 = vadd.f32 %v10906_v3, %v10886_v49  ;;  %v11069_v35 = vmul.f32 %v12975_v58, %v17412_v30  ;;  %v19184_v9 = vld [vmem:[#allocation80_spill] sm:$0xff]  ;;  %v19187_v49 = vld [vmem:[#allocation83_spill] sm:$0xff]  ;;  %v19190_v3 = vld [vmem:[#allocation70_spill] sm:$0xff] }
 0x5c3   :  { %vm10290_vm14 = vcmp.ge.f32.partialorder %v10282_v11, 1.25  ;;  %v10904_v27 = vmul.f32 %v19172_v19, %v19103_v36  ;;  %v10908_v16 = vmul.f32 %v19173_v13, %v19103_v36  ;;  %v10881_v29 = vadd.f32 %v19175_v44, %v19174_v2  ;;  %v19189_v21 = vld [vmem:[#allocation60_spill] sm:$0xff]  ;;  %v19194_v13 = vld [vmem:[#allocation119_spill] sm:$0xff]  ;;  %v19195_v44 = vld [vmem:[#allocation66_spill] sm:$0xff] }
 0x5c4   :  { %v12976_v43 = vsel %vm10290_vm14, 1.0, %v18791_v14  ;;  %vm10292_vm15 = vcmp.ge.f32.partialorder %v10284_v5, 1.25  ;;  %v10918_v1 = vpack.c.bf16 %v10914_v51, %v10910_v52  ;;  %v18438_v60 = vadd.f32 %v18300_v20, %v11069_v35  ;;  %v19179_v20 = vld [vmem:[#allocation44_spill] sm:$0xff] }
 0x5c5   :  { %v11070_v25 = vmul.f32 %v12976_v43, %v17406_v38  ;;  %v12978_v30 = vsel %vm10292_vm15, 1.0, %v18791_v14  ;;  %v10912_v28 = vadd.f32 %v10904_v27, %v10884_v7  ;;  %v10916_v62 = vadd.f32 %v10908_v16, %v10888_v26  ;;  %v19180_v38 = vld [vmem:[#allocation114_spill] sm:$0xff]  ;;  %v19192_v26 = vld [vmem:[#allocation107_spill] sm:$0xff]  ;;  %v19193_v27 = vld [vmem:[#allocation77_spill] sm:$0xff] }
 0x5c6   :  { %v11072_v41 = vmul.f32 %v12978_v30, %v17409_v50  ;;  %11523 = vmatprep.mubr.bf16.mxu0 %v10918_v1  ;;  %v10885_v18 = vadd.f32 %v19177_v17, %v19176_v53  ;;  %v10901_v32 = vmul.f32 %v19178_v24, %v19113_v0  ;;  %v10905_v15 = vmul.f32 %v19179_v20, %v19113_v0  ;;  %v19198_v17 = vld [vmem:[#allocation108_spill] sm:$0xff] }
 0x5c7   :  { %v18448_v40 = vadd.f32 %v18333_v59, %v11070_v25  ;;  %v10883_v45 = vadd.f32 %v19181_v31, %v19180_v38  ;;  %v10887_v50 = vadd.f32 %v19183_v23, %v19182_v22  ;;  %v10920_v12 = vpack.c.bf16 %v10916_v62, %v10912_v28  ;;  %v19186_v59 = vld [vmem:[#allocation95_spill] sm:$0xff]  ;;  %v19200_v20 = vld [vmem:[#allocation20_spill] sm:$0xff]  ;;  %v19201_v38 = vld [vmem:[#allocation73_spill] sm:$0xff] }
 0x5c8   :  { %v18457_v42 = vadd.f32 %v19184_v9, %v11072_v41  ;;  %v10909_v33 = vadd.f32 %v10901_v32, %v10881_v29  ;;  %v10903_v46 = vmul.f32 %v19185_v8, %v19120_v61  ;;  %v10913_v55 = vadd.f32 %v10905_v15, %v10885_v18  ;;  %v19196_v29 = vld [vmem:[#allocation49_spill] sm:$0xff]  ;;  %v19202_v31 = vld [vmem:[#allocation112_spill] sm:$0xff]  ;;  %v19203_v9 = vld [vmem:[#allocation62_spill] sm:$0xff] }
 0x5c9   :  { %v10907_v57 = vmul.f32 %v19186_v59, %v19120_v61  ;;  %v10992_v4 = vadd.f32 %v19188_v34, %v19187_v49  ;;  %v10996_v11 = vadd.f32 %v19190_v3, %v19189_v21  ;;  %11620 = vmatprep.mubr.bf16.mxu1 %v10920_v12  ;;  %v11012_v56 = vmul.f32 %v19191_v39, %v19096_v63  ;;  %v19197_v41 = vld [vmem:[#allocation97_spill] sm:$0xff]  ;;  %v19204_v12 = vld [vmem:[#allocation122_spill] sm:$0xff] }
 0x5ca   :  { %v10911_v48 = vadd.f32 %v10903_v46, %v10883_v45  ;;  %v10925_v7 = vadd.f32 %v10910_v52, %v10909_v33  ;;  %v11016_v58 = vmul.f32 %v19192_v26, %v19096_v63  ;;  %v10917_v5 = vpack.c.bf16 %v10913_v55, %v10909_v33  ;;  %v19199_v32 = vld [vmem:[#allocation25_spill] sm:$0xff]  ;;  %v19207_v59 = vld [vmem:[#allocation18_spill] sm:$0xff] }
 0x5cb   :  { %v10915_v35 = vadd.f32 %v10907_v57, %v10887_v50  ;;  %v10930_v19 = vadd.f32 %v10914_v51, %v10913_v55  ;;  %v10994_v16 = vadd.f32 %v19194_v13, %v19193_v27  ;;  %v11020_v1 = vadd.f32 %v11012_v56, %v10992_v4  ;;  %v19205_v8 = vld [vmem:[#allocation41_spill] sm:$0xff]  ;;  %v19209_v4 = vld [vmem:[#allocation91_spill] sm:$0xff]  ;;  %v19211_v3 = vld [vmem:[#allocation34_spill] sm:$0xff] }
 0x5cc   :  { %v10926_v43 = vadd.f32 %v10925_v7, %v10911_v48  ;;  %v11024_v2 = vadd.f32 %v11016_v58, %v10996_v11  ;;  %v10998_v25 = vadd.f32 %v19196_v29, %v19195_v44  ;;  %11524 = vmatmul.mubr.bf16.gmra.mrb[124].mxu0 %v10917_v5  ;;  %v11014_v53 = vmul.f32 %v19197_v41, %v19103_v36  ;;  %v19208_v57 = vld [vmem:[#allocation21_spill] sm:$0xff]  ;;  %v19213_v7 = vld [vmem:[#allocation38_spill] sm:$0xff]  ;;  %v19214_v5 = vld [vmem:[#allocation103_spill] sm:$0xff] }
 0x5cd   :  { %v10919_v52 = vpack.c.bf16 %v10915_v35, %v10911_v48  ;;  %v10931_v30 = vadd.f32 %v10930_v19, %v10915_v35  ;;  %v11018_v18 = vmul.f32 %v19198_v17, %v19103_v36  ;;  %v13107_v15 = vadd.f32 %v19200_v20, %v19199_v32  ;;  %v19212_v11 = vld [vmem:[#allocation125_spill] sm:$0xff]  ;;  %v19215_v27 = vld [vmem:[#allocation23_spill] sm:$0xff]  ;;  %v19218_v44 = vld [vmem:[#allocation102_spill] sm:$0xff] }
 0x5ce   :  { %v10927_v24 = vadd.f32 %v10926_v43, %v10912_v28  ;;  %v11028_v51 = vpack.c.bf16 %v11024_v2, %v11020_v1  ;;  %v10991_v45 = vadd.f32 %v19202_v31, %v19201_v38  ;;  %v11022_v23 = vadd.f32 %v11014_v53, %v10994_v16  ;;  %v19206_v28 = vld [vmem:[#allocation105_spill] sm:$0xff]  ;;  %v19216_v13 = vld [vmem:[#allocation99_spill] sm:$0xff]  ;;  %v19217_v43 = vld [vmem:[#allocation98_spill] sm:$0xff] }
 0x5cf   :  { %11621 = vmatmul.mubr.bf16.gmra.mrb[124].mxu1 %v10919_v52  ;;  %v10932_v22 = vadd.f32 %v10931_v30, %v10916_v62  ;;  %v11026_v50 = vadd.f32 %v11018_v18, %v10998_v25  ;;  %v10995_v33 = vadd.f32 %v19204_v12, %v19203_v9  ;;  %v11011_v46 = vmul.f32 %v19205_v8, %v19113_v0  ;;  %v19210_v62 = vld [vmem:[#allocation115_spill] sm:$0xff]  ;;  %v19219_v25 = vld [vmem:[#allocation116_spill] sm:$0xff]  ;;  %v19222_v9 = vld [vmem:[#allocation61_spill] sm:$0xff] }
 0x5d0   :  { %10928 = vadd.xlane.f32.xlu1 %v10927_v24  ;;  %11531 = vmatprep.mubr.bf16.mxu0 %v11028_v51  ;;  %v11015_v55 = vmul.f32 %v19206_v28, %v19113_v0  ;;  %v13171_v49 = vadd.f32 %v19208_v57, %v19207_v59  ;;  %v10993_v21 = vadd.f32 %v19210_v62, %v19209_v4  ;;  %v19220_v24 = vld [vmem:[#allocation126_spill] sm:$0xff]  ;;  %v19225_v57 = vld [vmem:[#allocation113_spill] sm:$0xff] }
 0x5d1   :  { %10933 = vadd.xlane.f32.xlu0 %v10932_v22  ;;  %v11030_v34 = vpack.c.bf16 %v11026_v50, %v11022_v23  ;;  %v10997_v48 = vadd.f32 %v19212_v11, %v19211_v3  ;;  %v11013_v39 = vmul.f32 %v19213_v7, %v19120_v61  ;;  %v11019_v56 = vadd.f32 %v11011_v46, %v10991_v45 }
 0x5d2   :  { %v11023_v26 = vadd.f32 %v11015_v55, %v10995_v33  ;;  %v18497_v58 = vadd.f32 %v13171_v49, %v13107_v15  ;;  %v11017_v35 = vmul.f32 %v19214_v5, %v19120_v61  ;;  %v13110_v16 = vadd.f32 %v19216_v13, %v19215_v27 }
 0x5d3   :  { %11628 = vmatprep.mubr.bf16.mxu1 %v11030_v34  ;;  %v11021_v19 = vadd.f32 %v11013_v39, %v10993_v21  ;;  %v13174_v29 = vadd.f32 %v19218_v44, %v19217_v43  ;;  %v11122_v52 = vmul.f32 %v19219_v25, %v19096_v63  ;;  %v11035_v53 = vadd.f32 %v11020_v1, %v11019_v56  ;;  %v19221_v1 = vld [vmem:[#allocation117_spill] sm:$0xff] }
 0x5d4   :  { %v11027_v30 = vpack.c.bf16 %v11023_v26, %v11019_v56  ;;  %v11025_v41 = vadd.f32 %v11017_v35, %v10997_v48  ;;  %v11040_v17 = vadd.f32 %v11024_v2, %v11023_v26  ;;  %vm11669_vm0 = vcmp.ge.f32.partialorder %v18497_v58, 1.25 }
 0x5d5   :  { %v18507_v18 = vadd.f32 %v13174_v29, %v13110_v16  ;;  %v11126_v51 = vmul.f32 %v19220_v24, %v19096_v63  ;;  %v11130_v32 = vadd.f32 %v11122_v52, %v18400_v10  ;;  %v11036_v15 = vadd.f32 %v11035_v53, %v11021_v19  ;;  %v19223_v10 = vld [vmem:[#allocation110_spill] sm:$0xff] }
 0x5d6   :  { %11532 = vmatmul.mubr.bf16.gmra.mrb[128].mxu0 %v11027_v30  ;;  %v11029_v20 = vpack.c.bf16 %v11025_v41, %v11021_v19  ;;  %v11041_v38 = vadd.f32 %v11040_v17, %v11025_v41  ;;  %v13019_v31 = vsel %vm11669_vm0, 1.0, %v18791_v14  ;;  %v11124_v2 = vmul.f32 %v19221_v1, %v19103_v36 }
 0x5d7   :  { %v11675_v45 = vsub.f32 1.0, %v13019_v31  ;;  %v11134_v22 = vadd.f32 %v11126_v51, %v18448_v40  ;;  %v11128_v12 = vmul.f32 %v19222_v9, %v19103_v36  ;;  %v11037_v33 = vadd.f32 %v11036_v15, %v11022_v23  ;;  %v19224_v36 = vld [vmem:[#allocation120_spill] sm:$0xff] }
 0x5d8   :  { %11629 = vmatmul.mubr.bf16.gmra.mrb[128].mxu1 %v11029_v20  ;;  %v11042_v63 = vadd.f32 %v11041_v38, %v11026_v50  ;;  %vm11670_vm1 = vcmp.ge.f32.partialorder %v18507_v18, 1.25  ;;  %v11121_v8 = vmul.f32 %v19223_v10, %v19113_v0  ;;  %v11132_v55 = vadd.f32 %v11124_v2, %v18406_v47 }
 0x5d9   :  { %v11677_v46 = vmul.f32 %v11675_v45, %v18497_v58  ;;  %v11138_v28 = vpack.c.bf16 %v11134_v22, %v11130_v32  ;;  %v11136_v40 = vadd.f32 %v11128_v12, %v18457_v42  ;;  %11038 = vadd.xlane.f32.xlu1 %v11037_v33  ;;  %v13020_v59 = vsel %vm11670_vm1, 1.0, %v18791_v14  ;;  %v19226_v42 = vld [vmem:[#allocation123_spill] sm:$0xff]  ;;  %v7963_v45 = vpop.xlane.xlu1 %7962 }
 0x5da   :  { %11043 = vadd.xlane.f32.xlu0 %v11042_v63  ;;  %v11125_v23 = vmul.f32 %v19224_v36, %v19113_v0  ;;  %v11129_v50 = vadd.f32 %v11121_v8, %v18392_v54  ;;  %v11123_v49 = vmul.f32 %v19225_v57, %v19120_v61  ;;  %v11676_v4 = vsub.f32 1.0, %v13020_v59 }
 0x5db   :  { %11539 = vmatprep.mubr.bf16.mxu0 %v11138_v28  ;;  %v11140_v34 = vpack.c.bf16 %v11136_v40, %v11132_v55  ;;  %v13062_v62 = vpack.c.bf16 %v13020_v59, %v13019_v31  ;;  %v11127_v21 = vmul.f32 %v19226_v42, %v19120_v61  ;;  %v11703_v43 = vmul.f32 0.75, %v18497_v58 }
 0x5dc   :  { %v11133_v47 = vadd.f32 %v11125_v23, %v18438_v60  ;;  %v11131_v3 = vadd.f32 %v11123_v49, %v18388_v6  ;;  %v11145_v11 = vadd.f32 %v11130_v32, %v11129_v50  ;;  %v11678_v0 = vmul.f32 %v11676_v4, %v18507_v18 }
 0x5dd   :  { %11636 = vmatprep.mubr.bf16.mxu1 %v11140_v34  ;;  %13082 = vst [vmem:[%s18625_s6 + $0x8] sm:$0xff] %v13062_v62   ;;  %11689 = vadd.xlane.f32.xlu1 %v13019_v31  ;;  %v11135_v48 = vadd.f32 %v11127_v21, %v18412_v37  ;;  %v11707_v52 = vmul.f32 0.97021484, %v11677_v46  ;;  %v11704_v24 = vmul.f32 0.75, %v18507_v18  ;;  %v8073_v18 = vpop.xlane.xlu1 %8072 }
 0x5de   :  { %11691 = vadd.xlane.f32.xlu0 %v13020_v59  ;;  %v11137_v54 = vpack.c.bf16 %v11133_v47, %v11129_v50  ;;  %v11146_v7 = vadd.f32 %v11145_v11, %v11131_v3  ;;  %v11150_v60 = vadd.f32 %v11134_v22, %v11133_v47  ;;  %v11708_v51 = vmul.f32 0.97021484, %v11678_v0  ;;  %v7968_v22 = vpop.xlane.xlu0 %7967 }
 0x5df   :  { %v11139_v39 = vpack.c.bf16 %v11135_v48, %v11131_v3 }
 0x5e0   :  { %11540 = vmatmul.mubr.bf16.gmra.mrb[132].mxu0 %v11137_v54  ;;  %v11147_v61 = vadd.f32 %v11146_v7, %v11132_v55  ;;  %v11151_v56 = vadd.f32 %v11150_v60, %v11135_v48 }
 0x5e1   :  { %11637 = vmatmul.mubr.bf16.gmra.mrb[132].mxu1 %v11139_v39  ;;  %v8183_v2 = vpop.xlane.xlu1 %8182 }
 0x5e2   :  { %11148 = vadd.xlane.f32.xlu1 %v11147_v61  ;;  %v11152_v6 = vadd.f32 %v11151_v56, %v11136_v40  ;;  %v8078_v1 = vpop.xlane.xlu0 %8077 }
 0x5e4   :  { %11153 = vadd.xlane.f32.xlu0 %v11152_v6 }
 0x5e5   :  { %v8293_v42 = vpop.xlane.xlu1 %8292 }
 0x5e6   :  { %v8188_v33 = vpop.xlane.xlu0 %8187 }
 0x5e9   :  { %v8403_v39 = vpop.xlane.xlu1 %8402 }
 0x5ea   :  { %v8298_v57 = vpop.xlane.xlu0 %8297 }
 0x5ee   :  { %v8408_v54 = vpop.xlane.xlu0 %8407 }
 0x5f2   :  { %v10480_v56 = vpop.xlane.xlu0 %10479 }
 0x618   :  { %v13111_v26 = vpop.f32.mrb[108].mxu0 }
 0x619   :  { %v13175_v5 = vpop.f32.mrb[108].mxu1  ;;  %v13112_v35 = vpop.f32.mrb[109].mxu0 }
 0x61a   :  { %v13113_v19 = vadd.f32 %v13112_v35, %v13111_v26  ;;  %v13176_v27 = vpop.f32.mrb[109].mxu1  ;;  %v13114_v13 = vpop.f32.mrb[110].mxu0  ;;  %v7969_v26 = vadd.f32 %v7968_v22, %v7963_v45  ;;  %v8299_v22 = vadd.f32 %v8298_v57, %v8293_v42 }
 0x61b   :  { %v13177_v16 = vadd.f32 %v13176_v27, %v13175_v5  ;;  %v13178_v37 = vpop.f32.mrb[110].mxu1  ;;  %v13115_v44 = vpop.f32.mrb[111].mxu0 }
 0x61c   :  { %v13116_v29 = vadd.f32 %v13115_v44, %v13114_v13  ;;  %v13179_v25 = vpop.f32.mrb[111].mxu1  ;;  %v10475_v5 = vpop.xlane.xlu1 %10474  ;;  %v7970_v13 = vrot.slane %v7969_v26, 4  ;;  %v8189_v44 = vadd.f32 %v8188_v33, %v8183_v2  ;;  %v8409_v33 = vadd.f32 %v8408_v54, %v8403_v39 }
 0x61d   :  { %v11591_v30 = vadd.f32 %v13177_v16, %v13113_v19  ;;  %v13180_v41 = vadd.f32 %v13179_v25, %v13178_v37  ;;  %v10583_v27 = vpop.xlane.xlu0 %10582  ;;  %v8079_v16 = vadd.f32 %v8078_v1, %v8073_v18 }
 0x61e   :  { %v7971_v25 = vadd.f32 %v7970_v13, %v7969_v26 }
 0x61f   :  { %v11705_v53 = vadd.f32 %v11703_v43, %v11591_v30  ;;  %v11594_v17 = vadd.f32 %v13180_v41, %v13116_v29  ;;  %v10481_v29 = vadd.f32 %v10480_v56, %v10475_v5 }
 0x620   :  { %v10578_v43 = vpop.xlane.xlu1 %10577 }
 0x621   :  { %v11706_v32 = vadd.f32 %v11704_v24, %v11594_v17  ;;  %v11709_v20 = vadd.f32 %v11707_v52, %v11705_v53  ;;  %v11745_v62 = vmul.f32 0.75, %v11705_v53  ;;  %v8080_v52 = vrot.slane %v8079_v16, 4 }
 0x622   :  { %v10584_v41 = vadd.f32 %v10583_v27, %v10578_v43  ;;  %v8190_v17 = vrot.slane %v8189_v44, 4  ;;  %v10482_v24 = vrot.slane %v10481_v29, 4 }
 0x623   :  { %vm11711_vm2 = vcmp.ge.f32.partialorder %v11709_v20, 1.25  ;;  %v11710_v15 = vadd.f32 %v11708_v51, %v11706_v32  ;;  %v11746_v0 = vmul.f32 0.75, %v11706_v32  ;;  %v7972_v51 = vrot.slane %v7971_v25, 2 }
 0x624   :  { %v13023_v38 = vsel %vm11711_vm2, 1.0, %v18791_v14  ;;  %v8081_v32 = vadd.f32 %v8080_v52, %v8079_v16  ;;  %v8191_v45 = vadd.f32 %v8190_v17, %v8189_v44  ;;  %v10483_v18 = vadd.f32 %v10482_v24, %v10481_v29  ;;  %v19227_v44 = vld [vmem:[#allocation58_spill] sm:$0xff] }
 0x625   :  { %11731 = vadd.xlane.f32.xlu1 %v13023_v38  ;;  %vm11712_vm3 = vcmp.ge.f32.partialorder %v11710_v15, 1.25  ;;  %v11717_v9 = vsub.f32 1.0, %v13023_v38  ;;  %v7973_v1 = vadd.f32 %v7972_v51, %v7971_v25 }
 0x626   :  { %v13024_v58 = vsel %vm11712_vm3, 1.0, %v18791_v14  ;;  %v8082_v2 = vrot.slane %v8081_v32, 2 }
 0x627   :  { %11733 = vadd.xlane.f32.xlu0 %v13024_v58  ;;  %v13065_v31 = vpack.c.bf16 %v13024_v58, %v13023_v38  ;;  %v11718_v8 = vsub.f32 1.0, %v13024_v58  ;;  %v11719_v59 = vmul.f32 %v11717_v9, %v11709_v20  ;;  %v10585_v38 = vrot.slane %v10584_v41, 4 }
 0x628   :  { %v10709_v30 = vpop.xlane.xlu1 %10708 }
 0x629   :  { %13083 = vst [vmem:[%s18625_s6 + $0x10] sm:$0xff] %v13065_v31   ;;  %v11720_v34 = vmul.f32 %v11718_v8, %v11710_v15  ;;  %v11749_v21 = vmul.f32 0.97021484, %v11719_v59  ;;  %v10714_v37 = vpop.xlane.xlu0 %10713  ;;  %v8083_v59 = vadd.f32 %v8082_v2, %v8081_v32 }
 0x62a   :  { %v10715_v20 = vadd.f32 %v10714_v37, %v10709_v30 }
 0x62b   :  { %v11750_v48 = vmul.f32 0.97021484, %v11720_v34 }
 0x62c   :  { %v10716_v9 = vrot.slane %v10715_v20, 4 }
 0x640   :  { %v13117_v12 = vpop.f32.mrb[112].mxu0 }
 0x641   :  { %v13118_v63 = vpop.f32.mrb[113].mxu0 }
 0x642   :  { %v13119_v46 = vadd.f32 %v13118_v63, %v13117_v12  ;;  %v13120_v28 = vpop.f32.mrb[114].mxu0  ;;  %v10586_v63 = vadd.f32 %v10585_v38, %v10584_v41 }
 0x643   :  { %v13181_v10 = vpop.f32.mrb[112].mxu1  ;;  %v13121_v40 = vpop.f32.mrb[115].mxu0 }
 0x644   :  { %v13182_v55 = vpop.f32.mrb[113].mxu1  ;;  %v13122_v50 = vadd.f32 %v13121_v40, %v13120_v28  ;;  %v10819_v15 = vpop.xlane.xlu1 %10818  ;;  %v8300_v28 = vrot.slane %v8299_v22, 4  ;;  %v7974_v40 = vrot.slane %v7973_v1, 1 }
 0x645   :  { %v13183_v36 = vadd.f32 %v13182_v55, %v13181_v10  ;;  %v13184_v23 = vpop.f32.mrb[114].mxu1  ;;  %v10484_v55 = vrot.slane %v10483_v18, 2 }
 0x646   :  { %v13185_v49 = vpop.f32.mrb[115].mxu1 }
 0x647   :  { %v11599_v4 = vadd.f32 %v13183_v36, %v13119_v46  ;;  %v13186_v47 = vadd.f32 %v13185_v49, %v13184_v23  ;;  %v8192_v46 = vrot.slane %v8191_v45, 2  ;;  %v10717_v36 = vadd.f32 %v10716_v9, %v10715_v20 }
 0x648   :  { %v8410_v23 = vrot.slane %v8409_v33, 4 }
 0x649   :  { %v18547_v3 = vadd.f32 %v11745_v62, %v11599_v4  ;;  %v11602_v11 = vadd.f32 %v13186_v47, %v13122_v50  ;;  %v10587_v50 = vrot.slane %v10586_v63, 2  ;;  %v8193_v57 = vadd.f32 %v8192_v46, %v8191_v45 }
 0x64a   :  { %v8301_v4 = vadd.f32 %v8300_v28, %v8299_v22  ;;  %v10485_v62 = vadd.f32 %v10484_v55, %v10483_v18 }
 0x64b   :  { %v18549_v7 = vadd.f32 %v11746_v0, %v11602_v11  ;;  %v18552_v60 = vadd.f32 %v11749_v21, %v18547_v3  ;;  %v10824_v53 = vpop.xlane.xlu0 %10823  ;;  %v7975_v21 = vadd.f32 %v7974_v40, %v7973_v1  ;;  %v8084_v11 = vrot.slane %v8083_v59, 1 }
 0x64c   :  { %v10825_v58 = vadd.f32 %v10824_v53, %v10819_v15  ;;  %v10718_v0 = vrot.slane %v10717_v36, 2  ;;  %v10588_v39 = vadd.f32 %v10587_v50, %v10586_v63  ;;  %v8194_v27 = vrot.slane %v8193_v57, 1 }
 0x64d   :  { %vm11753_vm4 = vcmp.ge.f32.partialorder %v18552_v60, 1.25  ;;  %v18556_v61 = vadd.f32 %v11750_v48, %v18549_v7  ;;  %v8411_v48 = vadd.f32 %v8410_v23, %v8409_v33  ;;  %v8302_v13 = vrot.slane %v8301_v4, 2 }
 0x64e   :  { %v18559_v6 = vsel %vm11753_vm4, 1.0, %v18791_v14  ;;  %v10826_v8 = vrot.slane %v10825_v58, 4  ;;  %v10486_v16 = vrot.slane %v10485_v62, 1  ;;  %v7976_v29 = vadd.f32 %v7975_v21, %v19227_v44 }
 0x64f   :  { %11773 = vadd.xlane.f32.xlu1 %v18559_v6  ;;  %vm11754_vm5 = vcmp.ge.f32.partialorder %v18556_v61, 1.25  ;;  %v8085_v25 = vadd.f32 %v8084_v11, %v8083_v59  ;;  %v10719_v52 = vadd.f32 %v10718_v0, %v10717_v36  ;;  %v8412_v17 = vrot.slane %v8411_v48, 2 }
 0x650   :  { %v18564_v35 = vsel %vm11754_vm5, 1.0, %v18791_v14  ;;  %v10827_v34 = vadd.f32 %v10826_v8, %v10825_v58  ;;  %v10589_v24 = vrot.slane %v10588_v39, 1  ;;  %v8195_v18 = vadd.f32 %v8194_v27, %v8193_v57 }
 0x651   :  { %11775 = vadd.xlane.f32.xlu0 %v18564_v35  ;;  %v13068_v19 = vpack.c.bf16 %v18564_v35, %v18559_v6  ;;  %v8303_v1 = vadd.f32 %v8302_v13, %v8301_v4  ;;  %v10487_v2 = vadd.f32 %v10486_v16, %v10485_v62  ;;  %v10720_v33 = vrot.slane %v10719_v52, 1 }
 0x652   :  { %v10828_v26 = vrot.slane %v10827_v34, 2  ;;  %v8413_v28 = vadd.f32 %v8412_v17, %v8411_v48  ;;  %v10590_v40 = vadd.f32 %v10589_v24, %v10588_v39  ;;  %v11788_v62 = vmul.f32 0.75, %v18549_v7 }
 0x653   :  { %13084 = vst [vmem:[%s18625_s6 + $0x18] sm:$0xff] %v13068_v19   ;;  %v11759_v19 = vsub.f32 1.0, %v18559_v6  ;;  %v11760_v6 = vsub.f32 1.0, %v18564_v35  ;;  %v10721_v21 = vadd.f32 %v10720_v33, %v10719_v52  ;;  %v8086_v7 = vadd.f32 %v8085_v25, %v7976_v29 }
 0x654   :  { %v10829_v15 = vadd.f32 %v10828_v26, %v10827_v34  ;;  %v8414_v39 = vrot.slane %v8413_v28, 1 }
 0x655   :  { %v11761_v38 = vmul.f32 %v11759_v19, %v18552_v60  ;;  %v11762_v55 = vmul.f32 %v11760_v6, %v18556_v61 }
 0x656   :  { %v10830_v59 = vrot.slane %v10829_v15, 1 }
 0x657   :  { %v11791_v50 = vmul.f32 0.97021484, %v11761_v38 }
 0x658   :  { %v10831_v26 = vadd.f32 %v10830_v59, %v10829_v15 }
 0x65d   :  { %v10929_v12 = vpop.xlane.xlu1 %10928 }
 0x65e   :  { %v10934_v31 = vpop.xlane.xlu0 %10933 }
 0x65f   :  { %v10935_v10 = vadd.f32 %v10934_v31, %v10929_v12 }
 0x661   :  { %v10936_v49 = vrot.slane %v10935_v10, 4 }
 0x663   :  { %v10937_v56 = vadd.f32 %v10936_v49, %v10935_v10  ;;  %v11787_v10 = vmul.f32 0.75, %v18547_v3  ;;  %v8304_v3 = vrot.slane %v8303_v1, 1 }
 0x665   :  { %v10938_v51 = vrot.slane %v10937_v56, 2  ;;  %v8305_v16 = vadd.f32 %v8304_v3, %v8303_v1 }
 0x666   :  { %v11039_v47 = vpop.xlane.xlu1 %11038 }
 0x667   :  { %v11044_v42 = vpop.xlane.xlu0 %11043  ;;  %v10939_v35 = vadd.f32 %v10938_v51, %v10937_v56 }
 0x668   :  { %v11045_v54 = vadd.f32 %v11044_v42, %v11039_v47  ;;  %v19228_v47 = vld [vmem:[#allocation57_spill] sm:$0xff] }
 0x669   :  { %v10488_v42 = vadd.f32 %v10487_v2, %v19228_v47  ;;  %v10940_v61 = vrot.slane %v10939_v35, 1 }
 0x66a   :  { %v11046_v5 = vrot.slane %v11045_v54, 4  ;;  %v18573_v43 = vpop.xlane.xlu1 %11689  ;;  %v13123_v41 = vpop.f32.mrb[116].mxu0 }
 0x66b   :  { %v18575_v37 = vpop.xlane.xlu0 %11691  ;;  %v13124_v32 = vpop.f32.mrb[117].mxu0  ;;  %v10591_v56 = vadd.f32 %v10590_v40, %v10488_v42  ;;  %v10941_v52 = vadd.f32 %v10940_v61, %v10939_v35 }
 0x66c   :  { %v11047_v30 = vadd.f32 %v11046_v5, %v11045_v54  ;;  %v13187_v53 = vpop.f32.mrb[116].mxu1  ;;  %v13125_v58 = vadd.f32 %v13124_v32, %v13123_v41  ;;  %v13126_v45 = vpop.f32.mrb[118].mxu0  ;;  %v11792_v54 = vmul.f32 0.97021484, %v11762_v55  ;;  %v8196_v41 = vadd.f32 %v8195_v18, %v8086_v7 }
 0x66d   :  { %v13188_v20 = vpop.f32.mrb[117].mxu1  ;;  %v13127_v12 = vpop.f32.mrb[119].mxu0  ;;  %v10722_v44 = vadd.f32 %v10721_v21, %v10591_v56 }
 0x66e   :  { %v13189_v31 = vadd.f32 %v13188_v20, %v13187_v53  ;;  %v13190_v22 = vpop.f32.mrb[118].mxu1  ;;  %v11048_v9 = vrot.slane %v11047_v30, 2  ;;  %v13128_v8 = vadd.f32 %v13127_v12, %v13126_v45  ;;  %v8415_v53 = vadd.f32 %v8414_v39, %v8413_v28 }
 0x66f   :  { %v13191_v46 = vpop.f32.mrb[119].mxu1  ;;  %v11149_v36 = vpop.xlane.xlu1 %11148  ;;  %v10832_v24 = vadd.f32 %v10831_v26, %v10722_v44  ;;  %v8306_v6 = vadd.f32 %v8305_v16, %v8196_v41 }
 0x670   :  { %v11607_v63 = vadd.f32 %v13189_v31, %v13125_v58  ;;  %v13192_v60 = vadd.f32 %v13191_v46, %v13190_v22  ;;  %v11049_v34 = vadd.f32 %v11048_v9, %v11047_v30  ;;  %v19229_v31 = vld [vmem:[#allocation17_spill] sm:$0xff] }
 0x671   :  { %v11154_v23 = vpop.xlane.xlu0 %11153  ;;  %v10942_v15 = vadd.f32 %v10941_v52, %v10832_v24  ;;  %v8416_v29 = vadd.f32 %v8415_v53, %v8306_v6  ;;  %vm11951_vm8 = vcmp.eq.s32.totalorder %v19229_v31, 0  ;;  %vm11953_vm9 = vcmp.eq.s32.totalorder %v19229_v31, 1 }
 0x672   :  { %v18582_v49 = vadd.f32 %v11787_v10, %v11607_v63  ;;  %v11155_v57 = vadd.f32 %v11154_v23, %v11149_v36  ;;  %v11610_v4 = vadd.f32 %v13192_v60, %v13128_v8  ;;  %v11050_v5 = vrot.slane %v11049_v34, 1 }
 0x673   :  { %v11952_v22 = vsel %vm11951_vm8, %v8416_v29, 0.0  ;;  %vm11956_vm0 = vcmp.eq.s32.totalorder %v19229_v31, 2 }
 0x674   :  { %v11793_v11 = vadd.f32 %v11791_v50, %v18582_v49  ;;  %v11156_v0 = vrot.slane %v11155_v57, 4  ;;  %v11790_v48 = vadd.f32 %v11788_v62, %v11610_v4  ;;  %v11051_v51 = vadd.f32 %v11050_v5, %v11049_v34 }
 0x675   :  { %v11829_v50 = vmul.f32 0.75, %v18582_v49 }
 0x676   :  { %vm11795_vm6 = vcmp.ge.f32.partialorder %v11793_v11, 1.25  ;;  %v11157_v19 = vadd.f32 %v11156_v0, %v11155_v57  ;;  %v11794_v13 = vadd.f32 %v11792_v54, %v11790_v48  ;;  %v11052_v25 = vadd.f32 %v11051_v51, %v10942_v15 }
 0x677   :  { %v13031_v27 = vsel %vm11795_vm6, 1.0, %v18791_v14  ;;  %v11830_v3 = vmul.f32 0.75, %v11790_v48 }
 0x678   :  { %11815 = vadd.xlane.f32.xlu1 %v13031_v27  ;;  %v11158_v30 = vrot.slane %v11157_v19, 2  ;;  %vm11796_vm7 = vcmp.ge.f32.partialorder %v11794_v13, 1.25  ;;  %v11801_v2 = vsub.f32 1.0, %v13031_v27 }
 0x679   :  { %v13032_v17 = vsel %vm11796_vm7, 1.0, %v18791_v14 }
 0x67a   :  { %v11159_v32 = vadd.f32 %v11158_v30, %v11157_v19  ;;  %11817 = vadd.xlane.f32.xlu0 %v13032_v17  ;;  %v13071_v20 = vpack.c.bf16 %v13032_v17, %v13031_v27  ;;  %v11802_v12 = vsub.f32 1.0, %v13032_v17  ;;  %v11803_v46 = vmul.f32 %v11801_v2, %v11793_v11 }
 0x67c   :  { %v11160_v38 = vrot.slane %v11159_v32, 1  ;;  %13085 = vst [vmem:[%s18625_s6 + $0x20] sm:$0xff] %v13071_v20   ;;  %v11804_v59 = vmul.f32 %v11802_v12, %v11794_v13  ;;  %v11833_v34 = vmul.f32 0.97021484, %v11803_v46 }
 0x67e   :  { %v11161_v58 = vadd.f32 %v11160_v38, %v11159_v32  ;;  %v11834_v47 = vmul.f32 0.97021484, %v11804_v59 }
 0x680   :  { %v11162_v45 = vadd.f32 %v11161_v58, %v11052_v25 }
 0x682   :  { %v11954_v18 = vsel %vm11953_vm9, %v11162_v45, 0.0 }
 0x683   :  { %v18594_v1 = vadd.f32 %v11954_v18, %v11952_v22 }
 0x687   :  { %v13129_v9 = vpop.f32.mrb[120].mxu0 }
 0x688   :  { %v13130_v33 = vpop.f32.mrb[121].mxu0 }
 0x689   :  { %v13193_v63 = vpop.f32.mrb[120].mxu1  ;;  %v13131_v10 = vadd.f32 %v13130_v33, %v13129_v9  ;;  %v13132_v8 = vpop.f32.mrb[122].mxu0 }
 0x68a   :  { %v13194_v28 = vpop.f32.mrb[121].mxu1  ;;  %v13133_v35 = vpop.f32.mrb[123].mxu0 }
 0x68b   :  { %v13195_v55 = vadd.f32 %v13194_v28, %v13193_v63  ;;  %v13196_v60 = vpop.f32.mrb[122].mxu1  ;;  %v13134_v40 = vadd.f32 %v13133_v35, %v13132_v8 }
 0x68c   :  { %v13197_v36 = vpop.f32.mrb[123].mxu1 }
 0x68d   :  { %v11615_v23 = vadd.f32 %v13195_v55, %v13131_v10  ;;  %v13198_v57 = vadd.f32 %v13197_v36, %v13196_v60 }
 0x68f   :  { %v11831_v4 = vadd.f32 %v11829_v50, %v11615_v23  ;;  %v11618_v62 = vadd.f32 %v13198_v57, %v13134_v40 }
 0x691   :  { %v11832_v42 = vadd.f32 %v11830_v3, %v11618_v62  ;;  %v11835_v21 = vadd.f32 %v11833_v34, %v11831_v4  ;;  %v11871_v17 = vmul.f32 0.75, %v11831_v4 }
 0x693   :  { %vm11837_vm10 = vcmp.ge.f32.partialorder %v11835_v21, 1.25  ;;  %v11836_v11 = vadd.f32 %v11834_v47, %v11832_v42  ;;  %v11872_v6 = vmul.f32 0.75, %v11832_v42 }
 0x694   :  { %v13035_v61 = vsel %vm11837_vm10, 1.0, %v18791_v14 }
 0x695   :  { %11857 = vadd.xlane.f32.xlu1 %v13035_v61  ;;  %vm11838_vm11 = vcmp.ge.f32.partialorder %v11836_v11, 1.25  ;;  %v11843_v49 = vsub.f32 1.0, %v13035_v61 }
 0x696   :  { %v13036_v0 = vsel %vm11838_vm11, 1.0, %v18791_v14 }
 0x697   :  { %11859 = vadd.xlane.f32.xlu0 %v13036_v0  ;;  %v13074_v54 = vpack.c.bf16 %v13036_v0, %v13035_v61  ;;  %v11844_v48 = vsub.f32 1.0, %v13036_v0  ;;  %v11845_v27 = vmul.f32 %v11843_v49, %v11835_v21 }
 0x699   :  { %13086 = vst [vmem:[%s18625_s6 + $0x28] sm:$0xff] %v13074_v54   ;;  %v11846_v30 = vmul.f32 %v11844_v48, %v11836_v11  ;;  %v11875_v24 = vmul.f32 0.97021484, %v11845_v27 }
 0x69b   :  { %v11876_v15 = vmul.f32 0.97021484, %v11846_v30 }
 0x69f   :  { %v13135_v39 = vpop.f32.mrb[124].mxu0 }
 0x6a0   :  { %v13136_v56 = vpop.f32.mrb[125].mxu0 }
 0x6a1   :  { %v13137_v5 = vadd.f32 %v13136_v56, %v13135_v39  ;;  %v13138_v19 = vpop.f32.mrb[126].mxu0 }
 0x6a2   :  { %v13199_v26 = vpop.f32.mrb[124].mxu1  ;;  %v13139_v7 = vpop.f32.mrb[127].mxu0 }
 0x6a3   :  { %v13200_v13 = vpop.f32.mrb[125].mxu1  ;;  %v13140_v52 = vadd.f32 %v13139_v7, %v13138_v19 }
 0x6a4   :  { %v13201_v16 = vadd.f32 %v13200_v13, %v13199_v26  ;;  %v13202_v44 = vpop.f32.mrb[126].mxu1 }
 0x6a5   :  { %v13203_v41 = vpop.f32.mrb[127].mxu1 }
 0x6a6   :  { %v11623_v53 = vadd.f32 %v13201_v16, %v13137_v5  ;;  %v13204_v51 = vadd.f32 %v13203_v41, %v13202_v44  ;;  %v11693_v41 = vadd.f32 %v18575_v37, %v18573_v43 }
 0x6a8   :  { %v11873_v32 = vadd.f32 %v11871_v17, %v11623_v53  ;;  %v11626_v20 = vadd.f32 %v13204_v51, %v13140_v52 }
 0x6a9   :  { %v13141_v38 = vpop.f32.mrb[128].mxu0 }
 0x6aa   :  { %v11874_v29 = vadd.f32 %v11872_v6, %v11626_v20  ;;  %v13142_v25 = vpop.f32.mrb[129].mxu0  ;;  %v11877_v58 = vadd.f32 %v11875_v24, %v11873_v32  ;;  %v11913_v40 = vmul.f32 0.75, %v11873_v32  ;;  %v11694_v32 = vrot.slane %v11693_v41, 4 }
 0x6ab   :  { %v13205_v45 = vpop.f32.mrb[128].mxu1  ;;  %v13143_v22 = vadd.f32 %v13142_v25, %v13141_v38  ;;  %v13144_v18 = vpop.f32.mrb[130].mxu0 }
 0x6ac   :  { %v13206_v2 = vpop.f32.mrb[129].mxu1  ;;  %vm11879_vm12 = vcmp.ge.f32.partialorder %v11877_v58, 1.25  ;;  %v13145_v9 = vpop.f32.mrb[131].mxu0  ;;  %v11878_v12 = vadd.f32 %v11876_v15, %v11874_v29  ;;  %v11914_v57 = vmul.f32 0.75, %v11874_v29  ;;  %v11695_v29 = vadd.f32 %v11694_v32, %v11693_v41 }
 0x6ad   :  { %v13207_v33 = vadd.f32 %v13206_v2, %v13205_v45  ;;  %v13208_v63 = vpop.f32.mrb[130].mxu1  ;;  %v13039_v10 = vsel %vm11879_vm12, 1.0, %v18791_v14  ;;  %v13146_v8 = vadd.f32 %v13145_v9, %v13144_v18 }
 0x6ae   :  { %11899 = vadd.xlane.f32.xlu1 %v13039_v10  ;;  %v11885_v46 = vsub.f32 1.0, %v13039_v10  ;;  %v13209_v28 = vpop.f32.mrb[131].mxu1  ;;  %vm11880_vm13 = vcmp.ge.f32.partialorder %v11878_v12, 1.25  ;;  %v11696_v9 = vrot.slane %v11695_v29, 2 }
 0x6af   :  { %v11631_v35 = vadd.f32 %v13207_v33, %v13143_v22  ;;  %v13210_v55 = vadd.f32 %v13209_v28, %v13208_v63  ;;  %v13040_v60 = vsel %vm11880_vm13, 1.0, %v18791_v14 }
 0x6b0   :  { %11901 = vadd.xlane.f32.xlu0 %v13040_v60  ;;  %v11886_v59 = vsub.f32 1.0, %v13040_v60  ;;  %v13077_v36 = vpack.c.bf16 %v13040_v60, %v13039_v10  ;;  %v11887_v23 = vmul.f32 %v11885_v46, %v11877_v58 }
 0x6b1   :  { %v11634_v50 = vadd.f32 %v13210_v55, %v13146_v8  ;;  %v11915_v34 = vadd.f32 %v11913_v40, %v11631_v35  ;;  %v11697_v8 = vadd.f32 %v11696_v9, %v11695_v29 }
 0x6b2   :  { %13087 = vst [vmem:[%s18625_s6 + $0x30] sm:$0xff] %v13077_v36   ;;  %v11917_v4 = vmul.f32 0.97021484, %v11887_v23  ;;  %v11888_v62 = vmul.f32 %v11886_v59, %v11878_v12  ;;  %v11732_v13 = vpop.xlane.xlu1 %11731 }
 0x6b3   :  { %v13147_v3 = vpop.f32.mrb[132].mxu0  ;;  %v11916_v47 = vadd.f32 %v11914_v57, %v11634_v50  ;;  %v11698_v59 = vrot.slane %v11697_v8, 1 }
 0x6b4   :  { %v13148_v42 = vpop.f32.mrb[133].mxu0  ;;  %v11919_v21 = vadd.f32 %v11917_v4, %v11915_v34  ;;  %v11918_v11 = vmul.f32 0.97021484, %v11888_v62  ;;  %v13211_v61 = vpop.f32.mrb[132].mxu1 }
 0x6b5   :  { %v13150_v0 = vpop.f32.mrb[134].mxu0  ;;  %v13212_v54 = vpop.f32.mrb[133].mxu1 }
 0x6b6   :  { %vm11921_vm14 = vcmp.ge.f32.partialorder %v11919_v21, 1.25  ;;  %v13151_v49 = vpop.f32.mrb[135].mxu0  ;;  %v11920_v39 = vadd.f32 %v11918_v11, %v11916_v47  ;;  %v13214_v48 = vpop.f32.mrb[134].mxu1  ;;  %v11699_v47 = vadd.f32 %v11698_v59, %v11697_v8 }
 0x6b7   :  { %v13043_v56 = vsel %vm11921_vm14, 1.0, %v18791_v14  ;;  %v13215_v26 = vpop.f32.mrb[135].mxu1  ;;  %v11734_v27 = vpop.xlane.xlu0 %11733 }
 0x6b8   :  { %11937 = vadd.xlane.f32.xlu1 %v13043_v56  ;;  %vm11922_vm15 = vcmp.ge.f32.partialorder %v11920_v39, 1.25  ;;  %v11735_v52 = vadd.f32 %v11734_v27, %v11732_v13 }
 0x6b9   :  { %v13044_v5 = vsel %vm11922_vm15, 1.0, %v18791_v14 }
 0x6ba   :  { %11939 = vadd.xlane.f32.xlu0 %v13044_v5  ;;  %v13080_v19 = vpack.c.bf16 %v13044_v5, %v13043_v56  ;;  %v11736_v24 = vrot.slane %v11735_v52, 4 }
 0x6bc   :  { %13088 = vst [vmem:[%s18625_s6 + $0x38] sm:$0xff] %v13080_v19   ;;  %v11737_v15 = vadd.f32 %v11736_v24, %v11735_v52 }
 0x6be   :  { %v11738_v45 = vrot.slane %v11737_v15, 2 }
 0x6c0   :  { %v11739_v33 = vadd.f32 %v11738_v45, %v11737_v15 }
 0x6c2   :  { %v11740_v55 = vrot.slane %v11739_v33, 1 }
 0x6c4   :  { %v11741_v57 = vadd.f32 %v11740_v55, %v11739_v33 }
 0x6c6   :  { %v11742_v61 = vadd.f32 %v11741_v57, %v11699_v47 }
 0x6dc   :  { %v11774_v16 = vpop.xlane.xlu1 %11773 }
 0x6de   :  { %v11776_v7 = vpop.xlane.xlu0 %11775 }
 0x6df   :  { %v11777_v53 = vadd.f32 %v11776_v7, %v11774_v16 }
 0x6e1   :  { %v11778_v20 = vrot.slane %v11777_v53, 4 }
 0x6e3   :  { %v11779_v25 = vadd.f32 %v11778_v20, %v11777_v53 }
 0x6e5   :  { %v11780_v12 = vrot.slane %v11779_v25, 2 }
 0x6e7   :  { %v11781_v46 = vadd.f32 %v11780_v12, %v11779_v25 }
 0x6e9   :  { %v11782_v36 = vrot.slane %v11781_v46, 1 }
 0x6eb   :  { %v11783_v42 = vadd.f32 %v11782_v36, %v11781_v46 }
 0x6ed   :  { %v11784_v39 = vadd.f32 %v11783_v42, %v11742_v61 }
 0x705   :  { %v11816_v30 = vpop.xlane.xlu1 %11815 }
 0x707   :  { %v11818_v44 = vpop.xlane.xlu0 %11817 }
 0x708   :  { %v11819_v14 = vadd.f32 %v11818_v44, %v11816_v30 }
 0x70a   :  { %v11820_v38 = vrot.slane %v11819_v14, 4 }
 0x70c   :  { %v11821_v22 = vadd.f32 %v11820_v38, %v11819_v14 }
 0x70e   :  { %v11822_v63 = vrot.slane %v11821_v22, 2 }
 0x710   :  { %v11823_v60 = vadd.f32 %v11822_v63, %v11821_v22 }
 0x712   :  { %v11824_v4 = vrot.slane %v11823_v60, 1 }
 0x714   :  { %v11825_v0 = vadd.f32 %v11824_v4, %v11823_v60 }
 0x716   :  { %v11826_v26 = vadd.f32 %v11825_v0, %v11784_v39 }
 0x722   :  { %v11858_v51 = vpop.xlane.xlu1 %11857 }
 0x724   :  { %v11860_v17 = vpop.xlane.xlu0 %11859 }
 0x725   :  { %v11861_v6 = vadd.f32 %v11860_v17, %v11858_v51 }
 0x727   :  { %v11862_v58 = vrot.slane %v11861_v6, 4 }
 0x729   :  { %v11863_v43 = vadd.f32 %v11862_v58, %v11861_v6 }
 0x72b   :  { %v11864_v28 = vrot.slane %v11863_v43, 2 }
 0x72d   :  { %v11865_v23 = vadd.f32 %v11864_v28, %v11863_v43 }
 0x72f   :  { %v11866_v21 = vrot.slane %v11865_v23, 1 }
 0x731   :  { %v11867_v48 = vadd.f32 %v11866_v21, %v11865_v23 }
 0x733   :  { %v11868_v27 = vadd.f32 %v11867_v48, %v11826_v26 }
 0x73b   :  { %v11900_v18 = vpop.xlane.xlu1 %11899 }
 0x73d   :  { %v11902_v2 = vpop.xlane.xlu0 %11901 }
 0x73e   :  { %v11903_v37 = vadd.f32 %v11902_v2, %v11900_v18 }
 0x740   :  { %v11904_v10 = vrot.slane %v11903_v37, 4 }
 0x742   :  { %v11905_v35 = vadd.f32 %v11904_v10, %v11903_v37 }
 0x744   :  { %v11906_v40 = vrot.slane %v11905_v35, 2 }
 0x745   :  { %v11938_v50 = vpop.xlane.xlu1 %11937 }
 0x746   :  { %v11907_v62 = vadd.f32 %v11906_v40, %v11905_v35 }
 0x747   :  { %v11940_v34 = vpop.xlane.xlu0 %11939 }
 0x748   :  { %v11941_v3 = vadd.f32 %v11940_v34, %v11938_v50  ;;  %v11908_v54 = vrot.slane %v11907_v62, 1 }
 0x74a   :  { %v11942_v11 = vrot.slane %v11941_v3, 4  ;;  %v11909_v5 = vadd.f32 %v11908_v54, %v11907_v62 }
 0x74c   :  { %v11943_v49 = vadd.f32 %v11942_v11, %v11941_v3  ;;  %v11910_v7 = vadd.f32 %v11909_v5, %v11868_v27 }
 0x74e   :  { %v11944_v56 = vrot.slane %v11943_v49, 2 }
 0x750   :  { %v11945_v19 = vadd.f32 %v11944_v56, %v11943_v49 }
 0x752   :  { %v11946_v13 = vrot.slane %v11945_v19, 1 }
 0x754   :  { %v11947_v16 = vadd.f32 %v11946_v13, %v11945_v19 }
 0x756   :  { %v11948_v44 = vadd.f32 %v11947_v16, %v11910_v7 }
 0x758   :  { %v11957_v52 = vsel %vm11956_vm0, %v11948_v44, 0.0 }
 0x759   :  { %v11958_v30 = vadd.f32 %v11957_v52, %v18594_v1 }
 0x75b   :  { %11959 = vst [vmem:[%s18626_s7] sm:$0xff] %v11958_v30 }
 0x75c   :  { %11968 = vsyncpa [#allocation8], 1 }
 0x75d   :  { %11969 = vsyncpa [#allocation10], 1 }
 0x75e   :  { %11970 = vsyncpa [#allocation13], 1 }

</bundles_post_ra>
